<compile_context>
chip_gen: v7x
topology: tpu7x:2x2x1
jax: 0.10.0
libtpu: 0.0.40
codegen_flags: <defaults>
</compile_context>

<pallas_src>
import functools

import numpy as np
import jax
import jax.numpy as jnp
from jax.experimental import pallas as pl
from jax.experimental.pallas import tpu as pltpu


# ----------------------------- Pallas kernels ------------------------------ #

def _chain_kernel(*refs, n_layers):
    # refs = x_ref, (w_ref, b_ref) * n_layers, o_ref
    # x: (tm, K0) bf16, w_l: (K_l, C_l) bf16, b_l: (1, C_l) f32, o: (tm, C_last)
    x_ref = refs[0]
    o_ref = refs[-1]
    h = x_ref[...]                                         # bf16 MXU operand
    for l in range(n_layers):
        w = refs[1 + 2 * l][...]
        b = refs[2 + 2 * l][...]
        acc = jnp.dot(h, w, preferred_element_type=jnp.float32)   # f32 accumulate
        acc = jnp.maximum(acc + b, 0.0)                            # bias + ReLU in f32
        h = acc if l == n_layers - 1 else acc.astype(jnp.bfloat16)
    o_ref[...] = h.astype(o_ref.dtype)


def _tail_kernel(x_ref, w7_ref, b7_ref, w8_ref, b8_ref, w9_ref, b9_ref,
                 pool_ref, o_ref):
    # conv7 + ReLU + conv8 + ReLU + conv9 + ReLU + 6x6 average pool, all in VMEM.
    h = x_ref[...]
    layers = ((w7_ref, b7_ref), (w8_ref, b8_ref), (w9_ref, b9_ref))
    for l, (w_ref, b_ref) in enumerate(layers):
        acc = jnp.dot(h, w_ref[...], preferred_element_type=jnp.float32)
        acc = jnp.maximum(acc + b_ref[...], 0.0)
        h = acc.astype(jnp.bfloat16) if l < len(layers) - 1 else acc
    # Average pool as a tiny (rows, M) f32 selection matmul (no serial add chain);
    # kept in f32 for accuracy.
    o_ref[...] = jnp.dot(pool_ref[...], h, preferred_element_type=jnp.float32)


# ------------------------------ Pallas wrappers ----------------------------- #

def _pick_tm(m):
    # grid=2 keeps both v7x TensorCores busy and only costs one extra ~0.35us step on
    # single-core v5e/v6e; tiny calls (M < 128) stay single-step.
    if m >= 128 and (m // 2) % 8 == 0:
        return m // 2
    return m


def matmul_chain(x, layers, *, out_dtype=jnp.bfloat16):
    """Fused relu(x @ W1 + b1) @ W2 ... chain, tiled over M with grid in {1, 2}."""
    m, k0 = x.shape
    tm = _pick_tm(m)
    cout = layers[-1][0].shape[1]

    in_specs = [pl.BlockSpec((tm, k0), lambda i: (i, 0))]
    args = [x]
    for w, b in layers:
        # Resident weights/biases (constant index_map). They are small (< 3.5 MiB total
        # across the whole net) so default double-buffering is harmless.
        in_specs.append(pl.BlockSpec(w.shape, lambda i: (0, 0)))
        in_specs.append(pl.BlockSpec(b.shape, lambda i: (0, 0)))
        args += [w, b]

    kernel = functools.partial(_chain_kernel, n_layers=len(layers))
    return pl.pallas_call(
        kernel,
        out_shape=jax.ShapeDtypeStruct((m, cout), out_dtype),
        grid=(m // tm,),
        in_specs=in_specs,
        out_specs=pl.BlockSpec((tm, cout), lambda i: (i, 0)),
        compiler_params=pltpu.CompilerParams(
            dimension_semantics=("parallel",)),
    )(*args)


def conv_tail(p, w7, b7, w8, b8, w9, b9, pool):
    """conv7+conv8+conv9 (+ReLU each) + avg-pool fused in one call (tiny M)."""
    rows = pool.shape[0]
    cout = w9.shape[1]

    def full(a):
        return pl.BlockSpec(a.shape, lambda i: (0, 0))

    return pl.pallas_call(
        _tail_kernel,
        out_shape=jax.ShapeDtypeStruct((rows, cout), jnp.float32),
        grid=(1,),
        in_specs=[full(p), full(w7), full(b7), full(w8), full(b8),
                  full(w9), full(b9), full(pool)],
        out_specs=pl.BlockSpec((rows, cout), lambda i: (0, 0)),
        compiler_params=pltpu.CompilerParams(
            dimension_semantics=("arbitrary",)),
    )(p, w7, b7, w8, b8, w9, b9, pool)


# ------------------------------- JAX glue ----------------------------------- #

def _round_up(x, m):
    return ((x + m - 1) // m) * m


def _pad2d(x, rows, cols):
    return jnp.pad(x, ((0, rows - x.shape[0]), (0, cols - x.shape[1])))


def _im2col(x, ksize, stride, pad):
    # x: (N, H, W, C) -> (N*Ho*Wo, k*k*C), row layout (kh, kw, cin).
    n, h, w, c = x.shape
    if pad:
        x = jnp.pad(x, ((0, 0), (pad, pad), (pad, pad), (0, 0)))
    hp, wp = h + 2 * pad, w + 2 * pad
    ho = (hp - ksize) // stride + 1
    wo = (wp - ksize) // stride + 1
    cols = []
    for dh in range(ksize):
        for dw in range(ksize):
            cols.append(x[:, dh:dh + stride * (ho - 1) + 1:stride,
                             dw:dw + stride * (wo - 1) + 1:stride, :])
    patches = jnp.stack(cols, axis=3)                      # (N, Ho, Wo, k*k, C)
    return patches.reshape(n * ho * wo, ksize * ksize * c), (n, ho, wo)


def _avg_pool_matrix(n, hw, m_pad):
    # Constant averaging matrix: row b averages image b's `hw` pooled positions;
    # padded rows/columns are zero so M-padding garbage never leaks into the output.
    rows = _round_up(max(n, 1), 8)
    mat = np.zeros((rows, m_pad), np.float32)
    for b in range(n):
        mat[b, b * hw:(b + 1) * hw] = 1.0 / hw
    return jnp.asarray(mat)


# --------------------------------- Params ----------------------------------- #

def init_params(key):
    # kaiming_normal_ (fan_in, gain=sqrt(2)) for weights, zeros for biases.
    def conv_init(k, cout, cin, ksz):
        std = float(np.sqrt(2.0 / (cin * ksz * ksz)))
        w = jax.random.normal(k, (cout, cin, ksz, ksz), jnp.float32) * std
        b = jnp.zeros((cout,), jnp.float32)
        return w, b

    keys = jax.random.split(key, 9)
    return {
        "conv1": conv_init(keys[0], 96, 3, 5),     # 5x5, pad 2
        "conv2": conv_init(keys[1], 96, 96, 1),    # 1x1
        "conv3": conv_init(keys[2], 96, 96, 3),    # 3x3, stride 2
        "conv4": conv_init(keys[3], 192, 96, 5),   # 5x5, pad 2
        "conv5": conv_init(keys[4], 192, 192, 1),  # 1x1
        "conv6": conv_init(keys[5], 192, 192, 3),  # 3x3, stride 2
        "conv7": conv_init(keys[6], 192, 192, 3),  # 3x3, pad 3
        "conv8": conv_init(keys[7], 192, 192, 1),  # 1x1
        "conv9": conv_init(keys[8], 10, 192, 1),   # 1x1 -> 10 classes
    }


def prepare_params(params):
    """OIHW f32 -> padded (K, Cout) bf16 matmul weights + (1, Cout) f32 biases."""
    def wmat(w, cin_pad, cout_pad, k_pad_to=None):
        cout, cin, kh, kw = w.shape
        wt = jnp.transpose(w, (2, 3, 1, 0))                          # (kh, kw, cin, cout)
        wt = jnp.pad(wt, ((0, 0), (0, 0),
                          (0, cin_pad - cin), (0, cout_pad - cout)))
        m = wt.reshape(kh * kw * cin_pad, cout_pad)
        if k_pad_to is not None and k_pad_to > m.shape[0]:
            m = jnp.pad(m, ((0, k_pad_to - m.shape[0]), (0, 0)))
        return m.astype(jnp.bfloat16)

    def bvec(b, cout_pad):
        return jnp.pad(b, (0, cout_pad - b.shape[0])).reshape(1, cout_pad).astype(jnp.float32)

    # (cin_pad, cout_pad, k_pad_to): 96-ch tensors padded to 128 lanes, 192-ch tensors
    # padded to 256 (lane-dense stores, full 256-wide MXU), conv1's K=75 padded to 128,
    # conv9's 10 outputs padded to 128. Padded lanes carry zero weights + zero bias, so
    # they stay exactly 0 through ReLU.
    cfg = {
        "conv1": (3, 128, 128),
        "conv2": (128, 128, None),
        "conv3": (128, 128, None),
        "conv4": (128, 256, None),
        "conv5": (256, 256, None),
        "conv6": (256, 256, None),
        "conv7": (256, 256, None),
        "conv8": (256, 256, None),
        "conv9": (256, 128, None),
    }
    prep = {}
    for i in range(1, 10):
        cin_pad, cout_pad, k_pad_to = cfg[f"conv{i}"]
        w, b = params[f"conv{i}"]
        prep[f"w{i}"] = wmat(w, cin_pad, cout_pad, k_pad_to)
        prep[f"b{i}"] = bvec(b, cout_pad)
    return prep


# --------------------------------- Forward ---------------------------------- #

def all_cnn_b_forward(prep, x_nchw):
    x = jnp.transpose(x_nchw, (0, 2, 3, 1)).astype(jnp.bfloat16)   # NCHW -> NHWC, bf16

    # conv1 (5x5, p2) + ReLU [+ dropout1: identity] + conv2 (1x1) + ReLU  (fused)
    p, (n, h, w) = _im2col(x, 5, 1, 2)
    m = n * h * w
    p = _pad2d(p, _round_up(m, 16), 128)                   # K 75->128, M to sublane mult
    a = matmul_chain(p, [(prep["w1"], prep["b1"]),
                         (prep["w2"], prep["b2"])])
    a = a[:m].reshape(n, h, w, 128)

    # conv3 (3x3, stride 2) + ReLU          [dropout2: identity in eval]
    p, (n, h, w) = _im2col(a, 3, 2, 0)
    m = n * h * w
    p = _pad2d(p, _round_up(m, 16), p.shape[1])
    a = matmul_chain(p, [(prep["w3"], prep["b3"])])
    a = a[:m].reshape(n, h, w, 128)

    # conv4 (5x5, p2) + ReLU + conv5 (1x1) + ReLU  (fused)
    p, (n, h, w) = _im2col(a, 5, 1, 2)
    m = n * h * w
    p = _pad2d(p, _round_up(m, 16), p.shape[1])
    a = matmul_chain(p, [(prep["w4"], prep["b4"]),
                         (prep["w5"], prep["b5"])])
    a = a[:m].reshape(n, h, w, 256)

    # conv6 (3x3, stride 2) + ReLU          [dropout3: identity in eval]
    p, (n, h, w) = _im2col(a, 3, 2, 0)
    m = n * h * w
    p = _pad2d(p, _round_up(m, 16), p.shape[1])
    a = matmul_chain(p, [(prep["w6"], prep["b6"])])
    a = a[:m].reshape(n, h, w, 256)

    # conv7 (3x3, p3) + conv8 (1x1) + conv9 (1x1) + ReLUs + AvgPool2d(6)  (fused).
    # AvgPool2d(6) on the 11x11 conv7 map reads only its top-left 6x6 window, and
    # conv8/conv9 are pointwise, so restricting the tail to that window is exact.
    win = 6
    xp = jnp.pad(a, ((0, 0), (3, 3), (3, 3), (0, 0)))[:, :win + 2, :win + 2, :]
    p, (n, ph, pw) = _im2col(xp, 3, 1, 0)                  # 6x6 pooled positions
    m = n * ph * pw
    mp = _round_up(m, 16)
    p = _pad2d(p, mp, p.shape[1])
    pool = _avg_pool_matrix(n, ph * pw, mp)
    out = conv_tail(p, prep["w7"], prep["b7"], prep["w8"], prep["b8"],
                    prep["w9"], prep["b9"], pool)
    return out[:n, :10]                                    # view(-1, 10)


# ------------------------------ Pure-JAX reference -------------------------- #

def reference_forward(params, x_nchw):
    # Same bf16-operand / f32-accumulate numerics so the comparison is tight.
    x = jnp.transpose(x_nchw, (0, 2, 3, 1))

    def conv(x, w, b, pad, stride=1):
        y = jax.lax.conv_general_dilated(
            x.astype(jnp.bfloat16),
            jnp.transpose(w, (2, 3, 1, 0)).astype(jnp.bfloat16),
            (stride, stride), [(pad, pad), (pad, pad)],
            dimension_numbers=("NHWC", "HWIO", "NHWC"),
            preferred_element_type=jnp.float32)
        return jax.nn.relu(y + b)

    out = conv(x, *params["conv1"], 2)
    out = conv(out, *params["conv2"], 0)
    out = conv(out, *params["conv3"], 0, 2)
    out = conv(out, *params["conv4"], 2)
    out = conv(out, *params["conv5"], 0)
    out = conv(out, *params["conv6"], 0, 2)
    out = conv(out, *params["conv7"], 3)
    out = conv(out, *params["conv8"], 0)
    out = conv(out, *params["conv9"], 0)
    out = jnp.mean(out[:, :6, :6, :], axis=(1, 2))         # AvgPool2d(6) on 11x11
    return out.reshape(-1, 10)


# ---------------------------------- Main ------------------------------------ #

if __name__ == "__main__":
    key = jax.random.PRNGKey(0)
    pkey, xkey = jax.random.split(key)
    params = init_params(pkey)
    x = jax.random.normal(xkey, (2, 3, 32, 32), jnp.float32)   # batch=2, CIFAR-size

    prep = prepare_params(params)
    fwd = jax.jit(all_cnn_b_forward)
    out = jax.block_until_ready(fwd(prep, x))
    assert out.shape == (2, 10), out.shape

    ref = reference_forward(params, x)
    # bf16 MXU operands + f32 accumulation in both paths -> only summation-order noise.
    np.testing.assert_allclose(np.asarray(out), np.asarray(ref),
                               rtol=5e-3, atol=5e-3)
    print("KERNEL_OK")
</pallas_src>

<mosaic_0001>
module attributes {stable_mosaic.version = 11 : i64} {
  func.func @_chain_kernel(%arg0: i32, %arg1: memref<1024x128xbf16, #tpu.memory_space<vmem>>, %arg2: memref<128x128xbf16, #tpu.memory_space<vmem>>, %arg3: memref<1x128xf32, #tpu.memory_space<vmem>>, %arg4: memref<128x128xbf16, #tpu.memory_space<vmem>>, %arg5: memref<1x128xf32, #tpu.memory_space<vmem>>, %arg6: memref<1024x128xbf16, #tpu.memory_space<vmem>>) attributes {dimension_semantics = [#tpu.dimension_semantics<parallel>], iteration_bounds = array<i64: 2>, scalar_prefetch = 0 : i64, scratch_operands = 0 : i64, tpu.core_type = #tpu.core_type<tc>, window_params = [{transform_indices = @transform_0, window_bounds = array<i64: 1024, 128>}, {pipeline_mode = #tpu.pipeline_mode<synchronous>, transform_indices = @transform_1, window_bounds = array<i64: 128, 128>}, {pipeline_mode = #tpu.pipeline_mode<synchronous>, transform_indices = @transform_2, window_bounds = array<i64: 1, 128>}, {pipeline_mode = #tpu.pipeline_mode<synchronous>, transform_indices = @transform_3, window_bounds = array<i64: 128, 128>}, {pipeline_mode = #tpu.pipeline_mode<synchronous>, transform_indices = @transform_4, window_bounds = array<i64: 1, 128>}, {transform_indices = @transform_5, window_bounds = array<i64: 1024, 128>}]} {
    %c0 = arith.constant 0 : index
    %c0_0 = arith.constant 0 : index
    %0 = vector.load %arg1[%c0, %c0_0] : memref<1024x128xbf16, #tpu.memory_space<vmem>>, vector<1024x128xbf16>
    %c0_1 = arith.constant 0 : index
    %c0_2 = arith.constant 0 : index
    %1 = vector.load %arg2[%c0_1, %c0_2] : memref<128x128xbf16, #tpu.memory_space<vmem>>, vector<128x128xbf16>
    %c0_3 = arith.constant 0 : index
    %c0_4 = arith.constant 0 : index
    %2 = vector.load %arg3[%c0_3, %c0_4] : memref<1x128xf32, #tpu.memory_space<vmem>>, vector<1x128xf32>
    %cst = arith.constant dense<0.000000e+00> : vector<1024x128xf32>
    %3 = tpu.matmul %0, %1, %cst {dimension_numbers = #tpu.dot_dimension_numbers<[1], [0], [0], [1], [0, 0, 1, 1], [], []>} : vector<1024x128xbf16>, vector<128x128xbf16>, vector<1024x128xf32> -> vector<1024x128xf32>
    %4 = vector.broadcast %2 : vector<1x128xf32> to vector<1024x128xf32>
    %5 = arith.addf %3, %4 : vector<1024x128xf32>
    %cst_5 = arith.constant 0.000000e+00 : f32
    %6 = vector.broadcast %cst_5 : f32 to vector<1024x128xf32>
    %7 = arith.maximumf %5, %6 : vector<1024x128xf32>
    %8 = arith.truncf %7 : vector<1024x128xf32> to vector<1024x128xbf16>
    %c0_6 = arith.constant 0 : index
    %c0_7 = arith.constant 0 : index
    %9 = vector.load %arg4[%c0_6, %c0_7] : memref<128x128xbf16, #tpu.memory_space<vmem>>, vector<128x128xbf16>
    %c0_8 = arith.constant 0 : index
    %c0_9 = arith.constant 0 : index
    %10 = vector.load %arg5[%c0_8, %c0_9] : memref<1x128xf32, #tpu.memory_space<vmem>>, vector<1x128xf32>
    %cst_10 = arith.constant dense<0.000000e+00> : vector<1024x128xf32>
    %11 = tpu.matmul %8, %9, %cst_10 {dimension_numbers = #tpu.dot_dimension_numbers<[1], [0], [0], [1], [0, 0, 1, 1], [], []>} : vector<1024x128xbf16>, vector<128x128xbf16>, vector<1024x128xf32> -> vector<1024x128xf32>
    %12 = vector.broadcast %10 : vector<1x128xf32> to vector<1024x128xf32>
    %13 = arith.addf %11, %12 : vector<1024x128xf32>
    %cst_11 = arith.constant 0.000000e+00 : f32
    %14 = vector.broadcast %cst_11 : f32 to vector<1024x128xf32>
    %15 = arith.maximumf %13, %14 : vector<1024x128xf32>
    %16 = arith.truncf %15 : vector<1024x128xf32> to vector<1024x128xbf16>
    %c0_12 = arith.constant 0 : index
    %c0_13 = arith.constant 0 : index
    %17 = vector.load %arg6[%c0_12, %c0_13] : memref<1024x128xbf16, #tpu.memory_space<vmem>>, vector<1024x128xbf16>
    tpu.vector_store %arg6[%c0_12, %c0_13], %16 {strides = array<i32>} : memref<1024x128xbf16, #tpu.memory_space<vmem>>, vector<1024x128xbf16>,
    return
  }
  func.func @transform_0(%arg0: i32) -> (i32, i32) {
    %c0_i32 = arith.constant 0 : i32
    %c0_i32_0 = arith.constant 0 : i32
    return %arg0, %c0_i32 : i32, i32
  }
  func.func @transform_1(%arg0: i32) -> (i32, i32) {
    %c0_i32 = arith.constant 0 : i32
    %c0_i32_0 = arith.constant 0 : i32
    %c0_i32_1 = arith.constant 0 : i32
    return %c0_i32, %c0_i32_0 : i32, i32
  }
  func.func @transform_2(%arg0: i32) -> (i32, i32) {
    %c0_i32 = arith.constant 0 : i32
    %c0_i32_0 = arith.constant 0 : i32
    %c0_i32_1 = arith.constant 0 : i32
    return %c0_i32, %c0_i32_0 : i32, i32
  }
  func.func @transform_3(%arg0: i32) -> (i32, i32) {
    %c0_i32 = arith.constant 0 : i32
    %c0_i32_0 = arith.constant 0 : i32
    %c0_i32_1 = arith.constant 0 : i32
    return %c0_i32, %c0_i32_0 : i32, i32
  }
  func.func @transform_4(%arg0: i32) -> (i32, i32) {
    %c0_i32 = arith.constant 0 : i32
    %c0_i32_0 = arith.constant 0 : i32
    %c0_i32_1 = arith.constant 0 : i32
    return %c0_i32, %c0_i32_0 : i32, i32
  }
  func.func @transform_5(%arg0: i32) -> (i32, i32) {
    %c0_i32 = arith.constant 0 : i32
    %c0_i32_0 = arith.constant 0 : i32
    return %arg0, %c0_i32 : i32, i32
  }
}

module attributes {stable_mosaic.version = 11 : i64} {
  func.func @_chain_kernel(%arg0: i32, %arg1: memref<232x1152xbf16, #tpu.memory_space<vmem>>, %arg2: memref<1152x128xbf16, #tpu.memory_space<vmem>>, %arg3: memref<1x128xf32, #tpu.memory_space<vmem>>, %arg4: memref<232x128xbf16, #tpu.memory_space<vmem>>) attributes {dimension_semantics = [#tpu.dimension_semantics<parallel>], iteration_bounds = array<i64: 2>, scalar_prefetch = 0 : i64, scratch_operands = 0 : i64, tpu.core_type = #tpu.core_type<tc>, window_params = [{transform_indices = @transform_0, window_bounds = array<i64: 232, 1152>}, {pipeline_mode = #tpu.pipeline_mode<synchronous>, transform_indices = @transform_1, window_bounds = array<i64: 1152, 128>}, {pipeline_mode = #tpu.pipeline_mode<synchronous>, transform_indices = @transform_2, window_bounds = array<i64: 1, 128>}, {transform_indices = @transform_3, window_bounds = array<i64: 232, 128>}]} {
    %c0 = arith.constant 0 : index
    %c0_0 = arith.constant 0 : index
    %0 = vector.load %arg1[%c0, %c0_0] : memref<232x1152xbf16, #tpu.memory_space<vmem>>, vector<232x1152xbf16>
    %c0_1 = arith.constant 0 : index
    %c0_2 = arith.constant 0 : index
    %1 = vector.load %arg2[%c0_1, %c0_2] : memref<1152x128xbf16, #tpu.memory_space<vmem>>, vector<1152x128xbf16>
    %c0_3 = arith.constant 0 : index
    %c0_4 = arith.constant 0 : index
    %2 = vector.load %arg3[%c0_3, %c0_4] : memref<1x128xf32, #tpu.memory_space<vmem>>, vector<1x128xf32>
    %cst = arith.constant dense<0.000000e+00> : vector<232x128xf32>
    %3 = tpu.matmul %0, %1, %cst {dimension_numbers = #tpu.dot_dimension_numbers<[1], [0], [0], [1], [0, 0, 1, 1], [], []>} : vector<232x1152xbf16>, vector<1152x128xbf16>, vector<232x128xf32> -> vector<232x128xf32>
    %4 = vector.broadcast %2 : vector<1x128xf32> to vector<232x128xf32>
    %5 = arith.addf %3, %4 : vector<232x128xf32>
    %cst_5 = arith.constant 0.000000e+00 : f32
    %6 = vector.broadcast %cst_5 : f32 to vector<232x128xf32>
    %7 = arith.maximumf %5, %6 : vector<232x128xf32>
    %8 = arith.truncf %7 : vector<232x128xf32> to vector<232x128xbf16>
    %c0_6 = arith.constant 0 : index
    %c0_7 = arith.constant 0 : index
    %9 = vector.load %arg4[%c0_6, %c0_7] : memref<232x128xbf16, #tpu.memory_space<vmem>>, vector<232x128xbf16>
    tpu.vector_store %arg4[%c0_6, %c0_7], %8 {strides = array<i32>} : memref<232x128xbf16, #tpu.memory_space<vmem>>, vector<232x128xbf16>,
    return
  }
  func.func @transform_0(%arg0: i32) -> (i32, i32) {
    %c0_i32 = arith.constant 0 : i32
    %c0_i32_0 = arith.constant 0 : i32
    return %arg0, %c0_i32 : i32, i32
  }
  func.func @transform_1(%arg0: i32) -> (i32, i32) {
    %c0_i32 = arith.constant 0 : i32
    %c0_i32_0 = arith.constant 0 : i32
    %c0_i32_1 = arith.constant 0 : i32
    return %c0_i32, %c0_i32_0 : i32, i32
  }
  func.func @transform_2(%arg0: i32) -> (i32, i32) {
    %c0_i32 = arith.constant 0 : i32
    %c0_i32_0 = arith.constant 0 : i32
    %c0_i32_1 = arith.constant 0 : i32
    return %c0_i32, %c0_i32_0 : i32, i32
  }
  func.func @transform_3(%arg0: i32) -> (i32, i32) {
    %c0_i32 = arith.constant 0 : i32
    %c0_i32_0 = arith.constant 0 : i32
    return %arg0, %c0_i32 : i32, i32
  }
}

module attributes {stable_mosaic.version = 11 : i64} {
  func.func @_chain_kernel(%arg0: i32, %arg1: memref<232x3200xbf16, #tpu.memory_space<vmem>>, %arg2: memref<3200x256xbf16, #tpu.memory_space<vmem>>, %arg3: memref<1x256xf32, #tpu.memory_space<vmem>>, %arg4: memref<256x256xbf16, #tpu.memory_space<vmem>>, %arg5: memref<1x256xf32, #tpu.memory_space<vmem>>, %arg6: memref<232x256xbf16, #tpu.memory_space<vmem>>) attributes {dimension_semantics = [#tpu.dimension_semantics<parallel>], iteration_bounds = array<i64: 2>, scalar_prefetch = 0 : i64, scratch_operands = 0 : i64, tpu.core_type = #tpu.core_type<tc>, window_params = [{transform_indices = @transform_0, window_bounds = array<i64: 232, 3200>}, {pipeline_mode = #tpu.pipeline_mode<synchronous>, transform_indices = @transform_1, window_bounds = array<i64: 3200, 256>}, {pipeline_mode = #tpu.pipeline_mode<synchronous>, transform_indices = @transform_2, window_bounds = array<i64: 1, 256>}, {pipeline_mode = #tpu.pipeline_mode<synchronous>, transform_indices = @transform_3, window_bounds = array<i64: 256, 256>}, {pipeline_mode = #tpu.pipeline_mode<synchronous>, transform_indices = @transform_4, window_bounds = array<i64: 1, 256>}, {transform_indices = @transform_5, window_bounds = array<i64: 232, 256>}]} {
    %c0 = arith.constant 0 : index
    %c0_0 = arith.constant 0 : index
    %0 = vector.load %arg1[%c0, %c0_0] : memref<232x3200xbf16, #tpu.memory_space<vmem>>, vector<232x3200xbf16>
    %c0_1 = arith.constant 0 : index
    %c0_2 = arith.constant 0 : index
    %1 = vector.load %arg2[%c0_1, %c0_2] : memref<3200x256xbf16, #tpu.memory_space<vmem>>, vector<3200x256xbf16>
    %c0_3 = arith.constant 0 : index
    %c0_4 = arith.constant 0 : index
    %2 = vector.load %arg3[%c0_3, %c0_4] : memref<1x256xf32, #tpu.memory_space<vmem>>, vector<1x256xf32>
    %cst = arith.constant dense<0.000000e+00> : vector<232x256xf32>
    %3 = tpu.matmul %0, %1, %cst {dimension_numbers = #tpu.dot_dimension_numbers<[1], [0], [0], [1], [0, 0, 1, 1], [], []>} : vector<232x3200xbf16>, vector<3200x256xbf16>, vector<232x256xf32> -> vector<232x256xf32>
    %4 = vector.broadcast %2 : vector<1x256xf32> to vector<232x256xf32>
    %5 = arith.addf %3, %4 : vector<232x256xf32>
    %cst_5 = arith.constant 0.000000e+00 : f32
    %6 = vector.broadcast %cst_5 : f32 to vector<232x256xf32>
    %7 = arith.maximumf %5, %6 : vector<232x256xf32>
    %8 = arith.truncf %7 : vector<232x256xf32> to vector<232x256xbf16>
    %c0_6 = arith.constant 0 : index
    %c0_7 = arith.constant 0 : index
    %9 = vector.load %arg4[%c0_6, %c0_7] : memref<256x256xbf16, #tpu.memory_space<vmem>>, vector<256x256xbf16>
    %c0_8 = arith.constant 0 : index
    %c0_9 = arith.constant 0 : index
    %10 = vector.load %arg5[%c0_8, %c0_9] : memref<1x256xf32, #tpu.memory_space<vmem>>, vector<1x256xf32>
    %cst_10 = arith.constant dense<0.000000e+00> : vector<232x256xf32>
    %11 = tpu.matmul %8, %9, %cst_10 {dimension_numbers = #tpu.dot_dimension_numbers<[1], [0], [0], [1], [0, 0, 1, 1], [], []>} : vector<232x256xbf16>, vector<256x256xbf16>, vector<232x256xf32> -> vector<232x256xf32>
    %12 = vector.broadcast %10 : vector<1x256xf32> to vector<232x256xf32>
    %13 = arith.addf %11, %12 : vector<232x256xf32>
    %cst_11 = arith.constant 0.000000e+00 : f32
    %14 = vector.broadcast %cst_11 : f32 to vector<232x256xf32>
    %15 = arith.maximumf %13, %14 : vector<232x256xf32>
    %16 = arith.truncf %15 : vector<232x256xf32> to vector<232x256xbf16>
    %c0_12 = arith.constant 0 : index
    %c0_13 = arith.constant 0 : index
    %17 = vector.load %arg6[%c0_12, %c0_13] : memref<232x256xbf16, #tpu.memory_space<vmem>>, vector<232x256xbf16>
    tpu.vector_store %arg6[%c0_12, %c0_13], %16 {strides = array<i32>} : memref<232x256xbf16, #tpu.memory_space<vmem>>, vector<232x256xbf16>,
    return
  }
  func.func @transform_0(%arg0: i32) -> (i32, i32) {
    %c0_i32 = arith.constant 0 : i32
    %c0_i32_0 = arith.constant 0 : i32
    return %arg0, %c0_i32 : i32, i32
  }
  func.func @transform_1(%arg0: i32) -> (i32, i32) {
    %c0_i32 = arith.constant 0 : i32
    %c0_i32_0 = arith.constant 0 : i32
    %c0_i32_1 = arith.constant 0 : i32
    return %c0_i32, %c0_i32_0 : i32, i32
  }
  func.func @transform_2(%arg0: i32) -> (i32, i32) {
    %c0_i32 = arith.constant 0 : i32
    %c0_i32_0 = arith.constant 0 : i32
    %c0_i32_1 = arith.constant 0 : i32
    return %c0_i32, %c0_i32_0 : i32, i32
  }
  func.func @transform_3(%arg0: i32) -> (i32, i32) {
    %c0_i32 = arith.constant 0 : i32
    %c0_i32_0 = arith.constant 0 : i32
    %c0_i32_1 = arith.constant 0 : i32
    return %c0_i32, %c0_i32_0 : i32, i32
  }
  func.func @transform_4(%arg0: i32) -> (i32, i32) {
    %c0_i32 = arith.constant 0 : i32
    %c0_i32_0 = arith.constant 0 : i32
    %c0_i32_1 = arith.constant 0 : i32
    return %c0_i32, %c0_i32_0 : i32, i32
  }
  func.func @transform_5(%arg0: i32) -> (i32, i32) {
    %c0_i32 = arith.constant 0 : i32
    %c0_i32_0 = arith.constant 0 : i32
    return %arg0, %c0_i32 : i32, i32
  }
}

module attributes {stable_mosaic.version = 11 : i64} {
  func.func @_chain_kernel(%arg0: i32, %arg1: memref<112x2304xbf16, #tpu.memory_space<vmem>>, %arg2: memref<2304x256xbf16, #tpu.memory_space<vmem>>, %arg3: memref<1x256xf32, #tpu.memory_space<vmem>>, %arg4: memref<112x256xbf16, #tpu.memory_space<vmem>>) attributes {dimension_semantics = [#tpu.dimension_semantics<parallel>], iteration_bounds = array<i64: 1>, scalar_prefetch = 0 : i64, scratch_operands = 0 : i64, tpu.core_type = #tpu.core_type<tc>, window_params = [{transform_indices = @transform_0, window_bounds = array<i64: 112, 2304>}, {pipeline_mode = #tpu.pipeline_mode<synchronous>, transform_indices = @transform_1, window_bounds = array<i64: 2304, 256>}, {pipeline_mode = #tpu.pipeline_mode<synchronous>, transform_indices = @transform_2, window_bounds = array<i64: 1, 256>}, {transform_indices = @transform_3, window_bounds = array<i64: 112, 256>}]} {
    %c0 = arith.constant 0 : index
    %c0_0 = arith.constant 0 : index
    %0 = vector.load %arg1[%c0, %c0_0] : memref<112x2304xbf16, #tpu.memory_space<vmem>>, vector<112x2304xbf16>
    %c0_1 = arith.constant 0 : index
    %c0_2 = arith.constant 0 : index
    %1 = vector.load %arg2[%c0_1, %c0_2] : memref<2304x256xbf16, #tpu.memory_space<vmem>>, vector<2304x256xbf16>
    %c0_3 = arith.constant 0 : index
    %c0_4 = arith.constant 0 : index
    %2 = vector.load %arg3[%c0_3, %c0_4] : memref<1x256xf32, #tpu.memory_space<vmem>>, vector<1x256xf32>
    %cst = arith.constant dense<0.000000e+00> : vector<112x256xf32>
    %3 = tpu.matmul %0, %1, %cst {dimension_numbers = #tpu.dot_dimension_numbers<[1], [0], [0], [1], [0, 0, 1, 1], [], []>} : vector<112x2304xbf16>, vector<2304x256xbf16>, vector<112x256xf32> -> vector<112x256xf32>
    %4 = vector.broadcast %2 : vector<1x256xf32> to vector<112x256xf32>
    %5 = arith.addf %3, %4 : vector<112x256xf32>
    %cst_5 = arith.constant 0.000000e+00 : f32
    %6 = vector.broadcast %cst_5 : f32 to vector<112x256xf32>
    %7 = arith.maximumf %5, %6 : vector<112x256xf32>
    %8 = arith.truncf %7 : vector<112x256xf32> to vector<112x256xbf16>
    %c0_6 = arith.constant 0 : index
    %c0_7 = arith.constant 0 : index
    %9 = vector.load %arg4[%c0_6, %c0_7] : memref<112x256xbf16, #tpu.memory_space<vmem>>, vector<112x256xbf16>
    tpu.vector_store %arg4[%c0_6, %c0_7], %8 {strides = array<i32>} : memref<112x256xbf16, #tpu.memory_space<vmem>>, vector<112x256xbf16>,
    return
  }
  func.func @transform_0(%arg0: i32) -> (i32, i32) {
    %c0_i32 = arith.constant 0 : i32
    %c0_i32_0 = arith.constant 0 : i32
    return %arg0, %c0_i32 : i32, i32
  }
  func.func @transform_1(%arg0: i32) -> (i32, i32) {
    %c0_i32 = arith.constant 0 : i32
    %c0_i32_0 = arith.constant 0 : i32
    %c0_i32_1 = arith.constant 0 : i32
    return %c0_i32, %c0_i32_0 : i32, i32
  }
  func.func @transform_2(%arg0: i32) -> (i32, i32) {
    %c0_i32 = arith.constant 0 : i32
    %c0_i32_0 = arith.constant 0 : i32
    %c0_i32_1 = arith.constant 0 : i32
    return %c0_i32, %c0_i32_0 : i32, i32
  }
  func.func @transform_3(%arg0: i32) -> (i32, i32) {
    %c0_i32 = arith.constant 0 : i32
    %c0_i32_0 = arith.constant 0 : i32
    return %arg0, %c0_i32 : i32, i32
  }
}

module attributes {stable_mosaic.version = 11 : i64} {
  func.func @_tail_kernel(%arg0: i32, %arg1: memref<80x2304xbf16, #tpu.memory_space<vmem>>, %arg2: memref<2304x256xbf16, #tpu.memory_space<vmem>>, %arg3: memref<1x256xf32, #tpu.memory_space<vmem>>, %arg4: memref<256x256xbf16, #tpu.memory_space<vmem>>, %arg5: memref<1x256xf32, #tpu.memory_space<vmem>>, %arg6: memref<256x128xbf16, #tpu.memory_space<vmem>>, %arg7: memref<1x128xf32, #tpu.memory_space<vmem>>, %arg8: memref<8x80xf32, #tpu.memory_space<vmem>>, %arg9: memref<8x128xf32, #tpu.memory_space<vmem>>) attributes {dimension_semantics = [#tpu.dimension_semantics<arbitrary>], iteration_bounds = array<i64: 1>, scalar_prefetch = 0 : i64, scratch_operands = 0 : i64, tpu.core_type = #tpu.core_type<tc>, window_params = [{pipeline_mode = #tpu.pipeline_mode<synchronous>, transform_indices = @transform_0, window_bounds = array<i64: 80, 2304>}, {pipeline_mode = #tpu.pipeline_mode<synchronous>, transform_indices = @transform_1, window_bounds = array<i64: 2304, 256>}, {pipeline_mode = #tpu.pipeline_mode<synchronous>, transform_indices = @transform_2, window_bounds = array<i64: 1, 256>}, {pipeline_mode = #tpu.pipeline_mode<synchronous>, transform_indices = @transform_3, window_bounds = array<i64: 256, 256>}, {pipeline_mode = #tpu.pipeline_mode<synchronous>, transform_indices = @transform_4, window_bounds = array<i64: 1, 256>}, {pipeline_mode = #tpu.pipeline_mode<synchronous>, transform_indices = @transform_5, window_bounds = array<i64: 256, 128>}, {pipeline_mode = #tpu.pipeline_mode<synchronous>, transform_indices = @transform_6, window_bounds = array<i64: 1, 128>}, {pipeline_mode = #tpu.pipeline_mode<synchronous>, transform_indices = @transform_7, window_bounds = array<i64: 8, 80>}, {pipeline_mode = #tpu.pipeline_mode<synchronous>, transform_indices = @transform_8, window_bounds = array<i64: 8, 128>}]} {
    %c0 = arith.constant 0 : index
    %c0_0 = arith.constant 0 : index
    %0 = vector.load %arg1[%c0, %c0_0] : memref<80x2304xbf16, #tpu.memory_space<vmem>>, vector<80x2304xbf16>
    %c0_1 = arith.constant 0 : index
    %c0_2 = arith.constant 0 : index
    %1 = vector.load %arg2[%c0_1, %c0_2] : memref<2304x256xbf16, #tpu.memory_space<vmem>>, vector<2304x256xbf16>
    %cst = arith.constant dense<0.000000e+00> : vector<80x256xf32>
    %2 = tpu.matmul %0, %1, %cst {dimension_numbers = #tpu.dot_dimension_numbers<[1], [0], [0], [1], [0, 0, 1, 1], [], []>} : vector<80x2304xbf16>, vector<2304x256xbf16>, vector<80x256xf32> -> vector<80x256xf32>
    %c0_3 = arith.constant 0 : index
    %c0_4 = arith.constant 0 : index
    %3 = vector.load %arg3[%c0_3, %c0_4] : memref<1x256xf32, #tpu.memory_space<vmem>>, vector<1x256xf32>
    %4 = vector.broadcast %3 : vector<1x256xf32> to vector<80x256xf32>
    %5 = arith.addf %2, %4 : vector<80x256xf32>
    %cst_5 = arith.constant 0.000000e+00 : f32
    %6 = vector.broadcast %cst_5 : f32 to vector<80x256xf32>
    %7 = arith.maximumf %5, %6 : vector<80x256xf32>
    %8 = arith.truncf %7 : vector<80x256xf32> to vector<80x256xbf16>
    %c0_6 = arith.constant 0 : index
    %c0_7 = arith.constant 0 : index
    %9 = vector.load %arg4[%c0_6, %c0_7] : memref<256x256xbf16, #tpu.memory_space<vmem>>, vector<256x256xbf16>
    %cst_8 = arith.constant dense<0.000000e+00> : vector<80x256xf32>
    %10 = tpu.matmul %8, %9, %cst_8 {dimension_numbers = #tpu.dot_dimension_numbers<[1], [0], [0], [1], [0, 0, 1, 1], [], []>} : vector<80x256xbf16>, vector<256x256xbf16>, vector<80x256xf32> -> vector<80x256xf32>
    %c0_9 = arith.constant 0 : index
    %c0_10 = arith.constant 0 : index
    %11 = vector.load %arg5[%c0_9, %c0_10] : memref<1x256xf32, #tpu.memory_space<vmem>>, vector<1x256xf32>
    %12 = vector.broadcast %11 : vector<1x256xf32> to vector<80x256xf32>
    %13 = arith.addf %10, %12 : vector<80x256xf32>
    %cst_11 = arith.constant 0.000000e+00 : f32
    %14 = vector.broadcast %cst_11 : f32 to vector<80x256xf32>
    %15 = arith.maximumf %13, %14 : vector<80x256xf32>
    %16 = arith.truncf %15 : vector<80x256xf32> to vector<80x256xbf16>
    %c0_12 = arith.constant 0 : index
    %c0_13 = arith.constant 0 : index
    %17 = vector.load %arg6[%c0_12, %c0_13] : memref<256x128xbf16, #tpu.memory_space<vmem>>, vector<256x128xbf16>
    %cst_14 = arith.constant dense<0.000000e+00> : vector<80x128xf32>
    %18 = tpu.matmul %16, %17, %cst_14 {dimension_numbers = #tpu.dot_dimension_numbers<[1], [0], [0], [1], [0, 0, 1, 1], [], []>} : vector<80x256xbf16>, vector<256x128xbf16>, vector<80x128xf32> -> vector<80x128xf32>
    %c0_15 = arith.constant 0 : index
    %c0_16 = arith.constant 0 : index
    %19 = vector.load %arg7[%c0_15, %c0_16] : memref<1x128xf32, #tpu.memory_space<vmem>>, vector<1x128xf32>
    %20 = vector.broadcast %19 : vector<1x128xf32> to vector<80x128xf32>
    %21 = arith.addf %18, %20 : vector<80x128xf32>
    %cst_17 = arith.constant 0.000000e+00 : f32
    %22 = vector.broadcast %cst_17 : f32 to vector<80x128xf32>
    %23 = arith.maximumf %21, %22 : vector<80x128xf32>
    %c0_18 = arith.constant 0 : index
    %c0_19 = arith.constant 0 : index
    %24 = vector.load %arg8[%c0_18, %c0_19] : memref<8x80xf32, #tpu.memory_space<vmem>>, vector<8x80xf32>
    %cst_20 = arith.constant dense<0.000000e+00> : vector<8x128xf32>
    %25 = tpu.matmul %24, %23, %cst_20 {dimension_numbers = #tpu.dot_dimension_numbers<[1], [0], [0], [1], [0, 0, 1, 1], [], []>} : vector<8x80xf32>, vector<80x128xf32>, vector<8x128xf32> -> vector<8x128xf32>
    %c0_21 = arith.constant 0 : index
    %c0_22 = arith.constant 0 : index
    %26 = vector.load %arg9[%c0_21, %c0_22] : memref<8x128xf32, #tpu.memory_space<vmem>>, vector<8x128xf32>
    tpu.vector_store %arg9[%c0_21, %c0_22], %25 {strides = array<i32>} : memref<8x128xf32, #tpu.memory_space<vmem>>, vector<8x128xf32>,
    return
  }
  func.func @transform_0(%arg0: i32) -> (i32, i32) {
    %c0_i32 = arith.constant 0 : i32
    %c0_i32_0 = arith.constant 0 : i32
    %c0_i32_1 = arith.constant 0 : i32
    return %c0_i32, %c0_i32_0 : i32, i32
  }
  func.func @transform_1(%arg0: i32) -> (i32, i32) {
    %c0_i32 = arith.constant 0 : i32
    %c0_i32_0 = arith.constant 0 : i32
    %c0_i32_1 = arith.constant 0 : i32
    return %c0_i32, %c0_i32_0 : i32, i32
  }
  func.func @transform_2(%arg0: i32) -> (i32, i32) {
    %c0_i32 = arith.constant 0 : i32
    %c0_i32_0 = arith.constant 0 : i32
    %c0_i32_1 = arith.constant 0 : i32
    return %c0_i32, %c0_i32_0 : i32, i32
  }
  func.func @transform_3(%arg0: i32) -> (i32, i32) {
    %c0_i32 = arith.constant 0 : i32
    %c0_i32_0 = arith.constant 0 : i32
    %c0_i32_1 = arith.constant 0 : i32
    return %c0_i32, %c0_i32_0 : i32, i32
  }
  func.func @transform_4(%arg0: i32) -> (i32, i32) {
    %c0_i32 = arith.constant 0 : i32
    %c0_i32_0 = arith.constant 0 : i32
    %c0_i32_1 = arith.constant 0 : i32
    return %c0_i32, %c0_i32_0 : i32, i32
  }
  func.func @transform_5(%arg0: i32) -> (i32, i32) {
    %c0_i32 = arith.constant 0 : i32
    %c0_i32_0 = arith.constant 0 : i32
    %c0_i32_1 = arith.constant 0 : i32
    return %c0_i32, %c0_i32_0 : i32, i32
  }
  func.func @transform_6(%arg0: i32) -> (i32, i32) {
    %c0_i32 = arith.constant 0 : i32
    %c0_i32_0 = arith.constant 0 : i32
    %c0_i32_1 = arith.constant 0 : i32
    return %c0_i32, %c0_i32_0 : i32, i32
  }
  func.func @transform_7(%arg0: i32) -> (i32, i32) {
    %c0_i32 = arith.constant 0 : i32
    %c0_i32_0 = arith.constant 0 : i32
    %c0_i32_1 = arith.constant 0 : i32
    return %c0_i32, %c0_i32_0 : i32, i32
  }
  func.func @transform_8(%arg0: i32) -> (i32, i32) {
    %c0_i32 = arith.constant 0 : i32
    %c0_i32_0 = arith.constant 0 : i32
    %c0_i32_1 = arith.constant 0 : i32
    return %c0_i32, %c0_i32_0 : i32, i32
  }
}

</mosaic_0001>

<bundles_post_ra>
// kernel: all_cnn_b_forward.5
= control target key start
LH: loop header
LB: loop body
LE: loop exit
PB: predicated region body
PF: predicated region fallthrough
CT: control target
= control target key end

     0   :  { %s4281_s18 = smov 0   ;;  %s4761_s0 = inlined_call_operand.vmem [shape: bf16[2048,128], index: 0, kind: input, shape index: {}]   ;;  %s4762_s1 = inlined_call_operand.vmem [shape: bf16[128,128], index: 1, kind: input, shape index: {}]   ;;  %s4763_s2 = inlined_call_operand.vmem [shape: f32[1,128], index: 2, kind: input, shape index: {}]   ;;  %s4764_s3 = inlined_call_operand.vmem [shape: bf16[128,128], index: 3, kind: input, shape index: {}]   ;;  %s4765_s4 = inlined_call_operand.vmem [shape: f32[1,128], index: 4, kind: input, shape index: {}]   ;;  %s4766_s5 = inlined_call_operand.vmem [shape: bf16[2048,128], index: 5, kind: output, shape index: {}]  }
   0x1 LB: > { %s2989_s19 = sadd.s32 4294967295, %s4249_s18   ;;  %p2993_p0 = scmp.ge.s32.totalorder %s4249_s18, 1  ;;  %s4249_s18 = sphi %s4281_s18, %s15_s18  }
   0x2   : > { %p188_p1 = scmp.lt.s32.totalorder %s4249_s18, 3 }
   0x4   : > { %p189_p2 = pnand %p2993_p0, %p188_p1 }
   0x5   : > { %v4161_v0 = vld [vmem:[%s4762_s1] sm:$0xff] (!%p189_p2)   ;;  %s2994_s22 = sshll.u32 (!%p189_p2), %s2989_s19, 7  ;;  %v4162_v1 = vld [vmem:[%s4762_s1 + $0x8] sm:$0xff] (!%p189_p2)   ;;  %v4163_v2 = vld [vmem:[%s4762_s1 + $0x10] sm:$0xff] (!%p189_p2)  }
   0x6   : > { %192 = sbr.rel (%p189_p2) target bundleno = 730 (0x2da), region = 40  ;;  %p217_p3 = scmp.lt.s32.totalorder (!%p189_p2), %s2994_s22, 255  ;;  %3865 = vmatprep.subr.bf16.mxu0 (!%p189_p2), %v4161_v0  ;;  %v4164_v3 = vld [vmem:[%s4762_s1 + $0x18] sm:$0xff] (!%p189_p2)   ;;  %v4165_v5 = vld [vmem:[%s4762_s1 + $0x20] sm:$0xff] (!%p189_p2)   ;;  %v4166_v6 = vld [vmem:[%s4762_s1 + $0x28] sm:$0xff] (!%p189_p2)  }
   0x7   : > { %3866 = vmatpush3.bf16.msra.mxu0 (!%p189_p2), %v4161_v0  ;;  %v4167_v7 = vld [vmem:[%s4762_s1 + $0x30] sm:$0xff] (!%p189_p2)   ;;  %v4168_v8 = vld [vmem:[%s4762_s1 + $0x38] sm:$0xff] (!%p189_p2)   ;;  %v4217_v25 = vld [vmem:[%s4764_s3] sm:$0xff] (!%p189_p2)  }
   0x8   : > { %3867 = vmatprep.subr.bf16.mxu0 (!%p189_p2), %v4162_v1  ;;  %4009 = vmatprep.subr.bf16.mxu1 (!%p189_p2), %v4217_v25  ;;  %v4220_v28 = vld [vmem:[%s4764_s3 + $0x8] sm:$0xff] (!%p189_p2)   ;;  %v4221_v29 = vld [vmem:[%s4764_s3 + $0x10] sm:$0xff] (!%p189_p2)   ;;  %v4224_v32 = vld [vmem:[%s4764_s3 + $0x18] sm:$0xff] (!%p189_p2)  }
   0x9   : > { %4010 = vmatpush3.bf16.msra.mxu1 (!%p189_p2), %v4217_v25  ;;  %v4225_v33 = vld [vmem:[%s4764_s3 + $0x20] sm:$0xff] (!%p189_p2)   ;;  %v4228_v36 = vld [vmem:[%s4764_s3 + $0x28] sm:$0xff] (!%p189_p2)   ;;  %v4229_v38 = vld [vmem:[%s4764_s3 + $0x30] sm:$0xff] (!%p189_p2)  }
   0xa   : > { %4011 = vmatprep.subr.bf16.mxu1 (!%p189_p2), %v4220_v28  ;;  %v4232_v40 = vld [vmem:[%s4764_s3 + $0x38] sm:$0xff] (!%p189_p2)  }
   0xb   : > { %3868 = vmatpush3.bf16.msra.mxu0 (!%p189_p2), %v4162_v1 }
   0xc   : > { %3869 = vmatprep.subr.bf16.mxu0 (!%p189_p2), %v4163_v2 }
   0xd   : > { %s4768_s22 = smov (!%p217_p3, %s2994_s22), 255  ;;  %4012 = vmatpush3.bf16.msra.mxu1 %v4220_v28 }
   0xe   : > { %s2995_s27 = sshll.u32 %s4768_s22, 2  ;;  %4013 = vmatprep.subr.bf16.mxu1 %v4221_v29 }
   0xf   : > { %s4306_s30 = scalar_lea.vmem %s4761_s0, %s2995_s27  ;;  %3870 = vmatpush3.bf16.msra.mxu0 %v4163_v2  ;;  %s4545_s16 = scalar_lea.vmem %s4766_s5, %s2995_s27 }
  0x10   : > { %v4169_v4 = vld [vmem:[%s4306_s30] sm:$0xff]   ;;  %3871 = vmatprep.subr.bf16.mxu0 %v4164_v3  ;;  %v4170_v9 = vld [vmem:[%s4306_s30 + $0x8] sm:$0xff]   ;;  %v4171_v10 = vld [vmem:[%s4306_s30 + $0x10] sm:$0xff]  }
  0x11   : > { %3881 = vmatprep.mubr.bf16.mxu0 %v4169_v4  ;;  %v4172_v11 = vld [vmem:[%s4306_s30 + $0x18] sm:$0xff]   ;;  %v4173_v12 = vld [vmem:[%s4306_s30 + $0x20] sm:$0xff]   ;;  %v4174_v13 = vld [vmem:[%s4306_s30 + $0x28] sm:$0xff]   ;;  %4014 = vmatpush3.bf16.msra.mxu1 %v4221_v29 }
  0x12   : > { %v4175_v14 = vld [vmem:[%s4306_s30 + $0x30] sm:$0xff]   ;;  %v4176_v15 = vld [vmem:[%s4306_s30 + $0x38] sm:$0xff]   ;;  %v4177_v16 = vld [vmem:[%s4306_s30 + $0x40] sm:$0xff]   ;;  %4015 = vmatprep.subr.bf16.mxu1 %v4224_v32 }
  0x13   : > { %3872 = vmatpush3.bf16.msra.mxu0 %v4164_v3  ;;  %v4178_v17 = vld [vmem:[%s4306_s30 + $0x48] sm:$0xff]   ;;  %v4179_v18 = vld [vmem:[%s4306_s30 + $0x50] sm:$0xff]   ;;  %v4180_v19 = vld [vmem:[%s4306_s30 + $0x58] sm:$0xff]  }
  0x14   : > { %3873 = vmatprep.subr.bf16.mxu0 %v4165_v5  ;;  %v4181_v20 = vld [vmem:[%s4306_s30 + $0x60] sm:$0xff]   ;;  %v4182_v21 = vld [vmem:[%s4306_s30 + $0x68] sm:$0xff]   ;;  %v4183_v22 = vld [vmem:[%s4306_s30 + $0x70] sm:$0xff]  }
  0x15   : > { %v4184_v23 = vld [vmem:[%s4306_s30 + $0x78] sm:$0xff]   ;;  %v4185_v24 = vld [vmem:[%s4306_s30 + $0x80] sm:$0xff]   ;;  %v4186_v26 = vld [vmem:[%s4306_s30 + $0x88] sm:$0xff]   ;;  %4016 = vmatpush3.bf16.msra.mxu1 %v4224_v32 }
  0x16   : > { %v4187_v27 = vld [vmem:[%s4306_s30 + $0x90] sm:$0xff]   ;;  %v4188_v30 = vld [vmem:[%s4306_s30 + $0x98] sm:$0xff]   ;;  %v4189_v31 = vld [vmem:[%s4306_s30 + $0xa0] sm:$0xff]   ;;  %4017 = vmatprep.subr.bf16.mxu1 %v4225_v33 }
  0x17   : > { %3874 = vmatpush3.bf16.msra.mxu0 %v4165_v5  ;;  %v4190_v34 = vld [vmem:[%s4306_s30 + $0xa8] sm:$0xff]   ;;  %v4191_v35 = vld [vmem:[%s4306_s30 + $0xb0] sm:$0xff]   ;;  %v4192_v37 = vld [vmem:[%s4306_s30 + $0xb8] sm:$0xff]  }
  0x18   : > { %3875 = vmatprep.subr.bf16.mxu0 %v4166_v6  ;;  %v4193_v39 = vld [vmem:[%s4306_s30 + $0xc0] sm:$0xff]   ;;  %v4194_v41 = vld [vmem:[%s4306_s30 + $0xc8] sm:$0xff]   ;;  %v4195_v42 = vld [vmem:[%s4306_s30 + $0xd0] sm:$0xff]  }
  0x19   : > { %4018 = vmatpush3.bf16.msra.mxu1 %v4225_v33  ;;  %v4196_v43 = vld [vmem:[%s4306_s30 + $0xd8] sm:$0xff]   ;;  %v4197_v44 = vld [vmem:[%s4306_s30 + $0xe0] sm:$0xff]   ;;  %v4198_v45 = vld [vmem:[%s4306_s30 + $0xe8] sm:$0xff]  }
  0x1a   : > { %4019 = vmatprep.subr.bf16.mxu1 %v4228_v36  ;;  %v4199_v46 = vld [vmem:[%s4306_s30 + $0xf0] sm:$0xff]   ;;  %v4200_v47 = vld [vmem:[%s4306_s30 + $0xf8] sm:$0xff]   ;;  %v4201_v48 = vld [vmem:[%s4306_s30 + $0x100] sm:$0xff]  }
  0x1b   : > { %3876 = vmatpush3.bf16.msra.mxu0 %v4166_v6  ;;  %v4202_v49 = vld [vmem:[%s4306_s30 + $0x108] sm:$0xff]   ;;  %v4203_v50 = vld [vmem:[%s4306_s30 + $0x110] sm:$0xff]   ;;  %v4204_v51 = vld [vmem:[%s4306_s30 + $0x118] sm:$0xff]  }
  0x1c   : > { %3877 = vmatprep.subr.bf16.mxu0 %v4167_v7  ;;  %v4205_v52 = vld [vmem:[%s4306_s30 + $0x120] sm:$0xff]   ;;  %v4206_v53 = vld [vmem:[%s4306_s30 + $0x128] sm:$0xff]   ;;  %v4207_v54 = vld [vmem:[%s4306_s30 + $0x130] sm:$0xff]  }
  0x1d   : > { %4020 = vmatpush3.bf16.msra.mxu1 %v4228_v36  ;;  %v4208_v55 = vld [vmem:[%s4306_s30 + $0x138] sm:$0xff]   ;;  %v4209_v56 = vld [vmem:[%s4306_s30 + $0x140] sm:$0xff]   ;;  %v4210_v57 = vld [vmem:[%s4306_s30 + $0x148] sm:$0xff]  }
  0x1e   : > { %4021 = vmatprep.subr.bf16.mxu1 %v4229_v38  ;;  %v4211_v58 = vld [vmem:[%s4306_s30 + $0x150] sm:$0xff]   ;;  %v4212_v59 = vld [vmem:[%s4306_s30 + $0x158] sm:$0xff]   ;;  %v4213_v60 = vld [vmem:[%s4306_s30 + $0x160] sm:$0xff]  }
  0x1f   : > { %3878 = vmatpush3.bf16.msra.mxu0 %v4167_v7  ;;  %v4214_v61 = vld [vmem:[%s4306_s30 + $0x168] sm:$0xff]   ;;  %v4215_v62 = vld [vmem:[%s4306_s30 + $0x170] sm:$0xff]   ;;  %v4216_v63 = vld [vmem:[%s4306_s30 + $0x178] sm:$0xff]  }
  0x20   : > { %3879 = vmatprep.subr.bf16.mxu0 %v4168_v8  ;;  %v4218_v0 = vld [vmem:[%s4306_s30 + $0x180] sm:$0xff]   ;;  %v4219_v1 = vld [vmem:[%s4306_s30 + $0x188] sm:$0xff]   ;;  %v4222_v2 = vld [vmem:[%s4306_s30 + $0x190] sm:$0xff]  }
  0x21   : > { %4022 = vmatpush3.bf16.msra.mxu1 %v4229_v38  ;;  %v4223_v3 = vld [vmem:[%s4306_s30 + $0x198] sm:$0xff]   ;;  %v4226_v4 = vld [vmem:[%s4306_s30 + $0x1a0] sm:$0xff]   ;;  %v4227_v5 = vld [vmem:[%s4306_s30 + $0x1a8] sm:$0xff]  }
  0x22   : > { %4023 = vmatprep.subr.bf16.mxu1 %v4232_v40  ;;  %v4230_v6 = vld [vmem:[%s4306_s30 + $0x1b0] sm:$0xff]   ;;  %v4405_v7 = vld [vmem:[%s4763_s2] ss:$0 sm:$0xff] }
  0x23   : > { %3880 = vmatpush3.bf16.msra.mxu0 %v4168_v8 }
  0x25   : > { %4024 = vmatpush3.bf16.msra.mxu1 %v4232_v40 }
  0x26   : > { %3882 = vmatmul.mubr.bf16.vlgmr.msra.gmra.mrb[0].mxu0 %v4170_v9 }
  0x27   : > { %3885 = vmatprep.mubr.bf16.mxu0 %v4171_v10 }
  0x2e   : > { %3886 = vmatmul.mubr.bf16.gmra.mrb[4].mxu0 %v4172_v11  ;;  %v4231_v11 = vld [vmem:[%s4306_s30 + $0x1b8] sm:$0xff]  }
  0x2f   : > { %3889 = vmatprep.mubr.bf16.mxu0 %v4173_v12 }
  0x36   : > { %3890 = vmatmul.mubr.bf16.gmra.mrb[8].mxu0 %v4174_v13 }
  0x37   : > { %3893 = vmatprep.mubr.bf16.mxu0 %v4175_v14  ;;  %v4233_v14 = vld [vmem:[%s4306_s30 + $0x1c0] sm:$0xff]  }
  0x3e   : > { %3894 = vmatmul.mubr.bf16.gmra.mrb[12].mxu0 %v4176_v15 }
  0x3f   : > { %3897 = vmatprep.mubr.bf16.mxu0 %v4177_v16 }
  0x46   : > { %3898 = vmatmul.mubr.bf16.gmra.mrb[16].mxu0 %v4178_v17 }
  0x47   : > { %3901 = vmatprep.mubr.bf16.mxu0 %v4179_v18 }
  0x4e   : > { %3902 = vmatmul.mubr.bf16.gmra.mrb[20].mxu0 %v4180_v19 }
  0x4f   : > { %3905 = vmatprep.mubr.bf16.mxu0 %v4181_v20 }
  0x56   : > { %3906 = vmatmul.mubr.bf16.gmra.mrb[24].mxu0 %v4182_v21 }
  0x57   : > { %3909 = vmatprep.mubr.bf16.mxu0 %v4183_v22 }
  0x5e   : > { %3910 = vmatmul.mubr.bf16.gmra.mrb[28].mxu0 %v4184_v23 }
  0x5f   : > { %3913 = vmatprep.mubr.bf16.mxu0 %v4185_v24 }
  0x66   : > { %3914 = vmatmul.mubr.bf16.gmra.mrb[32].mxu0 %v4186_v26 }
  0x67   : > { %3917 = vmatprep.mubr.bf16.mxu0 %v4187_v27  ;;  %v4234_v27 = vld [vmem:[%s4306_s30 + $0x1c8] sm:$0xff]  }
  0x6e   : > { %3918 = vmatmul.mubr.bf16.gmra.mrb[36].mxu0 %v4188_v30  ;;  %v4235_v30 = vld [vmem:[%s4306_s30 + $0x1d0] sm:$0xff]  }
  0x6f   : > { %3921 = vmatprep.mubr.bf16.mxu0 %v4189_v31 }
  0x76   : > { %3922 = vmatmul.mubr.bf16.gmra.mrb[40].mxu0 %v4190_v34 }
  0x77   : > { %3925 = vmatprep.mubr.bf16.mxu0 %v4191_v35 }
  0x7e   : > { %3926 = vmatmul.mubr.bf16.gmra.mrb[44].mxu0 %v4192_v37 }
  0x7f   : > { %3929 = vmatprep.mubr.bf16.mxu0 %v4193_v39 }
  0x86   : > { %3930 = vmatmul.mubr.bf16.gmra.mrb[48].mxu0 %v4194_v41 }
  0x87   : > { %3933 = vmatprep.mubr.bf16.mxu0 %v4195_v42 }
  0x8e   : > { %3934 = vmatmul.mubr.bf16.gmra.mrb[52].mxu0 %v4196_v43  ;;  %v4236_v43 = vld [vmem:[%s4306_s30 + $0x1d8] sm:$0xff]  }
  0x8f   : > { %3937 = vmatprep.mubr.bf16.mxu0 %v4197_v44 }
  0x96   : > { %3938 = vmatmul.mubr.bf16.gmra.mrb[56].mxu0 %v4198_v45 }
  0x97   : > { %3941 = vmatprep.mubr.bf16.mxu0 %v4199_v46  ;;  %v4237_v46 = vld [vmem:[%s4306_s30 + $0x1e0] sm:$0xff]  }
  0x9e   : > { %3942 = vmatmul.mubr.bf16.gmra.mrb[60].mxu0 %v4200_v47 }
  0x9f   : > { %3945 = vmatprep.mubr.bf16.mxu0 %v4201_v48 }
  0xa6   : > { %3946 = vmatmul.mubr.bf16.gmra.mrb[64].mxu0 %v4202_v49 }
  0xa7   : > { %3949 = vmatprep.mubr.bf16.mxu0 %v4203_v50 }
  0xae   : > { %3950 = vmatmul.mubr.bf16.gmra.mrb[68].mxu0 %v4204_v51 }
  0xaf   : > { %3953 = vmatprep.mubr.bf16.mxu0 %v4205_v52 }
  0xb6   : > { %3954 = vmatmul.mubr.bf16.gmra.mrb[72].mxu0 %v4206_v53 }
  0xb7   : > { %3957 = vmatprep.mubr.bf16.mxu0 %v4207_v54 }
  0xbe   : > { %3958 = vmatmul.mubr.bf16.gmra.mrb[76].mxu0 %v4208_v55 }
  0xbf   : > { %3961 = vmatprep.mubr.bf16.mxu0 %v4209_v56 }
  0xc6   : > { %3962 = vmatmul.mubr.bf16.gmra.mrb[80].mxu0 %v4210_v57 }
  0xc7   : > { %3965 = vmatprep.mubr.bf16.mxu0 %v4211_v58 }
  0xce   : > { %3966 = vmatmul.mubr.bf16.gmra.mrb[84].mxu0 %v4212_v59  ;;  %v4238_v59 = vld [vmem:[%s4306_s30 + $0x1e8] sm:$0xff]  }
  0xcf   : > { %3969 = vmatprep.mubr.bf16.mxu0 %v4213_v60 }
  0xd6   : > { %3970 = vmatmul.mubr.bf16.gmra.mrb[88].mxu0 %v4214_v61 }
  0xd7   : > { %3973 = vmatprep.mubr.bf16.mxu0 %v4215_v62  ;;  %v4239_v62 = vld [vmem:[%s4306_s30 + $0x1f0] sm:$0xff]  }
  0xde   : > { %3974 = vmatmul.mubr.bf16.gmra.mrb[92].mxu0 %v4216_v63 }
  0xdf   : > { %3977 = vmatprep.mubr.bf16.mxu0 %v4218_v0 }
  0xe6   : > { %3978 = vmatmul.mubr.bf16.gmra.mrb[96].mxu0 %v4219_v1 }
  0xe7   : > { %3981 = vmatprep.mubr.bf16.mxu0 %v4222_v2 }
  0xee   : > { %3982 = vmatmul.mubr.bf16.gmra.mrb[100].mxu0 %v4223_v3 }
  0xef   : > { %3985 = vmatprep.mubr.bf16.mxu0 %v4226_v4 }
  0xf6   : > { %3986 = vmatmul.mubr.bf16.gmra.mrb[104].mxu0 %v4227_v5 }
  0xf7   : > { %3989 = vmatprep.mubr.bf16.mxu0 %v4230_v6 }
  0xf9   : > { %v3883_v8 = vpop.f32.mrb[0].mxu0 }
  0xfa   : > { %v855_v9 = vadd.f32 %v3883_v8, %v4405_v7  ;;  %v846_v10 = vpop.f32.mrb[1].mxu0 }
  0xfb   : > { %v847_v12 = vadd.f32 %v4405_v7, %v846_v10  ;;  %v3884_v13 = vpop.f32.mrb[2].mxu0 }
  0xfc   : > { %v858_v15 = vadd.f32 %v3884_v13, %v4405_v7  ;;  %v849_v16 = vpop.f32.mrb[3].mxu0  ;;  %v1359_v18 = vmax.f32 %v855_v9, 0.0 }
  0xfd   : > { %v850_v17 = vadd.f32 %v4405_v7, %v849_v16  ;;  %v1357_v20 = vmax.f32 %v847_v12, 0.0  ;;  %v4240_v12 = vld [vmem:[%s4306_s30 + $0x1f8] sm:$0xff]  }
  0xfe   : > { %v1360_v19 = vmax.f32 %v858_v15, 0.0  ;;  %3990 = vmatmul.mubr.bf16.gmra.mrb[108].mxu0 %v4231_v11 }
  0xff   : > { %v1358_v21 = vmax.f32 %v850_v17, 0.0  ;;  %3993 = vmatprep.mubr.bf16.mxu0 %v4233_v14 }
 0x100   : > { %v1486_v22 = vpack.c.bf16 %v1360_v19, %v1359_v18 }
 0x101   : > { %v3887_v23 = vpop.f32.mrb[4].mxu0  ;;  %v1485_v24 = vpack.c.bf16 %v1358_v21, %v1357_v20 }
 0x102   : > { %v871_v25 = vadd.f32 %v3887_v23, %v4405_v7  ;;  %v862_v26 = vpop.f32.mrb[5].mxu0 }
 0x103   : > { %v863_v28 = vadd.f32 %v4405_v7, %v862_v26  ;;  %v3888_v29 = vpop.f32.mrb[6].mxu0  ;;  %4025 = vmatprep.mubr.bf16.mxu1 %v1485_v24 }
 0x104   : > { %v874_v31 = vadd.f32 %v3888_v29, %v4405_v7  ;;  %v865_v32 = vpop.f32.mrb[7].mxu0  ;;  %4026 = vmatmul.mubr.bf16.vlgmr.msra.gmra.mrb[0].mxu1 %v1486_v22  ;;  %v1363_v34 = vmax.f32 %v871_v25, 0.0 }
 0x105   : > { %v866_v33 = vadd.f32 %v4405_v7, %v865_v32  ;;  %v1361_v36 = vmax.f32 %v863_v28, 0.0 }
 0x106   : > { %v1364_v35 = vmax.f32 %v874_v31, 0.0  ;;  %3994 = vmatmul.mubr.bf16.gmra.mrb[112].mxu0 %v4234_v27 }
 0x107   : > { %v1362_v37 = vmax.f32 %v866_v33, 0.0  ;;  %3997 = vmatprep.mubr.bf16.mxu0 %v4235_v30 }
 0x108   : > { %v1488_v38 = vpack.c.bf16 %v1364_v35, %v1363_v34 }
 0x109   : > { %v1487_v39 = vpack.c.bf16 %v1362_v37, %v1361_v36  ;;  %v3891_v40 = vpop.f32.mrb[8].mxu0 }
 0x10a   : > { %v887_v41 = vadd.f32 %v3891_v40, %v4405_v7  ;;  %v878_v42 = vpop.f32.mrb[9].mxu0 }
 0x10b   : > { %v879_v44 = vadd.f32 %v4405_v7, %v878_v42  ;;  %v3892_v45 = vpop.f32.mrb[10].mxu0  ;;  %4029 = vmatprep.mubr.bf16.mxu1 %v1487_v39 }
 0x10c   : > { %v890_v47 = vadd.f32 %v3892_v45, %v4405_v7  ;;  %v881_v48 = vpop.f32.mrb[11].mxu0  ;;  %4030 = vmatmul.mubr.bf16.gmra.mrb[4].mxu1 %v1488_v38  ;;  %v1367_v50 = vmax.f32 %v887_v41, 0.0 }
 0x10d   : > { %v882_v49 = vadd.f32 %v4405_v7, %v881_v48  ;;  %v1365_v52 = vmax.f32 %v879_v44, 0.0 }
 0x10e   : > { %v1368_v51 = vmax.f32 %v890_v47, 0.0  ;;  %3998 = vmatmul.mubr.bf16.gmra.mrb[116].mxu0 %v4236_v43 }
 0x10f   : > { %v1366_v53 = vmax.f32 %v882_v49, 0.0  ;;  %4001 = vmatprep.mubr.bf16.mxu0 %v4237_v46 }
 0x110   : > { %v1490_v54 = vpack.c.bf16 %v1368_v51, %v1367_v50 }
 0x111   : > { %v1489_v55 = vpack.c.bf16 %v1366_v53, %v1365_v52  ;;  %v3895_v56 = vpop.f32.mrb[12].mxu0 }
 0x112   : > { %v903_v57 = vadd.f32 %v3895_v56, %v4405_v7  ;;  %v894_v58 = vpop.f32.mrb[13].mxu0 }
 0x113   : > { %v895_v60 = vadd.f32 %v4405_v7, %v894_v58  ;;  %v3896_v61 = vpop.f32.mrb[14].mxu0  ;;  %4033 = vmatprep.mubr.bf16.mxu1 %v1489_v55 }
 0x114   : > { %v906_v63 = vadd.f32 %v3896_v61, %v4405_v7  ;;  %v897_v0 = vpop.f32.mrb[15].mxu0  ;;  %4034 = vmatmul.mubr.bf16.gmra.mrb[8].mxu1 %v1490_v54  ;;  %v1371_v2 = vmax.f32 %v903_v57, 0.0 }
 0x115   : > { %v898_v1 = vadd.f32 %v4405_v7, %v897_v0  ;;  %v1369_v4 = vmax.f32 %v895_v60, 0.0 }
 0x116   : > { %v1372_v3 = vmax.f32 %v906_v63, 0.0  ;;  %4002 = vmatmul.mubr.bf16.gmra.mrb[120].mxu0 %v4238_v59 }
 0x117   : > { %v1370_v5 = vmax.f32 %v898_v1, 0.0  ;;  %4005 = vmatprep.mubr.bf16.mxu0 %v4239_v62 }
 0x118   : > { %v1492_v6 = vpack.c.bf16 %v1372_v3, %v1371_v2 }
 0x119   : > { %v1491_v8 = vpack.c.bf16 %v1370_v5, %v1369_v4  ;;  %v3899_v9 = vpop.f32.mrb[16].mxu0 }
 0x11a   : > { %v919_v10 = vadd.f32 %v3899_v9, %v4405_v7  ;;  %v910_v11 = vpop.f32.mrb[17].mxu0 }
 0x11b   : > { %v911_v13 = vadd.f32 %v4405_v7, %v910_v11  ;;  %v3900_v14 = vpop.f32.mrb[18].mxu0  ;;  %4037 = vmatprep.mubr.bf16.mxu1 %v1491_v8 }
 0x11c   : > { %v922_v15 = vadd.f32 %v3900_v14, %v4405_v7  ;;  %v913_v16 = vpop.f32.mrb[19].mxu0  ;;  %4038 = vmatmul.mubr.bf16.gmra.mrb[12].mxu1 %v1492_v6  ;;  %v1375_v18 = vmax.f32 %v919_v10, 0.0 }
 0x11d   : > { %v914_v17 = vadd.f32 %v4405_v7, %v913_v16  ;;  %v1373_v20 = vmax.f32 %v911_v13, 0.0 }
 0x11e   : > { %v1376_v19 = vmax.f32 %v922_v15, 0.0  ;;  %4006 = vmatmul.mubr.bf16.gmra.mrb[124].mxu0 %v4240_v12 }
 0x11f   : > { %v1374_v21 = vmax.f32 %v914_v17, 0.0 }
 0x120   : > { %v1494_v22 = vpack.c.bf16 %v1376_v19, %v1375_v18 }
 0x121   : > { %v1493_v23 = vpack.c.bf16 %v1374_v21, %v1373_v20  ;;  %v3903_v24 = vpop.f32.mrb[20].mxu0 }
 0x122   : > { %v935_v25 = vadd.f32 %v3903_v24, %v4405_v7  ;;  %v926_v26 = vpop.f32.mrb[21].mxu0 }
 0x123   : > { %v927_v27 = vadd.f32 %v4405_v7, %v926_v26  ;;  %v3904_v28 = vpop.f32.mrb[22].mxu0  ;;  %4041 = vmatprep.mubr.bf16.mxu1 %v1493_v23 }
 0x124   : > { %v938_v29 = vadd.f32 %v3904_v28, %v4405_v7  ;;  %v929_v30 = vpop.f32.mrb[23].mxu0  ;;  %4042 = vmatmul.mubr.bf16.gmra.mrb[16].mxu1 %v1494_v22  ;;  %v1379_v32 = vmax.f32 %v935_v25, 0.0 }
 0x125   : > { %v930_v31 = vadd.f32 %v4405_v7, %v929_v30  ;;  %v1377_v34 = vmax.f32 %v927_v27, 0.0 }
 0x126   : > { %v1380_v33 = vmax.f32 %v938_v29, 0.0 }
 0x127   : > { %v1378_v35 = vmax.f32 %v930_v31, 0.0 }
 0x128   : > { %v1496_v36 = vpack.c.bf16 %v1380_v33, %v1379_v32 }
 0x129   : > { %v1495_v37 = vpack.c.bf16 %v1378_v35, %v1377_v34  ;;  %v3907_v38 = vpop.f32.mrb[24].mxu0 }
 0x12a   : > { %v951_v39 = vadd.f32 %v3907_v38, %v4405_v7  ;;  %v942_v40 = vpop.f32.mrb[25].mxu0 }
 0x12b   : > { %v943_v41 = vadd.f32 %v4405_v7, %v942_v40  ;;  %v3908_v42 = vpop.f32.mrb[26].mxu0  ;;  %4045 = vmatprep.mubr.bf16.mxu1 %v1495_v37 }
 0x12c   : > { %v954_v43 = vadd.f32 %v3908_v42, %v4405_v7  ;;  %v945_v44 = vpop.f32.mrb[27].mxu0  ;;  %4046 = vmatmul.mubr.bf16.gmra.mrb[20].mxu1 %v1496_v36  ;;  %v1383_v46 = vmax.f32 %v951_v39, 0.0 }
 0x12d   : > { %v946_v45 = vadd.f32 %v4405_v7, %v945_v44  ;;  %v1381_v48 = vmax.f32 %v943_v41, 0.0 }
 0x12e   : > { %v1384_v47 = vmax.f32 %v954_v43, 0.0 }
 0x12f   : > { %v1382_v49 = vmax.f32 %v946_v45, 0.0 }
 0x130   : > { %v1498_v50 = vpack.c.bf16 %v1384_v47, %v1383_v46 }
 0x131   : > { %v1497_v51 = vpack.c.bf16 %v1382_v49, %v1381_v48  ;;  %v3911_v52 = vpop.f32.mrb[28].mxu0 }
 0x132   : > { %v967_v53 = vadd.f32 %v3911_v52, %v4405_v7  ;;  %v958_v54 = vpop.f32.mrb[29].mxu0 }
 0x133   : > { %v959_v55 = vadd.f32 %v4405_v7, %v958_v54  ;;  %v3912_v56 = vpop.f32.mrb[30].mxu0  ;;  %4049 = vmatprep.mubr.bf16.mxu1 %v1497_v51 }
 0x134   : > { %v970_v57 = vadd.f32 %v3912_v56, %v4405_v7  ;;  %v961_v58 = vpop.f32.mrb[31].mxu0  ;;  %4050 = vmatmul.mubr.bf16.gmra.mrb[24].mxu1 %v1498_v50  ;;  %v1387_v60 = vmax.f32 %v967_v53, 0.0 }
 0x135   : > { %v962_v59 = vadd.f32 %v4405_v7, %v961_v58  ;;  %v1385_v62 = vmax.f32 %v959_v55, 0.0 }
 0x136   : > { %v1388_v61 = vmax.f32 %v970_v57, 0.0 }
 0x137   : > { %v1386_v63 = vmax.f32 %v962_v59, 0.0 }
 0x138   : > { %v1500_v0 = vpack.c.bf16 %v1388_v61, %v1387_v60 }
 0x139   : > { %v1499_v1 = vpack.c.bf16 %v1386_v63, %v1385_v62  ;;  %v3915_v2 = vpop.f32.mrb[32].mxu0 }
 0x13a   : > { %v983_v3 = vadd.f32 %v3915_v2, %v4405_v7  ;;  %v974_v4 = vpop.f32.mrb[33].mxu0 }
 0x13b   : > { %v975_v5 = vadd.f32 %v4405_v7, %v974_v4  ;;  %v3916_v6 = vpop.f32.mrb[34].mxu0  ;;  %4053 = vmatprep.mubr.bf16.mxu1 %v1499_v1 }
 0x13c   : > { %v986_v8 = vadd.f32 %v3916_v6, %v4405_v7  ;;  %v977_v9 = vpop.f32.mrb[35].mxu0  ;;  %4054 = vmatmul.mubr.bf16.gmra.mrb[28].mxu1 %v1500_v0  ;;  %v1391_v11 = vmax.f32 %v983_v3, 0.0 }
 0x13d   : > { %v978_v10 = vadd.f32 %v4405_v7, %v977_v9  ;;  %v1389_v13 = vmax.f32 %v975_v5, 0.0 }
 0x13e   : > { %v1392_v12 = vmax.f32 %v986_v8, 0.0 }
 0x13f   : > { %v1390_v14 = vmax.f32 %v978_v10, 0.0 }
 0x140   : > { %v1502_v15 = vpack.c.bf16 %v1392_v12, %v1391_v11 }
 0x141   : > { %v1501_v16 = vpack.c.bf16 %v1390_v14, %v1389_v13  ;;  %v3919_v17 = vpop.f32.mrb[36].mxu0 }
 0x142   : > { %v999_v18 = vadd.f32 %v3919_v17, %v4405_v7  ;;  %v990_v19 = vpop.f32.mrb[37].mxu0 }
 0x143   : > { %v991_v20 = vadd.f32 %v4405_v7, %v990_v19  ;;  %v3920_v21 = vpop.f32.mrb[38].mxu0  ;;  %4057 = vmatprep.mubr.bf16.mxu1 %v1501_v16 }
 0x144   : > { %v1002_v22 = vadd.f32 %v3920_v21, %v4405_v7  ;;  %v993_v23 = vpop.f32.mrb[39].mxu0  ;;  %4058 = vmatmul.mubr.bf16.gmra.mrb[32].mxu1 %v1502_v15  ;;  %v1395_v25 = vmax.f32 %v999_v18, 0.0 }
 0x145   : > { %v994_v24 = vadd.f32 %v4405_v7, %v993_v23  ;;  %v1393_v27 = vmax.f32 %v991_v20, 0.0 }
 0x146   : > { %v1396_v26 = vmax.f32 %v1002_v22, 0.0 }
 0x147   : > { %v1394_v28 = vmax.f32 %v994_v24, 0.0 }
 0x148   : > { %v1504_v29 = vpack.c.bf16 %v1396_v26, %v1395_v25 }
 0x149   : > { %v1503_v30 = vpack.c.bf16 %v1394_v28, %v1393_v27  ;;  %v3923_v31 = vpop.f32.mrb[40].mxu0 }
 0x14a   : > { %v1015_v32 = vadd.f32 %v3923_v31, %v4405_v7  ;;  %v1006_v33 = vpop.f32.mrb[41].mxu0 }
 0x14b   : > { %v1007_v34 = vadd.f32 %v4405_v7, %v1006_v33  ;;  %v3924_v35 = vpop.f32.mrb[42].mxu0  ;;  %4061 = vmatprep.mubr.bf16.mxu1 %v1503_v30 }
 0x14c   : > { %v1018_v36 = vadd.f32 %v3924_v35, %v4405_v7  ;;  %v1009_v37 = vpop.f32.mrb[43].mxu0  ;;  %4062 = vmatmul.mubr.bf16.gmra.mrb[36].mxu1 %v1504_v29  ;;  %v1399_v39 = vmax.f32 %v1015_v32, 0.0 }
 0x14d   : > { %v1010_v38 = vadd.f32 %v4405_v7, %v1009_v37  ;;  %v1397_v41 = vmax.f32 %v1007_v34, 0.0 }
 0x14e   : > { %v1400_v40 = vmax.f32 %v1018_v36, 0.0 }
 0x14f   : > { %v1398_v42 = vmax.f32 %v1010_v38, 0.0 }
 0x150   : > { %v1506_v43 = vpack.c.bf16 %v1400_v40, %v1399_v39 }
 0x151   : > { %v1505_v44 = vpack.c.bf16 %v1398_v42, %v1397_v41  ;;  %v3927_v45 = vpop.f32.mrb[44].mxu0 }
 0x152   : > { %v1031_v46 = vadd.f32 %v3927_v45, %v4405_v7  ;;  %v1022_v47 = vpop.f32.mrb[45].mxu0 }
 0x153   : > { %v1023_v48 = vadd.f32 %v4405_v7, %v1022_v47  ;;  %v3928_v49 = vpop.f32.mrb[46].mxu0  ;;  %4065 = vmatprep.mubr.bf16.mxu1 %v1505_v44 }
 0x154   : > { %v1034_v50 = vadd.f32 %v3928_v49, %v4405_v7  ;;  %v1025_v51 = vpop.f32.mrb[47].mxu0  ;;  %4066 = vmatmul.mubr.bf16.gmra.mrb[40].mxu1 %v1506_v43  ;;  %v1403_v53 = vmax.f32 %v1031_v46, 0.0 }
 0x155   : > { %v1026_v52 = vadd.f32 %v4405_v7, %v1025_v51  ;;  %v1401_v55 = vmax.f32 %v1023_v48, 0.0 }
 0x156   : > { %v1404_v54 = vmax.f32 %v1034_v50, 0.0 }
 0x157   : > { %v1402_v56 = vmax.f32 %v1026_v52, 0.0 }
 0x158   : > { %v1508_v57 = vpack.c.bf16 %v1404_v54, %v1403_v53 }
 0x159   : > { %v1507_v58 = vpack.c.bf16 %v1402_v56, %v1401_v55  ;;  %v3931_v59 = vpop.f32.mrb[48].mxu0 }
 0x15a   : > { %v1047_v60 = vadd.f32 %v3931_v59, %v4405_v7  ;;  %v1038_v61 = vpop.f32.mrb[49].mxu0 }
 0x15b   : > { %v1039_v62 = vadd.f32 %v4405_v7, %v1038_v61  ;;  %v3932_v63 = vpop.f32.mrb[50].mxu0  ;;  %4069 = vmatprep.mubr.bf16.mxu1 %v1507_v58 }
 0x15c   : > { %v1050_v0 = vadd.f32 %v3932_v63, %v4405_v7  ;;  %v1041_v1 = vpop.f32.mrb[51].mxu0  ;;  %4070 = vmatmul.mubr.bf16.gmra.mrb[44].mxu1 %v1508_v57  ;;  %v1407_v3 = vmax.f32 %v1047_v60, 0.0 }
 0x15d   : > { %v1042_v2 = vadd.f32 %v4405_v7, %v1041_v1  ;;  %v1405_v5 = vmax.f32 %v1039_v62, 0.0 }
 0x15e   : > { %v1408_v4 = vmax.f32 %v1050_v0, 0.0 }
 0x15f   : > { %v1406_v6 = vmax.f32 %v1042_v2, 0.0 }
 0x160   : > { %v1510_v8 = vpack.c.bf16 %v1408_v4, %v1407_v3 }
 0x161   : > { %v1509_v9 = vpack.c.bf16 %v1406_v6, %v1405_v5  ;;  %v3935_v10 = vpop.f32.mrb[52].mxu0 }
 0x162   : > { %v1063_v11 = vadd.f32 %v3935_v10, %v4405_v7  ;;  %v1054_v12 = vpop.f32.mrb[53].mxu0 }
 0x163   : > { %v1055_v13 = vadd.f32 %v4405_v7, %v1054_v12  ;;  %v3936_v14 = vpop.f32.mrb[54].mxu0  ;;  %4073 = vmatprep.mubr.bf16.mxu1 %v1509_v9 }
 0x164   : > { %v1066_v15 = vadd.f32 %v3936_v14, %v4405_v7  ;;  %v1057_v16 = vpop.f32.mrb[55].mxu0  ;;  %4074 = vmatmul.mubr.bf16.gmra.mrb[48].mxu1 %v1510_v8  ;;  %v1411_v18 = vmax.f32 %v1063_v11, 0.0 }
 0x165   : > { %v1058_v17 = vadd.f32 %v4405_v7, %v1057_v16  ;;  %v1409_v20 = vmax.f32 %v1055_v13, 0.0 }
 0x166   : > { %v1412_v19 = vmax.f32 %v1066_v15, 0.0 }
 0x167   : > { %v1410_v21 = vmax.f32 %v1058_v17, 0.0 }
 0x168   : > { %v1512_v22 = vpack.c.bf16 %v1412_v19, %v1411_v18 }
 0x169   : > { %v1511_v23 = vpack.c.bf16 %v1410_v21, %v1409_v20  ;;  %v3939_v24 = vpop.f32.mrb[56].mxu0 }
 0x16a   : > { %v1079_v25 = vadd.f32 %v3939_v24, %v4405_v7  ;;  %v1070_v26 = vpop.f32.mrb[57].mxu0 }
 0x16b   : > { %v1071_v27 = vadd.f32 %v4405_v7, %v1070_v26  ;;  %v3940_v28 = vpop.f32.mrb[58].mxu0  ;;  %4077 = vmatprep.mubr.bf16.mxu1 %v1511_v23 }
 0x16c   : > { %v1082_v29 = vadd.f32 %v3940_v28, %v4405_v7  ;;  %v1073_v30 = vpop.f32.mrb[59].mxu0  ;;  %4078 = vmatmul.mubr.bf16.gmra.mrb[52].mxu1 %v1512_v22  ;;  %v1415_v32 = vmax.f32 %v1079_v25, 0.0 }
 0x16d   : > { %v1074_v31 = vadd.f32 %v4405_v7, %v1073_v30  ;;  %v1413_v34 = vmax.f32 %v1071_v27, 0.0 }
 0x16e   : > { %v1416_v33 = vmax.f32 %v1082_v29, 0.0 }
 0x16f   : > { %v1414_v35 = vmax.f32 %v1074_v31, 0.0 }
 0x170   : > { %v1514_v36 = vpack.c.bf16 %v1416_v33, %v1415_v32 }
 0x171   : > { %v1513_v37 = vpack.c.bf16 %v1414_v35, %v1413_v34  ;;  %v3943_v38 = vpop.f32.mrb[60].mxu0 }
 0x172   : > { %v1095_v39 = vadd.f32 %v3943_v38, %v4405_v7  ;;  %v1086_v40 = vpop.f32.mrb[61].mxu0 }
 0x173   : > { %v1087_v41 = vadd.f32 %v4405_v7, %v1086_v40  ;;  %v3944_v42 = vpop.f32.mrb[62].mxu0  ;;  %4081 = vmatprep.mubr.bf16.mxu1 %v1513_v37 }
 0x174   : > { %v1098_v43 = vadd.f32 %v3944_v42, %v4405_v7  ;;  %v1089_v44 = vpop.f32.mrb[63].mxu0  ;;  %4082 = vmatmul.mubr.bf16.gmra.mrb[56].mxu1 %v1514_v36  ;;  %v1419_v46 = vmax.f32 %v1095_v39, 0.0 }
 0x175   : > { %v1090_v45 = vadd.f32 %v4405_v7, %v1089_v44  ;;  %v1417_v48 = vmax.f32 %v1087_v41, 0.0 }
 0x176   : > { %v1420_v47 = vmax.f32 %v1098_v43, 0.0 }
 0x177   : > { %v1418_v49 = vmax.f32 %v1090_v45, 0.0 }
 0x178   : > { %v1516_v50 = vpack.c.bf16 %v1420_v47, %v1419_v46 }
 0x179   : > { %v1515_v51 = vpack.c.bf16 %v1418_v49, %v1417_v48  ;;  %v3947_v52 = vpop.f32.mrb[64].mxu0 }
 0x17a   : > { %v1111_v53 = vadd.f32 %v3947_v52, %v4405_v7  ;;  %v1102_v54 = vpop.f32.mrb[65].mxu0 }
 0x17b   : > { %v1103_v55 = vadd.f32 %v4405_v7, %v1102_v54  ;;  %v3948_v56 = vpop.f32.mrb[66].mxu0  ;;  %4085 = vmatprep.mubr.bf16.mxu1 %v1515_v51 }
 0x17c   : > { %v1114_v57 = vadd.f32 %v3948_v56, %v4405_v7  ;;  %v1105_v58 = vpop.f32.mrb[67].mxu0  ;;  %4086 = vmatmul.mubr.bf16.gmra.mrb[60].mxu1 %v1516_v50  ;;  %v1423_v60 = vmax.f32 %v1111_v53, 0.0 }
 0x17d   : > { %v1106_v59 = vadd.f32 %v4405_v7, %v1105_v58  ;;  %v1421_v62 = vmax.f32 %v1103_v55, 0.0 }
 0x17e   : > { %v1424_v61 = vmax.f32 %v1114_v57, 0.0 }
 0x17f   : > { %v1422_v63 = vmax.f32 %v1106_v59, 0.0 }
 0x180   : > { %v1518_v0 = vpack.c.bf16 %v1424_v61, %v1423_v60 }
 0x181   : > { %v1517_v1 = vpack.c.bf16 %v1422_v63, %v1421_v62  ;;  %v3951_v2 = vpop.f32.mrb[68].mxu0 }
 0x182   : > { %v1127_v3 = vadd.f32 %v3951_v2, %v4405_v7  ;;  %v1118_v4 = vpop.f32.mrb[69].mxu0 }
 0x183   : > { %v1119_v5 = vadd.f32 %v4405_v7, %v1118_v4  ;;  %v3952_v6 = vpop.f32.mrb[70].mxu0  ;;  %4089 = vmatprep.mubr.bf16.mxu1 %v1517_v1 }
 0x184   : > { %v1130_v8 = vadd.f32 %v3952_v6, %v4405_v7  ;;  %v1121_v9 = vpop.f32.mrb[71].mxu0  ;;  %4090 = vmatmul.mubr.bf16.gmra.mrb[64].mxu1 %v1518_v0  ;;  %v1427_v11 = vmax.f32 %v1127_v3, 0.0 }
 0x185   : > { %v1122_v10 = vadd.f32 %v4405_v7, %v1121_v9  ;;  %v1425_v13 = vmax.f32 %v1119_v5, 0.0 }
 0x186   : > { %v1428_v12 = vmax.f32 %v1130_v8, 0.0 }
 0x187   : > { %v1426_v14 = vmax.f32 %v1122_v10, 0.0 }
 0x188   : > { %v1520_v15 = vpack.c.bf16 %v1428_v12, %v1427_v11 }
 0x189   : > { %v1519_v16 = vpack.c.bf16 %v1426_v14, %v1425_v13  ;;  %v3955_v17 = vpop.f32.mrb[72].mxu0 }
 0x18a   : > { %v1143_v18 = vadd.f32 %v3955_v17, %v4405_v7  ;;  %v1134_v19 = vpop.f32.mrb[73].mxu0 }
 0x18b   : > { %v1135_v20 = vadd.f32 %v4405_v7, %v1134_v19  ;;  %v3956_v21 = vpop.f32.mrb[74].mxu0  ;;  %4093 = vmatprep.mubr.bf16.mxu1 %v1519_v16 }
 0x18c   : > { %v1146_v22 = vadd.f32 %v3956_v21, %v4405_v7  ;;  %v1137_v23 = vpop.f32.mrb[75].mxu0  ;;  %4094 = vmatmul.mubr.bf16.gmra.mrb[68].mxu1 %v1520_v15  ;;  %v1431_v25 = vmax.f32 %v1143_v18, 0.0 }
 0x18d   : > { %v1138_v24 = vadd.f32 %v4405_v7, %v1137_v23  ;;  %v1429_v27 = vmax.f32 %v1135_v20, 0.0 }
 0x18e   : > { %v1432_v26 = vmax.f32 %v1146_v22, 0.0 }
 0x18f   : > { %v1430_v28 = vmax.f32 %v1138_v24, 0.0 }
 0x190   : > { %v1522_v29 = vpack.c.bf16 %v1432_v26, %v1431_v25 }
 0x191   : > { %v1521_v30 = vpack.c.bf16 %v1430_v28, %v1429_v27  ;;  %v3959_v31 = vpop.f32.mrb[76].mxu0 }
 0x192   : > { %v1159_v32 = vadd.f32 %v3959_v31, %v4405_v7  ;;  %v1150_v33 = vpop.f32.mrb[77].mxu0 }
 0x193   : > { %v1151_v34 = vadd.f32 %v4405_v7, %v1150_v33  ;;  %v3960_v35 = vpop.f32.mrb[78].mxu0  ;;  %4097 = vmatprep.mubr.bf16.mxu1 %v1521_v30 }
 0x194   : > { %v1162_v36 = vadd.f32 %v3960_v35, %v4405_v7  ;;  %v1153_v37 = vpop.f32.mrb[79].mxu0  ;;  %4098 = vmatmul.mubr.bf16.gmra.mrb[72].mxu1 %v1522_v29  ;;  %v1435_v39 = vmax.f32 %v1159_v32, 0.0 }
 0x195   : > { %v1154_v38 = vadd.f32 %v4405_v7, %v1153_v37  ;;  %v1433_v41 = vmax.f32 %v1151_v34, 0.0 }
 0x196   : > { %v1436_v40 = vmax.f32 %v1162_v36, 0.0 }
 0x197   : > { %v1434_v42 = vmax.f32 %v1154_v38, 0.0 }
 0x198   : > { %v1524_v43 = vpack.c.bf16 %v1436_v40, %v1435_v39 }
 0x199   : > { %v1523_v44 = vpack.c.bf16 %v1434_v42, %v1433_v41  ;;  %v3963_v45 = vpop.f32.mrb[80].mxu0 }
 0x19a   : > { %v1175_v46 = vadd.f32 %v3963_v45, %v4405_v7  ;;  %v1166_v47 = vpop.f32.mrb[81].mxu0 }
 0x19b   : > { %v1167_v48 = vadd.f32 %v4405_v7, %v1166_v47  ;;  %v3964_v49 = vpop.f32.mrb[82].mxu0  ;;  %4101 = vmatprep.mubr.bf16.mxu1 %v1523_v44 }
 0x19c   : > { %v1178_v50 = vadd.f32 %v3964_v49, %v4405_v7  ;;  %v1169_v51 = vpop.f32.mrb[83].mxu0  ;;  %4102 = vmatmul.mubr.bf16.gmra.mrb[76].mxu1 %v1524_v43  ;;  %v1439_v53 = vmax.f32 %v1175_v46, 0.0 }
 0x19d   : > { %v1170_v52 = vadd.f32 %v4405_v7, %v1169_v51  ;;  %v1437_v55 = vmax.f32 %v1167_v48, 0.0 }
 0x19e   : > { %v1440_v54 = vmax.f32 %v1178_v50, 0.0 }
 0x19f   : > { %v1438_v56 = vmax.f32 %v1170_v52, 0.0 }
 0x1a0   : > { %v1526_v57 = vpack.c.bf16 %v1440_v54, %v1439_v53 }
 0x1a1   : > { %v1525_v58 = vpack.c.bf16 %v1438_v56, %v1437_v55  ;;  %v3967_v59 = vpop.f32.mrb[84].mxu0 }
 0x1a2   : > { %v1191_v60 = vadd.f32 %v3967_v59, %v4405_v7  ;;  %v1182_v61 = vpop.f32.mrb[85].mxu0 }
 0x1a3   : > { %v1183_v62 = vadd.f32 %v4405_v7, %v1182_v61  ;;  %v3968_v63 = vpop.f32.mrb[86].mxu0  ;;  %4105 = vmatprep.mubr.bf16.mxu1 %v1525_v58 }
 0x1a4   : > { %v1194_v0 = vadd.f32 %v3968_v63, %v4405_v7  ;;  %v1185_v1 = vpop.f32.mrb[87].mxu0  ;;  %4106 = vmatmul.mubr.bf16.gmra.mrb[80].mxu1 %v1526_v57  ;;  %v1443_v3 = vmax.f32 %v1191_v60, 0.0 }
 0x1a5   : > { %v1186_v2 = vadd.f32 %v4405_v7, %v1185_v1  ;;  %v1441_v5 = vmax.f32 %v1183_v62, 0.0 }
 0x1a6   : > { %v1444_v4 = vmax.f32 %v1194_v0, 0.0 }
 0x1a7   : > { %v1442_v6 = vmax.f32 %v1186_v2, 0.0 }
 0x1a8   : > { %v1528_v8 = vpack.c.bf16 %v1444_v4, %v1443_v3 }
 0x1a9   : > { %v1527_v9 = vpack.c.bf16 %v1442_v6, %v1441_v5  ;;  %v3971_v10 = vpop.f32.mrb[88].mxu0 }
 0x1aa   : > { %v1207_v11 = vadd.f32 %v3971_v10, %v4405_v7  ;;  %v1198_v12 = vpop.f32.mrb[89].mxu0 }
 0x1ab   : > { %v1199_v13 = vadd.f32 %v4405_v7, %v1198_v12  ;;  %v3972_v14 = vpop.f32.mrb[90].mxu0  ;;  %4109 = vmatprep.mubr.bf16.mxu1 %v1527_v9 }
 0x1ac   : > { %v1210_v15 = vadd.f32 %v3972_v14, %v4405_v7  ;;  %v1201_v16 = vpop.f32.mrb[91].mxu0  ;;  %4110 = vmatmul.mubr.bf16.gmra.mrb[84].mxu1 %v1528_v8  ;;  %v1447_v18 = vmax.f32 %v1207_v11, 0.0 }
 0x1ad   : > { %v1202_v17 = vadd.f32 %v4405_v7, %v1201_v16  ;;  %v1445_v20 = vmax.f32 %v1199_v13, 0.0 }
 0x1ae   : > { %v1448_v19 = vmax.f32 %v1210_v15, 0.0 }
 0x1af   : > { %v1446_v21 = vmax.f32 %v1202_v17, 0.0 }
 0x1b0   : > { %v1530_v22 = vpack.c.bf16 %v1448_v19, %v1447_v18 }
 0x1b1   : > { %v1529_v23 = vpack.c.bf16 %v1446_v21, %v1445_v20  ;;  %v3975_v24 = vpop.f32.mrb[92].mxu0 }
 0x1b2   : > { %v1223_v25 = vadd.f32 %v3975_v24, %v4405_v7  ;;  %v1214_v26 = vpop.f32.mrb[93].mxu0 }
 0x1b3   : > { %v1215_v27 = vadd.f32 %v4405_v7, %v1214_v26  ;;  %v3976_v28 = vpop.f32.mrb[94].mxu0  ;;  %4113 = vmatprep.mubr.bf16.mxu1 %v1529_v23 }
 0x1b4   : > { %v1226_v29 = vadd.f32 %v3976_v28, %v4405_v7  ;;  %v1217_v30 = vpop.f32.mrb[95].mxu0  ;;  %4114 = vmatmul.mubr.bf16.gmra.mrb[88].mxu1 %v1530_v22  ;;  %v1451_v32 = vmax.f32 %v1223_v25, 0.0  ;;  %v4531_v25 = vld [vmem:[%s4765_s4] ss:$0 sm:$0xff] }
 0x1b5   : > { %v1218_v31 = vadd.f32 %v4405_v7, %v1217_v30  ;;  %v1449_v34 = vmax.f32 %v1215_v27, 0.0 }
 0x1b6   : > { %v1452_v33 = vmax.f32 %v1226_v29, 0.0 }
 0x1b7   : > { %v1450_v35 = vmax.f32 %v1218_v31, 0.0 }
 0x1b8   : > { %v1532_v36 = vpack.c.bf16 %v1452_v33, %v1451_v32 }
 0x1b9   : > { %v1531_v37 = vpack.c.bf16 %v1450_v35, %v1449_v34  ;;  %v3979_v38 = vpop.f32.mrb[96].mxu0 }
 0x1ba   : > { %v1239_v39 = vadd.f32 %v3979_v38, %v4405_v7  ;;  %v1230_v40 = vpop.f32.mrb[97].mxu0 }
 0x1bb   : > { %v1231_v41 = vadd.f32 %v4405_v7, %v1230_v40  ;;  %v3980_v42 = vpop.f32.mrb[98].mxu0  ;;  %4117 = vmatprep.mubr.bf16.mxu1 %v1531_v37 }
 0x1bc   : > { %v1242_v43 = vadd.f32 %v3980_v42, %v4405_v7  ;;  %v1233_v44 = vpop.f32.mrb[99].mxu0  ;;  %4118 = vmatmul.mubr.bf16.gmra.mrb[92].mxu1 %v1532_v36  ;;  %v1455_v46 = vmax.f32 %v1239_v39, 0.0 }
 0x1bd   : > { %v1234_v45 = vadd.f32 %v4405_v7, %v1233_v44  ;;  %v1453_v48 = vmax.f32 %v1231_v41, 0.0 }
 0x1be   : > { %v1456_v47 = vmax.f32 %v1242_v43, 0.0 }
 0x1bf   : > { %v1454_v49 = vmax.f32 %v1234_v45, 0.0 }
 0x1c0   : > { %v1534_v50 = vpack.c.bf16 %v1456_v47, %v1455_v46 }
 0x1c1   : > { %v1533_v51 = vpack.c.bf16 %v1454_v49, %v1453_v48  ;;  %v3983_v52 = vpop.f32.mrb[100].mxu0 }
 0x1c2   : > { %v1255_v53 = vadd.f32 %v3983_v52, %v4405_v7  ;;  %v1246_v54 = vpop.f32.mrb[101].mxu0 }
 0x1c3   : > { %v1247_v55 = vadd.f32 %v4405_v7, %v1246_v54  ;;  %v3984_v56 = vpop.f32.mrb[102].mxu0  ;;  %4121 = vmatprep.mubr.bf16.mxu1 %v1533_v51 }
 0x1c4   : > { %v1258_v57 = vadd.f32 %v3984_v56, %v4405_v7  ;;  %v1249_v58 = vpop.f32.mrb[103].mxu0  ;;  %4122 = vmatmul.mubr.bf16.gmra.mrb[96].mxu1 %v1534_v50  ;;  %v1459_v60 = vmax.f32 %v1255_v53, 0.0 }
 0x1c5   : > { %v1250_v59 = vadd.f32 %v4405_v7, %v1249_v58  ;;  %v1457_v62 = vmax.f32 %v1247_v55, 0.0 }
 0x1c6   : > { %v1460_v61 = vmax.f32 %v1258_v57, 0.0 }
 0x1c7   : > { %v1458_v63 = vmax.f32 %v1250_v59, 0.0 }
 0x1c8   : > { %v1536_v0 = vpack.c.bf16 %v1460_v61, %v1459_v60 }
 0x1c9   : > { %v1535_v1 = vpack.c.bf16 %v1458_v63, %v1457_v62  ;;  %v3987_v2 = vpop.f32.mrb[104].mxu0 }
 0x1ca   : > { %v1271_v3 = vadd.f32 %v3987_v2, %v4405_v7  ;;  %v1262_v4 = vpop.f32.mrb[105].mxu0 }
 0x1cb   : > { %v1263_v5 = vadd.f32 %v4405_v7, %v1262_v4  ;;  %v3988_v6 = vpop.f32.mrb[106].mxu0  ;;  %4125 = vmatprep.mubr.bf16.mxu1 %v1535_v1 }
 0x1cc   : > { %v1274_v8 = vadd.f32 %v3988_v6, %v4405_v7  ;;  %v1265_v9 = vpop.f32.mrb[107].mxu0  ;;  %4126 = vmatmul.mubr.bf16.gmra.mrb[100].mxu1 %v1536_v0  ;;  %v1463_v11 = vmax.f32 %v1271_v3, 0.0 }
 0x1cd   : > { %v1266_v10 = vadd.f32 %v4405_v7, %v1265_v9  ;;  %v1461_v13 = vmax.f32 %v1263_v5, 0.0 }
 0x1ce   : > { %v1464_v12 = vmax.f32 %v1274_v8, 0.0 }
 0x1cf   : > { %v1462_v14 = vmax.f32 %v1266_v10, 0.0 }
 0x1d0   : > { %v1538_v15 = vpack.c.bf16 %v1464_v12, %v1463_v11  ;;  %v4559_v12 = vld [vmem:[%s4763_s2] ss:$0 sm:$0xff] }
 0x1d1   : > { %v1537_v16 = vpack.c.bf16 %v1462_v14, %v1461_v13  ;;  %v3991_v17 = vpop.f32.mrb[108].mxu0 }
 0x1d2   : > { %v1287_v18 = vadd.f32 %v3991_v17, %v4405_v7  ;;  %v1278_v19 = vpop.f32.mrb[109].mxu0 }
 0x1d3   : > { %v1279_v20 = vadd.f32 %v4405_v7, %v1278_v19  ;;  %v3992_v21 = vpop.f32.mrb[110].mxu0  ;;  %4129 = vmatprep.mubr.bf16.mxu1 %v1537_v16 }
 0x1d4   : > { %v1290_v22 = vadd.f32 %v3992_v21, %v4405_v7  ;;  %v1281_v23 = vpop.f32.mrb[111].mxu0  ;;  %4130 = vmatmul.mubr.bf16.gmra.mrb[104].mxu1 %v1538_v15  ;;  %v1467_v26 = vmax.f32 %v1287_v18, 0.0 }
 0x1d5   : > { %v1282_v24 = vadd.f32 %v4405_v7, %v1281_v23  ;;  %v1465_v28 = vmax.f32 %v1279_v20, 0.0 }
 0x1d6   : > { %v1468_v27 = vmax.f32 %v1290_v22, 0.0 }
 0x1d7   : > { %v1466_v29 = vmax.f32 %v1282_v24, 0.0  ;;  %v4027_v30 = vpop.f32.mrb[0].mxu1 }
 0x1d8   : > { %v1540_v31 = vpack.c.bf16 %v1468_v27, %v1467_v26  ;;  %v1663_v32 = vadd.f32 %v4027_v30, %v4531_v25  ;;  %v1654_v33 = vpop.f32.mrb[1].mxu1 }
 0x1d9   : > { %v1539_v34 = vpack.c.bf16 %v1466_v29, %v1465_v28  ;;  %v1655_v35 = vadd.f32 %v4531_v25, %v1654_v33  ;;  %v3995_v36 = vpop.f32.mrb[112].mxu0  ;;  %v4028_v37 = vpop.f32.mrb[2].mxu1 }
 0x1da   : > { %v1303_v38 = vadd.f32 %v3995_v36, %v4405_v7  ;;  %v1666_v39 = vadd.f32 %v4028_v37, %v4531_v25  ;;  %v1294_v40 = vpop.f32.mrb[113].mxu0  ;;  %v1657_v41 = vpop.f32.mrb[3].mxu1  ;;  %v2167_v45 = vmax.f32 %v1663_v32, 0.0 }
 0x1db   : > { %v1295_v42 = vadd.f32 %v4405_v7, %v1294_v40  ;;  %v1658_v43 = vadd.f32 %v4531_v25, %v1657_v41  ;;  %v3996_v44 = vpop.f32.mrb[114].mxu0  ;;  %4133 = vmatprep.mubr.bf16.mxu1 %v1539_v34  ;;  %v2165_v49 = vmax.f32 %v1655_v35, 0.0 }
 0x1dc   : > { %v2168_v46 = vmax.f32 %v1666_v39, 0.0  ;;  %v1306_v47 = vadd.f32 %v3996_v44, %v4405_v7  ;;  %v1297_v48 = vpop.f32.mrb[115].mxu0  ;;  %4134 = vmatmul.mubr.bf16.gmra.mrb[108].mxu1 %v1540_v31  ;;  %v1471_v52 = vmax.f32 %v1303_v38, 0.0 }
 0x1dd   : > { %v2166_v50 = vmax.f32 %v1658_v43, 0.0  ;;  %v1298_v51 = vadd.f32 %v4405_v7, %v1297_v48  ;;  %v1469_v55 = vmax.f32 %v1295_v42, 0.0 }
 0x1de   : > { %v3346_v53 = vpack.c.bf16 %v2168_v46, %v2167_v45  ;;  %v1472_v54 = vmax.f32 %v1306_v47, 0.0 }
 0x1df   : > { %v3341_v56 = vpack.c.bf16 %v2166_v50, %v2165_v49  ;;  %v1470_v57 = vmax.f32 %v1298_v51, 0.0  ;;  %v4031_v58 = vpop.f32.mrb[4].mxu1 }
 0x1e0   : > { %3658 = vst [vmem:[%s4545_s16 + $0x8] sm:$0xff] %v3346_v53   ;;  %v1542_v59 = vpack.c.bf16 %v1472_v54, %v1471_v52  ;;  %v1679_v60 = vadd.f32 %v4031_v58, %v4531_v25  ;;  %v1670_v61 = vpop.f32.mrb[5].mxu1 }
 0x1e1   : > { %3342 = vst [vmem:[%s4545_s16] sm:$0xff] %v3341_v56   ;;  %v1541_v62 = vpack.c.bf16 %v1470_v57, %v1469_v55  ;;  %v1671_v63 = vadd.f32 %v4531_v25, %v1670_v61  ;;  %v3999_v0 = vpop.f32.mrb[116].mxu0  ;;  %v4032_v1 = vpop.f32.mrb[6].mxu1 }
 0x1e2   : > { %v1319_v2 = vadd.f32 %v3999_v0, %v4405_v7  ;;  %v1682_v3 = vadd.f32 %v4032_v1, %v4531_v25  ;;  %v1310_v4 = vpop.f32.mrb[117].mxu0  ;;  %v1673_v5 = vpop.f32.mrb[7].mxu1  ;;  %v2171_v10 = vmax.f32 %v1679_v60, 0.0 }
 0x1e3   : > { %v1311_v6 = vadd.f32 %v4405_v7, %v1310_v4  ;;  %v1674_v8 = vadd.f32 %v4531_v25, %v1673_v5  ;;  %v4000_v9 = vpop.f32.mrb[118].mxu0  ;;  %4137 = vmatprep.mubr.bf16.mxu1 %v1541_v62  ;;  %v2169_v15 = vmax.f32 %v1671_v63, 0.0 }
 0x1e4   : > { %v2172_v11 = vmax.f32 %v1682_v3, 0.0  ;;  %v1322_v13 = vadd.f32 %v4559_v12, %v4000_v9  ;;  %v1313_v14 = vpop.f32.mrb[119].mxu0  ;;  %4138 = vmatmul.mubr.bf16.gmra.mrb[112].mxu1 %v1542_v59  ;;  %v1475_v17 = vmax.f32 %v1319_v2, 0.0 }
 0x1e5   : > { %v2170_v16 = vmax.f32 %v1674_v8, 0.0  ;;  %v1314_v7 = vadd.f32 %v4559_v12, %v1313_v14  ;;  %v1473_v20 = vmax.f32 %v1311_v6, 0.0 }
 0x1e6   : > { %v3356_v18 = vpack.c.bf16 %v2172_v11, %v2171_v10  ;;  %v1476_v19 = vmax.f32 %v1322_v13, 0.0 }
 0x1e7   : > { %v3351_v21 = vpack.c.bf16 %v2170_v16, %v2169_v15  ;;  %v1474_v22 = vmax.f32 %v1314_v7, 0.0  ;;  %v4035_v23 = vpop.f32.mrb[8].mxu1 }
 0x1e8   : > { %3660 = vst [vmem:[%s4545_s16 + $0x18] sm:$0xff] %v3356_v18   ;;  %v1544_v24 = vpack.c.bf16 %v1476_v19, %v1475_v17  ;;  %v1695_v26 = vadd.f32 %v4035_v23, %v4531_v25  ;;  %v1686_v27 = vpop.f32.mrb[9].mxu1 }
 0x1e9   : > { %3659 = vst [vmem:[%s4545_s16 + $0x10] sm:$0xff] %v3351_v21   ;;  %v1543_v28 = vpack.c.bf16 %v1474_v22, %v1473_v20  ;;  %v1687_v29 = vadd.f32 %v4531_v25, %v1686_v27  ;;  %v4003_v30 = vpop.f32.mrb[120].mxu0  ;;  %v4036_v31 = vpop.f32.mrb[10].mxu1 }
 0x1ea   : > { %v1335_v32 = vadd.f32 %v4559_v12, %v4003_v30  ;;  %v1698_v33 = vadd.f32 %v4036_v31, %v4531_v25  ;;  %v1326_v34 = vpop.f32.mrb[121].mxu0  ;;  %v1689_v35 = vpop.f32.mrb[11].mxu1  ;;  %v2175_v39 = vmax.f32 %v1695_v26, 0.0 }
 0x1eb   : > { %v1327_v36 = vadd.f32 %v4559_v12, %v1326_v34  ;;  %v1690_v37 = vadd.f32 %v4531_v25, %v1689_v35  ;;  %v4004_v38 = vpop.f32.mrb[122].mxu0  ;;  %4141 = vmatprep.mubr.bf16.mxu1 %v1543_v28  ;;  %v2173_v43 = vmax.f32 %v1687_v29, 0.0 }
 0x1ec   : > { %v2176_v40 = vmax.f32 %v1698_v33, 0.0  ;;  %v1338_v41 = vadd.f32 %v4559_v12, %v4004_v38  ;;  %v1329_v42 = vpop.f32.mrb[123].mxu0  ;;  %4142 = vmatmul.mubr.bf16.gmra.mrb[116].mxu1 %v1544_v24  ;;  %v1479_v46 = vmax.f32 %v1335_v32, 0.0 }
 0x1ed   : > { %v2174_v44 = vmax.f32 %v1690_v37, 0.0  ;;  %v1330_v45 = vadd.f32 %v4559_v12, %v1329_v42  ;;  %v1477_v49 = vmax.f32 %v1327_v36, 0.0 }
 0x1ee   : > { %v3366_v47 = vpack.c.bf16 %v2176_v40, %v2175_v39  ;;  %v1480_v48 = vmax.f32 %v1338_v41, 0.0 }
 0x1ef   : > { %v3361_v50 = vpack.c.bf16 %v2174_v44, %v2173_v43  ;;  %v1478_v51 = vmax.f32 %v1330_v45, 0.0  ;;  %v4039_v52 = vpop.f32.mrb[12].mxu1 }
 0x1f0   : > { %3662 = vst [vmem:[%s4545_s16 + $0x28] sm:$0xff] %v3366_v47   ;;  %v1546_v53 = vpack.c.bf16 %v1480_v48, %v1479_v46  ;;  %v1711_v54 = vadd.f32 %v4039_v52, %v4531_v25  ;;  %v1702_v55 = vpop.f32.mrb[13].mxu1 }
 0x1f1   : > { %3661 = vst [vmem:[%s4545_s16 + $0x20] sm:$0xff] %v3361_v50   ;;  %v1545_v56 = vpack.c.bf16 %v1478_v51, %v1477_v49  ;;  %v1703_v57 = vadd.f32 %v4531_v25, %v1702_v55  ;;  %v4007_v58 = vpop.f32.mrb[124].mxu0  ;;  %v4040_v59 = vpop.f32.mrb[14].mxu1 }
 0x1f2   : > { %v1351_v60 = vadd.f32 %v4559_v12, %v4007_v58  ;;  %v1714_v61 = vadd.f32 %v4040_v59, %v4531_v25  ;;  %v1342_v62 = vpop.f32.mrb[125].mxu0  ;;  %v1705_v63 = vpop.f32.mrb[15].mxu1  ;;  %v2179_v3 = vmax.f32 %v1711_v54, 0.0 }
 0x1f3   : > { %v1343_v0 = vadd.f32 %v4559_v12, %v1342_v62  ;;  %v1706_v1 = vadd.f32 %v4531_v25, %v1705_v63  ;;  %v4008_v2 = vpop.f32.mrb[126].mxu0  ;;  %4145 = vmatprep.mubr.bf16.mxu1 %v1545_v56  ;;  %v2177_v8 = vmax.f32 %v1703_v57, 0.0 }
 0x1f4   : > { %v2180_v4 = vmax.f32 %v1714_v61, 0.0  ;;  %v1354_v5 = vadd.f32 %v4559_v12, %v4008_v2  ;;  %v1345_v6 = vpop.f32.mrb[127].mxu0  ;;  %4146 = vmatmul.mubr.bf16.gmra.mrb[120].mxu1 %v1546_v53  ;;  %v1483_v11 = vmax.f32 %v1351_v60, 0.0 }
 0x1f5   : > { %v2178_v9 = vmax.f32 %v1706_v1, 0.0  ;;  %v1346_v10 = vadd.f32 %v4559_v12, %v1345_v6  ;;  %v1481_v15 = vmax.f32 %v1343_v0, 0.0 }
 0x1f6   : > { %v3376_v13 = vpack.c.bf16 %v2180_v4, %v2179_v3  ;;  %v1484_v14 = vmax.f32 %v1354_v5, 0.0 }
 0x1f7   : > { %v3371_v16 = vpack.c.bf16 %v2178_v9, %v2177_v8  ;;  %v1482_v7 = vmax.f32 %v1346_v10, 0.0  ;;  %v4043_v17 = vpop.f32.mrb[16].mxu1 }
 0x1f8   : > { %3664 = vst [vmem:[%s4545_s16 + $0x38] sm:$0xff] %v3376_v13   ;;  %v1548_v18 = vpack.c.bf16 %v1484_v14, %v1483_v11  ;;  %v1727_v19 = vadd.f32 %v4043_v17, %v4531_v25  ;;  %v1718_v20 = vpop.f32.mrb[17].mxu1 }
 0x1f9   : > { %3663 = vst [vmem:[%s4545_s16 + $0x30] sm:$0xff] %v3371_v16   ;;  %v1547_v21 = vpack.c.bf16 %v1482_v7, %v1481_v15  ;;  %v1719_v22 = vadd.f32 %v4531_v25, %v1718_v20  ;;  %v4044_v23 = vpop.f32.mrb[18].mxu1 }
 0x1fa   : > { %v1730_v12 = vadd.f32 %v4044_v23, %v4531_v25  ;;  %v1721_v24 = vpop.f32.mrb[19].mxu1  ;;  %v2183_v27 = vmax.f32 %v1727_v19, 0.0 }
 0x1fb   : > { %v1722_v26 = vadd.f32 %v4531_v25, %v1721_v24  ;;  %4149 = vmatprep.mubr.bf16.mxu1 %v1547_v21  ;;  %v2181_v29 = vmax.f32 %v1719_v22, 0.0 }
 0x1fc   : > { %v2184_v28 = vmax.f32 %v1730_v12, 0.0  ;;  %4150 = vmatmul.mubr.bf16.gmra.mrb[124].mxu1 %v1548_v18 }
 0x1fd   : > { %v2182_v30 = vmax.f32 %v1722_v26, 0.0 }
 0x1fe   : > { %v3386_v31 = vpack.c.bf16 %v2184_v28, %v2183_v27 }
 0x1ff   : > { %v3381_v32 = vpack.c.bf16 %v2182_v30, %v2181_v29  ;;  %v4047_v33 = vpop.f32.mrb[20].mxu1 }
 0x200   : > { %3666 = vst [vmem:[%s4545_s16 + $0x48] sm:$0xff] %v3386_v31   ;;  %v1743_v34 = vadd.f32 %v4047_v33, %v4531_v25  ;;  %v1734_v35 = vpop.f32.mrb[21].mxu1 }
 0x201   : > { %3665 = vst [vmem:[%s4545_s16 + $0x40] sm:$0xff] %v3381_v32   ;;  %v1735_v36 = vadd.f32 %v4531_v25, %v1734_v35  ;;  %v4048_v37 = vpop.f32.mrb[22].mxu1 }
 0x202   : > { %v1746_v38 = vadd.f32 %v4048_v37, %v4531_v25  ;;  %v1737_v39 = vpop.f32.mrb[23].mxu1  ;;  %v2187_v41 = vmax.f32 %v1743_v34, 0.0 }
 0x203   : > { %v1738_v40 = vadd.f32 %v4531_v25, %v1737_v39  ;;  %v2185_v43 = vmax.f32 %v1735_v36, 0.0 }
 0x204   : > { %v2188_v42 = vmax.f32 %v1746_v38, 0.0 }
 0x205   : > { %v2186_v44 = vmax.f32 %v1738_v40, 0.0 }
 0x206   : > { %v3396_v45 = vpack.c.bf16 %v2188_v42, %v2187_v41 }
 0x207   : > { %v3391_v46 = vpack.c.bf16 %v2186_v44, %v2185_v43  ;;  %v4051_v47 = vpop.f32.mrb[24].mxu1 }
 0x208   : > { %3668 = vst [vmem:[%s4545_s16 + $0x58] sm:$0xff] %v3396_v45   ;;  %v1759_v48 = vadd.f32 %v4051_v47, %v4531_v25  ;;  %v1750_v49 = vpop.f32.mrb[25].mxu1 }
 0x209   : > { %3667 = vst [vmem:[%s4545_s16 + $0x50] sm:$0xff] %v3391_v46   ;;  %v1751_v50 = vadd.f32 %v4531_v25, %v1750_v49  ;;  %v4052_v51 = vpop.f32.mrb[26].mxu1 }
 0x20a   : > { %v1762_v52 = vadd.f32 %v4052_v51, %v4531_v25  ;;  %v1753_v53 = vpop.f32.mrb[27].mxu1  ;;  %v2191_v55 = vmax.f32 %v1759_v48, 0.0 }
 0x20b   : > { %v1754_v54 = vadd.f32 %v4531_v25, %v1753_v53  ;;  %v2189_v57 = vmax.f32 %v1751_v50, 0.0 }
 0x20c   : > { %v2192_v56 = vmax.f32 %v1762_v52, 0.0 }
 0x20d   : > { %v2190_v58 = vmax.f32 %v1754_v54, 0.0 }
 0x20e   : > { %v3406_v59 = vpack.c.bf16 %v2192_v56, %v2191_v55 }
 0x20f   : > { %v3401_v60 = vpack.c.bf16 %v2190_v58, %v2189_v57  ;;  %v4055_v61 = vpop.f32.mrb[28].mxu1 }
 0x210   : > { %3670 = vst [vmem:[%s4545_s16 + $0x68] sm:$0xff] %v3406_v59   ;;  %v1775_v62 = vadd.f32 %v4055_v61, %v4531_v25  ;;  %v1766_v63 = vpop.f32.mrb[29].mxu1 }
 0x211   : > { %3669 = vst [vmem:[%s4545_s16 + $0x60] sm:$0xff] %v3401_v60   ;;  %v1767_v0 = vadd.f32 %v4531_v25, %v1766_v63  ;;  %v4056_v1 = vpop.f32.mrb[30].mxu1 }
 0x212   : > { %v1778_v2 = vadd.f32 %v4056_v1, %v4531_v25  ;;  %v1769_v3 = vpop.f32.mrb[31].mxu1  ;;  %v2195_v5 = vmax.f32 %v1775_v62, 0.0 }
 0x213   : > { %v1770_v4 = vadd.f32 %v4531_v25, %v1769_v3  ;;  %v2193_v8 = vmax.f32 %v1767_v0, 0.0 }
 0x214   : > { %v2196_v6 = vmax.f32 %v1778_v2, 0.0 }
 0x215   : > { %v2194_v9 = vmax.f32 %v1770_v4, 0.0 }
 0x216   : > { %v3416_v10 = vpack.c.bf16 %v2196_v6, %v2195_v5 }
 0x217   : > { %v3411_v11 = vpack.c.bf16 %v2194_v9, %v2193_v8  ;;  %v4059_v13 = vpop.f32.mrb[32].mxu1 }
 0x218   : > { %3672 = vst [vmem:[%s4545_s16 + $0x78] sm:$0xff] %v3416_v10   ;;  %v1791_v14 = vadd.f32 %v4059_v13, %v4531_v25  ;;  %v1782_v15 = vpop.f32.mrb[33].mxu1 }
 0x219   : > { %3671 = vst [vmem:[%s4545_s16 + $0x70] sm:$0xff] %v3411_v11   ;;  %v1783_v16 = vadd.f32 %v4531_v25, %v1782_v15  ;;  %v4060_v7 = vpop.f32.mrb[34].mxu1 }
 0x21a   : > { %v1794_v17 = vadd.f32 %v4060_v7, %v4531_v25  ;;  %v1785_v18 = vpop.f32.mrb[35].mxu1  ;;  %v2199_v20 = vmax.f32 %v1791_v14, 0.0 }
 0x21b   : > { %v1786_v19 = vadd.f32 %v4531_v25, %v1785_v18  ;;  %v2197_v22 = vmax.f32 %v1783_v16, 0.0 }
 0x21c   : > { %v2200_v21 = vmax.f32 %v1794_v17, 0.0 }
 0x21d   : > { %v2198_v23 = vmax.f32 %v1786_v19, 0.0 }
 0x21e   : > { %v3426_v12 = vpack.c.bf16 %v2200_v21, %v2199_v20 }
 0x21f   : > { %v3421_v24 = vpack.c.bf16 %v2198_v23, %v2197_v22  ;;  %v4063_v26 = vpop.f32.mrb[36].mxu1 }
 0x220   : > { %3674 = vst [vmem:[%s4545_s16 + $0x88] sm:$0xff] %v3426_v12   ;;  %v1807_v27 = vadd.f32 %v4063_v26, %v4531_v25  ;;  %v1798_v28 = vpop.f32.mrb[37].mxu1 }
 0x221   : > { %3673 = vst [vmem:[%s4545_s16 + $0x80] sm:$0xff] %v3421_v24   ;;  %v1799_v29 = vadd.f32 %v4531_v25, %v1798_v28  ;;  %v4064_v30 = vpop.f32.mrb[38].mxu1 }
 0x222   : > { %v1810_v31 = vadd.f32 %v4064_v30, %v4531_v25  ;;  %v1801_v32 = vpop.f32.mrb[39].mxu1  ;;  %v2203_v34 = vmax.f32 %v1807_v27, 0.0 }
 0x223   : > { %v1802_v33 = vadd.f32 %v4531_v25, %v1801_v32  ;;  %v2201_v36 = vmax.f32 %v1799_v29, 0.0 }
 0x224   : > { %v2204_v35 = vmax.f32 %v1810_v31, 0.0 }
 0x225   : > { %v2202_v37 = vmax.f32 %v1802_v33, 0.0 }
 0x226   : > { %v3436_v38 = vpack.c.bf16 %v2204_v35, %v2203_v34 }
 0x227   : > { %v3431_v39 = vpack.c.bf16 %v2202_v37, %v2201_v36  ;;  %v4067_v40 = vpop.f32.mrb[40].mxu1 }
 0x228   : > { %3676 = vst [vmem:[%s4545_s16 + $0x98] sm:$0xff] %v3436_v38   ;;  %v1823_v41 = vadd.f32 %v4067_v40, %v4531_v25  ;;  %v1814_v42 = vpop.f32.mrb[41].mxu1 }
 0x229   : > { %3675 = vst [vmem:[%s4545_s16 + $0x90] sm:$0xff] %v3431_v39   ;;  %v1815_v43 = vadd.f32 %v4531_v25, %v1814_v42  ;;  %v4068_v44 = vpop.f32.mrb[42].mxu1 }
 0x22a   : > { %v1826_v45 = vadd.f32 %v4068_v44, %v4531_v25  ;;  %v1817_v46 = vpop.f32.mrb[43].mxu1  ;;  %v2207_v48 = vmax.f32 %v1823_v41, 0.0 }
 0x22b   : > { %v1818_v47 = vadd.f32 %v4531_v25, %v1817_v46  ;;  %v2205_v50 = vmax.f32 %v1815_v43, 0.0 }
 0x22c   : > { %v2208_v49 = vmax.f32 %v1826_v45, 0.0 }
 0x22d   : > { %v2206_v51 = vmax.f32 %v1818_v47, 0.0 }
 0x22e   : > { %v3446_v52 = vpack.c.bf16 %v2208_v49, %v2207_v48 }
 0x22f   : > { %v3441_v53 = vpack.c.bf16 %v2206_v51, %v2205_v50  ;;  %v4071_v54 = vpop.f32.mrb[44].mxu1 }
 0x230   : > { %3678 = vst [vmem:[%s4545_s16 + $0xa8] sm:$0xff] %v3446_v52   ;;  %v1839_v55 = vadd.f32 %v4071_v54, %v4531_v25  ;;  %v1830_v56 = vpop.f32.mrb[45].mxu1 }
 0x231   : > { %3677 = vst [vmem:[%s4545_s16 + $0xa0] sm:$0xff] %v3441_v53   ;;  %v1831_v57 = vadd.f32 %v4531_v25, %v1830_v56  ;;  %v4072_v58 = vpop.f32.mrb[46].mxu1 }
 0x232   : > { %v1842_v59 = vadd.f32 %v4072_v58, %v4531_v25  ;;  %v1833_v60 = vpop.f32.mrb[47].mxu1  ;;  %v2211_v62 = vmax.f32 %v1839_v55, 0.0 }
 0x233   : > { %v1834_v61 = vadd.f32 %v4531_v25, %v1833_v60  ;;  %v2209_v0 = vmax.f32 %v1831_v57, 0.0 }
 0x234   : > { %v2212_v63 = vmax.f32 %v1842_v59, 0.0 }
 0x235   : > { %v2210_v1 = vmax.f32 %v1834_v61, 0.0 }
 0x236   : > { %v3456_v2 = vpack.c.bf16 %v2212_v63, %v2211_v62 }
 0x237   : > { %v3451_v3 = vpack.c.bf16 %v2210_v1, %v2209_v0  ;;  %v4075_v4 = vpop.f32.mrb[48].mxu1 }
 0x238   : > { %3680 = vst [vmem:[%s4545_s16 + $0xb8] sm:$0xff] %v3456_v2   ;;  %v1855_v5 = vadd.f32 %v4075_v4, %v4531_v25  ;;  %v1846_v6 = vpop.f32.mrb[49].mxu1 }
 0x239   : > { %3679 = vst [vmem:[%s4545_s16 + $0xb0] sm:$0xff] %v3451_v3   ;;  %v1847_v8 = vadd.f32 %v4531_v25, %v1846_v6  ;;  %v4076_v9 = vpop.f32.mrb[50].mxu1 }
 0x23a   : > { %v1858_v10 = vadd.f32 %v4076_v9, %v4531_v25  ;;  %v1849_v11 = vpop.f32.mrb[51].mxu1  ;;  %v2215_v14 = vmax.f32 %v1855_v5, 0.0 }
 0x23b   : > { %v1850_v13 = vadd.f32 %v4531_v25, %v1849_v11  ;;  %v2213_v16 = vmax.f32 %v1847_v8, 0.0 }
 0x23c   : > { %v2216_v15 = vmax.f32 %v1858_v10, 0.0 }
 0x23d   : > { %v2214_v7 = vmax.f32 %v1850_v13, 0.0 }
 0x23e   : > { %v3466_v17 = vpack.c.bf16 %v2216_v15, %v2215_v14 }
 0x23f   : > { %v3461_v18 = vpack.c.bf16 %v2214_v7, %v2213_v16  ;;  %v4079_v19 = vpop.f32.mrb[52].mxu1 }
 0x240   : > { %3682 = vst [vmem:[%s4545_s16 + $0xc8] sm:$0xff] %v3466_v17   ;;  %v1871_v20 = vadd.f32 %v4079_v19, %v4531_v25  ;;  %v1862_v21 = vpop.f32.mrb[53].mxu1 }
 0x241   : > { %3681 = vst [vmem:[%s4545_s16 + $0xc0] sm:$0xff] %v3461_v18   ;;  %v1863_v22 = vadd.f32 %v4531_v25, %v1862_v21  ;;  %v4080_v23 = vpop.f32.mrb[54].mxu1 }
 0x242   : > { %v1874_v12 = vadd.f32 %v4080_v23, %v4531_v25  ;;  %v1865_v24 = vpop.f32.mrb[55].mxu1  ;;  %v2219_v27 = vmax.f32 %v1871_v20, 0.0 }
 0x243   : > { %v1866_v26 = vadd.f32 %v4531_v25, %v1865_v24  ;;  %v2217_v29 = vmax.f32 %v1863_v22, 0.0 }
 0x244   : > { %v2220_v28 = vmax.f32 %v1874_v12, 0.0 }
 0x245   : > { %v2218_v30 = vmax.f32 %v1866_v26, 0.0 }
 0x246   : > { %v3476_v31 = vpack.c.bf16 %v2220_v28, %v2219_v27 }
 0x247   : > { %v3471_v32 = vpack.c.bf16 %v2218_v30, %v2217_v29  ;;  %v4083_v33 = vpop.f32.mrb[56].mxu1 }
 0x248   : > { %3684 = vst [vmem:[%s4545_s16 + $0xd8] sm:$0xff] %v3476_v31   ;;  %v1887_v34 = vadd.f32 %v4083_v33, %v4531_v25  ;;  %v1878_v35 = vpop.f32.mrb[57].mxu1 }
 0x249   : > { %3683 = vst [vmem:[%s4545_s16 + $0xd0] sm:$0xff] %v3471_v32   ;;  %v1879_v36 = vadd.f32 %v4531_v25, %v1878_v35  ;;  %v4084_v37 = vpop.f32.mrb[58].mxu1 }
 0x24a   : > { %v1890_v38 = vadd.f32 %v4084_v37, %v4531_v25  ;;  %v1881_v39 = vpop.f32.mrb[59].mxu1  ;;  %v2223_v41 = vmax.f32 %v1887_v34, 0.0 }
 0x24b   : > { %v1882_v40 = vadd.f32 %v4531_v25, %v1881_v39  ;;  %v2221_v43 = vmax.f32 %v1879_v36, 0.0 }
 0x24c   : > { %v2224_v42 = vmax.f32 %v1890_v38, 0.0 }
 0x24d   : > { %v2222_v44 = vmax.f32 %v1882_v40, 0.0 }
 0x24e   : > { %v3486_v45 = vpack.c.bf16 %v2224_v42, %v2223_v41 }
 0x24f   : > { %v3481_v46 = vpack.c.bf16 %v2222_v44, %v2221_v43  ;;  %v4087_v47 = vpop.f32.mrb[60].mxu1 }
 0x250   : > { %3686 = vst [vmem:[%s4545_s16 + $0xe8] sm:$0xff] %v3486_v45   ;;  %v1903_v48 = vadd.f32 %v4087_v47, %v4531_v25  ;;  %v1894_v49 = vpop.f32.mrb[61].mxu1 }
 0x251   : > { %3685 = vst [vmem:[%s4545_s16 + $0xe0] sm:$0xff] %v3481_v46   ;;  %v1895_v50 = vadd.f32 %v4531_v25, %v1894_v49  ;;  %v4088_v51 = vpop.f32.mrb[62].mxu1 }
 0x252   : > { %v1906_v52 = vadd.f32 %v4088_v51, %v4531_v25  ;;  %v1897_v53 = vpop.f32.mrb[63].mxu1  ;;  %v2227_v55 = vmax.f32 %v1903_v48, 0.0 }
 0x253   : > { %v1898_v54 = vadd.f32 %v4531_v25, %v1897_v53  ;;  %v2225_v57 = vmax.f32 %v1895_v50, 0.0 }
 0x254   : > { %v2228_v56 = vmax.f32 %v1906_v52, 0.0 }
 0x255   : > { %v2226_v58 = vmax.f32 %v1898_v54, 0.0 }
 0x256   : > { %v3496_v59 = vpack.c.bf16 %v2228_v56, %v2227_v55 }
 0x257   : > { %v3491_v60 = vpack.c.bf16 %v2226_v58, %v2225_v57  ;;  %v4091_v61 = vpop.f32.mrb[64].mxu1 }
 0x258   : > { %3688 = vst [vmem:[%s4545_s16 + $0xf8] sm:$0xff] %v3496_v59   ;;  %v1919_v62 = vadd.f32 %v4091_v61, %v4531_v25  ;;  %v1910_v63 = vpop.f32.mrb[65].mxu1 }
 0x259   : > { %3687 = vst [vmem:[%s4545_s16 + $0xf0] sm:$0xff] %v3491_v60   ;;  %v1911_v0 = vadd.f32 %v4531_v25, %v1910_v63  ;;  %v4092_v1 = vpop.f32.mrb[66].mxu1 }
 0x25a   : > { %v1922_v2 = vadd.f32 %v4092_v1, %v4531_v25  ;;  %v1913_v3 = vpop.f32.mrb[67].mxu1  ;;  %v2231_v5 = vmax.f32 %v1919_v62, 0.0 }
 0x25b   : > { %v1914_v4 = vadd.f32 %v4531_v25, %v1913_v3  ;;  %v2229_v8 = vmax.f32 %v1911_v0, 0.0 }
 0x25c   : > { %v2232_v6 = vmax.f32 %v1922_v2, 0.0 }
 0x25d   : > { %v2230_v9 = vmax.f32 %v1914_v4, 0.0 }
 0x25e   : > { %v3506_v10 = vpack.c.bf16 %v2232_v6, %v2231_v5 }
 0x25f   : > { %v3501_v11 = vpack.c.bf16 %v2230_v9, %v2229_v8  ;;  %v4095_v13 = vpop.f32.mrb[68].mxu1 }
 0x260   : > { %3690 = vst [vmem:[%s4545_s16 + $0x108] sm:$0xff] %v3506_v10   ;;  %v1935_v14 = vadd.f32 %v4095_v13, %v4531_v25  ;;  %v1926_v15 = vpop.f32.mrb[69].mxu1 }
 0x261   : > { %3689 = vst [vmem:[%s4545_s16 + $0x100] sm:$0xff] %v3501_v11   ;;  %v1927_v16 = vadd.f32 %v4531_v25, %v1926_v15  ;;  %v4096_v7 = vpop.f32.mrb[70].mxu1 }
 0x262   : > { %v1938_v17 = vadd.f32 %v4096_v7, %v4531_v25  ;;  %v1929_v18 = vpop.f32.mrb[71].mxu1  ;;  %v2235_v20 = vmax.f32 %v1935_v14, 0.0 }
 0x263   : > { %v1930_v19 = vadd.f32 %v4531_v25, %v1929_v18  ;;  %v2233_v22 = vmax.f32 %v1927_v16, 0.0 }
 0x264   : > { %v2236_v21 = vmax.f32 %v1938_v17, 0.0 }
 0x265   : > { %v2234_v23 = vmax.f32 %v1930_v19, 0.0 }
 0x266   : > { %v3516_v12 = vpack.c.bf16 %v2236_v21, %v2235_v20 }
 0x267   : > { %v3511_v24 = vpack.c.bf16 %v2234_v23, %v2233_v22  ;;  %v4099_v26 = vpop.f32.mrb[72].mxu1 }
 0x268   : > { %3692 = vst [vmem:[%s4545_s16 + $0x118] sm:$0xff] %v3516_v12   ;;  %v1951_v27 = vadd.f32 %v4099_v26, %v4531_v25  ;;  %v1942_v28 = vpop.f32.mrb[73].mxu1 }
 0x269   : > { %3691 = vst [vmem:[%s4545_s16 + $0x110] sm:$0xff] %v3511_v24   ;;  %v1943_v29 = vadd.f32 %v4531_v25, %v1942_v28  ;;  %v4100_v30 = vpop.f32.mrb[74].mxu1 }
 0x26a   : > { %v1954_v31 = vadd.f32 %v4100_v30, %v4531_v25  ;;  %v1945_v32 = vpop.f32.mrb[75].mxu1  ;;  %v2239_v34 = vmax.f32 %v1951_v27, 0.0 }
 0x26b   : > { %v1946_v33 = vadd.f32 %v4531_v25, %v1945_v32  ;;  %v2237_v36 = vmax.f32 %v1943_v29, 0.0 }
 0x26c   : > { %v2240_v35 = vmax.f32 %v1954_v31, 0.0 }
 0x26d   : > { %v2238_v37 = vmax.f32 %v1946_v33, 0.0 }
 0x26e   : > { %v3526_v38 = vpack.c.bf16 %v2240_v35, %v2239_v34 }
 0x26f   : > { %v3521_v39 = vpack.c.bf16 %v2238_v37, %v2237_v36  ;;  %v4103_v40 = vpop.f32.mrb[76].mxu1 }
 0x270   : > { %3694 = vst [vmem:[%s4545_s16 + $0x128] sm:$0xff] %v3526_v38   ;;  %v1967_v41 = vadd.f32 %v4103_v40, %v4531_v25  ;;  %v1958_v42 = vpop.f32.mrb[77].mxu1 }
 0x271   : > { %3693 = vst [vmem:[%s4545_s16 + $0x120] sm:$0xff] %v3521_v39   ;;  %v1959_v43 = vadd.f32 %v4531_v25, %v1958_v42  ;;  %v4104_v44 = vpop.f32.mrb[78].mxu1 }
 0x272   : > { %v1970_v45 = vadd.f32 %v4104_v44, %v4531_v25  ;;  %v1961_v46 = vpop.f32.mrb[79].mxu1  ;;  %v2243_v48 = vmax.f32 %v1967_v41, 0.0 }
 0x273   : > { %v1962_v47 = vadd.f32 %v4531_v25, %v1961_v46  ;;  %v2241_v50 = vmax.f32 %v1959_v43, 0.0 }
 0x274   : > { %v2244_v49 = vmax.f32 %v1970_v45, 0.0 }
 0x275   : > { %v2242_v51 = vmax.f32 %v1962_v47, 0.0 }
 0x276   : > { %v3536_v52 = vpack.c.bf16 %v2244_v49, %v2243_v48 }
 0x277   : > { %v3531_v53 = vpack.c.bf16 %v2242_v51, %v2241_v50  ;;  %v4107_v54 = vpop.f32.mrb[80].mxu1 }
 0x278   : > { %3696 = vst [vmem:[%s4545_s16 + $0x138] sm:$0xff] %v3536_v52   ;;  %v1983_v55 = vadd.f32 %v4107_v54, %v4531_v25  ;;  %v1974_v56 = vpop.f32.mrb[81].mxu1 }
 0x279   : > { %3695 = vst [vmem:[%s4545_s16 + $0x130] sm:$0xff] %v3531_v53   ;;  %v1975_v57 = vadd.f32 %v4531_v25, %v1974_v56  ;;  %v4108_v58 = vpop.f32.mrb[82].mxu1 }
 0x27a   : > { %v1986_v59 = vadd.f32 %v4108_v58, %v4531_v25  ;;  %v1977_v60 = vpop.f32.mrb[83].mxu1  ;;  %v2247_v62 = vmax.f32 %v1983_v55, 0.0 }
 0x27b   : > { %v1978_v61 = vadd.f32 %v4531_v25, %v1977_v60  ;;  %v2245_v0 = vmax.f32 %v1975_v57, 0.0 }
 0x27c   : > { %v2248_v63 = vmax.f32 %v1986_v59, 0.0 }
 0x27d   : > { %v2246_v1 = vmax.f32 %v1978_v61, 0.0 }
 0x27e   : > { %v3546_v2 = vpack.c.bf16 %v2248_v63, %v2247_v62 }
 0x27f   : > { %v3541_v3 = vpack.c.bf16 %v2246_v1, %v2245_v0  ;;  %v4111_v4 = vpop.f32.mrb[84].mxu1 }
 0x280   : > { %3698 = vst [vmem:[%s4545_s16 + $0x148] sm:$0xff] %v3546_v2   ;;  %v1999_v5 = vadd.f32 %v4111_v4, %v4531_v25  ;;  %v1990_v6 = vpop.f32.mrb[85].mxu1 }
 0x281   : > { %3697 = vst [vmem:[%s4545_s16 + $0x140] sm:$0xff] %v3541_v3   ;;  %v1991_v8 = vadd.f32 %v4531_v25, %v1990_v6  ;;  %v4112_v9 = vpop.f32.mrb[86].mxu1 }
 0x282   : > { %v2002_v10 = vadd.f32 %v4112_v9, %v4531_v25  ;;  %v1993_v11 = vpop.f32.mrb[87].mxu1  ;;  %v2251_v14 = vmax.f32 %v1999_v5, 0.0 }
 0x283   : > { %v1994_v13 = vadd.f32 %v4531_v25, %v1993_v11  ;;  %v2249_v16 = vmax.f32 %v1991_v8, 0.0 }
 0x284   : > { %v2252_v15 = vmax.f32 %v2002_v10, 0.0 }
 0x285   : > { %v2250_v7 = vmax.f32 %v1994_v13, 0.0 }
 0x286   : > { %v3556_v17 = vpack.c.bf16 %v2252_v15, %v2251_v14 }
 0x287   : > { %v3551_v18 = vpack.c.bf16 %v2250_v7, %v2249_v16  ;;  %v4115_v19 = vpop.f32.mrb[88].mxu1 }
 0x288   : > { %3700 = vst [vmem:[%s4545_s16 + $0x158] sm:$0xff] %v3556_v17   ;;  %v2015_v20 = vadd.f32 %v4115_v19, %v4531_v25  ;;  %v2006_v21 = vpop.f32.mrb[89].mxu1 }
 0x289   : > { %3699 = vst [vmem:[%s4545_s16 + $0x150] sm:$0xff] %v3551_v18   ;;  %v2007_v22 = vadd.f32 %v4531_v25, %v2006_v21  ;;  %v4116_v23 = vpop.f32.mrb[90].mxu1 }
 0x28a   : > { %v2018_v12 = vadd.f32 %v4116_v23, %v4531_v25  ;;  %v2009_v24 = vpop.f32.mrb[91].mxu1  ;;  %v2255_v27 = vmax.f32 %v2015_v20, 0.0 }
 0x28b   : > { %v2010_v26 = vadd.f32 %v4531_v25, %v2009_v24  ;;  %v2253_v29 = vmax.f32 %v2007_v22, 0.0 }
 0x28c   : > { %v2256_v28 = vmax.f32 %v2018_v12, 0.0 }
 0x28d   : > { %v2254_v30 = vmax.f32 %v2010_v26, 0.0 }
 0x28e   : > { %v3566_v31 = vpack.c.bf16 %v2256_v28, %v2255_v27 }
 0x28f   : > { %v3561_v32 = vpack.c.bf16 %v2254_v30, %v2253_v29  ;;  %v4119_v33 = vpop.f32.mrb[92].mxu1 }
 0x290   : > { %3702 = vst [vmem:[%s4545_s16 + $0x168] sm:$0xff] %v3566_v31   ;;  %v2031_v34 = vadd.f32 %v4119_v33, %v4531_v25  ;;  %v2022_v35 = vpop.f32.mrb[93].mxu1  ;;  %v4729_v33 = vld [vmem:[%s4765_s4] ss:$0 sm:$0xff] }
 0x291   : > { %3701 = vst [vmem:[%s4545_s16 + $0x160] sm:$0xff] %v3561_v32   ;;  %v2023_v36 = vadd.f32 %v4531_v25, %v2022_v35  ;;  %v4120_v37 = vpop.f32.mrb[94].mxu1 }
 0x292   : > { %v2034_v38 = vadd.f32 %v4120_v37, %v4531_v25  ;;  %v2025_v39 = vpop.f32.mrb[95].mxu1  ;;  %v2259_v41 = vmax.f32 %v2031_v34, 0.0 }
 0x293   : > { %v2026_v40 = vadd.f32 %v4531_v25, %v2025_v39  ;;  %v2257_v43 = vmax.f32 %v2023_v36, 0.0 }
 0x294   : > { %v2260_v42 = vmax.f32 %v2034_v38, 0.0 }
 0x295   : > { %v2258_v44 = vmax.f32 %v2026_v40, 0.0 }
 0x296   : > { %v3576_v45 = vpack.c.bf16 %v2260_v42, %v2259_v41 }
 0x297   : > { %v3571_v46 = vpack.c.bf16 %v2258_v44, %v2257_v43  ;;  %v4123_v47 = vpop.f32.mrb[96].mxu1 }
 0x298   : > { %3704 = vst [vmem:[%s4545_s16 + $0x178] sm:$0xff] %v3576_v45   ;;  %v2047_v48 = vadd.f32 %v4123_v47, %v4531_v25  ;;  %v2038_v49 = vpop.f32.mrb[97].mxu1 }
 0x299   : > { %3703 = vst [vmem:[%s4545_s16 + $0x170] sm:$0xff] %v3571_v46   ;;  %v2039_v50 = vadd.f32 %v4531_v25, %v2038_v49  ;;  %v4124_v51 = vpop.f32.mrb[98].mxu1 }
 0x29a   : > { %v2050_v52 = vadd.f32 %v4124_v51, %v4531_v25  ;;  %v2041_v53 = vpop.f32.mrb[99].mxu1  ;;  %v2263_v55 = vmax.f32 %v2047_v48, 0.0 }
 0x29b   : > { %v2042_v54 = vadd.f32 %v4531_v25, %v2041_v53  ;;  %v2261_v57 = vmax.f32 %v2039_v50, 0.0 }
 0x29c   : > { %v2264_v56 = vmax.f32 %v2050_v52, 0.0 }
 0x29d   : > { %v2262_v58 = vmax.f32 %v2042_v54, 0.0 }
 0x29e   : > { %v3586_v59 = vpack.c.bf16 %v2264_v56, %v2263_v55 }
 0x29f   : > { %v3581_v60 = vpack.c.bf16 %v2262_v58, %v2261_v57  ;;  %v4127_v61 = vpop.f32.mrb[100].mxu1 }
 0x2a0   : > { %3706 = vst [vmem:[%s4545_s16 + $0x188] sm:$0xff] %v3586_v59   ;;  %v2063_v62 = vadd.f32 %v4127_v61, %v4531_v25  ;;  %v2054_v63 = vpop.f32.mrb[101].mxu1 }
 0x2a1   : > { %3705 = vst [vmem:[%s4545_s16 + $0x180] sm:$0xff] %v3581_v60   ;;  %v2055_v0 = vadd.f32 %v4531_v25, %v2054_v63  ;;  %v4128_v1 = vpop.f32.mrb[102].mxu1 }
 0x2a2   : > { %v2066_v2 = vadd.f32 %v4128_v1, %v4531_v25  ;;  %v2057_v3 = vpop.f32.mrb[103].mxu1  ;;  %v2267_v5 = vmax.f32 %v2063_v62, 0.0 }
 0x2a3   : > { %v2058_v4 = vadd.f32 %v4531_v25, %v2057_v3  ;;  %v2265_v8 = vmax.f32 %v2055_v0, 0.0 }
 0x2a4   : > { %v2268_v6 = vmax.f32 %v2066_v2, 0.0 }
 0x2a5   : > { %v2266_v9 = vmax.f32 %v2058_v4, 0.0 }
 0x2a6   : > { %v3596_v10 = vpack.c.bf16 %v2268_v6, %v2267_v5 }
 0x2a7   : > { %v3591_v11 = vpack.c.bf16 %v2266_v9, %v2265_v8  ;;  %v4131_v13 = vpop.f32.mrb[104].mxu1 }
 0x2a8   : > { %3708 = vst [vmem:[%s4545_s16 + $0x198] sm:$0xff] %v3596_v10   ;;  %v2079_v14 = vadd.f32 %v4131_v13, %v4531_v25  ;;  %v2070_v15 = vpop.f32.mrb[105].mxu1 }
 0x2a9   : > { %3707 = vst [vmem:[%s4545_s16 + $0x190] sm:$0xff] %v3591_v11   ;;  %v2071_v16 = vadd.f32 %v4531_v25, %v2070_v15  ;;  %v4132_v7 = vpop.f32.mrb[106].mxu1 }
 0x2aa   : > { %v2082_v17 = vadd.f32 %v4132_v7, %v4531_v25  ;;  %v2073_v18 = vpop.f32.mrb[107].mxu1  ;;  %v2271_v20 = vmax.f32 %v2079_v14, 0.0 }
 0x2ab   : > { %v2074_v19 = vadd.f32 %v4531_v25, %v2073_v18  ;;  %v2269_v22 = vmax.f32 %v2071_v16, 0.0 }
 0x2ac   : > { %v2272_v21 = vmax.f32 %v2082_v17, 0.0 }
 0x2ad   : > { %v2270_v23 = vmax.f32 %v2074_v19, 0.0 }
 0x2ae   : > { %v3606_v12 = vpack.c.bf16 %v2272_v21, %v2271_v20 }
 0x2af   : > { %v3601_v24 = vpack.c.bf16 %v2270_v23, %v2269_v22  ;;  %v4135_v26 = vpop.f32.mrb[108].mxu1 }
 0x2b0   : > { %3710 = vst [vmem:[%s4545_s16 + $0x1a8] sm:$0xff] %v3606_v12   ;;  %v2095_v27 = vadd.f32 %v4135_v26, %v4531_v25  ;;  %v2086_v28 = vpop.f32.mrb[109].mxu1 }
 0x2b1   : > { %3709 = vst [vmem:[%s4545_s16 + $0x1a0] sm:$0xff] %v3601_v24   ;;  %v2087_v29 = vadd.f32 %v4531_v25, %v2086_v28  ;;  %v4136_v30 = vpop.f32.mrb[110].mxu1 }
 0x2b2   : > { %v2098_v31 = vadd.f32 %v4136_v30, %v4531_v25  ;;  %v2089_v32 = vpop.f32.mrb[111].mxu1  ;;  %v2275_v35 = vmax.f32 %v2095_v27, 0.0 }
 0x2b3   : > { %v2090_v34 = vadd.f32 %v4729_v33, %v2089_v32  ;;  %v2273_v37 = vmax.f32 %v2087_v29, 0.0 }
 0x2b4   : > { %v2276_v36 = vmax.f32 %v2098_v31, 0.0 }
 0x2b5   : > { %v2274_v38 = vmax.f32 %v2090_v34, 0.0 }
 0x2b6   : > { %v3616_v39 = vpack.c.bf16 %v2276_v36, %v2275_v35 }
 0x2b7   : > { %v3611_v40 = vpack.c.bf16 %v2274_v38, %v2273_v37  ;;  %v4139_v41 = vpop.f32.mrb[112].mxu1 }
 0x2b8   : > { %3712 = vst [vmem:[%s4545_s16 + $0x1b8] sm:$0xff] %v3616_v39   ;;  %v2111_v42 = vadd.f32 %v4729_v33, %v4139_v41  ;;  %v2102_v25 = vpop.f32.mrb[113].mxu1 }
 0x2b9   : > { %3711 = vst [vmem:[%s4545_s16 + $0x1b0] sm:$0xff] %v3611_v40   ;;  %v2103_v43 = vadd.f32 %v4729_v33, %v2102_v25  ;;  %v4140_v44 = vpop.f32.mrb[114].mxu1 }
 0x2ba   : > { %v2114_v45 = vadd.f32 %v4729_v33, %v4140_v44  ;;  %v2105_v46 = vpop.f32.mrb[115].mxu1  ;;  %v2279_v48 = vmax.f32 %v2111_v42, 0.0 }
 0x2bb   : > { %v2106_v47 = vadd.f32 %v4729_v33, %v2105_v46  ;;  %v2277_v50 = vmax.f32 %v2103_v43, 0.0 }
 0x2bc   : > { %v2280_v49 = vmax.f32 %v2114_v45, 0.0 }
 0x2bd   : > { %v2278_v51 = vmax.f32 %v2106_v47, 0.0 }
 0x2be   : > { %v3626_v52 = vpack.c.bf16 %v2280_v49, %v2279_v48 }
 0x2bf   : > { %v3621_v53 = vpack.c.bf16 %v2278_v51, %v2277_v50  ;;  %v4143_v54 = vpop.f32.mrb[116].mxu1 }
 0x2c0   : > { %3714 = vst [vmem:[%s4545_s16 + $0x1c8] sm:$0xff] %v3626_v52   ;;  %v2127_v55 = vadd.f32 %v4729_v33, %v4143_v54  ;;  %v2118_v56 = vpop.f32.mrb[117].mxu1 }
 0x2c1   : > { %3713 = vst [vmem:[%s4545_s16 + $0x1c0] sm:$0xff] %v3621_v53   ;;  %v2119_v57 = vadd.f32 %v4729_v33, %v2118_v56  ;;  %v4144_v58 = vpop.f32.mrb[118].mxu1 }
 0x2c2   : > { %v2130_v59 = vadd.f32 %v4729_v33, %v4144_v58  ;;  %v2121_v60 = vpop.f32.mrb[119].mxu1  ;;  %v2283_v62 = vmax.f32 %v2127_v55, 0.0 }
 0x2c3   : > { %v2122_v61 = vadd.f32 %v4729_v33, %v2121_v60  ;;  %v2281_v0 = vmax.f32 %v2119_v57, 0.0 }
 0x2c4   : > { %v2284_v63 = vmax.f32 %v2130_v59, 0.0 }
 0x2c5   : > { %v2282_v1 = vmax.f32 %v2122_v61, 0.0 }
 0x2c6   : > { %v3636_v2 = vpack.c.bf16 %v2284_v63, %v2283_v62 }
 0x2c7   : > { %v3631_v3 = vpack.c.bf16 %v2282_v1, %v2281_v0  ;;  %v4147_v4 = vpop.f32.mrb[120].mxu1 }
 0x2c8   : > { %3716 = vst [vmem:[%s4545_s16 + $0x1d8] sm:$0xff] %v3636_v2   ;;  %v2143_v5 = vadd.f32 %v4729_v33, %v4147_v4  ;;  %v2134_v6 = vpop.f32.mrb[121].mxu1 }
 0x2c9   : > { %3715 = vst [vmem:[%s4545_s16 + $0x1d0] sm:$0xff] %v3631_v3   ;;  %v2135_v8 = vadd.f32 %v4729_v33, %v2134_v6  ;;  %v4148_v9 = vpop.f32.mrb[122].mxu1 }
 0x2ca   : > { %v2146_v10 = vadd.f32 %v4729_v33, %v4148_v9  ;;  %v2137_v11 = vpop.f32.mrb[123].mxu1  ;;  %v2287_v14 = vmax.f32 %v2143_v5, 0.0 }
 0x2cb   : > { %v2138_v13 = vadd.f32 %v4729_v33, %v2137_v11  ;;  %v2285_v16 = vmax.f32 %v2135_v8, 0.0 }
 0x2cc   : > { %v2288_v15 = vmax.f32 %v2146_v10, 0.0 }
 0x2cd   : > { %v2286_v7 = vmax.f32 %v2138_v13, 0.0 }
 0x2ce   : > { %v3646_v17 = vpack.c.bf16 %v2288_v15, %v2287_v14 }
 0x2cf   : > { %v3641_v18 = vpack.c.bf16 %v2286_v7, %v2285_v16  ;;  %v4151_v19 = vpop.f32.mrb[124].mxu1 }
 0x2d0   : > { %3718 = vst [vmem:[%s4545_s16 + $0x1e8] sm:$0xff] %v3646_v17   ;;  %v2159_v20 = vadd.f32 %v4729_v33, %v4151_v19  ;;  %v2150_v21 = vpop.f32.mrb[125].mxu1 }
 0x2d1   : > { %3717 = vst [vmem:[%s4545_s16 + $0x1e0] sm:$0xff] %v3641_v18   ;;  %v2151_v22 = vadd.f32 %v4729_v33, %v2150_v21  ;;  %v4152_v23 = vpop.f32.mrb[126].mxu1 }
 0x2d2   : > { %v2162_v12 = vadd.f32 %v4729_v33, %v4152_v23  ;;  %v2153_v24 = vpop.f32.mrb[127].mxu1  ;;  %v2291_v27 = vmax.f32 %v2159_v20, 0.0 }
 0x2d3   : > { %v2154_v26 = vadd.f32 %v4729_v33, %v2153_v24  ;;  %v2289_v29 = vmax.f32 %v2151_v22, 0.0 }
 0x2d4   : > { %v2292_v28 = vmax.f32 %v2162_v12, 0.0 }
 0x2d5   : > { %v2290_v30 = vmax.f32 %v2154_v26, 0.0 }
 0x2d6   : > { %v3656_v31 = vpack.c.bf16 %v2292_v28, %v2291_v27 }
 0x2d7   : > { %v3651_v32 = vpack.c.bf16 %v2290_v30, %v2289_v29 }
 0x2d8   : > { %3720 = vst [vmem:[%s4545_s16 + $0x1f8] sm:$0xff] %v3656_v31  }
 0x2d9   : > { %3719 = vst [vmem:[%s4545_s16 + $0x1f0] sm:$0xff] %v3651_v32  }
 0x2da PF: > { %s15_s18 = sadd.s32 1, %s4249_s18  }
 0x2db   : > { %p12_p4 = scmp.ge.s32.totalorder %s15_s18, 4  }
 0x2dd   :  { %14 = sbr.rel (!%p12_p4) target bundleno = 1 (0x1), region = 70 }

// kernel: all_cnn_b_forward.6
= control target key start
LH: loop header
LB: loop body
LE: loop exit
PB: predicated region body
PF: predicated region fallthrough
CT: control target
= control target key end

     0   :  { %s3774_s12 = smov 0   ;;  %s4407_s0 = inlined_call_operand.vmem [shape: bf16[464,1152], index: 0, kind: input, shape index: {}]   ;;  %s4408_s1 = inlined_call_operand.vmem [shape: bf16[1152,128], index: 1, kind: input, shape index: {}]   ;;  %s4409_s2 = inlined_call_operand.vmem [shape: f32[1,128], index: 2, kind: input, shape index: {}]   ;;  %s4410_s3 = inlined_call_operand.vmem [shape: bf16[464,128], index: 3, kind: output, shape index: {}]  }
   0x1 LB: > { %s2573_s13 = sadd.s32 4294967295, %s3750_s12   ;;  %p2577_p0 = scmp.ge.s32.totalorder %s3750_s12, 1  ;;  %s3750_s12 = sphi %s3774_s12, %s13_s12  }
   0x2   : > { %p139_p1 = scmp.lt.s32.totalorder %s3750_s12, 3 }
   0x4   : > { %p140_p2 = pnand %p2577_p0, %p139_p1 }
   0x5   : > { %v3481_v0 = vld [vmem:[%s4408_s1 + $0x40] sm:$0xff] (!%p140_p2)   ;;  %s164_s16 = smul.u32 (!%p140_p2), 29, %s2573_s13  ;;  %v3483_v2 = vld [vmem:[%s4408_s1 + $0x48] sm:$0xff] (!%p140_p2)   ;;  %v3485_v4 = vld [vmem:[%s4408_s1 + $0x50] sm:$0xff] (!%p140_p2)   ;;  %vm3753_vm0 = vmmov (!%p140_p2), 0  }
   0x6   : > { %143 = sbr.rel (%p140_p2) target bundleno = 553 (0x229), region = 32  ;;  %v3482_v1 = vld [vmem:[%s4408_s1] sm:$0xff] (!%p140_p2)   ;;  %2931 = vmatprep.subr.bf16.mxu0 (!%p140_p2), %v3481_v0  ;;  %3454 = vmatprep.subr.bf16.mxu1 (!%p140_p2), %v3481_v0  ;;  %v3484_v3 = vld [vmem:[%s4408_s1 + $0x8] sm:$0xff] (!%p140_p2)   ;;  %v3486_v5 = vld [vmem:[%s4408_s1 + $0x10] sm:$0xff] (!%p140_p2)  }
   0x7   : > { %p165_p3 = scmp.lt.s32.totalorder (!%p140_p2), %s164_s16, 57  ;;  %2932 = vmatpush3.bf16.msra.mxu0 (!%p140_p2), %v3482_v1  ;;  %3462 = vmatpush3.bf16.msra.mxu1 (!%p140_p2), %v3482_v1  ;;  %v3487_v6 = vld [vmem:[%s4408_s1 + $0x58] sm:$0xff] (!%p140_p2)   ;;  %v3489_v8 = vld [vmem:[%s4408_s1 + $0x60] sm:$0xff] (!%p140_p2)   ;;  %v3491_v10 = vld [vmem:[%s4408_s1 + $0x68] sm:$0xff] (!%p140_p2)  }
   0x8   : > { %2933 = vmatprep.subr.bf16.mxu0 (!%p140_p2), %v3483_v2  ;;  %3455 = vmatprep.subr.bf16.mxu1 (!%p140_p2), %v3483_v2  ;;  %v3488_v7 = vld [vmem:[%s4408_s1 + $0x18] sm:$0xff] (!%p140_p2)   ;;  %v3490_v9 = vld [vmem:[%s4408_s1 + $0x20] sm:$0xff] (!%p140_p2)   ;;  %v3492_v13 = vld [vmem:[%s4408_s1 + $0x28] sm:$0xff] (!%p140_p2)  }
   0x9   : > { %v3493_v14 = vld [vmem:[%s4408_s1 + $0x70] sm:$0xff] (!%p140_p2)   ;;  %v3495_v16 = vld [vmem:[%s4408_s1 + $0x78] sm:$0xff] (!%p140_p2)   ;;  %v3503_v18 = vld [vmem:[%s4408_s1 + $0x140] sm:$0xff] (!%p140_p2)  }
   0xa   : > { %v3494_v15 = vld [vmem:[%s4408_s1 + $0x30] sm:$0xff] (!%p140_p2)   ;;  %v3496_v17 = vld [vmem:[%s4408_s1 + $0x38] sm:$0xff] (!%p140_p2)   ;;  %v3505_v20 = vld [vmem:[%s4408_s1 + $0xc0] sm:$0xff] (!%p140_p2)  }
   0xb   : > { %2934 = vmatpush3.bf16.msra.mxu0 (!%p140_p2), %v3484_v3  ;;  %3463 = vmatpush3.bf16.msra.mxu1 (!%p140_p2), %v3484_v3  ;;  %v3504_v22 = vld [vmem:[%s4408_s1 + $0x100] sm:$0xff] (!%p140_p2)   ;;  %v3513_v26 = vld [vmem:[%s4408_s1 + $0x148] sm:$0xff] (!%p140_p2)   ;;  %v3523_v30 = vld [vmem:[%s4408_s1 + $0x150] sm:$0xff] (!%p140_p2)  }
   0xc   : > { %2935 = vmatprep.subr.bf16.mxu0 (!%p140_p2), %v3485_v4  ;;  %3456 = vmatprep.subr.bf16.mxu1 (!%p140_p2), %v3485_v4  ;;  %v3506_v23 = vld [vmem:[%s4408_s1 + $0x80] sm:$0xff] (!%p140_p2)   ;;  %v3514_v27 = vld [vmem:[%s4408_s1 + $0x108] sm:$0xff] (!%p140_p2)   ;;  %v3524_v33 = vld [vmem:[%s4408_s1 + $0xd0] sm:$0xff] (!%p140_p2)  }
   0xd   : > { %s4412_s16 = smov (!%p165_p3, %s164_s16), 57  ;;  %v3515_v28 = vld [vmem:[%s4408_s1 + $0xc8] sm:$0xff]   ;;  %v3525_v36 = vld [vmem:[%s4408_s1 + $0x110] sm:$0xff]   ;;  %v3533_v38 = vld [vmem:[%s4408_s1 + $0xd8] sm:$0xff]  }
   0xe   : > { %s3470_s29 = smul.u32 36, %s4412_s16  ;;  %v3516_v29 = vld [vmem:[%s4408_s1 + $0x88] sm:$0xff]   ;;  %v3526_v37 = vld [vmem:[%s4408_s1 + $0x90] sm:$0xff]   ;;  %v3534_v39 = vld [vmem:[%s4408_s1 + $0x158] sm:$0xff]  }
   0xf   : > { %2936 = vmatpush3.bf16.msra.mxu0 %v3486_v5  ;;  %3464 = vmatpush3.bf16.msra.mxu1 %v3486_v5  ;;  %v3535_v40 = vld [vmem:[%s4408_s1 + $0x98] sm:$0xff]   ;;  %v3541_v45 = vld [vmem:[%s4408_s1 + $0xe0] sm:$0xff]   ;;  %v3547_v50 = vld [vmem:[%s4408_s1 + $0xe8] sm:$0xff]  }
  0x10   : > { %2937 = vmatprep.subr.bf16.mxu0 %v3487_v6  ;;  %3457 = vmatprep.subr.bf16.mxu1 %v3487_v6  ;;  %s3815_s9 = scalar_lea.vmem %s4407_s0, %s3470_s29  ;;  %v3536_v43 = vld [vmem:[%s4408_s1 + $0x118] sm:$0xff]   ;;  %v3544_v47 = vld [vmem:[%s4408_s1 + $0xa0] sm:$0xff]   ;;  %v3552_v55 = vld [vmem:[%s4408_s1 + $0xa8] sm:$0xff]  }
  0x11   : > { %v3499_v11 = vld [vmem:[%s3815_s9 + $0x4] ss:$36 sps:$4 sm:$0xff]   ;;  %v3507_v24 = vld [vmem:[%s3815_s9 + $0x4c] ss:$36 sps:$4 sm:$0xff]   ;;  %v3517_v34 = vld [vmem:[%s3815_s9 + $0x94] ss:$36 sps:$4 sm:$0xff]  }
  0x12   : > { %v3502_v12 = vld [vmem:[%s3815_s9 + $0x244] ss:$36 sps:$4 sm:$0xff]   ;;  %1614 = vmatprep.mubr.bf16.mxu0 %v3499_v11  ;;  %v3509_v25 = vld [vmem:[%s3815_s9 + $0x28c] ss:$36 sps:$4 sm:$0xff]   ;;  %v3519_v35 = vld [vmem:[%s3815_s9 + $0x2d4] ss:$36 sps:$4 sm:$0xff]  }
  0x13   : > { %2938 = vmatpush3.bf16.msra.mxu0 %v3488_v7  ;;  %3465 = vmatpush3.bf16.msra.mxu1 %v3488_v7  ;;  %v3497_v19 = vld [vmem:[%s3815_s9] ss:$36 sps:$4 sm:$0xff]   ;;  %v3511_v31 = vld [vmem:[%s3815_s9 + $0x48] ss:$36 sps:$4 sm:$0xff]   ;;  %v3521_v41 = vld [vmem:[%s3815_s9 + $0x90] ss:$36 sps:$4 sm:$0xff]  }
  0x14   : > { %2939 = vmatprep.subr.bf16.mxu0 %v3489_v8  ;;  %3458 = vmatprep.subr.bf16.mxu1 %v3489_v8  ;;  %v3500_v21 = vld [vmem:[%s3815_s9 + $0x240] ss:$36 sps:$4 sm:$0xff]   ;;  %v3512_v32 = vld [vmem:[%s3815_s9 + $0x288] ss:$36 sps:$4 sm:$0xff]   ;;  %v3522_v42 = vld [vmem:[%s3815_s9 + $0x2d0] ss:$36 sps:$4 sm:$0xff]  }
  0x15   : > { %1678 = vmatprep.mubr.bf16.mxu1 %v3502_v12  ;;  %v3527_v44 = vld [vmem:[%s3815_s9 + $0xdc] ss:$36 sps:$4 sm:$0xff]   ;;  %v3537_v53 = vld [vmem:[%s3815_s9 + $0x124] ss:$36 sps:$4 sm:$0xff]   ;;  %v3557_v58 = vld [vmem:[%s4408_s1 + $0xf0] sm:$0xff]   ;;  %v3752_v12 = vmov 0.0  }
  0x16   : > { %v3529_v46 = vld [vmem:[%s3815_s9 + $0x31c] ss:$36 sps:$4 sm:$0xff]   ;;  %v3539_v54 = vld [vmem:[%s3815_s9 + $0x364] ss:$36 sps:$4 sm:$0xff]   ;;  %v3558_v59 = vld [vmem:[%s4408_s1 + $0xb0] sm:$0xff]  }
  0x17   : > { %2940 = vmatpush3.bf16.msra.mxu0 %v3490_v9  ;;  %3466 = vmatpush3.bf16.msra.mxu1 %v3490_v9  ;;  %v3545_v48 = vld [vmem:[%s4408_s1 + $0x160] sm:$0xff]   ;;  %v3531_v51 = vld [vmem:[%s3815_s9 + $0xd8] ss:$36 sps:$4 sm:$0xff]   ;;  %v3555_v56 = vld [vmem:[%s4408_s1 + $0x168] sm:$0xff]  }
  0x18   : > { %2941 = vmatprep.subr.bf16.mxu0 %v3491_v10  ;;  %3459 = vmatprep.subr.bf16.mxu1 %v3491_v10  ;;  %v3546_v49 = vld [vmem:[%s4408_s1 + $0x120] sm:$0xff]   ;;  %v3532_v52 = vld [vmem:[%s3815_s9 + $0x318] ss:$36 sps:$4 sm:$0xff]   ;;  %v3556_v57 = vld [vmem:[%s4408_s1 + $0x128] sm:$0xff]  }
  0x19   : > { %v3542_v60 = vld [vmem:[%s3815_s9 + $0x120] ss:$36 sps:$4 sm:$0xff]   ;;  %v3564_v62 = vld [vmem:[%s4408_s1 + $0x170] sm:$0xff]   ;;  %v3566_v2 = vld [vmem:[%s4408_s1 + $0xf8] sm:$0xff]  }
  0x1a   : > { %v3543_v61 = vld [vmem:[%s3815_s9 + $0x360] ss:$36 sps:$4 sm:$0xff]   ;;  %v3548_v63 = vld [vmem:[%s3815_s9 + $0x16c] ss:$36 sps:$4 sm:$0xff]   ;;  %v3567_v3 = vld [vmem:[%s4408_s1 + $0xb8] sm:$0xff]  }
  0x1b   : > { %2942 = vmatpush3.bf16.msra.mxu0 %v3492_v13  ;;  %3467 = vmatpush3.bf16.msra.mxu1 %v3492_v13  ;;  %v3550_v0 = vld [vmem:[%s3815_s9 + $0x3ac] ss:$36 sps:$4 sm:$0xff]   ;;  %v3574_v5 = vld [vmem:[%s4408_s1 + $0x178] sm:$0xff]   ;;  %v3576_v8 = vld [vmem:[%s4408_s1 + $0x1c0] sm:$0xff]  }
  0x1c   : > { %2943 = vmatprep.subr.bf16.mxu0 %v3493_v14  ;;  %3460 = vmatprep.subr.bf16.mxu1 %v3493_v14  ;;  %v3565_v1 = vld [vmem:[%s4408_s1 + $0x130] sm:$0xff]   ;;  %v3553_v6 = vld [vmem:[%s3815_s9 + $0x168] ss:$36 sps:$4 sm:$0xff]   ;;  %v3575_v7 = vld [vmem:[%s4408_s1 + $0x138] sm:$0xff]  }
  0x1d   : > { %v318_v4 = vld [vmem:[%s3815_s9 + $0x3f0] sm:$0xff]  ;;  %v3554_v9 = vld [vmem:[%s3815_s9 + $0x3a8] ss:$36 sps:$4 sm:$0xff]  }
  0x1e   : > { %v3559_v10 = vld [vmem:[%s3815_s9 + $0x1b4] ss:$36 sps:$4 sm:$0xff]   ;;  %v2708_v11 = vcombine.high %v318_v4, %v318_v4  ;;  %v2707_v14 = vcombine.low %v318_v4, %v318_v4  ;;  %v3628_v4 = vld [vmem:[%s3815_s9 + $0x200] ss:$36 sps:$4 sm:$0xff]  }
  0x1f   : > { %2944 = vmatpush3.bf16.msra.mxu0 %v3494_v15  ;;  %3468 = vmatpush3.bf16.msra.mxu1 %v3494_v15  ;;  %v3562_v13 = vld [vmem:[%s3815_s9 + $0x1b0] ss:$36 sps:$4 sm:$0xff]   ;;  %v3568_v15 = vld [vmem:[%s3815_s9 + $0x1fc] ss:$36 sps:$4 sm:$0xff]  }
  0x20   : > { %2945 = vmatprep.subr.bf16.mxu0 %v3495_v16  ;;  %3461 = vmatprep.subr.bf16.mxu1 %v3495_v16  ;;  %v3572_v16 = vld [vmem:[%s3815_s9 + $0xc] ss:$36 sps:$4 sm:$0xff]  }
  0x23   : > { %2946 = vmatpush3.bf16.msra.mxu0 %v3496_v17  ;;  %3469 = vmatpush3.bf16.msra.mxu1 %v3496_v17  ;;  %v3570_v17 = vld [vmem:[%s3815_s9 + $0x8] ss:$36 sps:$4 sm:$0xff]  }
  0x24   : > { %3143 = vmatprep.subr.bf16.mxu0 %v3503_v18  ;;  %3037 = vmatprep.subr.bf16.mxu1 %v3505_v20  ;;  %v3573_v18 = vld [vmem:[%s3815_s9 + $0x1f8] ss:$36 sps:$4 sm:$0xff]  }
  0x25   : > { %v3578_v20 = vld [vmem:[%s3815_s9 + $0x54] ss:$36 sps:$4 sm:$0xff]  }
  0x26   : > { %1615 = vmatmul.mubr.bf16.vlgmr.msra.gmra.mrb[0].mxu0 %v3497_v19  ;;  %1679 = vmatmul.mubr.bf16.vlgmr.msra.gmra.mrb[0].mxu1 %v3500_v21  ;;  %v3577_v19 = vld [vmem:[%s4408_s1 + $0x180] sm:$0xff]   ;;  %v3582_v21 = vld [vmem:[%s3815_s9 + $0x14] ss:$36 sps:$4 sm:$0xff]  }
  0x27   : > { %3144 = vmatpush3.bf16.msra.mxu0 %v3504_v22  ;;  %3038 = vmatpush3.bf16.msra.mxu1 %v3506_v23  ;;  %v3591_v22 = vld [vmem:[%s4408_s1 + $0x1c8] sm:$0xff]  }
  0x28   : > { %1622 = vmatprep.mubr.bf16.mxu0 %v3507_v24  ;;  %1686 = vmatprep.mubr.bf16.mxu1 %v3509_v25  ;;  %v3592_v23 = vld [vmem:[%s4408_s1 + $0x188] sm:$0xff]   ;;  %v3580_v24 = vld [vmem:[%s3815_s9 + $0x10] ss:$36 sps:$4 sm:$0xff]  }
  0x29   : > { %3145 = vmatprep.subr.bf16.mxu0 %v3513_v26  ;;  %3039 = vmatprep.subr.bf16.mxu1 %v3515_v28  ;;  %v3606_v25 = vld [vmem:[%s4408_s1 + $0x1d0] sm:$0xff]   ;;  %v3585_v28 = vld [vmem:[%s3815_s9 + $0x9c] ss:$36 sps:$4 sm:$0xff]  }
  0x2a   : > { %v3583_v26 = vld [vmem:[%s3815_s9 + $0x50] ss:$36 sps:$4 sm:$0xff]  }
  0x2b   : > { %3146 = vmatpush3.bf16.msra.mxu0 %v3514_v27  ;;  %3040 = vmatpush3.bf16.msra.mxu1 %v3516_v29  ;;  %v3584_v27 = vld [vmem:[%s4408_s1 + $0x200] sm:$0xff]  }
  0x2c   : > { %3147 = vmatprep.subr.bf16.mxu0 %v3523_v30  ;;  %3041 = vmatprep.subr.bf16.mxu1 %v3524_v33  ;;  %v3587_v29 = vld [vmem:[%s3815_s9 + $0x5c] ss:$36 sps:$4 sm:$0xff]   ;;  %v3607_v30 = vld [vmem:[%s4408_s1 + $0x190] sm:$0xff]  }
  0x2d   : > { %v3589_v33 = vld [vmem:[%s3815_s9 + $0x98] ss:$36 sps:$4 sm:$0xff]  }
  0x2e   : > { %1623 = vmatmul.mubr.bf16.gmra.mrb[4].mxu0 %v3511_v31  ;;  %1687 = vmatmul.mubr.bf16.gmra.mrb[4].mxu1 %v3512_v32  ;;  %v3621_v31 = vld [vmem:[%s4408_s1 + $0x1d8] sm:$0xff]   ;;  %v3599_v32 = vld [vmem:[%s4408_s1 + $0x208] sm:$0xff]  }
  0x2f   : > { %1630 = vmatprep.mubr.bf16.mxu0 %v3517_v34  ;;  %1694 = vmatprep.mubr.bf16.mxu1 %v3519_v35  ;;  %v3590_v34 = vld [vmem:[%s3815_s9 + $0x58] ss:$36 sps:$4 sm:$0xff]  }
  0x30   : > { %3148 = vmatpush3.bf16.msra.mxu0 %v3525_v36  ;;  %3042 = vmatpush3.bf16.msra.mxu1 %v3526_v37  ;;  %v3622_v35 = vld [vmem:[%s4408_s1 + $0x198] sm:$0xff]   ;;  %v3593_v36 = vld [vmem:[%s3815_s9 + $0xe4] ss:$36 sps:$4 sm:$0xff]  }
  0x31   : > { %3043 = vmatprep.subr.bf16.mxu1 %v3533_v38  ;;  %3149 = vmatprep.subr.bf16.mxu0 %v3534_v39  ;;  %v3595_v37 = vld [vmem:[%s3815_s9 + $0xa4] ss:$36 sps:$4 sm:$0xff]   ;;  %v3612_v38 = vld [vmem:[%s4408_s1 + $0x210] sm:$0xff]  }
  0x32   : > { %v3634_v39 = vld [vmem:[%s4408_s1 + $0x1e0] sm:$0xff]  }
  0x34   : > { %3044 = vmatpush3.bf16.msra.mxu1 %v3535_v40  ;;  %3150 = vmatpush3.bf16.msra.mxu0 %v3536_v43  ;;  %v3637_v40 = vld [vmem:[%s4408_s1 + $0x1a0] sm:$0xff]  }
  0x35   : > { %3045 = vmatprep.subr.bf16.mxu1 %v3541_v45  ;;  %3151 = vmatprep.subr.bf16.mxu0 %v3545_v48  ;;  %v3597_v43 = vld [vmem:[%s3815_s9 + $0xe0] ss:$36 sps:$4 sm:$0xff]   ;;  %v3600_v45 = vld [vmem:[%s3815_s9 + $0x12c] ss:$36 sps:$4 sm:$0xff]  }
  0x36   : > { %1631 = vmatmul.mubr.bf16.gmra.mrb[8].mxu0 %v3521_v41  ;;  %1695 = vmatmul.mubr.bf16.gmra.mrb[8].mxu1 %v3522_v42  ;;  %v3623_v41 = vld [vmem:[%s4408_s1 + $0x218] sm:$0xff]   ;;  %v3645_v42 = vld [vmem:[%s4408_s1 + $0x1e8] sm:$0xff]   ;;  %v3638_v48 = vld [vmem:[%s4408_s1 + $0x220] sm:$0xff]  }
  0x37   : > { %1638 = vmatprep.mubr.bf16.mxu0 %v3527_v44  ;;  %1702 = vmatprep.mubr.bf16.mxu1 %v3529_v46  ;;  %v3598_v44 = vld [vmem:[%s3815_s9 + $0xa0] ss:$36 sps:$4 sm:$0xff]   ;;  %v3602_v46 = vld [vmem:[%s3815_s9 + $0xec] ss:$36 sps:$4 sm:$0xff]  }
  0x38   : > { %3046 = vmatpush3.bf16.msra.mxu1 %v3544_v47  ;;  %3152 = vmatpush3.bf16.msra.mxu0 %v3546_v49  ;;  %v3650_v47 = vld [vmem:[%s4408_s1 + $0x1a8] sm:$0xff]  }
  0x39   : > { %3047 = vmatprep.subr.bf16.mxu1 %v3547_v50  ;;  %3153 = vmatprep.subr.bf16.mxu0 %v3555_v56  ;;  %v3653_v49 = vld [vmem:[%s4408_s1 + $0x228] sm:$0xff]   ;;  %v3668_v56 = vld [vmem:[%s4408_s1 + $0x230] sm:$0xff]  }
  0x3a   : > { %v3604_v50 = vld [vmem:[%s3815_s9 + $0x128] ss:$36 sps:$4 sm:$0xff]  }
  0x3c   : > { %3048 = vmatpush3.bf16.msra.mxu1 %v3552_v55  ;;  %3154 = vmatpush3.bf16.msra.mxu0 %v3556_v57  ;;  %v3610_v55 = vld [vmem:[%s3815_s9 + $0x134] ss:$36 sps:$4 sm:$0xff]  }
  0x3d   : > { %3049 = vmatprep.subr.bf16.mxu1 %v3557_v58  ;;  %3155 = vmatprep.subr.bf16.mxu0 %v3564_v62  ;;  %v3613_v57 = vld [vmem:[%s3815_s9 + $0x170] ss:$36 sps:$4 sm:$0xff]   ;;  %v3675_v58 = vld [vmem:[%s4408_s1 + $0x1f8] sm:$0xff]  }
  0x3e   : > { %1639 = vmatmul.mubr.bf16.gmra.mrb[12].mxu0 %v3531_v51  ;;  %1703 = vmatmul.mubr.bf16.gmra.mrb[12].mxu1 %v3532_v52  ;;  %v3660_v51 = vld [vmem:[%s4408_s1 + $0x1f0] sm:$0xff]   ;;  %v3617_v62 = vld [vmem:[%s3815_s9 + $0x17c] ss:$36 sps:$4 sm:$0xff]  }
  0x3f   : > { %1646 = vmatprep.mubr.bf16.mxu0 %v3537_v53  ;;  %1710 = vmatprep.mubr.bf16.mxu1 %v3539_v54  ;;  %v3661_v52 = vld [vmem:[%s4408_s1 + $0x1b0] sm:$0xff]   ;;  %v3605_v53 = vld [vmem:[%s3815_s9 + $0xe8] ss:$36 sps:$4 sm:$0xff]  }
  0x40   : > { %3050 = vmatpush3.bf16.msra.mxu1 %v3558_v59  ;;  %3156 = vmatpush3.bf16.msra.mxu0 %v3565_v1  ;;  %v3608_v54 = vld [vmem:[%s3815_s9 + $0x174] ss:$36 sps:$4 sm:$0xff]  }
  0x41   : > { %3051 = vmatprep.subr.bf16.mxu1 %v3566_v2  ;;  %3157 = vmatprep.subr.bf16.mxu0 %v3574_v5  ;;  %v3676_v59 = vld [vmem:[%s4408_s1 + $0x1b8] sm:$0xff]   ;;  %v3624_v2 = vld [vmem:[%s3815_s9 + $0x204] ss:$36 sps:$4 sm:$0xff]  }
  0x42   : > { %v3620_v1 = vld [vmem:[%s3815_s9 + $0x178] ss:$36 sps:$4 sm:$0xff]   ;;  %v3629_v5 = vld [vmem:[%s3815_s9 + $0x1c0] ss:$36 sps:$4 sm:$0xff]  }
  0x44   : > { %3052 = vmatpush3.bf16.msra.mxu1 %v3567_v3  ;;  %3158 = vmatpush3.bf16.msra.mxu0 %v3575_v7  ;;  %v3626_v3 = vld [vmem:[%s3815_s9 + $0x1c4] ss:$36 sps:$4 sm:$0xff]   ;;  %v3632_v7 = vld [vmem:[%s3815_s9 + $0x20c] ss:$36 sps:$4 sm:$0xff]  }
  0x45   : > { %3249 = vmatprep.subr.bf16.mxu1 %v3576_v8  ;;  %3378 = vmatprep.subr.bf16.mxu0 %v3752_v12  ;;  %v3635_v8 = vld [vmem:[%s3815_s9 + $0x248] ss:$36 sps:$4 sm:$0xff]  }
  0x46   : > { %1647 = vmatmul.mubr.bf16.gmra.mrb[16].mxu0 %v3542_v60  ;;  %1711 = vmatmul.mubr.bf16.gmra.mrb[16].mxu1 %v3543_v61  ;;  %v3614_v60 = vld [vmem:[%s3815_s9 + $0x130] ss:$36 sps:$4 sm:$0xff]   ;;  %v3615_v61 = vld [vmem:[%s3815_s9 + $0x1bc] ss:$36 sps:$4 sm:$0xff]  }
  0x47   : > { %1654 = vmatprep.mubr.bf16.mxu0 %v3548_v63  ;;  %1718 = vmatprep.mubr.bf16.mxu1 %v3550_v0  ;;  %v3682_v63 = vld [vmem:[%s4408_s1 + $0x238] sm:$0xff]  }
  0x48   : > { %v3619_v0 = vld [vmem:[%s3815_s9 + $0x1b8] ss:$36 sps:$4 sm:$0xff]  }
  0x4e   : > { %1655 = vmatmul.mubr.bf16.gmra.mrb[20].mxu0 %v3553_v6  ;;  %1719 = vmatmul.mubr.bf16.gmra.mrb[20].mxu1 %v3554_v9  ;;  %v3630_v6 = vld [vmem:[%s3815_s9 + $0x24c] ss:$36 sps:$4 sm:$0xff]  }
  0x4f   : > { %1662 = vmatprep.mubr.bf16.mxu0 %v3559_v10  ;;  %1726 = vmatprep.mubr.bf16.mxu1 %v2708_v11  ;;  %v3636_v9 = vld [vmem:[%s3815_s9 + $0x208] ss:$36 sps:$4 sm:$0xff]   ;;  %v3639_v10 = vld [vmem:[%s3815_s9 + $0x294] ss:$36 sps:$4 sm:$0xff]  }
  0x50   : > { %v3641_v11 = vld [vmem:[%s3815_s9 + $0x254] ss:$36 sps:$4 sm:$0xff]  }
  0x56   : > { %1663 = vmatmul.mubr.bf16.gmra.mrb[24].mxu0 %v3562_v13  ;;  %1727 = vmatmul.mubr.bf16.gmra.mrb[24].mxu1 %v2707_v14  ;;  %v3643_v13 = vld [vmem:[%s3815_s9 + $0x290] ss:$36 sps:$4 sm:$0xff]  }
  0x57   : > { %1670 = vmatprep.mubr.bf16.mxu0 %v3568_v15  ;;  %1766 = vmatprep.mubr.bf16.mxu1 %v3572_v16  ;;  %v3644_v14 = vld [vmem:[%s3815_s9 + $0x250] ss:$36 sps:$4 sm:$0xff]   ;;  %v3646_v15 = vld [vmem:[%s3815_s9 + $0x2dc] ss:$36 sps:$4 sm:$0xff]  }
  0x58   : > { %v3648_v16 = vld [vmem:[%s3815_s9 + $0x29c] ss:$36 sps:$4 sm:$0xff]  }
  0x5e   : > { %1671 = vmatmul.mubr.bf16.gmra.mrb[28].mxu0 %v3573_v18  ;;  %1767 = vmatmul.mubr.bf16.vlgmr.msra.gmra.mrb[28].mxu1 %v3570_v17  ;;  %v3651_v17 = vld [vmem:[%s3815_s9 + $0x2d8] ss:$36 sps:$4 sm:$0xff]  }
  0x5f   : > { %3250 = vmatpush3.bf16.msra.mxu1 %v3577_v19  ;;  %1774 = vmatprep.mubr.bf16.mxu1 %v3578_v20  ;;  %v3652_v18 = vld [vmem:[%s3815_s9 + $0x298] ss:$36 sps:$4 sm:$0xff]   ;;  %v3654_v19 = vld [vmem:[%s3815_s9 + $0x324] ss:$36 sps:$4 sm:$0xff]  }
  0x60   : > { %1918 = vmatprep.mubr.bf16.mxu0 %v3582_v21  ;;  %3251 = vmatprep.subr.bf16.mxu1 %v3591_v22  ;;  %v3656_v20 = vld [vmem:[%s3815_s9 + $0x2e4] ss:$36 sps:$4 sm:$0xff]  }
  0x61   : > { %v3658_v21 = vld [vmem:[%s3815_s9 + $0x320] ss:$36 sps:$4 sm:$0xff]  }
  0x62   : > { %v3659_v22 = vld [vmem:[%s3815_s9 + $0x2e0] ss:$36 sps:$4 sm:$0xff]  }
  0x63   : > { %3252 = vmatpush3.bf16.msra.mxu1 %v3592_v23  ;;  %v3662_v23 = vld [vmem:[%s3815_s9 + $0x36c] ss:$36 sps:$4 sm:$0xff]  }
  0x64   : > { %3253 = vmatprep.subr.bf16.mxu1 %v3606_v25  ;;  %v3666_v25 = vld [vmem:[%s3815_s9 + $0x368] ss:$36 sps:$4 sm:$0xff]  }
  0x66   : > { %1775 = vmatmul.mubr.bf16.gmra.mrb[32].mxu1 %v3583_v26  ;;  %1919 = vmatmul.mubr.bf16.vlgmr.msra.gmra.mrb[32].mxu0 %v3580_v24  ;;  %v3664_v24 = vld [vmem:[%s3815_s9 + $0x32c] ss:$36 sps:$4 sm:$0xff]  }
  0x67   : > { %3379 = vmatpush3.bf16.msra.mxu0 %v3584_v27  ;;  %1782 = vmatprep.mubr.bf16.mxu1 %v3585_v28  ;;  %v3667_v26 = vld [vmem:[%s3815_s9 + $0x328] ss:$36 sps:$4 sm:$0xff]   ;;  %v3669_v27 = vld [vmem:[%s3815_s9 + $0x3b4] ss:$36 sps:$4 sm:$0xff]  }
  0x68   : > { %1926 = vmatprep.mubr.bf16.mxu0 %v3587_v29  ;;  %3380 = vmatprep.subr.bf16.mxu0 %v3752_v12  ;;  %v3671_v28 = vld [vmem:[%s3815_s9 + $0x374] ss:$36 sps:$4 sm:$0xff]  }
  0x69   : > { %3254 = vmatpush3.bf16.msra.mxu1 %v3607_v30  ;;  %v319_v29 = vld [vmem:[%s3815_s9 + $0x3f8] sm:$0xff]  ;;  %v3673_v30 = vld [vmem:[%s3815_s9 + $0x3b0] ss:$36 sps:$4 sm:$0xff]  }
  0x6a   : > { %3255 = vmatprep.subr.bf16.mxu1 %v3621_v31  ;;  %v3674_v31 = vld [vmem:[%s3815_s9 + $0x370] ss:$36 sps:$4 sm:$0xff]  }
  0x6b   : > { %3381 = vmatpush3.bf16.msra.mxu0 %v3599_v32  ;;  %v2710_v32 = vcombine.high %v319_v29, %v319_v29 }
  0x6c   : > { %3382 = vmatprep.subr.bf16.mxu0 %v3752_v12 }
  0x6d   : > { %3256 = vmatpush3.bf16.msra.mxu1 %v3622_v35  ;;  %v2709_v35 = vcombine.low %v319_v29, %v319_v29 }
  0x6e   : > { %1783 = vmatmul.mubr.bf16.gmra.mrb[36].mxu1 %v3589_v33  ;;  %1927 = vmatmul.mubr.bf16.gmra.mrb[36].mxu0 %v3590_v34  ;;  %v3678_v33 = vld [vmem:[%s3815_s9 + $0x3bc] ss:$36 sps:$4 sm:$0xff]  }
  0x6f   : > { %1790 = vmatprep.mubr.bf16.mxu1 %v3593_v36  ;;  %1934 = vmatprep.mubr.bf16.mxu0 %v3595_v37  ;;  %v320_v34 = vld [vmem:[%s3815_s9 + $0x400] sm:$0xff]  ;;  %v3681_v36 = vld [vmem:[%s3815_s9 + $0x3b8] ss:$36 sps:$4 sm:$0xff]  }
  0x70   : > { %3383 = vmatpush3.bf16.msra.mxu0 %v3612_v38  ;;  %3257 = vmatprep.subr.bf16.mxu1 %v3634_v39  ;;  %v2712_v37 = vcombine.high %v320_v34, %v320_v34  ;;  %v3686_v38 = vld [vmem:[%s3815_s9 + $0x1c] ss:$36 sps:$4 sm:$0xff]  }
  0x71   : > { %3384 = vmatprep.subr.bf16.mxu0 %v3752_v12  ;;  %3258 = vmatpush3.bf16.msra.mxu1 %v3637_v40  ;;  %v3684_v39 = vld [vmem:[%s3815_s9 + $0x18] ss:$36 sps:$4 sm:$0xff]   ;;  %v2711_v40 = vcombine.low %v320_v34, %v320_v34 }
  0x72   : > { %3259 = vmatprep.subr.bf16.mxu1 %v3645_v42  ;;  %v3690_v42 = vld [vmem:[%s3815_s9 + $0x60] ss:$36 sps:$4 sm:$0xff]  }
  0x74   : > { %3385 = vmatpush3.bf16.msra.mxu0 %v3623_v41  ;;  %v3688_v41 = vld [vmem:[%s3815_s9 + $0x64] ss:$36 sps:$4 sm:$0xff]  }
  0x75   : > { %3386 = vmatprep.subr.bf16.mxu0 %v3752_v12  ;;  %3260 = vmatpush3.bf16.msra.mxu1 %v3650_v47  ;;  %v3696_v47 = vld [vmem:[%s3815_s9 + $0xf4] ss:$36 sps:$4 sm:$0xff]  }
  0x76   : > { %1791 = vmatmul.mubr.bf16.gmra.mrb[40].mxu1 %v3597_v43  ;;  %1935 = vmatmul.mubr.bf16.gmra.mrb[40].mxu0 %v3598_v44  ;;  %v3691_v43 = vld [vmem:[%s3815_s9 + $0x20] ss:$36 sps:$4 sm:$0xff]   ;;  %v3692_v44 = vld [vmem:[%s3815_s9 + $0xac] ss:$36 sps:$4 sm:$0xff]  }
  0x77   : > { %1798 = vmatprep.mubr.bf16.mxu1 %v3600_v45  ;;  %1942 = vmatprep.mubr.bf16.mxu0 %v3602_v46  ;;  %v3694_v45 = vld [vmem:[%s3815_s9 + $0xa8] ss:$36 sps:$4 sm:$0xff]  }
  0x78   : > { %3387 = vmatpush3.bf16.msra.mxu0 %v3638_v48  ;;  %3261 = vmatprep.subr.bf16.mxu1 %v3660_v51  ;;  %v3695_v46 = vld [vmem:[%s3815_s9 + $0x68] ss:$36 sps:$4 sm:$0xff]   ;;  %v3698_v48 = vld [vmem:[%s3815_s9 + $0xf0] ss:$36 sps:$4 sm:$0xff]   ;;  %v3702_v51 = vld [vmem:[%s3815_s9 + $0x138] ss:$36 sps:$4 sm:$0xff]  }
  0x79   : > { %3388 = vmatprep.subr.bf16.mxu0 %v3752_v12  ;;  %3262 = vmatpush3.bf16.msra.mxu1 %v3661_v52  ;;  %v3703_v52 = vld [vmem:[%s3815_s9 + $0xf8] ss:$36 sps:$4 sm:$0xff]  }
  0x7a   : > { %3263 = vmatprep.subr.bf16.mxu1 %v3675_v58  ;;  %v3706_v58 = vld [vmem:[%s3815_s9 + $0x180] ss:$36 sps:$4 sm:$0xff]  }
  0x7c   : > { %3389 = vmatpush3.bf16.msra.mxu0 %v3653_v49  ;;  %v3699_v49 = vld [vmem:[%s3815_s9 + $0xb0] ss:$36 sps:$4 sm:$0xff]  }
  0x7d   : > { %3390 = vmatprep.subr.bf16.mxu0 %v3752_v12  ;;  %3264 = vmatpush3.bf16.msra.mxu1 %v3676_v59  ;;  %v3707_v59 = vld [vmem:[%s3815_s9 + $0x140] ss:$36 sps:$4 sm:$0xff]  }
  0x7e   : > { %1799 = vmatmul.mubr.bf16.gmra.mrb[44].mxu1 %v3604_v50  ;;  %1943 = vmatmul.mubr.bf16.gmra.mrb[44].mxu0 %v3605_v53  ;;  %v3700_v50 = vld [vmem:[%s3815_s9 + $0x13c] ss:$36 sps:$4 sm:$0xff]   ;;  %v3704_v53 = vld [vmem:[%s3815_s9 + $0x184] ss:$36 sps:$4 sm:$0xff]  }
  0x7f   : > { %1806 = vmatprep.mubr.bf16.mxu1 %v3608_v54  ;;  %1950 = vmatprep.mubr.bf16.mxu0 %v3610_v55 }
  0x80   : > { %3391 = vmatpush3.bf16.msra.mxu0 %v3668_v56 }
  0x81   : > { %3392 = vmatprep.subr.bf16.mxu0 %v3752_v12 }
  0x84   : > { %3393 = vmatpush3.bf16.msra.mxu0 %v3682_v63 }
  0x86   : > { %1807 = vmatmul.mubr.bf16.gmra.mrb[48].mxu1 %v3613_v57  ;;  %1951 = vmatmul.mubr.bf16.gmra.mrb[48].mxu0 %v3614_v60 }
  0x87   : > { %1814 = vmatprep.mubr.bf16.mxu1 %v3615_v61  ;;  %1958 = vmatprep.mubr.bf16.mxu0 %v3617_v62 }
  0x8e   : > { %1815 = vmatmul.mubr.bf16.gmra.mrb[52].mxu1 %v3619_v0  ;;  %1959 = vmatmul.mubr.bf16.gmra.mrb[52].mxu0 %v3620_v1  ;;  %v3708_v0 = vld [vmem:[%s3815_s9 + $0x1cc] ss:$36 sps:$4 sm:$0xff]   ;;  %v4134_v1 = vld [vmem:[%s4409_s2] ss:$0 sm:$0xff] }
  0x8f   : > { %1822 = vmatprep.mubr.bf16.mxu1 %v3624_v2  ;;  %1966 = vmatprep.mubr.bf16.mxu0 %v3626_v3 }
  0x96   : > { %1823 = vmatmul.mubr.bf16.gmra.mrb[56].mxu1 %v3628_v4  ;;  %1967 = vmatmul.mubr.bf16.gmra.mrb[56].mxu0 %v3629_v5 }
  0x97   : > { %1830 = vmatprep.mubr.bf16.mxu1 %v3630_v6  ;;  %1974 = vmatprep.mubr.bf16.mxu0 %v3632_v7 }
  0x9e   : > { %1831 = vmatmul.mubr.bf16.gmra.mrb[60].mxu1 %v3635_v8  ;;  %1975 = vmatmul.mubr.bf16.gmra.mrb[60].mxu0 %v3636_v9 }
  0x9f   : > { %1838 = vmatprep.mubr.bf16.mxu1 %v3639_v10  ;;  %1982 = vmatprep.mubr.bf16.mxu0 %v3641_v11 }
  0xa6   : > { %1839 = vmatmul.mubr.bf16.gmra.mrb[64].mxu1 %v3643_v13  ;;  %1983 = vmatmul.mubr.bf16.gmra.mrb[64].mxu0 %v3644_v14  ;;  %v3710_v13 = vld [vmem:[%s3815_s9 + $0x1c8] ss:$36 sps:$4 sm:$0xff]  }
  0xa7   : > { %1846 = vmatprep.mubr.bf16.mxu1 %v3646_v15  ;;  %1990 = vmatprep.mubr.bf16.mxu0 %v3648_v16  ;;  %v3711_v14 = vld [vmem:[%s3815_s9 + $0x188] ss:$36 sps:$4 sm:$0xff]  }
  0xae   : > { %1847 = vmatmul.mubr.bf16.gmra.mrb[68].mxu1 %v3651_v17  ;;  %1991 = vmatmul.mubr.bf16.gmra.mrb[68].mxu0 %v3652_v18 }
  0xaf   : > { %1854 = vmatprep.mubr.bf16.mxu1 %v3654_v19  ;;  %1998 = vmatprep.mubr.bf16.mxu0 %v3656_v20  ;;  %v3712_v19 = vld [vmem:[%s3815_s9 + $0x214] ss:$36 sps:$4 sm:$0xff]  }
  0xb6   : > { %1855 = vmatmul.mubr.bf16.gmra.mrb[72].mxu1 %v3658_v21  ;;  %1999 = vmatmul.mubr.bf16.gmra.mrb[72].mxu0 %v3659_v22 }
  0xb7   : > { %1862 = vmatprep.mubr.bf16.mxu1 %v3662_v23  ;;  %2006 = vmatprep.mubr.bf16.mxu0 %v3664_v24 }
  0xbe   : > { %1863 = vmatmul.mubr.bf16.gmra.mrb[76].mxu1 %v3666_v25  ;;  %2007 = vmatmul.mubr.bf16.gmra.mrb[76].mxu0 %v3667_v26 }
  0xbf   : > { %1870 = vmatprep.mubr.bf16.mxu1 %v3669_v27  ;;  %2014 = vmatprep.mubr.bf16.mxu0 %v3671_v28 }
  0xc6   : > { %1871 = vmatmul.mubr.bf16.gmra.mrb[80].mxu1 %v3673_v30  ;;  %2015 = vmatmul.mubr.bf16.gmra.mrb[80].mxu0 %v3674_v31  ;;  %v3714_v30 = vld [vmem:[%s3815_s9 + $0x210] ss:$36 sps:$4 sm:$0xff]  }
  0xc7   : > { %1878 = vmatprep.mubr.bf16.mxu1 %v2710_v32  ;;  %2022 = vmatprep.mubr.bf16.mxu0 %v3678_v33  ;;  %v3715_v31 = vld [vmem:[%s3815_s9 + $0x1d0] ss:$36 sps:$4 sm:$0xff]  }
  0xce   : > { %1879 = vmatmul.mubr.bf16.gmra.mrb[84].mxu1 %v2709_v35  ;;  %2023 = vmatmul.mubr.bf16.gmra.mrb[84].mxu0 %v3681_v36  ;;  %v3716_v36 = vld [vmem:[%s3815_s9 + $0x25c] ss:$36 sps:$4 sm:$0xff]  }
  0xcf   : > { %2030 = vmatprep.mubr.bf16.mxu0 %v2712_v37  ;;  %2070 = vmatprep.mubr.bf16.mxu1 %v3686_v38 }
  0xd6   : > { %2031 = vmatmul.mubr.bf16.gmra.mrb[88].mxu0 %v2711_v40  ;;  %2071 = vmatmul.mubr.bf16.vlgmr.msra.gmra.mrb[88].mxu1 %v3684_v39 }
  0xd7   : > { %2078 = vmatprep.mubr.bf16.mxu1 %v3688_v41  ;;  %3394 = vmatprep.mubr.msk.bf16.mxu0 %vm3753_vm0, %v3752_v12 }
  0xde   : > { %2079 = vmatmul.mubr.bf16.gmra.mrb[92].mxu1 %v3690_v42  ;;  %3395 = vmatmul.mubr.bf16.vlgmr.msra.gmra.mrb[92].mxu0 %v3691_v43 }
  0xdf   : > { %2086 = vmatprep.mubr.bf16.mxu1 %v3692_v44  ;;  %3398 = vmatprep.mubr.msk.bf16.mxu0 %vm3753_vm0, %v3752_v12 }
  0xe6   : > { %2087 = vmatmul.mubr.bf16.gmra.mrb[96].mxu1 %v3694_v45  ;;  %3399 = vmatmul.mubr.bf16.gmra.mrb[96].mxu0 %v3695_v46 }
  0xe7   : > { %2094 = vmatprep.mubr.bf16.mxu1 %v3696_v47  ;;  %3402 = vmatprep.mubr.msk.bf16.mxu0 %vm3753_vm0, %v3752_v12  ;;  %v3718_v47 = vld [vmem:[%s3815_s9 + $0x258] ss:$36 sps:$4 sm:$0xff]  }
  0xee   : > { %2095 = vmatmul.mubr.bf16.gmra.mrb[100].mxu1 %v3698_v48  ;;  %3403 = vmatmul.mubr.bf16.gmra.mrb[100].mxu0 %v3699_v49  ;;  %v3719_v48 = vld [vmem:[%s3815_s9 + $0x218] ss:$36 sps:$4 sm:$0xff]  }
  0xef   : > { %2102 = vmatprep.mubr.bf16.mxu1 %v3700_v50  ;;  %3406 = vmatprep.mubr.msk.bf16.mxu0 %vm3753_vm0, %v3752_v12 }
  0xf6   : > { %2103 = vmatmul.mubr.bf16.gmra.mrb[104].mxu1 %v3702_v51  ;;  %3407 = vmatmul.mubr.bf16.gmra.mrb[104].mxu0 %v3703_v52 }
  0xf7   : > { %2110 = vmatprep.mubr.bf16.mxu1 %v3704_v53  ;;  %3410 = vmatprep.mubr.msk.bf16.mxu0 %vm3753_vm0, %v3752_v12  ;;  %v3720_v53 = vld [vmem:[%s3815_s9 + $0x2a4] ss:$36 sps:$4 sm:$0xff]  }
  0xf9   : > { %v2947_v54 = vpop.f32.mrb[0].mxu0  ;;  %v2995_v55 = vpop.f32.mrb[0].mxu1 }
  0xfa   : > { %v2948_v56 = vpop.f32.mrb[1].mxu0  ;;  %v2996_v57 = vpop.f32.mrb[1].mxu1 }
  0xfb   : > { %v4128_v60 = vadd.f32 %v2948_v56, %v2947_v54  ;;  %v2950_v61 = vpop.f32.mrb[2].mxu0  ;;  %v2997_v62 = vadd.f32 %v2996_v57, %v2995_v55  ;;  %v2998_v63 = vpop.f32.mrb[2].mxu1 }
  0xfc   : > { %v2951_v2 = vpop.f32.mrb[3].mxu0  ;;  %v2999_v3 = vpop.f32.mrb[3].mxu1 }
  0xfd   : > { %v4137_v4 = vadd.f32 %v2997_v62, %v4134_v1  ;;  %v4139_v5 = vadd.f32 %v2951_v2, %v2950_v61  ;;  %v3000_v6 = vadd.f32 %v2999_v3, %v2998_v63  ;;  %v3722_v2 = vld [vmem:[%s3815_s9 + $0x2a0] ss:$36 sps:$4 sm:$0xff]  }
  0xfe   : > { %2111 = vmatmul.mubr.bf16.gmra.mrb[108].mxu1 %v3706_v58  ;;  %3411 = vmatmul.mubr.bf16.gmra.mrb[108].mxu0 %v3707_v59  ;;  %v3723_v3 = vld [vmem:[%s3815_s9 + $0x260] ss:$36 sps:$4 sm:$0xff]  }
  0xff   : > { %v4142_v7 = vadd.f32 %v3000_v6, %v4134_v1  ;;  %2118 = vmatprep.mubr.bf16.mxu1 %v3708_v0  ;;  %3414 = vmatprep.mubr.msk.bf16.mxu0 %vm3753_vm0, %v3752_v12 }
 0x101   : > { %v2953_v8 = vpop.f32.mrb[4].mxu0  ;;  %v3001_v9 = vpop.f32.mrb[4].mxu1 }
 0x102   : > { %v2954_v10 = vpop.f32.mrb[5].mxu0  ;;  %v3002_v11 = vpop.f32.mrb[5].mxu1 }
 0x103   : > { %v4148_v15 = vadd.f32 %v2954_v10, %v2953_v8  ;;  %v2956_v16 = vpop.f32.mrb[6].mxu0  ;;  %v3003_v17 = vadd.f32 %v3002_v11, %v3001_v9  ;;  %v3004_v18 = vpop.f32.mrb[6].mxu1  ;;  %v3724_v11 = vld [vmem:[%s3815_s9 + $0x2ec] ss:$36 sps:$4 sm:$0xff]  }
 0x104   : > { %v2957_v20 = vpop.f32.mrb[7].mxu0  ;;  %v3005_v21 = vpop.f32.mrb[7].mxu1 }
 0x105   : > { %v4152_v22 = vadd.f32 %v3003_v17, %v4134_v1  ;;  %v4154_v23 = vadd.f32 %v2957_v20, %v2956_v16  ;;  %v3006_v24 = vadd.f32 %v3005_v21, %v3004_v18 }
 0x106   : > { %2119 = vmatmul.mubr.bf16.gmra.mrb[112].mxu1 %v3710_v13  ;;  %3415 = vmatmul.mubr.bf16.gmra.mrb[112].mxu0 %v3711_v14 }
 0x107   : > { %v4157_v25 = vadd.f32 %v3006_v24, %v4134_v1  ;;  %2126 = vmatprep.mubr.bf16.mxu1 %v3712_v19  ;;  %3418 = vmatprep.mubr.msk.bf16.mxu0 %vm3753_vm0, %v3752_v12 }
 0x109   : > { %v2959_v26 = vpop.f32.mrb[8].mxu0  ;;  %v3007_v27 = vpop.f32.mrb[8].mxu1 }
 0x10a   : > { %v2960_v28 = vpop.f32.mrb[9].mxu0  ;;  %v3008_v29 = vpop.f32.mrb[9].mxu1 }
 0x10b   : > { %v4163_v32 = vadd.f32 %v2960_v28, %v2959_v26  ;;  %v2962_v33 = vpop.f32.mrb[10].mxu0  ;;  %v3009_v34 = vadd.f32 %v3008_v29, %v3007_v27  ;;  %v3010_v35 = vpop.f32.mrb[10].mxu1  ;;  %v3726_v27 = vld [vmem:[%s3815_s9 + $0x2e8] ss:$36 sps:$4 sm:$0xff]  }
 0x10c   : > { %v2963_v37 = vpop.f32.mrb[11].mxu0  ;;  %v3011_v38 = vpop.f32.mrb[11].mxu1  ;;  %v3727_v28 = vld [vmem:[%s3815_s9 + $0x2a8] ss:$36 sps:$4 sm:$0xff]  }
 0x10d   : > { %v4167_v39 = vadd.f32 %v3009_v34, %v4134_v1  ;;  %v4169_v40 = vadd.f32 %v2963_v37, %v2962_v33  ;;  %v3012_v41 = vadd.f32 %v3011_v38, %v3010_v35  ;;  %v3728_v34 = vld [vmem:[%s3815_s9 + $0x334] ss:$36 sps:$4 sm:$0xff]  }
 0x10e   : > { %2127 = vmatmul.mubr.bf16.gmra.mrb[116].mxu1 %v3714_v30  ;;  %3419 = vmatmul.mubr.bf16.gmra.mrb[116].mxu0 %v3715_v31 }
 0x10f   : > { %v4172_v42 = vadd.f32 %v3012_v41, %v4134_v1  ;;  %2134 = vmatprep.mubr.bf16.mxu1 %v3716_v36  ;;  %3422 = vmatprep.mubr.msk.bf16.mxu0 %vm3753_vm0, %v3752_v12 }
 0x111   : > { %v2965_v43 = vpop.f32.mrb[12].mxu0  ;;  %v3013_v44 = vpop.f32.mrb[12].mxu1 }
 0x112   : > { %v2966_v45 = vpop.f32.mrb[13].mxu0  ;;  %v3014_v46 = vpop.f32.mrb[13].mxu1 }
 0x113   : > { %v4178_v49 = vadd.f32 %v2966_v45, %v2965_v43  ;;  %v2968_v50 = vpop.f32.mrb[14].mxu0  ;;  %v3015_v51 = vadd.f32 %v3014_v46, %v3013_v44  ;;  %v3016_v52 = vpop.f32.mrb[14].mxu1 }
 0x114   : > { %v2969_v54 = vpop.f32.mrb[15].mxu0  ;;  %v3017_v55 = vpop.f32.mrb[15].mxu1 }
 0x115   : > { %v4182_v56 = vadd.f32 %v3015_v51, %v4134_v1  ;;  %v4184_v57 = vadd.f32 %v2969_v54, %v2968_v50  ;;  %v3018_v58 = vadd.f32 %v3017_v55, %v3016_v52  ;;  %v3731_v50 = vld [vmem:[%s3815_s9 + $0x2f0] ss:$36 sps:$4 sm:$0xff]   ;;  %v3732_v55 = vld [vmem:[%s3815_s9 + $0x37c] ss:$36 sps:$4 sm:$0xff]  }
 0x116   : > { %2135 = vmatmul.mubr.bf16.gmra.mrb[120].mxu1 %v3718_v47  ;;  %3423 = vmatmul.mubr.bf16.gmra.mrb[120].mxu0 %v3719_v48  ;;  %v3730_v48 = vld [vmem:[%s3815_s9 + $0x330] ss:$36 sps:$4 sm:$0xff]  }
 0x117   : > { %v4187_v59 = vadd.f32 %v3018_v58, %v4134_v1  ;;  %2142 = vmatprep.mubr.bf16.mxu1 %v3720_v53  ;;  %3426 = vmatprep.mubr.msk.bf16.mxu0 %vm3753_vm0, %v3752_v12 }
 0x119   : > { %v2971_v61 = vpop.f32.mrb[16].mxu0  ;;  %v3019_v62 = vpop.f32.mrb[16].mxu1 }
 0x11a   : > { %v2972_v63 = vpop.f32.mrb[17].mxu0  ;;  %v3020_v0 = vpop.f32.mrb[17].mxu1 }
 0x11b   : > { %v4193_v6 = vadd.f32 %v2972_v63, %v2971_v61  ;;  %v2974_v8 = vpop.f32.mrb[18].mxu0  ;;  %v3021_v9 = vadd.f32 %v3020_v0, %v3019_v62  ;;  %v3022_v10 = vpop.f32.mrb[18].mxu1 }
 0x11c   : > { %v2975_v13 = vpop.f32.mrb[19].mxu0  ;;  %v3023_v14 = vpop.f32.mrb[19].mxu1 }
 0x11d   : > { %v4197_v16 = vadd.f32 %v3021_v9, %v4134_v1  ;;  %v4199_v17 = vadd.f32 %v2975_v13, %v2974_v8  ;;  %v3024_v18 = vadd.f32 %v3023_v14, %v3022_v10  ;;  %v3734_v9 = vld [vmem:[%s3815_s9 + $0x378] ss:$36 sps:$4 sm:$0xff]  }
 0x11e   : > { %2143 = vmatmul.mubr.bf16.gmra.mrb[124].mxu1 %v3722_v2  ;;  %3427 = vmatmul.mubr.bf16.gmra.mrb[124].mxu0 %v3723_v3  ;;  %v3735_v10 = vld [vmem:[%s3815_s9 + $0x338] ss:$36 sps:$4 sm:$0xff]  }
 0x11f   : > { %v4202_v19 = vadd.f32 %v3024_v18, %v4134_v1  ;;  %2150 = vmatprep.mubr.bf16.mxu1 %v3724_v11  ;;  %3430 = vmatprep.mubr.msk.bf16.mxu0 %vm3753_vm0, %v3752_v12  ;;  %v1617_v11 = vadd.f32 %v4128_v60, %v4134_v1 }
 0x121   : > { %v2977_v20 = vpop.f32.mrb[20].mxu0  ;;  %v3025_v21 = vpop.f32.mrb[20].mxu1 }
 0x122   : > { %v2978_v24 = vpop.f32.mrb[21].mxu0  ;;  %v3026_v26 = vpop.f32.mrb[21].mxu1 }
 0x123   : > { %v4208_v29 = vadd.f32 %v2978_v24, %v2977_v20  ;;  %v2980_v30 = vpop.f32.mrb[22].mxu0  ;;  %v3027_v31 = vadd.f32 %v3026_v26, %v3025_v21  ;;  %v3028_v33 = vpop.f32.mrb[22].mxu1  ;;  %v3736_v21 = vld [vmem:[%s3815_s9 + $0x3c4] ss:$36 sps:$4 sm:$0xff]  }
 0x124   : > { %v2981_v35 = vpop.f32.mrb[23].mxu0  ;;  %v3029_v36 = vpop.f32.mrb[23].mxu1 }
 0x125   : > { %v4212_v37 = vadd.f32 %v3027_v31, %v4134_v1  ;;  %v4214_v38 = vadd.f32 %v2981_v35, %v2980_v30  ;;  %v3030_v41 = vadd.f32 %v3029_v36, %v3028_v33  ;;  %v321_v33 = vld [vmem:[%s3815_s9 + $0x408] sm:$0xff] }
 0x126   : > { %2151 = vmatmul.mubr.bf16.gmra.mrb[128].mxu1 %v3726_v27  ;;  %3431 = vmatmul.mubr.bf16.gmra.mrb[128].mxu0 %v3727_v28  ;;  %v1620_v27 = vadd.f32 %v4139_v5, %v4134_v1  ;;  %v1625_v5 = vadd.f32 %v4148_v15, %v4134_v1 }
 0x127   : > { %v4217_v43 = vadd.f32 %v3030_v41, %v4134_v1  ;;  %2158 = vmatprep.mubr.bf16.mxu1 %v3728_v34  ;;  %3434 = vmatprep.mubr.msk.bf16.mxu0 %vm3753_vm0, %v3752_v12 }
 0x129   : > { %v2983_v44 = vpop.f32.mrb[24].mxu0  ;;  %v3031_v45 = vpop.f32.mrb[24].mxu1 }
 0x12a   : > { %v2984_v46 = vpop.f32.mrb[25].mxu0  ;;  %v3032_v47 = vpop.f32.mrb[25].mxu1 }
 0x12b   : > { %v4223_v51 = vadd.f32 %v2984_v46, %v2983_v44  ;;  %v2986_v52 = vpop.f32.mrb[26].mxu0  ;;  %v3033_v53 = vadd.f32 %v3032_v47, %v3031_v45  ;;  %v3034_v54 = vpop.f32.mrb[26].mxu1  ;;  %v3738_v44 = vld [vmem:[%s3815_s9 + $0x3c0] ss:$36 sps:$4 sm:$0xff]  }
 0x12c   : > { %v2987_v58 = vpop.f32.mrb[27].mxu0  ;;  %v3035_v61 = vpop.f32.mrb[27].mxu1  ;;  %v3739_v45 = vld [vmem:[%s3815_s9 + $0x380] ss:$36 sps:$4 sm:$0xff]  }
 0x12d   : > { %v4227_v62 = vadd.f32 %v3033_v53, %v4134_v1  ;;  %v4229_v63 = vadd.f32 %v2987_v58, %v2986_v52  ;;  %v2714_v52 = vcombine.high %v321_v33, %v321_v33  ;;  %v1628_v53 = vadd.f32 %v4154_v23, %v4134_v1 }
 0x12e   : > { %2159 = vmatmul.mubr.bf16.gmra.mrb[132].mxu1 %v3730_v48  ;;  %3435 = vmatmul.mubr.bf16.gmra.mrb[132].mxu0 %v3731_v50 }
 0x12f   : > { %2166 = vmatprep.mubr.bf16.mxu1 %v3732_v55  ;;  %3438 = vmatprep.mubr.msk.bf16.mxu0 %vm3753_vm0, %v3752_v12 }
 0x131   : > { %v2989_v0 = vpop.f32.mrb[28].mxu0  ;;  %v3053_v2 = vpop.f32.mrb[28].mxu1 }
 0x132   : > { %v2990_v3 = vpop.f32.mrb[29].mxu0  ;;  %v3054_v8 = vpop.f32.mrb[29].mxu1 }
 0x133   : > { %v4237_v13 = vadd.f32 %v2990_v3, %v2989_v0  ;;  %v3055_v14 = vadd.f32 %v3054_v8, %v3053_v2  ;;  %v2992_v18 = vpop.f32.mrb[30].mxu0  ;;  %v3056_v20 = vpop.f32.mrb[30].mxu1 }
 0x134   : > { %v2993_v24 = vpop.f32.mrb[31].mxu0  ;;  %v3057_v26 = vpop.f32.mrb[31].mxu1 }
 0x135   : > { %v1769_v28 = vadd.f32 %v3055_v14, %v1617_v11  ;;  %v4242_v30 = vadd.f32 %v2993_v24, %v2992_v18  ;;  %v3058_v31 = vadd.f32 %v3057_v26, %v3056_v20  ;;  %v2713_v11 = vcombine.low %v321_v33, %v321_v33  ;;  %v3742_v14 = vld [vmem:[%s3815_s9 + $0x3c8] ss:$36 sps:$4 sm:$0xff]  }
 0x136   : > { %2167 = vmatmul.mubr.bf16.gmra.mrb[136].mxu1 %v3734_v9  ;;  %3439 = vmatmul.mubr.bf16.gmra.mrb[136].mxu0 %v3735_v10  ;;  %v1633_v18 = vadd.f32 %v4163_v32, %v4134_v1 }
 0x137   : > { %v1772_v60 = vadd.f32 %v3058_v31, %v1620_v27  ;;  %2174 = vmatprep.mubr.bf16.mxu1 %v3736_v21  ;;  %3442 = vmatprep.mubr.msk.bf16.mxu0 %vm3753_vm0, %v3752_v12  ;;  %v1636_v27 = vadd.f32 %v4169_v40, %v4134_v1 }
 0x139   : > { %v3059_v34 = vpop.f32.mrb[32].mxu1  ;;  %v3159_v35 = vpop.f32.mrb[32].mxu0 }
 0x13a   : > { %v3060_v36 = vpop.f32.mrb[33].mxu1  ;;  %v3160_v41 = vpop.f32.mrb[33].mxu0 }
 0x13b   : > { %v3061_v46 = vadd.f32 %v3060_v36, %v3059_v34  ;;  %v3161_v47 = vadd.f32 %v3160_v41, %v3159_v35  ;;  %v3062_v48 = vpop.f32.mrb[34].mxu1  ;;  %v3162_v50 = vpop.f32.mrb[34].mxu0 }
 0x13c   : > { %v3063_v54 = vpop.f32.mrb[35].mxu1  ;;  %v3163_v55 = vpop.f32.mrb[35].mxu0 }
 0x13d   : > { %v1777_v58 = vadd.f32 %v3061_v46, %v1625_v5  ;;  %v4253_v61 = vadd.f32 %v3161_v47, %v1769_v28  ;;  %v3064_v0 = vadd.f32 %v3063_v54, %v3062_v48  ;;  %v3164_v2 = vadd.f32 %v3163_v55, %v3162_v50  ;;  %v3743_v5 = vld [vmem:[%s3815_s9 + $0x410] ss:$0 sps:$4 sm:$0xff]   ;;  %s2579_s9 = sshll.u32 %s4412_s16, 2 }
 0x13e   : > { %2175 = vmatmul.mubr.bf16.gmra.mrb[140].mxu1 %v3738_v44  ;;  %3443 = vmatmul.mubr.bf16.gmra.mrb[140].mxu0 %v3739_v45  ;;  %v1641_v46 = vadd.f32 %v4178_v49, %v4134_v1  ;;  %s4361_s22 = scalar_lea.vmem %s4410_s3, %s2579_s9 }
 0x13f   : > { %v1780_v3 = vadd.f32 %v3064_v0, %v1628_v53  ;;  %v4255_v15 = vadd.f32 %v3164_v2, %v1772_v60  ;;  %2182 = vmatprep.mubr.bf16.mxu1 %v2714_v52  ;;  %3446 = vmatprep.mubr.msk.bf16.mxu0 %vm3753_vm0, %v3752_v12  ;;  %v1644_v53 = vadd.f32 %v4184_v57, %v4134_v1 }
 0x141   : > { %v3065_v8 = vpop.f32.mrb[36].mxu1  ;;  %v3165_v9 = vpop.f32.mrb[36].mxu0 }
 0x142   : > { %v3066_v23 = vpop.f32.mrb[37].mxu1  ;;  %v3166_v10 = vpop.f32.mrb[37].mxu0 }
 0x143   : > { %v3067_v20 = vadd.f32 %v3066_v23, %v3065_v8  ;;  %v3167_v21 = vadd.f32 %v3166_v10, %v3165_v9  ;;  %v3068_v24 = vpop.f32.mrb[38].mxu1  ;;  %v3168_v26 = vpop.f32.mrb[38].mxu0 }
 0x144   : > { %v3069_v28 = vpop.f32.mrb[39].mxu1  ;;  %v3169_v31 = vpop.f32.mrb[39].mxu0 }
 0x145   : > { %v1785_v60 = vadd.f32 %v3067_v20, %v1633_v18  ;;  %v4264_v34 = vadd.f32 %v3167_v21, %v1777_v58  ;;  %v3070_v35 = vadd.f32 %v3069_v28, %v3068_v24  ;;  %v3170_v36 = vadd.f32 %v3169_v31, %v3168_v26 }
 0x146   : > { %2183 = vmatmul.mubr.bf16.gmra.mrb[144].mxu1 %v2713_v11  ;;  %3447 = vmatmul.mubr.bf16.gmra.mrb[144].mxu0 %v3742_v14  ;;  %v1649_v11 = vadd.f32 %v4193_v6, %v4134_v1  ;;  %v1652_v21 = vadd.f32 %v4199_v17, %v4134_v1 }
 0x147   : > { %v1788_v33 = vadd.f32 %v3070_v35, %v1636_v27  ;;  %v4266_v41 = vadd.f32 %v3170_v36, %v1780_v3  ;;  %3450 = vmatprep.mubr.msk.bf16.mxu0 %vm3753_vm0, %v3752_v12 }
 0x149   : > { %v3071_v32 = vpop.f32.mrb[40].mxu1  ;;  %v3171_v44 = vpop.f32.mrb[40].mxu0 }
 0x14a   : > { %v3072_v45 = vpop.f32.mrb[41].mxu1  ;;  %v3172_v40 = vpop.f32.mrb[41].mxu0 }
 0x14b   : > { %v3073_v47 = vadd.f32 %v3072_v45, %v3071_v32  ;;  %v3173_v48 = vadd.f32 %v3172_v40, %v3171_v44  ;;  %v3074_v50 = vpop.f32.mrb[42].mxu1  ;;  %v3174_v52 = vpop.f32.mrb[42].mxu0  ;;  %v1657_v45 = vadd.f32 %v4208_v29, %v4134_v1 }
 0x14c   : > { %v3075_v54 = vpop.f32.mrb[43].mxu1  ;;  %v3175_v55 = vpop.f32.mrb[43].mxu0 }
 0x14d   : > { %v1793_v58 = vadd.f32 %v3073_v47, %v1641_v46  ;;  %v4275_v0 = vadd.f32 %v3173_v48, %v1785_v60  ;;  %v3076_v12 = vadd.f32 %v3075_v54, %v3074_v50  ;;  %v3176_v2 = vadd.f32 %v3175_v55, %v3174_v52 }
 0x14e   : > { %3451 = vmatmul.mubr.bf16.gmra.mrb[148].mxu0 %v3743_v5  ;;  %v1660_v47 = vadd.f32 %v4214_v38, %v4134_v1 }
 0x14f   : > { %v1796_v3 = vadd.f32 %v3076_v12, %v1644_v53  ;;  %v4277_v8 = vadd.f32 %v3176_v2, %v1788_v33 }
 0x151   : > { %v3077_v9 = vpop.f32.mrb[44].mxu1  ;;  %v3177_v49 = vpop.f32.mrb[44].mxu0 }
 0x152   : > { %v3078_v23 = vpop.f32.mrb[45].mxu1  ;;  %v3178_v10 = vpop.f32.mrb[45].mxu0 }
 0x153   : > { %v3079_v14 = vadd.f32 %v3078_v23, %v3077_v9  ;;  %v3179_v57 = vadd.f32 %v3178_v10, %v3177_v49  ;;  %v3080_v18 = vpop.f32.mrb[46].mxu1  ;;  %v3180_v20 = vpop.f32.mrb[46].mxu0  ;;  %v1665_v49 = vadd.f32 %v4223_v51, %v4134_v1 }
 0x154   : > { %v3081_v24 = vpop.f32.mrb[47].mxu1  ;;  %v3181_v26 = vpop.f32.mrb[47].mxu0 }
 0x155   : > { %v1801_v27 = vadd.f32 %v3079_v14, %v1649_v11  ;;  %v4283_v28 = vadd.f32 %v3179_v57, %v1793_v58  ;;  %v3082_v31 = vadd.f32 %v3081_v24, %v3080_v18  ;;  %v3182_v60 = vadd.f32 %v3181_v26, %v3180_v20 }
 0x156   : > { %v1668_v14 = vadd.f32 %v4229_v63, %v4134_v1 }
 0x157   : > { %v1804_v35 = vadd.f32 %v3082_v31, %v1652_v21  ;;  %v4285_v36 = vadd.f32 %v3182_v60, %v1796_v3 }
 0x159   : > { %v3083_v33 = vpop.f32.mrb[48].mxu1  ;;  %v3183_v32 = vpop.f32.mrb[48].mxu0 }
 0x15a   : > { %v3084_v6 = vpop.f32.mrb[49].mxu1  ;;  %v3184_v44 = vpop.f32.mrb[49].mxu0 }
 0x15b   : > { %v3085_v40 = vadd.f32 %v3084_v6, %v3083_v33  ;;  %v3185_v5 = vadd.f32 %v3184_v44, %v3183_v32  ;;  %v3086_v17 = vpop.f32.mrb[50].mxu1  ;;  %v3186_v46 = vpop.f32.mrb[50].mxu0  ;;  %v1673_v32 = vadd.f32 %v4237_v13, %v4134_v1 }
 0x15c   : > { %v3087_v48 = vpop.f32.mrb[51].mxu1  ;;  %v3187_v50 = vpop.f32.mrb[51].mxu0 }
 0x15d   : > { %v1809_v52 = vadd.f32 %v3085_v40, %v1657_v45  ;;  %v4291_v53 = vadd.f32 %v3185_v5, %v1801_v27  ;;  %v3088_v54 = vadd.f32 %v3087_v48, %v3086_v17  ;;  %v3188_v55 = vadd.f32 %v3187_v50, %v3186_v46 }
 0x15e   : > { %v1676_v40 = vadd.f32 %v4242_v30, %v4134_v1 }
 0x15f   : > { %v1812_v58 = vadd.f32 %v3088_v54, %v1660_v47  ;;  %v4293_v12 = vadd.f32 %v3188_v55, %v1804_v35 }
 0x161   : > { %v3089_v2 = vpop.f32.mrb[52].mxu1  ;;  %v3189_v3 = vpop.f32.mrb[52].mxu0 }
 0x162   : > { %v3090_v29 = vpop.f32.mrb[53].mxu1  ;;  %v3190_v9 = vpop.f32.mrb[53].mxu0 }
 0x163   : > { %v3091_v23 = vadd.f32 %v3090_v29, %v3089_v2  ;;  %v3191_v10 = vadd.f32 %v3190_v9, %v3189_v3  ;;  %v3092_v38 = vpop.f32.mrb[54].mxu1  ;;  %v3192_v11 = vpop.f32.mrb[54].mxu0 }
 0x164   : > { %v3093_v57 = vpop.f32.mrb[55].mxu1  ;;  %v3193_v18 = vpop.f32.mrb[55].mxu0 }
 0x165   : > { %v1817_v20 = vadd.f32 %v3091_v23, %v1665_v49  ;;  %v4299_v21 = vadd.f32 %v3191_v10, %v1809_v52  ;;  %v3094_v24 = vadd.f32 %v3093_v57, %v3092_v38  ;;  %v3194_v26 = vadd.f32 %v3193_v18, %v3192_v11 }
 0x167   : > { %v1820_v27 = vadd.f32 %v3094_v24, %v1668_v14  ;;  %v4301_v31 = vadd.f32 %v3194_v26, %v1812_v58 }
 0x169   : > { %v3095_v60 = vpop.f32.mrb[56].mxu1  ;;  %v3195_v35 = vpop.f32.mrb[56].mxu0 }
 0x16a   : > { %v3096_v51 = vpop.f32.mrb[57].mxu1  ;;  %v3196_v33 = vpop.f32.mrb[57].mxu0 }
 0x16b   : > { %v3097_v6 = vadd.f32 %v3096_v51, %v3095_v60  ;;  %v3197_v44 = vadd.f32 %v3196_v33, %v3195_v35  ;;  %v3098_v63 = vpop.f32.mrb[58].mxu1  ;;  %v3198_v45 = vpop.f32.mrb[58].mxu0 }
 0x16c   : > { %v3099_v5 = vpop.f32.mrb[59].mxu1  ;;  %v3199_v17 = vpop.f32.mrb[59].mxu0 }
 0x16d   : > { %v1825_v46 = vadd.f32 %v3097_v6, %v1673_v32  ;;  %v4307_v47 = vadd.f32 %v3197_v44, %v1817_v20  ;;  %v3100_v48 = vadd.f32 %v3099_v5, %v3098_v63  ;;  %v3200_v50 = vadd.f32 %v3199_v17, %v3198_v45 }
 0x16f   : > { %v1828_v52 = vadd.f32 %v3100_v48, %v1676_v40  ;;  %v4309_v54 = vadd.f32 %v3200_v50, %v1820_v27 }
 0x171   : > { %v3101_v55 = vpop.f32.mrb[60].mxu1  ;;  %v3201_v58 = vpop.f32.mrb[60].mxu0 }
 0x172   : > { %v3102_v13 = vpop.f32.mrb[61].mxu1  ;;  %v3202_v2 = vpop.f32.mrb[61].mxu0 }
 0x173   : > { %v3103_v3 = vadd.f32 %v3102_v13, %v3101_v55  ;;  %v3203_v29 = vadd.f32 %v3202_v2, %v3201_v58  ;;  %v3104_v9 = vpop.f32.mrb[62].mxu1  ;;  %v3204_v49 = vpop.f32.mrb[62].mxu0 }
 0x174   : > { %v3105_v23 = vpop.f32.mrb[63].mxu1  ;;  %v3205_v1 = vpop.f32.mrb[63].mxu0 }
 0x175   : > { %v1833_v30 = vadd.f32 %v3103_v3, %v4137_v4  ;;  %v4312_v10 = vadd.f32 %v3203_v29, %v1825_v46  ;;  %v3106_v38 = vadd.f32 %v3105_v23, %v3104_v9  ;;  %v3206_v11 = vadd.f32 %v3205_v1, %v3204_v49 }
 0x177   : > { %v1836_v14 = vadd.f32 %v3106_v38, %v4142_v7  ;;  %v4315_v57 = vadd.f32 %v3206_v11, %v1828_v52 }
 0x179   : > { %v3107_v18 = vpop.f32.mrb[64].mxu1  ;;  %v3207_v20 = vpop.f32.mrb[64].mxu0 }
 0x17a   : > { %v3108_v24 = vpop.f32.mrb[65].mxu1  ;;  %v3208_v26 = vpop.f32.mrb[65].mxu0 }
 0x17b   : > { %v3109_v27 = vadd.f32 %v3108_v24, %v3107_v18  ;;  %v3209_v60 = vadd.f32 %v3208_v26, %v3207_v20  ;;  %v3110_v35 = vpop.f32.mrb[66].mxu1  ;;  %v3210_v51 = vpop.f32.mrb[66].mxu0 }
 0x17c   : > { %v3111_v33 = vpop.f32.mrb[67].mxu1  ;;  %v3211_v32 = vpop.f32.mrb[67].mxu0 }
 0x17d   : > { %v1841_v4 = vadd.f32 %v3109_v27, %v4152_v22  ;;  %v4318_v6 = vadd.f32 %v3209_v60, %v1833_v30  ;;  %v3112_v44 = vadd.f32 %v3111_v33, %v3110_v35  ;;  %v3212_v63 = vadd.f32 %v3211_v32, %v3210_v51 }
 0x17f   : > { %v1844_v7 = vadd.f32 %v3112_v44, %v4157_v25  ;;  %v4321_v45 = vadd.f32 %v3212_v63, %v1836_v14 }
 0x181   : > { %v3113_v40 = vpop.f32.mrb[68].mxu1  ;;  %v3213_v5 = vpop.f32.mrb[68].mxu0 }
 0x182   : > { %v3114_v17 = vpop.f32.mrb[69].mxu1  ;;  %v3214_v46 = vpop.f32.mrb[69].mxu0 }
 0x183   : > { %v3115_v48 = vadd.f32 %v3114_v17, %v3113_v40  ;;  %v3215_v50 = vadd.f32 %v3214_v46, %v3213_v5  ;;  %v3116_v52 = vpop.f32.mrb[70].mxu1  ;;  %v3216_v55 = vpop.f32.mrb[70].mxu0 }
 0x184   : > { %v3117_v58 = vpop.f32.mrb[71].mxu1  ;;  %v3217_v13 = vpop.f32.mrb[71].mxu0 }
 0x185   : > { %v1849_v22 = vadd.f32 %v3115_v48, %v4167_v39  ;;  %v4324_v2 = vadd.f32 %v3215_v50, %v1841_v4  ;;  %v3118_v3 = vadd.f32 %v3117_v58, %v3116_v52  ;;  %v3218_v29 = vadd.f32 %v3217_v13, %v3216_v55 }
 0x187   : > { %v1852_v25 = vadd.f32 %v3118_v3, %v4172_v42  ;;  %v4327_v9 = vadd.f32 %v3218_v29, %v1844_v7 }
 0x189   : > { %v3119_v49 = vpop.f32.mrb[72].mxu1  ;;  %v3219_v23 = vpop.f32.mrb[72].mxu0 }
 0x18a   : > { %v3120_v1 = vpop.f32.mrb[73].mxu1  ;;  %v3220_v30 = vpop.f32.mrb[73].mxu0 }
 0x18b   : > { %v3121_v38 = vadd.f32 %v3120_v1, %v3119_v49  ;;  %v3221_v11 = vadd.f32 %v3220_v30, %v3219_v23  ;;  %v3122_v14 = vpop.f32.mrb[74].mxu1  ;;  %v3222_v18 = vpop.f32.mrb[74].mxu0 }
 0x18c   : > { %v3123_v20 = vpop.f32.mrb[75].mxu1  ;;  %v3223_v24 = vpop.f32.mrb[75].mxu0 }
 0x18d   : > { %v1857_v39 = vadd.f32 %v3121_v38, %v4182_v56  ;;  %v4330_v26 = vadd.f32 %v3221_v11, %v1849_v22  ;;  %v3124_v27 = vadd.f32 %v3123_v20, %v3122_v14  ;;  %v3224_v60 = vadd.f32 %v3223_v24, %v3222_v18 }
 0x18f   : > { %v1860_v42 = vadd.f32 %v3124_v27, %v4187_v59  ;;  %v4333_v35 = vadd.f32 %v3224_v60, %v1852_v25 }
 0x191   : > { %v3125_v51 = vpop.f32.mrb[76].mxu1  ;;  %v3225_v33 = vpop.f32.mrb[76].mxu0 }
 0x192   : > { %v3126_v32 = vpop.f32.mrb[77].mxu1  ;;  %v3226_v4 = vpop.f32.mrb[77].mxu0 }
 0x193   : > { %v3127_v44 = vadd.f32 %v3126_v32, %v3125_v51  ;;  %v3227_v63 = vadd.f32 %v3226_v4, %v3225_v33  ;;  %v3128_v7 = vpop.f32.mrb[78].mxu1  ;;  %v3228_v40 = vpop.f32.mrb[78].mxu0 }
 0x194   : > { %v3129_v5 = vpop.f32.mrb[79].mxu1  ;;  %v3229_v17 = vpop.f32.mrb[79].mxu0 }
 0x195   : > { %v1865_v56 = vadd.f32 %v3127_v44, %v4197_v16  ;;  %v4336_v46 = vadd.f32 %v3227_v63, %v1857_v39  ;;  %v3130_v48 = vadd.f32 %v3129_v5, %v3128_v7  ;;  %v3230_v50 = vadd.f32 %v3229_v17, %v3228_v40 }
 0x197   : > { %v1868_v59 = vadd.f32 %v3130_v48, %v4202_v19  ;;  %v4339_v52 = vadd.f32 %v3230_v50, %v1860_v42 }
 0x199   : > { %v3131_v55 = vpop.f32.mrb[80].mxu1  ;;  %v3231_v58 = vpop.f32.mrb[80].mxu0 }
 0x19a   : > { %v3132_v13 = vpop.f32.mrb[81].mxu1  ;;  %v3232_v22 = vpop.f32.mrb[81].mxu0 }
 0x19b   : > { %v3133_v3 = vadd.f32 %v3132_v13, %v3131_v55  ;;  %v3233_v29 = vadd.f32 %v3232_v22, %v3231_v58  ;;  %v3134_v25 = vpop.f32.mrb[82].mxu1  ;;  %v3234_v49 = vpop.f32.mrb[82].mxu0 }
 0x19c   : > { %v3135_v23 = vpop.f32.mrb[83].mxu1  ;;  %v3235_v1 = vpop.f32.mrb[83].mxu0 }
 0x19d   : > { %v1873_v16 = vadd.f32 %v3133_v3, %v4212_v37  ;;  %v4342_v30 = vadd.f32 %v3233_v29, %v1865_v56  ;;  %v3136_v38 = vadd.f32 %v3135_v23, %v3134_v25  ;;  %v3236_v11 = vadd.f32 %v3235_v1, %v3234_v49 }
 0x19f   : > { %v1876_v19 = vadd.f32 %v3136_v38, %v4217_v43  ;;  %v4345_v14 = vadd.f32 %v3236_v11, %v1868_v59 }
 0x1a1   : > { %v3137_v18 = vpop.f32.mrb[84].mxu1  ;;  %v3237_v20 = vpop.f32.mrb[84].mxu0 }
 0x1a2   : > { %v3138_v24 = vpop.f32.mrb[85].mxu1  ;;  %v3238_v39 = vpop.f32.mrb[85].mxu0 }
 0x1a3   : > { %v3139_v27 = vadd.f32 %v3138_v24, %v3137_v18  ;;  %v3239_v60 = vadd.f32 %v3238_v39, %v3237_v20  ;;  %v3240_v42 = vpop.f32.mrb[86].mxu0  ;;  %v3140_v51 = vpop.f32.mrb[86].mxu1 }
 0x1a4   : > { %v3241_v33 = vpop.f32.mrb[87].mxu0  ;;  %v3141_v32 = vpop.f32.mrb[87].mxu1 }
 0x1a5   : > { %v1881_v37 = vadd.f32 %v3139_v27, %v4227_v62  ;;  %v4348_v4 = vadd.f32 %v3239_v60, %v1873_v16  ;;  %v3242_v44 = vadd.f32 %v3241_v33, %v3240_v42 }
 0x1a7   : > { %v4350_v63 = vadd.f32 %v3242_v44, %v1876_v19 }
 0x1a9   : > { %v3243_v43 = vpop.f32.mrb[88].mxu0  ;;  %v3265_v7 = vpop.f32.mrb[88].mxu1 }
 0x1aa   : > { %v3244_v40 = vpop.f32.mrb[89].mxu0  ;;  %v3266_v5 = vpop.f32.mrb[89].mxu1 }
 0x1ab   : > { %v3245_v17 = vadd.f32 %v3244_v40, %v3243_v43  ;;  %v3267_v56 = vadd.f32 %v3266_v5, %v3265_v7  ;;  %v3246_v48 = vpop.f32.mrb[90].mxu0  ;;  %v3268_v50 = vpop.f32.mrb[90].mxu1 }
 0x1ac   : > { %v3247_v59 = vpop.f32.mrb[91].mxu0  ;;  %v3269_v55 = vpop.f32.mrb[91].mxu1 }
 0x1ad   : > { %v4352_v58 = vadd.f32 %v3245_v17, %v1881_v37  ;;  %v3270_v13 = vadd.f32 %v3269_v55, %v3268_v50  ;;  %v2073_v62 = vadd.f32 %v3267_v56, %v4253_v61 }
 0x1af   : > { %v2076_v22 = vadd.f32 %v3270_v13, %v4255_v15 }
 0x1b1   : > { %v3271_v3 = vpop.f32.mrb[92].mxu1  ;;  %v2224_v29 = vpop.f32.mrb[92].mxu0 }
 0x1b2   : > { %v2225_v25 = vadd.f32 %v2224_v29, %v2073_v62  ;;  %v3272_v49 = vpop.f32.mrb[93].mxu1  ;;  %v3396_v23 = vpop.f32.mrb[93].mxu0 }
 0x1b3   : > { %v3273_v1 = vadd.f32 %v3272_v49, %v3271_v3  ;;  %v3274_v16 = vpop.f32.mrb[94].mxu1  ;;  %v2227_v38 = vpop.f32.mrb[94].mxu0 }
 0x1b4   : > { %v2228_v11 = vadd.f32 %v2227_v38, %v2076_v22  ;;  %v3275_v19 = vpop.f32.mrb[95].mxu1  ;;  %v3397_v18 = vpop.f32.mrb[95].mxu0  ;;  %v2342_v39 = vmax.f32 %v2225_v25, 0.0 }
 0x1b5   : > { %v3276_v20 = vadd.f32 %v3275_v19, %v3274_v16  ;;  %v2081_v24 = vadd.f32 %v3273_v1, %v4264_v34 }
 0x1b6   : > { %v2343_v27 = vmax.f32 %v2228_v11, 0.0 }
 0x1b7   : > { %v2084_v61 = vadd.f32 %v3276_v20, %v4266_v41 }
 0x1b8   : > { %v2851_v15 = vpack.c.bf16 %v2343_v27, %v2342_v39 }
 0x1b9   : > { %v3277_v60 = vpop.f32.mrb[96].mxu1  ;;  %v2232_v42 = vpop.f32.mrb[96].mxu0 }
 0x1ba   : > { %2852 = vst [vmem:[%s4361_s22] sm:$0xff] %v2851_v15   ;;  %v2233_v51 = vadd.f32 %v2232_v42, %v2081_v24  ;;  %v3278_v33 = vpop.f32.mrb[97].mxu1  ;;  %v3400_v32 = vpop.f32.mrb[97].mxu0 }
 0x1bb   : > { %v3279_v37 = vadd.f32 %v3278_v33, %v3277_v60  ;;  %v3280_v34 = vpop.f32.mrb[98].mxu1  ;;  %v2235_v44 = vpop.f32.mrb[98].mxu0 }
 0x1bc   : > { %v2236_v43 = vadd.f32 %v2235_v44, %v2084_v61  ;;  %v3281_v7 = vpop.f32.mrb[99].mxu1  ;;  %v3401_v40 = vpop.f32.mrb[99].mxu0  ;;  %v2344_v56 = vmax.f32 %v2233_v51, 0.0 }
 0x1bd   : > { %v3282_v5 = vadd.f32 %v3281_v7, %v3280_v34  ;;  %v2089_v17 = vadd.f32 %v3279_v37, %v4275_v0 }
 0x1be   : > { %v2345_v48 = vmax.f32 %v2236_v43, 0.0 }
 0x1bf   : > { %v2092_v41 = vadd.f32 %v3282_v5, %v4277_v8 }
 0x1c0   : > { %v2856_v50 = vpack.c.bf16 %v2345_v48, %v2344_v56 }
 0x1c1   : > { %v3283_v59 = vpop.f32.mrb[100].mxu1  ;;  %v2240_v55 = vpop.f32.mrb[100].mxu0 }
 0x1c2   : > { %2918 = vst [vmem:[%s4361_s22 + $0x8] sm:$0xff] %v2856_v50   ;;  %v2241_v13 = vadd.f32 %v2240_v55, %v2089_v17  ;;  %v3284_v62 = vpop.f32.mrb[101].mxu1  ;;  %v3404_v22 = vpop.f32.mrb[101].mxu0 }
 0x1c3   : > { %v3285_v3 = vadd.f32 %v3284_v62, %v3283_v59  ;;  %v3286_v29 = vpop.f32.mrb[102].mxu1  ;;  %v2243_v25 = vpop.f32.mrb[102].mxu0 }
 0x1c4   : > { %v2244_v49 = vadd.f32 %v2243_v25, %v2092_v41  ;;  %v3287_v23 = vpop.f32.mrb[103].mxu1  ;;  %v3405_v1 = vpop.f32.mrb[103].mxu0  ;;  %v2346_v38 = vmax.f32 %v2241_v13, 0.0 }
 0x1c5   : > { %v3288_v16 = vadd.f32 %v3287_v23, %v3286_v29  ;;  %v2097_v0 = vadd.f32 %v3285_v3, %v4283_v28 }
 0x1c6   : > { %v2347_v11 = vmax.f32 %v2244_v49, 0.0 }
 0x1c7   : > { %v2100_v8 = vadd.f32 %v3288_v16, %v4285_v36 }
 0x1c8   : > { %v2861_v19 = vpack.c.bf16 %v2347_v11, %v2346_v38 }
 0x1c9   : > { %v3289_v18 = vpop.f32.mrb[104].mxu1  ;;  %v2248_v20 = vpop.f32.mrb[104].mxu0 }
 0x1ca   : > { %2919 = vst [vmem:[%s4361_s22 + $0x10] sm:$0xff] %v2861_v19   ;;  %v2249_v24 = vadd.f32 %v2248_v20, %v2097_v0  ;;  %v3290_v39 = vpop.f32.mrb[105].mxu1  ;;  %v3408_v27 = vpop.f32.mrb[105].mxu0 }
 0x1cb   : > { %v3291_v61 = vadd.f32 %v3290_v39, %v3289_v18  ;;  %v3292_v15 = vpop.f32.mrb[106].mxu1  ;;  %v2251_v60 = vpop.f32.mrb[106].mxu0 }
 0x1cc   : > { %v2252_v42 = vadd.f32 %v2251_v60, %v2100_v8  ;;  %v3293_v51 = vpop.f32.mrb[107].mxu1  ;;  %v3409_v33 = vpop.f32.mrb[107].mxu0  ;;  %v2348_v37 = vmax.f32 %v2249_v24, 0.0 }
 0x1cd   : > { %v3294_v32 = vadd.f32 %v3293_v51, %v3292_v15  ;;  %v2105_v28 = vadd.f32 %v3291_v61, %v4291_v53 }
 0x1ce   : > { %v2349_v34 = vmax.f32 %v2252_v42, 0.0 }
 0x1cf   : > { %v2108_v36 = vadd.f32 %v3294_v32, %v4293_v12 }
 0x1d0   : > { %v2866_v44 = vpack.c.bf16 %v2349_v34, %v2348_v37 }
 0x1d1   : > { %v3295_v43 = vpop.f32.mrb[108].mxu1  ;;  %v2256_v7 = vpop.f32.mrb[108].mxu0 }
 0x1d2   : > { %2920 = vst [vmem:[%s4361_s22 + $0x18] sm:$0xff] %v2866_v44   ;;  %v2257_v40 = vadd.f32 %v2256_v7, %v2105_v28  ;;  %v3296_v5 = vpop.f32.mrb[109].mxu1  ;;  %v3412_v17 = vpop.f32.mrb[109].mxu0 }
 0x1d3   : > { %v3297_v56 = vadd.f32 %v3296_v5, %v3295_v43  ;;  %v3298_v48 = vpop.f32.mrb[110].mxu1  ;;  %v2259_v41 = vpop.f32.mrb[110].mxu0 }
 0x1d4   : > { %v2260_v50 = vadd.f32 %v2259_v41, %v2108_v36  ;;  %v3299_v59 = vpop.f32.mrb[111].mxu1  ;;  %v3413_v55 = vpop.f32.mrb[111].mxu0  ;;  %v2350_v62 = vmax.f32 %v2257_v40, 0.0 }
 0x1d5   : > { %v3300_v13 = vadd.f32 %v3299_v59, %v3298_v48  ;;  %v2113_v53 = vadd.f32 %v3297_v56, %v4299_v21 }
 0x1d6   : > { %v2351_v22 = vmax.f32 %v2260_v50, 0.0 }
 0x1d7   : > { %v2116_v12 = vadd.f32 %v3300_v13, %v4301_v31 }
 0x1d8   : > { %v2871_v3 = vpack.c.bf16 %v2351_v22, %v2350_v62 }
 0x1d9   : > { %v3301_v29 = vpop.f32.mrb[112].mxu1  ;;  %v2264_v25 = vpop.f32.mrb[112].mxu0 }
 0x1da   : > { %2921 = vst [vmem:[%s4361_s22 + $0x20] sm:$0xff] %v2871_v3   ;;  %v2265_v49 = vadd.f32 %v2264_v25, %v2113_v53  ;;  %v3302_v23 = vpop.f32.mrb[113].mxu1  ;;  %v3416_v1 = vpop.f32.mrb[113].mxu0 }
 0x1db   : > { %v3303_v16 = vadd.f32 %v3302_v23, %v3301_v29  ;;  %v3304_v0 = vpop.f32.mrb[114].mxu1  ;;  %v2267_v38 = vpop.f32.mrb[114].mxu0 }
 0x1dc   : > { %v2268_v11 = vadd.f32 %v2267_v38, %v2116_v12  ;;  %v3305_v8 = vpop.f32.mrb[115].mxu1  ;;  %v3417_v19 = vpop.f32.mrb[115].mxu0  ;;  %v2352_v20 = vmax.f32 %v2265_v49, 0.0 }
 0x1dd   : > { %v3306_v18 = vadd.f32 %v3305_v8, %v3304_v0  ;;  %v2121_v21 = vadd.f32 %v3303_v16, %v4307_v47 }
 0x1de   : > { %v2353_v24 = vmax.f32 %v2268_v11, 0.0 }
 0x1df   : > { %v2124_v31 = vadd.f32 %v3306_v18, %v4309_v54 }
 0x1e0   : > { %v2876_v39 = vpack.c.bf16 %v2353_v24, %v2352_v20 }
 0x1e1   : > { %v3307_v27 = vpop.f32.mrb[116].mxu1  ;;  %v2272_v61 = vpop.f32.mrb[116].mxu0 }
 0x1e2   : > { %2922 = vst [vmem:[%s4361_s22 + $0x28] sm:$0xff] %v2876_v39   ;;  %v2273_v15 = vadd.f32 %v2272_v61, %v2121_v21  ;;  %v3308_v60 = vpop.f32.mrb[117].mxu1  ;;  %v3420_v42 = vpop.f32.mrb[117].mxu0 }
 0x1e3   : > { %v3309_v51 = vadd.f32 %v3308_v60, %v3307_v27  ;;  %v3310_v33 = vpop.f32.mrb[118].mxu1  ;;  %v2275_v32 = vpop.f32.mrb[118].mxu0 }
 0x1e4   : > { %v2276_v28 = vadd.f32 %v2275_v32, %v2124_v31  ;;  %v3311_v37 = vpop.f32.mrb[119].mxu1  ;;  %v3421_v34 = vpop.f32.mrb[119].mxu0  ;;  %v2354_v44 = vmax.f32 %v2273_v15, 0.0 }
 0x1e5   : > { %v3312_v36 = vadd.f32 %v3311_v37, %v3310_v33  ;;  %v2129_v47 = vadd.f32 %v3309_v51, %v4312_v10 }
 0x1e6   : > { %v2355_v43 = vmax.f32 %v2276_v28, 0.0 }
 0x1e7   : > { %v2132_v54 = vadd.f32 %v3312_v36, %v4315_v57 }
 0x1e8   : > { %v2881_v7 = vpack.c.bf16 %v2355_v43, %v2354_v44 }
 0x1e9   : > { %v3313_v40 = vpop.f32.mrb[120].mxu1  ;;  %v2280_v5 = vpop.f32.mrb[120].mxu0 }
 0x1ea   : > { %2923 = vst [vmem:[%s4361_s22 + $0x30] sm:$0xff] %v2881_v7   ;;  %v2281_v17 = vadd.f32 %v2280_v5, %v2129_v47  ;;  %v3314_v56 = vpop.f32.mrb[121].mxu1  ;;  %v3424_v48 = vpop.f32.mrb[121].mxu0 }
 0x1eb   : > { %v3315_v41 = vadd.f32 %v3314_v56, %v3313_v40  ;;  %v3316_v50 = vpop.f32.mrb[122].mxu1  ;;  %v2283_v59 = vpop.f32.mrb[122].mxu0 }
 0x1ec   : > { %v2284_v55 = vadd.f32 %v2283_v59, %v2132_v54  ;;  %v3317_v13 = vpop.f32.mrb[123].mxu1  ;;  %v3425_v53 = vpop.f32.mrb[123].mxu0  ;;  %v2356_v22 = vmax.f32 %v2281_v17, 0.0 }
 0x1ed   : > { %v3318_v62 = vadd.f32 %v3317_v13, %v3316_v50  ;;  %v2137_v10 = vadd.f32 %v3315_v41, %v4318_v6 }
 0x1ee   : > { %v2357_v12 = vmax.f32 %v2284_v55, 0.0 }
 0x1ef   : > { %v2140_v57 = vadd.f32 %v3318_v62, %v4321_v45 }
 0x1f0   : > { %v2886_v3 = vpack.c.bf16 %v2357_v12, %v2356_v22 }
 0x1f1   : > { %v3319_v29 = vpop.f32.mrb[124].mxu1  ;;  %v2288_v25 = vpop.f32.mrb[124].mxu0 }
 0x1f2   : > { %2924 = vst [vmem:[%s4361_s22 + $0x38] sm:$0xff] %v2886_v3   ;;  %v2289_v49 = vadd.f32 %v2288_v25, %v2137_v10  ;;  %v3320_v23 = vpop.f32.mrb[125].mxu1  ;;  %v3428_v1 = vpop.f32.mrb[125].mxu0 }
 0x1f3   : > { %v3321_v16 = vadd.f32 %v3320_v23, %v3319_v29  ;;  %v3322_v0 = vpop.f32.mrb[126].mxu1  ;;  %v2291_v38 = vpop.f32.mrb[126].mxu0 }
 0x1f4   : > { %v2292_v11 = vadd.f32 %v2291_v38, %v2140_v57  ;;  %v3323_v8 = vpop.f32.mrb[127].mxu1  ;;  %v3429_v19 = vpop.f32.mrb[127].mxu0  ;;  %v2358_v21 = vmax.f32 %v2289_v49, 0.0 }
 0x1f5   : > { %v3324_v18 = vadd.f32 %v3323_v8, %v3322_v0  ;;  %v2145_v6 = vadd.f32 %v3321_v16, %v4324_v2 }
 0x1f6   : > { %v2359_v20 = vmax.f32 %v2292_v11, 0.0 }
 0x1f7   : > { %v2148_v45 = vadd.f32 %v3324_v18, %v4327_v9 }
 0x1f8   : > { %v2891_v24 = vpack.c.bf16 %v2359_v20, %v2358_v21 }
 0x1f9   : > { %v3325_v31 = vpop.f32.mrb[128].mxu1  ;;  %v2296_v39 = vpop.f32.mrb[128].mxu0 }
 0x1fa   : > { %2925 = vst [vmem:[%s4361_s22 + $0x40] sm:$0xff] %v2891_v24   ;;  %v2297_v27 = vadd.f32 %v2296_v39, %v2145_v6  ;;  %v3326_v61 = vpop.f32.mrb[129].mxu1  ;;  %v3432_v15 = vpop.f32.mrb[129].mxu0 }
 0x1fb   : > { %v3327_v60 = vadd.f32 %v3326_v61, %v3325_v31  ;;  %v3328_v42 = vpop.f32.mrb[130].mxu1  ;;  %v2299_v51 = vpop.f32.mrb[130].mxu0 }
 0x1fc   : > { %v2300_v33 = vadd.f32 %v2299_v51, %v2148_v45  ;;  %v3329_v32 = vpop.f32.mrb[131].mxu1  ;;  %v3433_v28 = vpop.f32.mrb[131].mxu0  ;;  %v2360_v34 = vmax.f32 %v2297_v27, 0.0 }
 0x1fd   : > { %v3330_v37 = vadd.f32 %v3329_v32, %v3328_v42  ;;  %v2153_v2 = vadd.f32 %v3327_v60, %v4330_v26 }
 0x1fe   : > { %v2361_v36 = vmax.f32 %v2300_v33, 0.0 }
 0x1ff   : > { %v2156_v9 = vadd.f32 %v3330_v37, %v4333_v35 }
 0x200   : > { %v2896_v47 = vpack.c.bf16 %v2361_v36, %v2360_v34 }
 0x201   : > { %v3331_v44 = vpop.f32.mrb[132].mxu1  ;;  %v2304_v43 = vpop.f32.mrb[132].mxu0 }
 0x202   : > { %2926 = vst [vmem:[%s4361_s22 + $0x48] sm:$0xff] %v2896_v47   ;;  %v2305_v54 = vadd.f32 %v2304_v43, %v2153_v2  ;;  %v3332_v7 = vpop.f32.mrb[133].mxu1  ;;  %v3436_v40 = vpop.f32.mrb[133].mxu0 }
 0x203   : > { %v3333_v5 = vadd.f32 %v3332_v7, %v3331_v44  ;;  %v3334_v17 = vpop.f32.mrb[134].mxu1  ;;  %v2307_v56 = vpop.f32.mrb[134].mxu0 }
 0x204   : > { %v2308_v48 = vadd.f32 %v2307_v56, %v2156_v9  ;;  %v3335_v41 = vpop.f32.mrb[135].mxu1  ;;  %v3437_v50 = vpop.f32.mrb[135].mxu0  ;;  %v2362_v55 = vmax.f32 %v2305_v54, 0.0 }
 0x205   : > { %v3336_v59 = vadd.f32 %v3335_v41, %v3334_v17  ;;  %v2161_v26 = vadd.f32 %v3333_v5, %v4336_v46 }
 0x206   : > { %v2363_v13 = vmax.f32 %v2308_v48, 0.0 }
 0x207   : > { %v2164_v35 = vadd.f32 %v3336_v59, %v4339_v52 }
 0x208   : > { %v2901_v53 = vpack.c.bf16 %v2363_v13, %v2362_v55 }
 0x209   : > { %v3337_v62 = vpop.f32.mrb[136].mxu1  ;;  %v2312_v10 = vpop.f32.mrb[136].mxu0 }
 0x20a   : > { %2927 = vst [vmem:[%s4361_s22 + $0x50] sm:$0xff] %v2901_v53   ;;  %v2313_v22 = vadd.f32 %v2312_v10, %v2161_v26  ;;  %v3338_v12 = vpop.f32.mrb[137].mxu1  ;;  %v3440_v57 = vpop.f32.mrb[137].mxu0 }
 0x20b   : > { %v3339_v3 = vadd.f32 %v3338_v12, %v3337_v62  ;;  %v3340_v29 = vpop.f32.mrb[138].mxu1  ;;  %v2315_v25 = vpop.f32.mrb[138].mxu0 }
 0x20c   : > { %v2316_v49 = vadd.f32 %v2315_v25, %v2164_v35  ;;  %v3341_v23 = vpop.f32.mrb[139].mxu1  ;;  %v3441_v1 = vpop.f32.mrb[139].mxu0  ;;  %v2364_v0 = vmax.f32 %v2313_v22, 0.0 }
 0x20d   : > { %v3342_v16 = vadd.f32 %v3341_v23, %v3340_v29  ;;  %v2169_v46 = vadd.f32 %v3339_v3, %v4342_v30 }
 0x20e   : > { %v2365_v38 = vmax.f32 %v2316_v49, 0.0 }
 0x20f   : > { %v2172_v52 = vadd.f32 %v3342_v16, %v4345_v14 }
 0x210   : > { %v2906_v11 = vpack.c.bf16 %v2365_v38, %v2364_v0 }
 0x211   : > { %v3343_v8 = vpop.f32.mrb[140].mxu1  ;;  %v2320_v19 = vpop.f32.mrb[140].mxu0 }
 0x212   : > { %2928 = vst [vmem:[%s4361_s22 + $0x58] sm:$0xff] %v2906_v11   ;;  %v2321_v18 = vadd.f32 %v2320_v19, %v2169_v46  ;;  %v3344_v6 = vpop.f32.mrb[141].mxu1  ;;  %v3444_v21 = vpop.f32.mrb[141].mxu0 }
 0x213   : > { %v3345_v20 = vadd.f32 %v3344_v6, %v3343_v8  ;;  %v3346_v45 = vpop.f32.mrb[142].mxu1  ;;  %v2323_v24 = vpop.f32.mrb[142].mxu0 }
 0x214   : > { %v2324_v31 = vadd.f32 %v2323_v24, %v2172_v52  ;;  %v3347_v39 = vpop.f32.mrb[143].mxu1  ;;  %v3445_v27 = vpop.f32.mrb[143].mxu0  ;;  %v2366_v15 = vmax.f32 %v2321_v18, 0.0 }
 0x215   : > { %v3348_v61 = vadd.f32 %v3347_v39, %v3346_v45  ;;  %v2177_v30 = vadd.f32 %v3345_v20, %v4348_v4 }
 0x216   : > { %v2367_v60 = vmax.f32 %v2324_v31, 0.0 }
 0x217   : > { %v2180_v14 = vadd.f32 %v3348_v61, %v4350_v63 }
 0x218   : > { %v2911_v42 = vpack.c.bf16 %v2367_v60, %v2366_v15 }
 0x219   : > { %v3349_v51 = vpop.f32.mrb[144].mxu1  ;;  %v2328_v33 = vpop.f32.mrb[144].mxu0 }
 0x21a   : > { %2929 = vst [vmem:[%s4361_s22 + $0x60] sm:$0xff] %v2911_v42   ;;  %v2329_v32 = vadd.f32 %v2328_v33, %v2177_v30  ;;  %v3350_v28 = vpop.f32.mrb[145].mxu1  ;;  %v3448_v37 = vpop.f32.mrb[145].mxu0 }
 0x21b   : > { %v3351_v2 = vadd.f32 %v3350_v28, %v3349_v51  ;;  %v2331_v34 = vpop.f32.mrb[146].mxu0  ;;  %v3352_v36 = vpop.f32.mrb[146].mxu1 }
 0x21c   : > { %v2332_v9 = vadd.f32 %v2331_v34, %v2180_v14  ;;  %v3449_v47 = vpop.f32.mrb[147].mxu0  ;;  %v3353_v44 = vpop.f32.mrb[147].mxu1  ;;  %v2368_v43 = vmax.f32 %v2329_v32, 0.0 }
 0x21d   : > { %v2185_v4 = vadd.f32 %v3351_v2, %v4352_v58 }
 0x21e   : > { %v2369_v54 = vmax.f32 %v2332_v9, 0.0 }
 0x220   : > { %v2916_v63 = vpack.c.bf16 %v2369_v54, %v2368_v43 }
 0x221   : > { %v2336_v7 = vpop.f32.mrb[148].mxu0 }
 0x222   : > { %2930 = vst [vmem:[%s4361_s22 + $0x68] sm:$0xff] %v2916_v63   ;;  %v2337_v40 = vadd.f32 %v2336_v7, %v2185_v4  ;;  %v3452_v5 = vpop.f32.mrb[149].mxu0 }
 0x223   : > { %v2339_v17 = vpop.f32.mrb[150].mxu0 }
 0x224   : > { %v2370_v56 = vmax.f32 %v2337_v40, 0.0  ;;  %v3453_v48 = vpop.f32.mrb[151].mxu0 }
 0x226   : > { %v2847_v41 = vpack.c.bf16 %v2370_v56, %v2370_v56 }
 0x228   : > { %2516 = vst [vmem:[%s4361_s22 + $0x70] sm:$0xf] %v2847_v41 }
 0x229 PF: > { %s13_s12 = sadd.s32 1, %s3750_s12  }
 0x22a   : > { %p10_p4 = scmp.ge.s32.totalorder %s13_s12, 4  }
 0x22c   :  { %12 = sbr.rel (!%p10_p4) target bundleno = 1 (0x1), region = 62 }

// kernel: all_cnn_b_forward.7
= control target key start
LH: loop header
LB: loop body
LE: loop exit
PB: predicated region body
PF: predicated region fallthrough
CT: control target
= control target key end

     0   :  { %s10914_s18 = smov 0   ;;  %s12960_s0 = inlined_call_operand.vmem [shape: bf16[464,3200], index: 0, kind: input, shape index: {}]   ;;  %s12961_s1 = inlined_call_operand.vmem [shape: bf16[3200,256], index: 1, kind: input, shape index: {}]   ;;  %s12962_s2 = inlined_call_operand.vmem [shape: f32[1,256], index: 2, kind: input, shape index: {}]   ;;  %s12963_s3 = inlined_call_operand.vmem [shape: bf16[256,256], index: 3, kind: input, shape index: {}]   ;;  %s12964_s4 = inlined_call_operand.vmem [shape: f32[1,256], index: 4, kind: input, shape index: {}]   ;;  %s12965_s5 = inlined_call_operand.vmem [shape: bf16[464,256], index: 5, kind: output, shape index: {}]  }
   0x1 LB: > { %s8022_s19 = sadd.s32 4294967295, %s10881_s18   ;;  %p8026_p0 = scmp.ge.s32.totalorder %s10881_s18, 1  ;;  %s10881_s18 = sphi %s10914_s18, %s15_s18  }
   0x2   : > { %p189_p1 = scmp.lt.s32.totalorder %s10881_s18, 3 }
   0x4   : > { %p190_p2 = pnand %p8026_p0, %p189_p1 }
   0x6   : > { %193 = sbr.rel (%p190_p2) target bundleno = 1353 (0x549), region = 40 }
   0xd   : > { %v9684_v0 = vld [vmem:[%s12961_s1 + $0x4] ss:$8 sps:$4 sm:$0xff]   ;;  %v9688_v2 = vld [vmem:[%s12961_s1] ss:$8 sps:$4 sm:$0xff]   ;;  %v9690_v4 = vld [vmem:[%s12961_s1 + $0x14] ss:$8 sps:$4 sm:$0xff]  }
   0xe   : > { %v9686_v1 = vld [vmem:[%s12961_s1 + $0x604] ss:$8 sps:$4 sm:$0xff]   ;;  %4875 = vmatprep.subr.bf16.mxu1 %v9684_v0  ;;  %v9689_v3 = vld [vmem:[%s12961_s1 + $0x600] ss:$8 sps:$4 sm:$0xff]   ;;  %v9692_v5 = vld [vmem:[%s12961_s1 + $0x614] ss:$8 sps:$4 sm:$0xff]  }
   0xf   : > { %5961 = vmatprep.subr.bf16.mxu0 %v9686_v1  ;;  %4876 = vmatpush1.bf16.msra.mxu1 %v9688_v2  ;;  %v9694_v6 = vld [vmem:[%s12961_s1 + $0x10] ss:$8 sps:$4 sm:$0xff]   ;;  %v9696_v8 = vld [vmem:[%s12961_s1 + $0x24] ss:$8 sps:$4 sm:$0xff]   ;;  %v9700_v10 = vld [vmem:[%s12961_s1 + $0x20] ss:$8 sps:$4 sm:$0xff]  }
  0x10   : > { %5962 = vmatpush1.bf16.msra.mxu0 %v9689_v3  ;;  %4877 = vmatprep.subr.bf16.mxu1 %v9690_v4  ;;  %v9695_v7 = vld [vmem:[%s12961_s1 + $0x610] ss:$8 sps:$4 sm:$0xff]   ;;  %v9698_v9 = vld [vmem:[%s12961_s1 + $0x624] ss:$8 sps:$4 sm:$0xff]   ;;  %v9701_v11 = vld [vmem:[%s12961_s1 + $0x620] ss:$8 sps:$4 sm:$0xff]  }
  0x11   : > { %5963 = vmatprep.subr.bf16.mxu0 %v9692_v5  ;;  %v9702_v12 = vld [vmem:[%s12961_s1 + $0x34] ss:$8 sps:$4 sm:$0xff]   ;;  %v9706_v14 = vld [vmem:[%s12961_s1 + $0x30] ss:$8 sps:$4 sm:$0xff]   ;;  %v9708_v16 = vld [vmem:[%s12961_s1 + $0x44] ss:$8 sps:$4 sm:$0xff]  }
  0x12   : > { %v9704_v13 = vld [vmem:[%s12961_s1 + $0x634] ss:$8 sps:$4 sm:$0xff]   ;;  %v9707_v15 = vld [vmem:[%s12961_s1 + $0x630] ss:$8 sps:$4 sm:$0xff]   ;;  %v9710_v17 = vld [vmem:[%s12961_s1 + $0x644] ss:$8 sps:$4 sm:$0xff]  }
  0x13   : > { %4878 = vmatpush1.bf16.msra.mxu1 %v9694_v6  ;;  %v9712_v18 = vld [vmem:[%s12961_s1 + $0x40] ss:$8 sps:$4 sm:$0xff]   ;;  %v9714_v20 = vld [vmem:[%s12961_s1 + $0x54] ss:$8 sps:$4 sm:$0xff]   ;;  %v9718_v22 = vld [vmem:[%s12961_s1 + $0x50] ss:$8 sps:$4 sm:$0xff]  }
  0x14   : > { %5964 = vmatpush1.bf16.msra.mxu0 %v9695_v7  ;;  %4879 = vmatprep.subr.bf16.mxu1 %v9696_v8  ;;  %v9713_v19 = vld [vmem:[%s12961_s1 + $0x640] ss:$8 sps:$4 sm:$0xff]   ;;  %v9716_v21 = vld [vmem:[%s12961_s1 + $0x654] ss:$8 sps:$4 sm:$0xff]   ;;  %v9719_v23 = vld [vmem:[%s12961_s1 + $0x650] ss:$8 sps:$4 sm:$0xff]  }
  0x15   : > { %5965 = vmatprep.subr.bf16.mxu0 %v9698_v9  ;;  %v9720_v24 = vld [vmem:[%s12961_s1 + $0x64] ss:$8 sps:$4 sm:$0xff]   ;;  %v9724_v26 = vld [vmem:[%s12961_s1 + $0x60] ss:$8 sps:$4 sm:$0xff]   ;;  %v9726_v28 = vld [vmem:[%s12961_s1 + $0x74] ss:$8 sps:$4 sm:$0xff]  }
  0x16   : > { %v9722_v25 = vld [vmem:[%s12961_s1 + $0x664] ss:$8 sps:$4 sm:$0xff]   ;;  %v9725_v27 = vld [vmem:[%s12961_s1 + $0x660] ss:$8 sps:$4 sm:$0xff]   ;;  %s219_s7 = smul.u32 29, %s8022_s19 }
  0x17   : > { %4880 = vmatpush1.bf16.msra.mxu1 %v9700_v10  ;;  %v9728_v29 = vld [vmem:[%s12961_s1 + $0x674] ss:$8 sps:$4 sm:$0xff]   ;;  %v9730_v30 = vld [vmem:[%s12961_s1 + $0x70] ss:$8 sps:$4 sm:$0xff]   ;;  %v9732_v32 = vld [vmem:[%s12961_s1 + $0x84] ss:$8 sps:$4 sm:$0xff]  }
  0x18   : > { %5966 = vmatpush1.bf16.msra.mxu0 %v9701_v11  ;;  %4881 = vmatprep.subr.bf16.mxu1 %v9702_v12  ;;  %v9731_v31 = vld [vmem:[%s12961_s1 + $0x670] ss:$8 sps:$4 sm:$0xff]   ;;  %p220_p3 = scmp.lt.s32.totalorder %s219_s7, 57  ;;  %v9734_v33 = vld [vmem:[%s12961_s1 + $0x684] ss:$8 sps:$4 sm:$0xff]  }
  0x19   : > { %5967 = vmatprep.subr.bf16.mxu0 %v9704_v13  ;;  %v9736_v34 = vld [vmem:[%s12961_s1 + $0x80] ss:$8 sps:$4 sm:$0xff]   ;;  %v9738_v36 = vld [vmem:[%s12961_s1 + $0x94] ss:$8 sps:$4 sm:$0xff]   ;;  %v9742_v38 = vld [vmem:[%s12961_s1 + $0x90] ss:$8 sps:$4 sm:$0xff]  }
  0x1a   : > { %v9737_v35 = vld [vmem:[%s12961_s1 + $0x680] ss:$8 sps:$4 sm:$0xff]   ;;  %s12999_s7 = smov (!%p220_p3, %s219_s7), 57  ;;  %v9740_v37 = vld [vmem:[%s12961_s1 + $0x694] ss:$8 sps:$4 sm:$0xff]  }
  0x1b   : > { %4882 = vmatpush1.bf16.msra.mxu1 %v9706_v14  ;;  %v9743_v39 = vld [vmem:[%s12961_s1 + $0x690] ss:$8 sps:$4 sm:$0xff]   ;;  %v9744_v40 = vld [vmem:[%s12961_s1 + $0xa4] ss:$8 sps:$4 sm:$0xff]   ;;  %s9674_s9 = smul.u32 100, %s12999_s7  ;;  %s8868_s29 = sshll.u32 %s12999_s7, 3 }
  0x1c   : > { %5968 = vmatpush1.bf16.msra.mxu0 %v9707_v15  ;;  %4883 = vmatprep.subr.bf16.mxu1 %v9708_v16  ;;  %v9746_v41 = vld [vmem:[%s12961_s1 + $0x6a4] ss:$8 sps:$4 sm:$0xff]   ;;  %v9748_v42 = vld [vmem:[%s12961_s1 + $0xa0] ss:$8 sps:$4 sm:$0xff]   ;;  %v9750_v44 = vld [vmem:[%s12961_s1 + $0xb4] ss:$8 sps:$4 sm:$0xff]   ;;  %s12872_s8 = scalar_lea.vmem %s12965_s5, %s8868_s29 }
  0x1d   : > { %5969 = vmatprep.subr.bf16.mxu0 %v9710_v17  ;;  %v9749_v43 = vld [vmem:[%s12961_s1 + $0x6a0] ss:$8 sps:$4 sm:$0xff]   ;;  %s11065_s21 = scalar_lea.vmem %s12960_s0, %s9674_s9  ;;  %v9752_v45 = vld [vmem:[%s12961_s1 + $0x6b4] ss:$8 sps:$4 sm:$0xff]   ;;  %v9754_v46 = vld [vmem:[%s12961_s1 + $0xb0] ss:$8 sps:$4 sm:$0xff]  }
  0x1e   : > { %v9755_v47 = vld [vmem:[%s12961_s1 + $0x6b0] ss:$8 sps:$4 sm:$0xff]   ;;  %v9756_v48 = vld [vmem:[%s12961_s1 + $0xc4] ss:$8 sps:$4 sm:$0xff]   ;;  %v9760_v52 = vld [vmem:[%s12961_s1 + $0xc0] ss:$8 sps:$4 sm:$0xff]  }
  0x1f   : > { %4884 = vmatpush1.bf16.msra.mxu1 %v9712_v18  ;;  %v9782_v49 = vld [vmem:[%s11065_s21 + $0x4] ss:$100 sps:$4 sm:$0xff]   ;;  %v9785_v51 = vld [vmem:[%s11065_s21 + $0x34] ss:$100 sps:$4 sm:$0xff]   ;;  %v9789_v6 = vld [vmem:[%s11065_s21 + $0xcc] ss:$100 sps:$4 sm:$0xff]  }
  0x20   : > { %5970 = vmatpush1.bf16.msra.mxu0 %v9713_v19  ;;  %4885 = vmatprep.subr.bf16.mxu1 %v9714_v20  ;;  %v9758_v50 = vld [vmem:[%s12961_s1 + $0x6c4] ss:$8 sps:$4 sm:$0xff]   ;;  %v9761_v53 = vld [vmem:[%s12961_s1 + $0x6c0] ss:$8 sps:$4 sm:$0xff]   ;;  %v9762_v54 = vld [vmem:[%s12961_s1 + $0xd4] ss:$8 sps:$4 sm:$0xff]  }
  0x21   : > { %5971 = vmatprep.subr.bf16.mxu0 %v9716_v21  ;;  %4907 = vmatprep.mubr.bf16.mxu1 %v9782_v49  ;;  %v9764_v55 = vld [vmem:[%s12961_s1 + $0x6d4] ss:$8 sps:$4 sm:$0xff]   ;;  %v9766_v56 = vld [vmem:[%s12961_s1 + $0xd0] ss:$8 sps:$4 sm:$0xff]   ;;  %v9768_v58 = vld [vmem:[%s12961_s1 + $0xe4] ss:$8 sps:$4 sm:$0xff]  }
  0x22   : > { %5993 = vmatprep.mubr.bf16.mxu0 %v9785_v51  ;;  %v9767_v57 = vld [vmem:[%s12961_s1 + $0x6d0] ss:$8 sps:$4 sm:$0xff]   ;;  %v9770_v59 = vld [vmem:[%s12961_s1 + $0x6e4] ss:$8 sps:$4 sm:$0xff]   ;;  %v9772_v60 = vld [vmem:[%s12961_s1 + $0xe0] ss:$8 sps:$4 sm:$0xff]  }
  0x23   : > { %4886 = vmatpush1.bf16.msra.mxu1 %v9718_v22  ;;  %v9773_v61 = vld [vmem:[%s12961_s1 + $0x6e0] ss:$8 sps:$4 sm:$0xff]   ;;  %v9774_v62 = vld [vmem:[%s12961_s1 + $0xf4] ss:$8 sps:$4 sm:$0xff]   ;;  %v9778_v0 = vld [vmem:[%s12961_s1 + $0xf0] ss:$8 sps:$4 sm:$0xff]  }
  0x24   : > { %5972 = vmatpush1.bf16.msra.mxu0 %v9719_v23  ;;  %4887 = vmatprep.subr.bf16.mxu1 %v9720_v24  ;;  %v9776_v63 = vld [vmem:[%s12961_s1 + $0x6f4] ss:$8 sps:$4 sm:$0xff]   ;;  %v9779_v1 = vld [vmem:[%s12961_s1 + $0x6f0] ss:$8 sps:$4 sm:$0xff]   ;;  %v9788_v2 = vld [vmem:[%s12961_s1 + $0x704] ss:$8 sps:$4 sm:$0xff]  }
  0x25   : > { %5973 = vmatprep.subr.bf16.mxu0 %v9722_v25  ;;  %v9780_v3 = vld [vmem:[%s11065_s21] ss:$100 sps:$4 sm:$0xff]   ;;  %v9783_v4 = vld [vmem:[%s11065_s21 + $0x30] ss:$100 sps:$4 sm:$0xff]   ;;  %v9793_v11 = vld [vmem:[%s11065_s21 + $0xc8] ss:$100 sps:$4 sm:$0xff]  }
  0x26   : > { %v9786_v5 = vld [vmem:[%s12961_s1 + $0x700] ss:$8 sps:$4 sm:$0xff]   ;;  %v9797_v8 = vld [vmem:[%s12961_s1 + $0x714] ss:$8 sps:$4 sm:$0xff]   ;;  %v9795_v9 = vld [vmem:[%s12961_s1 + $0x710] ss:$8 sps:$4 sm:$0xff]  }
  0x27   : > { %4888 = vmatpush1.bf16.msra.mxu1 %v9724_v26  ;;  %v9791_v7 = vld [vmem:[%s11065_s21 + $0xfc] ss:$100 sps:$4 sm:$0xff]   ;;  %v9804_v10 = vld [vmem:[%s12961_s1 + $0x724] ss:$8 sps:$4 sm:$0xff]   ;;  %v9798_v13 = vld [vmem:[%s11065_s21 + $0x194] ss:$100 sps:$4 sm:$0xff]  }
  0x28   : > { %5974 = vmatpush1.bf16.msra.mxu0 %v9725_v27  ;;  %4889 = vmatprep.subr.bf16.mxu1 %v9726_v28  ;;  %v9794_v12 = vld [vmem:[%s11065_s21 + $0xf8] ss:$100 sps:$4 sm:$0xff]   ;;  %v9800_v14 = vld [vmem:[%s11065_s21 + $0x1c4] ss:$100 sps:$4 sm:$0xff]   ;;  %v9805_v20 = vld [vmem:[%s11065_s21 + $0x190] ss:$100 sps:$4 sm:$0xff]  }
  0x29   : > { %5975 = vmatprep.subr.bf16.mxu0 %v9728_v29  ;;  %v9802_v15 = vld [vmem:[%s12961_s1 + $0x720] ss:$8 sps:$4 sm:$0xff]   ;;  %v9813_v16 = vld [vmem:[%s12961_s1 + $0x734] ss:$8 sps:$4 sm:$0xff]   ;;  %v9853_v18 = vld [vmem:[%s12961_s1 + $0x104] ss:$8 sps:$4 sm:$0xff]  }
  0x2a   : > { %v9851_v17 = vld [vmem:[%s12961_s1 + $0x100] ss:$8 sps:$4 sm:$0xff]   ;;  %v9811_v19 = vld [vmem:[%s12961_s1 + $0x730] ss:$8 sps:$4 sm:$0xff]   ;;  %v9857_v22 = vld [vmem:[%s12961_s1 + $0x114] ss:$8 sps:$4 sm:$0xff]  }
  0x2b   : > { %4890 = vmatpush1.bf16.msra.mxu1 %v9730_v30  ;;  %v9806_v21 = vld [vmem:[%s11065_s21 + $0x1c0] ss:$100 sps:$4 sm:$0xff]   ;;  %v9855_v24 = vld [vmem:[%s12961_s1 + $0x110] ss:$8 sps:$4 sm:$0xff]   ;;  %v9827_v28 = vld [vmem:[%s12961_s1 + $0x754] ss:$8 sps:$4 sm:$0xff]  }
  0x2c   : > { %5976 = vmatpush1.bf16.msra.mxu0 %v9731_v31  ;;  %4891 = vmatprep.subr.bf16.mxu1 %v9732_v32  ;;  %v9818_v23 = vld [vmem:[%s12961_s1 + $0x744] ss:$8 sps:$4 sm:$0xff]   ;;  %v9807_v25 = vld [vmem:[%s11065_s21 + $0x25c] ss:$100 sps:$4 sm:$0xff]   ;;  %v9825_v32 = vld [vmem:[%s12961_s1 + $0x750] ss:$8 sps:$4 sm:$0xff]  }
  0x2d   : > { %5977 = vmatprep.subr.bf16.mxu0 %v9734_v33  ;;  %v9809_v26 = vld [vmem:[%s11065_s21 + $0x28c] ss:$100 sps:$4 sm:$0xff]   ;;  %v9816_v27 = vld [vmem:[%s12961_s1 + $0x740] ss:$8 sps:$4 sm:$0xff]   ;;  %v9872_v31 = vld [vmem:[%s12961_s1 + $0x134] ss:$8 sps:$4 sm:$0xff]  }
  0x2e   : > { %v9866_v29 = vld [vmem:[%s12961_s1 + $0x120] ss:$8 sps:$4 sm:$0xff]   ;;  %v9868_v30 = vld [vmem:[%s12961_s1 + $0x124] ss:$8 sps:$4 sm:$0xff]   ;;  %v9814_v33 = vld [vmem:[%s11065_s21 + $0x258] ss:$100 sps:$4 sm:$0xff]  }
  0x2f   : > { %4892 = vmatpush1.bf16.msra.mxu1 %v9736_v34  ;;  %v9836_v34 = vld [vmem:[%s12961_s1 + $0x764] ss:$8 sps:$4 sm:$0xff]   ;;  %v9858_v51 = vld [vmem:[%s12961_s1 + $0x780] ss:$8 sps:$4 sm:$0xff]  }
  0x30   : > { %5978 = vmatpush1.bf16.msra.mxu0 %v9737_v35  ;;  %4893 = vmatprep.subr.bf16.mxu1 %v9738_v36  ;;  %v9870_v35 = vld [vmem:[%s12961_s1 + $0x130] ss:$8 sps:$4 sm:$0xff]   ;;  %v9815_v36 = vld [vmem:[%s11065_s21 + $0x288] ss:$100 sps:$4 sm:$0xff]  }
  0x31   : > { %5979 = vmatprep.subr.bf16.mxu0 %v9740_v37  ;;  %v9819_v37 = vld [vmem:[%s11065_s21 + $0x324] ss:$100 sps:$4 sm:$0xff]   ;;  %v9828_v49 = vld [vmem:[%s11065_s21 + $0x3ec] ss:$100 sps:$4 sm:$0xff]  }
  0x33   : > { %4894 = vmatpush1.bf16.msra.mxu1 %v9742_v38  ;;  %v9821_v38 = vld [vmem:[%s11065_s21 + $0x354] ss:$100 sps:$4 sm:$0xff]  }
  0x34   : > { %5980 = vmatpush1.bf16.msra.mxu0 %v9743_v39  ;;  %4895 = vmatprep.subr.bf16.mxu1 %v9744_v40  ;;  %v9834_v39 = vld [vmem:[%s12961_s1 + $0x760] ss:$8 sps:$4 sm:$0xff]   ;;  %v9883_v40 = vld [vmem:[%s12961_s1 + $0x144] ss:$8 sps:$4 sm:$0xff]  }
  0x35   : > { %5981 = vmatprep.subr.bf16.mxu0 %v9746_v41  ;;  %v9845_v41 = vld [vmem:[%s12961_s1 + $0x774] ss:$8 sps:$4 sm:$0xff]  }
  0x37   : > { %4896 = vmatpush1.bf16.msra.mxu1 %v9748_v42  ;;  %v9881_v42 = vld [vmem:[%s12961_s1 + $0x140] ss:$8 sps:$4 sm:$0xff]  }
  0x38   : > { %5982 = vmatpush1.bf16.msra.mxu0 %v9749_v43  ;;  %4897 = vmatprep.subr.bf16.mxu1 %v9750_v44  ;;  %v9890_v43 = vld [vmem:[%s12961_s1 + $0x154] ss:$8 sps:$4 sm:$0xff]   ;;  %v9843_v44 = vld [vmem:[%s12961_s1 + $0x770] ss:$8 sps:$4 sm:$0xff]  }
  0x39   : > { %5983 = vmatprep.subr.bf16.mxu0 %v9752_v45  ;;  %v9823_v45 = vld [vmem:[%s11065_s21 + $0x320] ss:$100 sps:$4 sm:$0xff]  }
  0x3b   : > { %4898 = vmatpush1.bf16.msra.mxu1 %v9754_v46  ;;  %v9860_v46 = vld [vmem:[%s12961_s1 + $0x784] ss:$8 sps:$4 sm:$0xff]  }
  0x3c   : > { %5984 = vmatpush1.bf16.msra.mxu0 %v9755_v47  ;;  %4899 = vmatprep.subr.bf16.mxu1 %v9756_v48  ;;  %v9888_v47 = vld [vmem:[%s12961_s1 + $0x150] ss:$8 sps:$4 sm:$0xff]  }
  0x3d   : > { %5985 = vmatprep.subr.bf16.mxu0 %v9758_v50  ;;  %v9824_v48 = vld [vmem:[%s11065_s21 + $0x350] ss:$100 sps:$4 sm:$0xff]   ;;  %v9830_v50 = vld [vmem:[%s11065_s21 + $0x41c] ss:$100 sps:$4 sm:$0xff]  }
  0x3f   : > { %4900 = vmatpush1.bf16.msra.mxu1 %v9760_v52  ;;  %v9898_v52 = vld [vmem:[%s12961_s1 + $0x164] ss:$8 sps:$4 sm:$0xff]  }
  0x40   : > { %5986 = vmatpush1.bf16.msra.mxu0 %v9761_v53  ;;  %4901 = vmatprep.subr.bf16.mxu1 %v9762_v54  ;;  %v9875_v53 = vld [vmem:[%s12961_s1 + $0x794] ss:$8 sps:$4 sm:$0xff]   ;;  %v9896_v54 = vld [vmem:[%s12961_s1 + $0x160] ss:$8 sps:$4 sm:$0xff]  }
  0x41   : > { %5987 = vmatprep.subr.bf16.mxu0 %v9764_v55  ;;  %v9905_v55 = vld [vmem:[%s12961_s1 + $0x174] ss:$8 sps:$4 sm:$0xff]  }
  0x43   : > { %4902 = vmatpush1.bf16.msra.mxu1 %v9766_v56  ;;  %v9832_v56 = vld [vmem:[%s11065_s21 + $0x3e8] ss:$100 sps:$4 sm:$0xff]  }
  0x44   : > { %5988 = vmatpush1.bf16.msra.mxu0 %v9767_v57  ;;  %4903 = vmatprep.subr.bf16.mxu1 %v9768_v58  ;;  %v9833_v57 = vld [vmem:[%s11065_s21 + $0x418] ss:$100 sps:$4 sm:$0xff]  }
  0x45   : > { %5989 = vmatprep.subr.bf16.mxu0 %v9770_v59  ;;  %v9873_v58 = vld [vmem:[%s12961_s1 + $0x790] ss:$8 sps:$4 sm:$0xff]  }
  0x46   : > { %v9837_v59 = vld [vmem:[%s11065_s21 + $0x4b4] ss:$100 sps:$4 sm:$0xff]  }
  0x47   : > { %4904 = vmatpush1.bf16.msra.mxu1 %v9772_v60  ;;  %v9887_v60 = vld [vmem:[%s12961_s1 + $0x7a4] ss:$8 sps:$4 sm:$0xff]  }
  0x48   : > { %5990 = vmatpush1.bf16.msra.mxu0 %v9773_v61  ;;  %4905 = vmatprep.subr.bf16.mxu1 %v9774_v62  ;;  %v9903_v61 = vld [vmem:[%s12961_s1 + $0x170] ss:$8 sps:$4 sm:$0xff]   ;;  %v9839_v62 = vld [vmem:[%s11065_s21 + $0x4e4] ss:$100 sps:$4 sm:$0xff]  }
  0x49   : > { %5991 = vmatprep.subr.bf16.mxu0 %v9776_v63  ;;  %v9885_v63 = vld [vmem:[%s12961_s1 + $0x7a0] ss:$8 sps:$4 sm:$0xff]  }
  0x4b   : > { %4906 = vmatpush1.bf16.msra.mxu1 %v9778_v0  ;;  %v9902_v0 = vld [vmem:[%s12961_s1 + $0x7b4] ss:$8 sps:$4 sm:$0xff]  }
  0x4c   : > { %5992 = vmatpush1.bf16.msra.mxu0 %v9779_v1  ;;  %5056 = vmatprep.subr.bf16.mxu1 %v9853_v18  ;;  %v9913_v1 = vld [vmem:[%s12961_s1 + $0x184] ss:$8 sps:$4 sm:$0xff]  }
  0x4d   : > { %6142 = vmatprep.subr.bf16.mxu0 %v9788_v2  ;;  %v9911_v2 = vld [vmem:[%s12961_s1 + $0x180] ss:$8 sps:$4 sm:$0xff]  }
  0x4e   : > { %4908 = vmatmul.mubr.bf16.vlgmr.msra.gmra.mrb[0].mxu1 %v9780_v3  ;;  %v9920_v3 = vld [vmem:[%s12961_s1 + $0x194] ss:$8 sps:$4 sm:$0xff]   ;;  %v9854_v18 = vld [vmem:[%s11065_s21 + $0x5a8] ss:$100 sps:$4 sm:$0xff]  }
  0x4f   : > { %5994 = vmatmul.mubr.bf16.vlgmr.msra.gmra.mrb[0].mxu0 %v9783_v4  ;;  %4917 = vmatprep.mubr.bf16.mxu1 %v9789_v6  ;;  %v9841_v4 = vld [vmem:[%s11065_s21 + $0x4b0] ss:$100 sps:$4 sm:$0xff]  }
  0x50   : > { %6143 = vmatpush1.bf16.msra.mxu0 %v9786_v5  ;;  %6003 = vmatprep.mubr.bf16.mxu0 %v9791_v7  ;;  %v9842_v5 = vld [vmem:[%s11065_s21 + $0x4e0] ss:$100 sps:$4 sm:$0xff]   ;;  %v9900_v6 = vld [vmem:[%s12961_s1 + $0x7b0] ss:$8 sps:$4 sm:$0xff]  }
  0x51   : > { %6144 = vmatprep.subr.bf16.mxu0 %v9797_v8  ;;  %5057 = vmatpush1.bf16.msra.mxu1 %v9851_v17  ;;  %v9846_v7 = vld [vmem:[%s11065_s21 + $0x57c] ss:$100 sps:$4 sm:$0xff]   ;;  %v9917_v8 = vld [vmem:[%s12961_s1 + $0x7c4] ss:$8 sps:$4 sm:$0xff]   ;;  %v9930_v17 = vld [vmem:[%s12961_s1 + $0x7d0] ss:$8 sps:$4 sm:$0xff]  }
  0x52   : > { %5058 = vmatprep.subr.bf16.mxu1 %v9857_v22  ;;  %v9863_v22 = vld [vmem:[%s11065_s21 + $0x674] ss:$100 sps:$4 sm:$0xff]  }
  0x54   : > { %6145 = vmatpush1.bf16.msra.mxu0 %v9795_v9  ;;  %v9918_v9 = vld [vmem:[%s12961_s1 + $0x190] ss:$8 sps:$4 sm:$0xff]  }
  0x55   : > { %6146 = vmatprep.subr.bf16.mxu0 %v9804_v10  ;;  %5059 = vmatpush1.bf16.msra.mxu1 %v9855_v24  ;;  %v9848_v10 = vld [vmem:[%s11065_s21 + $0x5ac] ss:$100 sps:$4 sm:$0xff]  }
  0x56   : > { %4918 = vmatmul.mubr.bf16.gmra.mrb[4].mxu1 %v9793_v11  ;;  %5060 = vmatprep.subr.bf16.mxu1 %v9868_v30  ;;  %v9915_v11 = vld [vmem:[%s12961_s1 + $0x7c0] ss:$8 sps:$4 sm:$0xff]   ;;  %v9943_v24 = vld [vmem:[%s12961_s1 + $0x1c4] ss:$8 sps:$4 sm:$0xff]   ;;  %v9958_v30 = vld [vmem:[%s12961_s1 + $0x7f0] ss:$8 sps:$4 sm:$0xff]  }
  0x57   : > { %6004 = vmatmul.mubr.bf16.gmra.mrb[4].mxu0 %v9794_v12  ;;  %4927 = vmatprep.mubr.bf16.mxu1 %v9798_v13  ;;  %v9926_v12 = vld [vmem:[%s12961_s1 + $0x1a0] ss:$8 sps:$4 sm:$0xff]   ;;  %v9928_v13 = vld [vmem:[%s12961_s1 + $0x1a4] ss:$8 sps:$4 sm:$0xff]  }
  0x58   : > { %6013 = vmatprep.mubr.bf16.mxu0 %v9800_v14  ;;  %6147 = vmatpush1.bf16.msra.mxu0 %v9802_v15  ;;  %v9932_v14 = vld [vmem:[%s12961_s1 + $0x7d4] ss:$8 sps:$4 sm:$0xff]  }
  0x59   : > { %6148 = vmatprep.subr.bf16.mxu0 %v9813_v16  ;;  %5061 = vmatpush1.bf16.msra.mxu1 %v9866_v29  ;;  %v9935_v15 = vld [vmem:[%s12961_s1 + $0x1b4] ss:$8 sps:$4 sm:$0xff]  }
  0x5a   : > { %5062 = vmatprep.subr.bf16.mxu1 %v9872_v31  ;;  %v9850_v16 = vld [vmem:[%s11065_s21 + $0x578] ss:$100 sps:$4 sm:$0xff]   ;;  %v9869_v29 = vld [vmem:[%s11065_s21 + $0x670] ss:$100 sps:$4 sm:$0xff]  }
  0x5b   : > { %v9876_v31 = vld [vmem:[%s11065_s21 + $0x70c] ss:$100 sps:$4 sm:$0xff]  }
  0x5c   : > { %6149 = vmatpush1.bf16.msra.mxu0 %v9811_v19  ;;  %v9933_v19 = vld [vmem:[%s12961_s1 + $0x1b0] ss:$8 sps:$4 sm:$0xff]  }
  0x5d   : > { %6150 = vmatprep.subr.bf16.mxu0 %v9818_v23  ;;  %5063 = vmatpush1.bf16.msra.mxu1 %v9870_v35  ;;  %v9941_v23 = vld [vmem:[%s12961_s1 + $0x1c0] ss:$8 sps:$4 sm:$0xff]   ;;  %v9956_v35 = vld [vmem:[%s12961_s1 + $0x1e4] ss:$8 sps:$4 sm:$0xff]  }
  0x5e   : > { %4928 = vmatmul.mubr.bf16.gmra.mrb[8].mxu1 %v9805_v20  ;;  %5064 = vmatprep.subr.bf16.mxu1 %v9883_v40  ;;  %v9947_v20 = vld [vmem:[%s12961_s1 + $0x7e4] ss:$8 sps:$4 sm:$0xff]   ;;  %v9961_v40 = vld [vmem:[%s12961_s1 + $0x1f0] ss:$8 sps:$4 sm:$0xff]  }
  0x5f   : > { %6014 = vmatmul.mubr.bf16.gmra.mrb[8].mxu0 %v9806_v21  ;;  %4937 = vmatprep.mubr.bf16.mxu1 %v9807_v25  ;;  %v9861_v21 = vld [vmem:[%s11065_s21 + $0x644] ss:$100 sps:$4 sm:$0xff]  }
  0x60   : > { %6023 = vmatprep.mubr.bf16.mxu0 %v9809_v26  ;;  %6151 = vmatpush1.bf16.msra.mxu0 %v9816_v27  ;;  %v9945_v25 = vld [vmem:[%s12961_s1 + $0x7e0] ss:$8 sps:$4 sm:$0xff]   ;;  %v9960_v26 = vld [vmem:[%s12961_s1 + $0x7f4] ss:$8 sps:$4 sm:$0xff]  }
  0x61   : > { %6152 = vmatprep.subr.bf16.mxu0 %v9827_v28  ;;  %5065 = vmatpush1.bf16.msra.mxu1 %v9881_v42  ;;  %v9950_v27 = vld [vmem:[%s12961_s1 + $0x1d4] ss:$8 sps:$4 sm:$0xff]   ;;  %v9865_v28 = vld [vmem:[%s11065_s21 + $0x640] ss:$100 sps:$4 sm:$0xff]  }
  0x62   : > { %5066 = vmatprep.subr.bf16.mxu1 %v9890_v43  ;;  %v9893_v42 = vld [vmem:[%s11065_s21 + $0x804] ss:$100 sps:$4 sm:$0xff]   ;;  %v9895_v43 = vld [vmem:[%s11065_s21 + $0x7d0] ss:$100 sps:$4 sm:$0xff]  }
  0x64   : > { %6153 = vmatpush1.bf16.msra.mxu0 %v9825_v32  ;;  %v9948_v32 = vld [vmem:[%s12961_s1 + $0x1d0] ss:$8 sps:$4 sm:$0xff]  }
  0x65   : > { %6154 = vmatprep.subr.bf16.mxu0 %v9836_v34  ;;  %5067 = vmatpush1.bf16.msra.mxu1 %v9888_v47  ;;  %v9878_v34 = vld [vmem:[%s11065_s21 + $0x73c] ss:$100 sps:$4 sm:$0xff]  }
  0x66   : > { %4938 = vmatmul.mubr.bf16.gmra.mrb[12].mxu1 %v9814_v33  ;;  %5068 = vmatprep.subr.bf16.mxu1 %v9898_v52  ;;  %v9972_v33 = vld [vmem:[%s12961_s1 + $0x804] ss:$8 sps:$4 sm:$0xff]   ;;  %v9910_v47 = vld [vmem:[%s11065_s21 + $0x898] ss:$100 sps:$4 sm:$0xff]  }
  0x67   : > { %6024 = vmatmul.mubr.bf16.gmra.mrb[12].mxu0 %v9815_v36  ;;  %4947 = vmatprep.mubr.bf16.mxu1 %v9819_v37  ;;  %v9954_v36 = vld [vmem:[%s12961_s1 + $0x1e0] ss:$8 sps:$4 sm:$0xff]   ;;  %v9963_v37 = vld [vmem:[%s12961_s1 + $0x1f4] ss:$8 sps:$4 sm:$0xff]  }
  0x68   : > { %6033 = vmatprep.mubr.bf16.mxu0 %v9821_v38  ;;  %6155 = vmatpush1.bf16.msra.mxu0 %v9834_v39  ;;  %v9880_v38 = vld [vmem:[%s11065_s21 + $0x708] ss:$100 sps:$4 sm:$0xff]   ;;  %v9884_v39 = vld [vmem:[%s11065_s21 + $0x738] ss:$100 sps:$4 sm:$0xff]   ;;  %v9925_v52 = vld [vmem:[%s11065_s21 + $0x960] ss:$100 sps:$4 sm:$0xff]  }
  0x69   : > { %6156 = vmatprep.subr.bf16.mxu0 %v9845_v41  ;;  %5069 = vmatpush1.bf16.msra.mxu1 %v9896_v54  ;;  %v9891_v41 = vld [vmem:[%s11065_s21 + $0x7d4] ss:$100 sps:$4 sm:$0xff]   ;;  %v9936_v54 = vld [vmem:[%s11065_s21 + $0xa2c] ss:$100 sps:$4 sm:$0xff]  }
  0x6a   : > { %5070 = vmatprep.subr.bf16.mxu1 %v9905_v55  ;;  %v9938_v55 = vld [vmem:[%s11065_s21 + $0xa5c] ss:$100 sps:$4 sm:$0xff]  }
  0x6c   : > { %6157 = vmatpush1.bf16.msra.mxu0 %v9843_v44  ;;  %v9899_v44 = vld [vmem:[%s11065_s21 + $0x800] ss:$100 sps:$4 sm:$0xff]  }
  0x6d   : > { %6158 = vmatprep.subr.bf16.mxu0 %v9860_v46  ;;  %5071 = vmatpush1.bf16.msra.mxu1 %v9903_v61  ;;  %v9908_v46 = vld [vmem:[%s11065_s21 + $0x8cc] ss:$100 sps:$4 sm:$0xff]  }
  0x6e   : > { %4948 = vmatmul.mubr.bf16.gmra.mrb[16].mxu1 %v9823_v45  ;;  %5072 = vmatprep.subr.bf16.mxu1 %v9913_v1  ;;  %v9906_v45 = vld [vmem:[%s11065_s21 + $0x89c] ss:$100 sps:$4 sm:$0xff]  }
  0x6f   : > { %6034 = vmatmul.mubr.bf16.gmra.mrb[16].mxu0 %v9824_v48  ;;  %4957 = vmatprep.mubr.bf16.mxu1 %v9828_v49  ;;  %v9914_v48 = vld [vmem:[%s11065_s21 + $0x8c8] ss:$100 sps:$4 sm:$0xff]   ;;  %v9969_v1 = vld [vmem:[%s11065_s21 + $0x3c] ss:$100 sps:$4 sm:$0xff]  }
  0x70   : > { %6043 = vmatprep.mubr.bf16.mxu0 %v9830_v50  ;;  %6159 = vmatpush1.bf16.msra.mxu0 %v9858_v51  ;;  %v9921_v49 = vld [vmem:[%s11065_s21 + $0x964] ss:$100 sps:$4 sm:$0xff]   ;;  %v9923_v50 = vld [vmem:[%s11065_s21 + $0x994] ss:$100 sps:$4 sm:$0xff]  }
  0x71   : > { %6160 = vmatprep.subr.bf16.mxu0 %v9875_v53  ;;  %5073 = vmatpush1.bf16.msra.mxu1 %v9911_v2  ;;  %v10037_v51 = vld [vmem:[%s12961_s1 + $0x204] ss:$8 sps:$4 sm:$0xff]   ;;  %v9929_v53 = vld [vmem:[%s11065_s21 + $0x990] ss:$100 sps:$4 sm:$0xff]  }
  0x72   : > { %5074 = vmatprep.subr.bf16.mxu1 %v9920_v3  ;;  %v9964_v2 = vld [vmem:[%s11065_s21 + $0x8] ss:$100 sps:$4 sm:$0xff]   ;;  %v9967_v3 = vld [vmem:[%s11065_s21 + $0x38] ss:$100 sps:$4 sm:$0xff]  }
  0x74   : > { %6161 = vmatpush1.bf16.msra.mxu0 %v9873_v58  ;;  %v9940_v58 = vld [vmem:[%s11065_s21 + $0xa28] ss:$100 sps:$4 sm:$0xff]  }
  0x75   : > { %6162 = vmatprep.subr.bf16.mxu0 %v9887_v60  ;;  %5075 = vmatpush1.bf16.msra.mxu1 %v9918_v9  ;;  %v10041_v9 = vld [vmem:[%s12961_s1 + $0x214] ss:$8 sps:$4 sm:$0xff]  }
  0x76   : > { %4958 = vmatmul.mubr.bf16.gmra.mrb[20].mxu1 %v9832_v56  ;;  %5076 = vmatprep.subr.bf16.mxu1 %v9928_v13  ;;  %v598_v56 = vld [vmem:[%s11065_s21 + $0xaf0] sm:$0xff]  ;;  %v9988_v13 = vld [vmem:[%s12961_s1 + $0x824] ss:$8 sps:$4 sm:$0xff]  }
  0x77   : > { %6044 = vmatmul.mubr.bf16.gmra.mrb[20].mxu0 %v9833_v57  ;;  %4967 = vmatprep.mubr.bf16.mxu1 %v9837_v59  ;;  %v604_v57 = vld [vmem:[%s11065_s21 + $0xb20] sm:$0xff]  ;;  %v9944_v59 = vld [vmem:[%s11065_s21 + $0xa58] ss:$100 sps:$4 sm:$0xff]   ;;  %v8381_v60 = vcombine.high %v598_v56, %v598_v56 }
  0x78   : > { %6053 = vmatprep.mubr.bf16.mxu0 %v9839_v62  ;;  %6163 = vmatpush1.bf16.msra.mxu0 %v9885_v63  ;;  %v8393_v61 = vcombine.high %v604_v57, %v604_v57  ;;  %v8380_v62 = vcombine.low %v598_v56, %v598_v56  ;;  %v8392_v63 = vcombine.low %v604_v57, %v604_v57  ;;  %v10095_v56 = vld [vmem:[%s12961_s1 + $0x280] ss:$8 sps:$4 sm:$0xff]   ;;  %v10104_v57 = vld [vmem:[%s12961_s1 + $0x294] ss:$8 sps:$4 sm:$0xff]  }
  0x79   : > { %6164 = vmatprep.subr.bf16.mxu0 %v9902_v0  ;;  %5077 = vmatpush1.bf16.msra.mxu1 %v9926_v12  ;;  %v9966_v0 = vld [vmem:[%s11065_s21 + $0xc] ss:$100 sps:$4 sm:$0xff]   ;;  %v9978_v12 = vld [vmem:[%s11065_s21 + $0x100] ss:$100 sps:$4 sm:$0xff]  }
  0x7a   : > { %5078 = vmatprep.subr.bf16.mxu1 %v9935_v15  ;;  %v9982_v15 = vld [vmem:[%s11065_s21 + $0x19c] ss:$100 sps:$4 sm:$0xff]  }
  0x7c   : > { %6165 = vmatpush1.bf16.msra.mxu0 %v9900_v6  ;;  %v9975_v6 = vld [vmem:[%s11065_s21 + $0x104] ss:$100 sps:$4 sm:$0xff]  }
  0x7d   : > { %6166 = vmatprep.subr.bf16.mxu0 %v9917_v8  ;;  %5079 = vmatpush1.bf16.msra.mxu1 %v9933_v19  ;;  %v10035_v8 = vld [vmem:[%s12961_s1 + $0x200] ss:$8 sps:$4 sm:$0xff]   ;;  %v9997_v19 = vld [vmem:[%s12961_s1 + $0x834] ss:$8 sps:$4 sm:$0xff]  }
  0x7e   : > { %4968 = vmatmul.mubr.bf16.gmra.mrb[24].mxu1 %v9841_v4  ;;  %5080 = vmatprep.subr.bf16.mxu1 %v9943_v24  ;;  %v9970_v4 = vld [vmem:[%s12961_s1 + $0x800] ss:$8 sps:$4 sm:$0xff]   ;;  %v10002_v24 = vld [vmem:[%s12961_s1 + $0x844] ss:$8 sps:$4 sm:$0xff]  }
  0x7f   : > { %6054 = vmatmul.mubr.bf16.gmra.mrb[24].mxu0 %v9842_v5  ;;  %4977 = vmatprep.mubr.bf16.mxu1 %v9846_v7  ;;  %v9973_v5 = vld [vmem:[%s11065_s21 + $0xd4] ss:$100 sps:$4 sm:$0xff]  }
  0x80   : > { %6063 = vmatprep.mubr.bf16.mxu0 %v9848_v10  ;;  %6167 = vmatpush1.bf16.msra.mxu0 %v9915_v11  ;;  %v9981_v7 = vld [vmem:[%s12961_s1 + $0x814] ss:$8 sps:$4 sm:$0xff]   ;;  %v9979_v10 = vld [vmem:[%s12961_s1 + $0x810] ss:$8 sps:$4 sm:$0xff]  }
  0x81   : > { %6168 = vmatprep.subr.bf16.mxu0 %v9932_v14  ;;  %5081 = vmatpush1.bf16.msra.mxu1 %v9941_v23  ;;  %v9977_v11 = vld [vmem:[%s11065_s21 + $0xd0] ss:$100 sps:$4 sm:$0xff]  }
  0x82   : > { %5082 = vmatprep.subr.bf16.mxu1 %v9950_v27  ;;  %v10039_v14 = vld [vmem:[%s12961_s1 + $0x210] ss:$8 sps:$4 sm:$0xff]   ;;  %v9991_v27 = vld [vmem:[%s11065_s21 + $0x264] ss:$100 sps:$4 sm:$0xff]  }
  0x83   : > { %v9995_v23 = vld [vmem:[%s12961_s1 + $0x830] ss:$8 sps:$4 sm:$0xff]  }
  0x84   : > { %6169 = vmatpush1.bf16.msra.mxu0 %v9930_v17  ;;  %v9986_v17 = vld [vmem:[%s12961_s1 + $0x820] ss:$8 sps:$4 sm:$0xff]  }
  0x85   : > { %6170 = vmatprep.subr.bf16.mxu0 %v9947_v20  ;;  %5083 = vmatpush1.bf16.msra.mxu1 %v9948_v32  ;;  %v10050_v20 = vld [vmem:[%s12961_s1 + $0x220] ss:$8 sps:$4 sm:$0xff]  }
  0x86   : > { %4978 = vmatmul.mubr.bf16.gmra.mrb[28].mxu1 %v9850_v16  ;;  %5084 = vmatprep.subr.bf16.mxu1 %v9956_v35  ;;  %v9984_v16 = vld [vmem:[%s11065_s21 + $0x1cc] ss:$100 sps:$4 sm:$0xff]   ;;  %v10065_v32 = vld [vmem:[%s12961_s1 + $0x240] ss:$8 sps:$4 sm:$0xff]  }
  0x87   : > { %6064 = vmatmul.mubr.bf16.gmra.mrb[28].mxu0 %v9854_v18  ;;  %4987 = vmatprep.mubr.bf16.mxu1 %v9861_v21  ;;  %v10052_v18 = vld [vmem:[%s12961_s1 + $0x224] ss:$8 sps:$4 sm:$0xff]   ;;  %v10056_v21 = vld [vmem:[%s12961_s1 + $0x234] ss:$8 sps:$4 sm:$0xff]  }
  0x88   : > { %6073 = vmatprep.mubr.bf16.mxu0 %v9863_v22  ;;  %6171 = vmatpush1.bf16.msra.mxu0 %v9945_v25  ;;  %v9989_v22 = vld [vmem:[%s11065_s21 + $0x198] ss:$100 sps:$4 sm:$0xff]   ;;  %v9999_v35 = vld [vmem:[%s11065_s21 + $0x290] ss:$100 sps:$4 sm:$0xff]  }
  0x89   : > { %6172 = vmatprep.subr.bf16.mxu0 %v9960_v26  ;;  %5085 = vmatpush1.bf16.msra.mxu1 %v9954_v36  ;;  %v10054_v25 = vld [vmem:[%s12961_s1 + $0x230] ss:$8 sps:$4 sm:$0xff]   ;;  %v9990_v26 = vld [vmem:[%s11065_s21 + $0x1c8] ss:$100 sps:$4 sm:$0xff]  }
  0x8a   : > { %5086 = vmatprep.subr.bf16.mxu1 %v9963_v37  ;;  %v10009_v36 = vld [vmem:[%s12961_s1 + $0x850] ss:$8 sps:$4 sm:$0xff]   ;;  %v10020_v37 = vld [vmem:[%s12961_s1 + $0x864] ss:$8 sps:$4 sm:$0xff]  }
  0x8c   : > { %6173 = vmatpush1.bf16.msra.mxu0 %v9958_v30  ;;  %v10067_v30 = vld [vmem:[%s12961_s1 + $0x244] ss:$8 sps:$4 sm:$0xff]  }
  0x8d   : > { %6323 = vmatprep.subr.bf16.mxu0 %v9972_v33  ;;  %5087 = vmatpush1.bf16.msra.mxu1 %v9961_v40  ;;  %v10074_v33 = vld [vmem:[%s12961_s1 + $0x254] ss:$8 sps:$4 sm:$0xff]  }
  0x8e   : > { %4988 = vmatmul.mubr.bf16.gmra.mrb[32].mxu1 %v9865_v28  ;;  %5237 = vmatprep.subr.bf16.mxu1 %v10037_v51  ;;  %v9993_v28 = vld [vmem:[%s11065_s21 + $0x294] ss:$100 sps:$4 sm:$0xff]   ;;  %v10005_v40 = vld [vmem:[%s11065_s21 + $0x35c] ss:$100 sps:$4 sm:$0xff]  }
  0x8f   : > { %6074 = vmatmul.mubr.bf16.gmra.mrb[32].mxu0 %v9869_v29  ;;  %4997 = vmatprep.mubr.bf16.mxu1 %v9876_v31  ;;  %v10000_v29 = vld [vmem:[%s12961_s1 + $0x840] ss:$8 sps:$4 sm:$0xff]   ;;  %v10011_v31 = vld [vmem:[%s12961_s1 + $0x854] ss:$8 sps:$4 sm:$0xff]  }
  0x90   : > { %6083 = vmatprep.mubr.bf16.mxu0 %v9878_v34  ;;  %v9998_v34 = vld [vmem:[%s11065_s21 + $0x260] ss:$100 sps:$4 sm:$0xff]   ;;  %v10012_v51 = vld [vmem:[%s11065_s21 + $0x3f4] ss:$100 sps:$4 sm:$0xff]  }
  0x96   : > { %4998 = vmatmul.mubr.bf16.gmra.mrb[36].mxu1 %v9880_v38  ;;  %v10072_v38 = vld [vmem:[%s12961_s1 + $0x250] ss:$8 sps:$4 sm:$0xff]  }
  0x97   : > { %6084 = vmatmul.mubr.bf16.gmra.mrb[36].mxu0 %v9884_v39  ;;  %5007 = vmatprep.mubr.bf16.mxu1 %v9891_v41  ;;  %v10003_v39 = vld [vmem:[%s11065_s21 + $0x32c] ss:$100 sps:$4 sm:$0xff]   ;;  %v10018_v41 = vld [vmem:[%s12961_s1 + $0x860] ss:$8 sps:$4 sm:$0xff]  }
  0x98   : > { %6093 = vmatprep.mubr.bf16.mxu0 %v9893_v42  ;;  %v10082_v42 = vld [vmem:[%s12961_s1 + $0x264] ss:$8 sps:$4 sm:$0xff]  }
  0x9e   : > { %5008 = vmatmul.mubr.bf16.gmra.mrb[40].mxu1 %v9895_v43  ;;  %v10029_v43 = vld [vmem:[%s12961_s1 + $0x874] ss:$8 sps:$4 sm:$0xff]  }
  0x9f   : > { %6094 = vmatmul.mubr.bf16.gmra.mrb[40].mxu0 %v9899_v44  ;;  %5017 = vmatprep.mubr.bf16.mxu1 %v9906_v45  ;;  %v10080_v44 = vld [vmem:[%s12961_s1 + $0x260] ss:$8 sps:$4 sm:$0xff]   ;;  %v10089_v45 = vld [vmem:[%s12961_s1 + $0x274] ss:$8 sps:$4 sm:$0xff]  }
  0xa0   : > { %6103 = vmatprep.mubr.bf16.mxu0 %v9908_v46  ;;  %v10027_v46 = vld [vmem:[%s12961_s1 + $0x870] ss:$8 sps:$4 sm:$0xff]  }
  0xa6   : > { %5018 = vmatmul.mubr.bf16.gmra.mrb[44].mxu1 %v9910_v47  ;;  %v10007_v47 = vld [vmem:[%s11065_s21 + $0x328] ss:$100 sps:$4 sm:$0xff]  }
  0xa7   : > { %6104 = vmatmul.mubr.bf16.gmra.mrb[44].mxu0 %v9914_v48  ;;  %5027 = vmatprep.mubr.bf16.mxu1 %v9921_v49  ;;  %v10008_v48 = vld [vmem:[%s11065_s21 + $0x358] ss:$100 sps:$4 sm:$0xff]   ;;  %v10044_v49 = vld [vmem:[%s12961_s1 + $0x884] ss:$8 sps:$4 sm:$0xff]  }
  0xa8   : > { %6113 = vmatprep.mubr.bf16.mxu0 %v9923_v50  ;;  %v10087_v50 = vld [vmem:[%s12961_s1 + $0x270] ss:$8 sps:$4 sm:$0xff]  }
  0xae   : > { %5028 = vmatmul.mubr.bf16.gmra.mrb[48].mxu1 %v9925_v52  ;;  %v10014_v52 = vld [vmem:[%s11065_s21 + $0x424] ss:$100 sps:$4 sm:$0xff]  }
  0xaf   : > { %6114 = vmatmul.mubr.bf16.gmra.mrb[48].mxu0 %v9929_v53  ;;  %5037 = vmatprep.mubr.bf16.mxu1 %v9936_v54  ;;  %v10042_v53 = vld [vmem:[%s12961_s1 + $0x880] ss:$8 sps:$4 sm:$0xff]   ;;  %v10059_v54 = vld [vmem:[%s12961_s1 + $0x894] ss:$8 sps:$4 sm:$0xff]  }
  0xb0   : > { %6123 = vmatprep.mubr.bf16.mxu0 %v9938_v55  ;;  %v10097_v55 = vld [vmem:[%s12961_s1 + $0x284] ss:$8 sps:$4 sm:$0xff]  }
  0xb6   : > { %5038 = vmatmul.mubr.bf16.gmra.mrb[52].mxu1 %v9940_v58  ;;  %v10057_v58 = vld [vmem:[%s12961_s1 + $0x890] ss:$8 sps:$4 sm:$0xff]  }
  0xb7   : > { %6124 = vmatmul.mubr.bf16.gmra.mrb[52].mxu0 %v9944_v59  ;;  %5047 = vmatprep.mubr.bf16.mxu1 %v8381_v60  ;;  %v10016_v59 = vld [vmem:[%s11065_s21 + $0x3f0] ss:$100 sps:$4 sm:$0xff]   ;;  %v10017_v60 = vld [vmem:[%s11065_s21 + $0x420] ss:$100 sps:$4 sm:$0xff]  }
  0xb8   : > { %6133 = vmatprep.mubr.bf16.mxu0 %v8393_v61  ;;  %v10071_v61 = vld [vmem:[%s12961_s1 + $0x8a4] ss:$8 sps:$4 sm:$0xff]  }
  0xbe   : > { %5048 = vmatmul.mubr.bf16.gmra.mrb[56].mxu1 %v8380_v62  ;;  %v10102_v62 = vld [vmem:[%s12961_s1 + $0x290] ss:$8 sps:$4 sm:$0xff]  }
  0xbf   : > { %6134 = vmatmul.mubr.bf16.gmra.mrb[56].mxu0 %v8392_v63  ;;  %5088 = vmatprep.mubr.bf16.mxu1 %v9966_v0  ;;  %v10021_v63 = vld [vmem:[%s11065_s21 + $0x4bc] ss:$100 sps:$4 sm:$0xff]   ;;  %v10023_v0 = vld [vmem:[%s11065_s21 + $0x4ec] ss:$100 sps:$4 sm:$0xff]  }
  0xc0   : > { %6174 = vmatprep.mubr.bf16.mxu0 %v9969_v1  ;;  %v10069_v1 = vld [vmem:[%s12961_s1 + $0x8a0] ss:$8 sps:$4 sm:$0xff]  }
  0xc6   : > { %5089 = vmatmul.mubr.bf16.vlgmr.msra.gmra.mrb[0].mxu1 %v9964_v2  ;;  %v10086_v2 = vld [vmem:[%s12961_s1 + $0x8b4] ss:$8 sps:$4 sm:$0xff]  }
  0xc7   : > { %6175 = vmatmul.mubr.bf16.vlgmr.msra.gmra.mrb[0].mxu0 %v9967_v3  ;;  %5098 = vmatprep.mubr.bf16.mxu1 %v9973_v5  ;;  %v10112_v3 = vld [vmem:[%s12961_s1 + $0x2a4] ss:$8 sps:$4 sm:$0xff]   ;;  %v10119_v5 = vld [vmem:[%s12961_s1 + $0x2b4] ss:$8 sps:$4 sm:$0xff]  }
  0xc8   : > { %6324 = vmatpush1.bf16.msra.mxu0 %v9970_v4  ;;  %6184 = vmatprep.mubr.bf16.mxu0 %v9975_v6  ;;  %v10110_v4 = vld [vmem:[%s12961_s1 + $0x2a0] ss:$8 sps:$4 sm:$0xff]   ;;  %v10084_v6 = vld [vmem:[%s12961_s1 + $0x8b0] ss:$8 sps:$4 sm:$0xff]  }
  0xc9   : > { %6325 = vmatprep.subr.bf16.mxu0 %v9981_v7  ;;  %5238 = vmatpush1.bf16.msra.mxu1 %v10035_v8  ;;  %v10025_v7 = vld [vmem:[%s11065_s21 + $0x4b8] ss:$100 sps:$4 sm:$0xff]   ;;  %v10026_v8 = vld [vmem:[%s11065_s21 + $0x4e8] ss:$100 sps:$4 sm:$0xff]  }
  0xca   : > { %5239 = vmatprep.subr.bf16.mxu1 %v10041_v9  ;;  %v10101_v9 = vld [vmem:[%s12961_s1 + $0x8c4] ss:$8 sps:$4 sm:$0xff]  }
  0xcc   : > { %6326 = vmatpush1.bf16.msra.mxu0 %v9979_v10  ;;  %v10117_v10 = vld [vmem:[%s12961_s1 + $0x2b0] ss:$8 sps:$4 sm:$0xff]  }
  0xcd   : > { %6327 = vmatprep.subr.bf16.mxu0 %v9988_v13  ;;  %5240 = vmatpush1.bf16.msra.mxu1 %v10039_v14  ;;  %v10099_v13 = vld [vmem:[%s12961_s1 + $0x8c0] ss:$8 sps:$4 sm:$0xff]   ;;  %v10116_v14 = vld [vmem:[%s12961_s1 + $0x8d4] ss:$8 sps:$4 sm:$0xff]  }
  0xce   : > { %5099 = vmatmul.mubr.bf16.gmra.mrb[4].mxu1 %v9977_v11  ;;  %5241 = vmatprep.subr.bf16.mxu1 %v10052_v18  ;;  %v10030_v11 = vld [vmem:[%s11065_s21 + $0x584] ss:$100 sps:$4 sm:$0xff]  }
  0xcf   : > { %6185 = vmatmul.mubr.bf16.gmra.mrb[4].mxu0 %v9978_v12  ;;  %5108 = vmatprep.mubr.bf16.mxu1 %v9982_v15  ;;  %v10032_v12 = vld [vmem:[%s11065_s21 + $0x5b4] ss:$100 sps:$4 sm:$0xff]   ;;  %v10127_v15 = vld [vmem:[%s12961_s1 + $0x2c4] ss:$8 sps:$4 sm:$0xff]  }
  0xd0   : > { %6194 = vmatprep.mubr.bf16.mxu0 %v9984_v16  ;;  %6328 = vmatpush1.bf16.msra.mxu0 %v9986_v17  ;;  %v10125_v16 = vld [vmem:[%s12961_s1 + $0x2c0] ss:$8 sps:$4 sm:$0xff]   ;;  %v10134_v17 = vld [vmem:[%s12961_s1 + $0x2d4] ss:$8 sps:$4 sm:$0xff]  }
  0xd1   : > { %6329 = vmatprep.subr.bf16.mxu0 %v9997_v19  ;;  %5242 = vmatpush1.bf16.msra.mxu1 %v10050_v20  ;;  %v10034_v18 = vld [vmem:[%s11065_s21 + $0x580] ss:$100 sps:$4 sm:$0xff]   ;;  %v10038_v19 = vld [vmem:[%s11065_s21 + $0x5b0] ss:$100 sps:$4 sm:$0xff]  }
  0xd2   : > { %5243 = vmatprep.subr.bf16.mxu1 %v10056_v21  ;;  %v10114_v20 = vld [vmem:[%s12961_s1 + $0x8d0] ss:$8 sps:$4 sm:$0xff]  }
  0xd3   : > { %v10045_v21 = vld [vmem:[%s11065_s21 + $0x64c] ss:$100 sps:$4 sm:$0xff]  }
  0xd4   : > { %6330 = vmatpush1.bf16.msra.mxu0 %v9995_v23  ;;  %v10132_v23 = vld [vmem:[%s12961_s1 + $0x2d0] ss:$8 sps:$4 sm:$0xff]  }
  0xd5   : > { %6331 = vmatprep.subr.bf16.mxu0 %v10002_v24  ;;  %5244 = vmatpush1.bf16.msra.mxu1 %v10054_v25  ;;  %v10047_v24 = vld [vmem:[%s11065_s21 + $0x67c] ss:$100 sps:$4 sm:$0xff]  }
  0xd6   : > { %5109 = vmatmul.mubr.bf16.gmra.mrb[8].mxu1 %v9989_v22  ;;  %5245 = vmatprep.subr.bf16.mxu1 %v10067_v30  ;;  %v10131_v22 = vld [vmem:[%s12961_s1 + $0x8e4] ss:$8 sps:$4 sm:$0xff]   ;;  %v10129_v25 = vld [vmem:[%s12961_s1 + $0x8e0] ss:$8 sps:$4 sm:$0xff]  }
  0xd7   : > { %6195 = vmatmul.mubr.bf16.gmra.mrb[8].mxu0 %v9990_v26  ;;  %5118 = vmatprep.mubr.bf16.mxu1 %v9991_v27  ;;  %v10138_v26 = vld [vmem:[%s12961_s1 + $0x2e0] ss:$8 sps:$4 sm:$0xff]   ;;  %v10140_v27 = vld [vmem:[%s12961_s1 + $0x2e4] ss:$8 sps:$4 sm:$0xff]  }
  0xd8   : > { %6204 = vmatprep.mubr.bf16.mxu0 %v9993_v28  ;;  %6332 = vmatpush1.bf16.msra.mxu0 %v10000_v29  ;;  %v10144_v28 = vld [vmem:[%s12961_s1 + $0x8f4] ss:$8 sps:$4 sm:$0xff]   ;;  %v10049_v30 = vld [vmem:[%s11065_s21 + $0x648] ss:$100 sps:$4 sm:$0xff]  }
  0xd9   : > { %6333 = vmatprep.subr.bf16.mxu0 %v10011_v31  ;;  %5246 = vmatpush1.bf16.msra.mxu1 %v10065_v32  ;;  %v10147_v29 = vld [vmem:[%s12961_s1 + $0x2f4] ss:$8 sps:$4 sm:$0xff]   ;;  %v10142_v31 = vld [vmem:[%s12961_s1 + $0x8f0] ss:$8 sps:$4 sm:$0xff]  }
  0xda   : > { %5247 = vmatprep.subr.bf16.mxu1 %v10074_v33  ;;  %v10145_v32 = vld [vmem:[%s12961_s1 + $0x2f0] ss:$8 sps:$4 sm:$0xff]   ;;  %v10156_v33 = vld [vmem:[%s12961_s1 + $0x904] ss:$8 sps:$4 sm:$0xff]  }
  0xdc   : > { %6334 = vmatpush1.bf16.msra.mxu0 %v10009_v36  ;;  %v10062_v36 = vld [vmem:[%s11065_s21 + $0x744] ss:$100 sps:$4 sm:$0xff]  }
  0xdd   : > { %6335 = vmatprep.subr.bf16.mxu0 %v10020_v37  ;;  %5248 = vmatpush1.bf16.msra.mxu1 %v10072_v38  ;;  %v10221_v37 = vld [vmem:[%s12961_s1 + $0x304] ss:$8 sps:$4 sm:$0xff]   ;;  %v10064_v38 = vld [vmem:[%s11065_s21 + $0x710] ss:$100 sps:$4 sm:$0xff]  }
  0xde   : > { %5119 = vmatmul.mubr.bf16.gmra.mrb[12].mxu1 %v9998_v34  ;;  %5249 = vmatprep.subr.bf16.mxu1 %v10082_v42  ;;  %v10053_v34 = vld [vmem:[%s11065_s21 + $0x678] ss:$100 sps:$4 sm:$0xff]  }
  0xdf   : > { %6205 = vmatmul.mubr.bf16.gmra.mrb[12].mxu0 %v9999_v35  ;;  %5128 = vmatprep.mubr.bf16.mxu1 %v10003_v39  ;;  %v10060_v35 = vld [vmem:[%s11065_s21 + $0x714] ss:$100 sps:$4 sm:$0xff]   ;;  %v10068_v39 = vld [vmem:[%s11065_s21 + $0x740] ss:$100 sps:$4 sm:$0xff]  }
  0xe0   : > { %6214 = vmatprep.mubr.bf16.mxu0 %v10005_v40  ;;  %6336 = vmatpush1.bf16.msra.mxu0 %v10018_v41  ;;  %v10075_v40 = vld [vmem:[%s11065_s21 + $0x7dc] ss:$100 sps:$4 sm:$0xff]   ;;  %v10077_v41 = vld [vmem:[%s11065_s21 + $0x80c] ss:$100 sps:$4 sm:$0xff]  }
  0xe1   : > { %6337 = vmatprep.subr.bf16.mxu0 %v10029_v43  ;;  %5250 = vmatpush1.bf16.msra.mxu1 %v10080_v44  ;;  %v10079_v42 = vld [vmem:[%s11065_s21 + $0x7d8] ss:$100 sps:$4 sm:$0xff]   ;;  %v10083_v43 = vld [vmem:[%s11065_s21 + $0x808] ss:$100 sps:$4 sm:$0xff]  }
  0xe2   : > { %5251 = vmatprep.subr.bf16.mxu1 %v10089_v45  ;;  %v10090_v44 = vld [vmem:[%s11065_s21 + $0x8a4] ss:$100 sps:$4 sm:$0xff]   ;;  %v10092_v45 = vld [vmem:[%s11065_s21 + $0x8d4] ss:$100 sps:$4 sm:$0xff]  }
  0xe4   : > { %6338 = vmatpush1.bf16.msra.mxu0 %v10027_v46  ;;  %v10094_v46 = vld [vmem:[%s11065_s21 + $0x8a0] ss:$100 sps:$4 sm:$0xff]  }
  0xe5   : > { %6339 = vmatprep.subr.bf16.mxu0 %v10044_v49  ;;  %5252 = vmatpush1.bf16.msra.mxu1 %v10087_v50  ;;  %v10107_v49 = vld [vmem:[%s11065_s21 + $0x99c] ss:$100 sps:$4 sm:$0xff]   ;;  %v10109_v50 = vld [vmem:[%s11065_s21 + $0x968] ss:$100 sps:$4 sm:$0xff]  }
  0xe6   : > { %5129 = vmatmul.mubr.bf16.gmra.mrb[16].mxu1 %v10007_v47  ;;  %5253 = vmatprep.subr.bf16.mxu1 %v10097_v55  ;;  %v10098_v47 = vld [vmem:[%s11065_s21 + $0x8d0] ss:$100 sps:$4 sm:$0xff]   ;;  %v605_v55 = vld [vmem:[%s11065_s21 + $0xb28] sm:$0xff] }
  0xe7   : > { %6215 = vmatmul.mubr.bf16.gmra.mrb[16].mxu0 %v10008_v48  ;;  %5138 = vmatprep.mubr.bf16.mxu1 %v10012_v51  ;;  %v10105_v48 = vld [vmem:[%s11065_s21 + $0x96c] ss:$100 sps:$4 sm:$0xff]   ;;  %v10113_v51 = vld [vmem:[%s11065_s21 + $0x998] ss:$100 sps:$4 sm:$0xff]  }
  0xe8   : > { %6224 = vmatprep.mubr.bf16.mxu0 %v10014_v52  ;;  %6340 = vmatpush1.bf16.msra.mxu0 %v10042_v53  ;;  %v10120_v52 = vld [vmem:[%s11065_s21 + $0xa34] ss:$100 sps:$4 sm:$0xff]   ;;  %v10122_v53 = vld [vmem:[%s11065_s21 + $0xa64] ss:$100 sps:$4 sm:$0xff]  }
  0xe9   : > { %6341 = vmatprep.subr.bf16.mxu0 %v10059_v54  ;;  %5254 = vmatpush1.bf16.msra.mxu1 %v10095_v56  ;;  %v599_v54 = vld [vmem:[%s11065_s21 + $0xaf8] sm:$0xff]  ;;  %v10124_v56 = vld [vmem:[%s11065_s21 + $0xa30] ss:$100 sps:$4 sm:$0xff]  }
  0xea   : > { %5255 = vmatprep.subr.bf16.mxu1 %v10104_v57  ;;  %v10128_v57 = vld [vmem:[%s11065_s21 + $0xa60] ss:$100 sps:$4 sm:$0xff]  }
  0xec   : > { %6342 = vmatpush1.bf16.msra.mxu0 %v10057_v58  ;;  %v8383_v58 = vcombine.high %v599_v54, %v599_v54 }
  0xed   : > { %6343 = vmatprep.subr.bf16.mxu0 %v10071_v61  ;;  %5256 = vmatpush1.bf16.msra.mxu1 %v10102_v62  ;;  %v10153_v61 = vld [vmem:[%s11065_s21 + $0x44] ss:$100 sps:$4 sm:$0xff]   ;;  %v8382_v62 = vcombine.low %v599_v54, %v599_v54 }
  0xee   : > { %5139 = vmatmul.mubr.bf16.gmra.mrb[20].mxu1 %v10016_v59  ;;  %5257 = vmatprep.subr.bf16.mxu1 %v10112_v3  ;;  %v8395_v59 = vcombine.high %v605_v55, %v605_v55  ;;  %v10157_v3 = vld [vmem:[%s11065_s21 + $0xdc] ss:$100 sps:$4 sm:$0xff]  }
  0xef   : > { %6225 = vmatmul.mubr.bf16.gmra.mrb[20].mxu0 %v10017_v60  ;;  %5148 = vmatprep.mubr.bf16.mxu1 %v10021_v63  ;;  %v10150_v60 = vld [vmem:[%s11065_s21 + $0x14] ss:$100 sps:$4 sm:$0xff]   ;;  %v8394_v63 = vcombine.low %v605_v55, %v605_v55  ;;  %v10279_v54 = vld [vmem:[%s12961_s1 + $0x380] ss:$8 sps:$4 sm:$0xff]  }
  0xf0   : > { %6234 = vmatprep.mubr.bf16.mxu0 %v10023_v0  ;;  %6344 = vmatpush1.bf16.msra.mxu0 %v10069_v1  ;;  %v10148_v0 = vld [vmem:[%s11065_s21 + $0x10] ss:$100 sps:$4 sm:$0xff]   ;;  %v10151_v1 = vld [vmem:[%s11065_s21 + $0x40] ss:$100 sps:$4 sm:$0xff]  }
  0xf1   : > { %6345 = vmatprep.subr.bf16.mxu0 %v10086_v2  ;;  %5258 = vmatpush1.bf16.msra.mxu1 %v10110_v4  ;;  %v10154_v2 = vld [vmem:[%s12961_s1 + $0x900] ss:$8 sps:$4 sm:$0xff]   ;;  %v10159_v4 = vld [vmem:[%s11065_s21 + $0x10c] ss:$100 sps:$4 sm:$0xff]  }
  0xf2   : > { %5259 = vmatprep.subr.bf16.mxu1 %v10119_v5  ;;  %v10165_v5 = vld [vmem:[%s12961_s1 + $0x914] ss:$8 sps:$4 sm:$0xff]   ;;  %v10241_v55 = vld [vmem:[%s12961_s1 + $0x990] ss:$8 sps:$4 sm:$0xff]  }
  0xf4   : > { %6346 = vmatpush1.bf16.msra.mxu0 %v10084_v6  ;;  %v10219_v6 = vld [vmem:[%s12961_s1 + $0x300] ss:$8 sps:$4 sm:$0xff]  }
  0xf5   : > { %6347 = vmatprep.subr.bf16.mxu0 %v10101_v9  ;;  %5260 = vmatpush1.bf16.msra.mxu1 %v10117_v10  ;;  %v10172_v9 = vld [vmem:[%s12961_s1 + $0x924] ss:$8 sps:$4 sm:$0xff]   ;;  %v10161_v10 = vld [vmem:[%s11065_s21 + $0xd8] ss:$100 sps:$4 sm:$0xff]  }
  0xf6   : > { %5149 = vmatmul.mubr.bf16.gmra.mrb[24].mxu1 %v10025_v7  ;;  %5261 = vmatprep.subr.bf16.mxu1 %v10127_v15  ;;  %v10225_v7 = vld [vmem:[%s12961_s1 + $0x314] ss:$8 sps:$4 sm:$0xff]   ;;  %v10170_v15 = vld [vmem:[%s12961_s1 + $0x920] ss:$8 sps:$4 sm:$0xff]  }
  0xf7   : > { %6235 = vmatmul.mubr.bf16.gmra.mrb[24].mxu0 %v10026_v8  ;;  %5158 = vmatprep.mubr.bf16.mxu1 %v10030_v11  ;;  %v10163_v8 = vld [vmem:[%s12961_s1 + $0x910] ss:$8 sps:$4 sm:$0xff]   ;;  %v10162_v11 = vld [vmem:[%s11065_s21 + $0x108] ss:$100 sps:$4 sm:$0xff]  }
  0xf8   : > { %6244 = vmatprep.mubr.bf16.mxu0 %v10032_v12  ;;  %6348 = vmatpush1.bf16.msra.mxu0 %v10099_v13  ;;  %v10223_v12 = vld [vmem:[%s12961_s1 + $0x310] ss:$8 sps:$4 sm:$0xff]   ;;  %v10166_v13 = vld [vmem:[%s11065_s21 + $0x1a4] ss:$100 sps:$4 sm:$0xff]  }
  0xf9   : > { %6349 = vmatprep.subr.bf16.mxu0 %v10116_v14  ;;  %5262 = vmatpush1.bf16.msra.mxu1 %v10125_v16  ;;  %v10168_v14 = vld [vmem:[%s11065_s21 + $0x1d4] ss:$100 sps:$4 sm:$0xff]  }
  0xfa   : > { %5263 = vmatprep.subr.bf16.mxu1 %v10134_v17  ;;  %v10181_v16 = vld [vmem:[%s12961_s1 + $0x934] ss:$8 sps:$4 sm:$0xff]   ;;  %v10234_v17 = vld [vmem:[%s12961_s1 + $0x320] ss:$8 sps:$4 sm:$0xff]  }
  0xfc   : > { %6350 = vmatpush1.bf16.msra.mxu0 %v10114_v20  ;;  %v10179_v20 = vld [vmem:[%s12961_s1 + $0x930] ss:$8 sps:$4 sm:$0xff]  }
  0xfd   : > { %6351 = vmatprep.subr.bf16.mxu0 %v10131_v22  ;;  %5264 = vmatpush1.bf16.msra.mxu1 %v10132_v23  ;;  %v10173_v22 = vld [vmem:[%s11065_s21 + $0x1a0] ss:$100 sps:$4 sm:$0xff]   ;;  %v10174_v23 = vld [vmem:[%s11065_s21 + $0x1d0] ss:$100 sps:$4 sm:$0xff]  }
  0xfe   : > { %5159 = vmatmul.mubr.bf16.gmra.mrb[28].mxu1 %v10034_v18  ;;  %5265 = vmatprep.subr.bf16.mxu1 %v10140_v27  ;;  %v10236_v18 = vld [vmem:[%s12961_s1 + $0x324] ss:$8 sps:$4 sm:$0xff]   ;;  %v10184_v27 = vld [vmem:[%s12961_s1 + $0x940] ss:$8 sps:$4 sm:$0xff]  }
  0xff   : > { %6245 = vmatmul.mubr.bf16.gmra.mrb[28].mxu0 %v10038_v19  ;;  %5168 = vmatprep.mubr.bf16.mxu1 %v10045_v21  ;;  %v10240_v19 = vld [vmem:[%s12961_s1 + $0x334] ss:$8 sps:$4 sm:$0xff]   ;;  %v10186_v21 = vld [vmem:[%s12961_s1 + $0x944] ss:$8 sps:$4 sm:$0xff]  }
 0x100   : > { %6254 = vmatprep.mubr.bf16.mxu0 %v10047_v24  ;;  %6352 = vmatpush1.bf16.msra.mxu0 %v10129_v25  ;;  %v10238_v24 = vld [vmem:[%s12961_s1 + $0x330] ss:$8 sps:$4 sm:$0xff]  }
 0x101   : > { %5266 = vmatpush1.bf16.msra.mxu1 %v10138_v26  ;;  %6353 = vmatprep.subr.bf16.mxu0 %v10144_v28  ;;  %v10175_v25 = vld [vmem:[%s11065_s21 + $0x26c] ss:$100 sps:$4 sm:$0xff]   ;;  %v10177_v26 = vld [vmem:[%s11065_s21 + $0x29c] ss:$100 sps:$4 sm:$0xff]  }
 0x102   : > { %5267 = vmatprep.subr.bf16.mxu1 %v10147_v29  ;;  %v10251_v28 = vld [vmem:[%s12961_s1 + $0x344] ss:$8 sps:$4 sm:$0xff]   ;;  %v10195_v29 = vld [vmem:[%s12961_s1 + $0x954] ss:$8 sps:$4 sm:$0xff]  }
 0x104   : > { %6354 = vmatpush1.bf16.msra.mxu0 %v10142_v31  ;;  %v10193_v31 = vld [vmem:[%s12961_s1 + $0x950] ss:$8 sps:$4 sm:$0xff]  }
 0x105   : > { %5268 = vmatpush1.bf16.msra.mxu1 %v10145_v32  ;;  %6504 = vmatprep.subr.bf16.mxu0 %v10156_v33  ;;  %v10258_v32 = vld [vmem:[%s12961_s1 + $0x354] ss:$8 sps:$4 sm:$0xff]   ;;  %v10204_v33 = vld [vmem:[%s12961_s1 + $0x964] ss:$8 sps:$4 sm:$0xff]  }
 0x106   : > { %5169 = vmatmul.mubr.bf16.gmra.mrb[32].mxu1 %v10049_v30  ;;  %5418 = vmatprep.subr.bf16.mxu1 %v10221_v37  ;;  %v10249_v30 = vld [vmem:[%s12961_s1 + $0x340] ss:$8 sps:$4 sm:$0xff]   ;;  %v10187_v37 = vld [vmem:[%s11065_s21 + $0x334] ss:$100 sps:$4 sm:$0xff]  }
 0x107   : > { %6255 = vmatmul.mubr.bf16.gmra.mrb[32].mxu0 %v10053_v34  ;;  %5178 = vmatprep.mubr.bf16.mxu1 %v10060_v35  ;;  %v10256_v34 = vld [vmem:[%s12961_s1 + $0x350] ss:$8 sps:$4 sm:$0xff]   ;;  %v10182_v35 = vld [vmem:[%s11065_s21 + $0x268] ss:$100 sps:$4 sm:$0xff]  }
 0x108   : > { %6264 = vmatprep.mubr.bf16.mxu0 %v10062_v36  ;;  %v10183_v36 = vld [vmem:[%s11065_s21 + $0x298] ss:$100 sps:$4 sm:$0xff]  }
 0x10e   : > { %5179 = vmatmul.mubr.bf16.gmra.mrb[36].mxu1 %v10064_v38  ;;  %v10189_v38 = vld [vmem:[%s11065_s21 + $0x364] ss:$100 sps:$4 sm:$0xff]  }
 0x10f   : > { %6265 = vmatmul.mubr.bf16.gmra.mrb[36].mxu0 %v10068_v39  ;;  %5188 = vmatprep.mubr.bf16.mxu1 %v10075_v40  ;;  %v10202_v39 = vld [vmem:[%s12961_s1 + $0x960] ss:$8 sps:$4 sm:$0xff]   ;;  %v10266_v40 = vld [vmem:[%s12961_s1 + $0x364] ss:$8 sps:$4 sm:$0xff]  }
 0x110   : > { %6274 = vmatprep.mubr.bf16.mxu0 %v10077_v41  ;;  %v10213_v41 = vld [vmem:[%s12961_s1 + $0x974] ss:$8 sps:$4 sm:$0xff]  }
 0x116   : > { %5189 = vmatmul.mubr.bf16.gmra.mrb[40].mxu1 %v10079_v42  ;;  %v10264_v42 = vld [vmem:[%s12961_s1 + $0x360] ss:$8 sps:$4 sm:$0xff]  }
 0x117   : > { %6275 = vmatmul.mubr.bf16.gmra.mrb[40].mxu0 %v10083_v43  ;;  %5198 = vmatprep.mubr.bf16.mxu1 %v10090_v44  ;;  %v10211_v43 = vld [vmem:[%s12961_s1 + $0x970] ss:$8 sps:$4 sm:$0xff]   ;;  %v10273_v44 = vld [vmem:[%s12961_s1 + $0x374] ss:$8 sps:$4 sm:$0xff]  }
 0x118   : > { %6284 = vmatprep.mubr.bf16.mxu0 %v10092_v45  ;;  %v10228_v45 = vld [vmem:[%s12961_s1 + $0x984] ss:$8 sps:$4 sm:$0xff]  }
 0x11e   : > { %5199 = vmatmul.mubr.bf16.gmra.mrb[44].mxu1 %v10094_v46  ;;  %v10271_v46 = vld [vmem:[%s12961_s1 + $0x370] ss:$8 sps:$4 sm:$0xff]  }
 0x11f   : > { %6285 = vmatmul.mubr.bf16.gmra.mrb[44].mxu0 %v10098_v47  ;;  %5208 = vmatprep.mubr.bf16.mxu1 %v10105_v48  ;;  %v10191_v47 = vld [vmem:[%s11065_s21 + $0x330] ss:$100 sps:$4 sm:$0xff]   ;;  %v10192_v48 = vld [vmem:[%s11065_s21 + $0x360] ss:$100 sps:$4 sm:$0xff]  }
 0x120   : > { %6294 = vmatprep.mubr.bf16.mxu0 %v10107_v49  ;;  %v10196_v49 = vld [vmem:[%s11065_s21 + $0x3fc] ss:$100 sps:$4 sm:$0xff]  }
 0x126   : > { %5209 = vmatmul.mubr.bf16.gmra.mrb[48].mxu1 %v10109_v50  ;;  %v10198_v50 = vld [vmem:[%s11065_s21 + $0x42c] ss:$100 sps:$4 sm:$0xff]  }
 0x127   : > { %6295 = vmatmul.mubr.bf16.gmra.mrb[48].mxu0 %v10113_v51  ;;  %5218 = vmatprep.mubr.bf16.mxu1 %v10120_v52  ;;  %v10226_v51 = vld [vmem:[%s12961_s1 + $0x980] ss:$8 sps:$4 sm:$0xff]   ;;  %v10281_v52 = vld [vmem:[%s12961_s1 + $0x384] ss:$8 sps:$4 sm:$0xff]  }
 0x128   : > { %6304 = vmatprep.mubr.bf16.mxu0 %v10122_v53  ;;  %v10243_v53 = vld [vmem:[%s12961_s1 + $0x994] ss:$8 sps:$4 sm:$0xff]  }
 0x12e   : > { %5219 = vmatmul.mubr.bf16.gmra.mrb[52].mxu1 %v10124_v56  ;;  %v10288_v56 = vld [vmem:[%s12961_s1 + $0x394] ss:$8 sps:$4 sm:$0xff]  }
 0x12f   : > { %6305 = vmatmul.mubr.bf16.gmra.mrb[52].mxu0 %v10128_v57  ;;  %5228 = vmatprep.mubr.bf16.mxu1 %v8383_v58  ;;  %v10255_v57 = vld [vmem:[%s12961_s1 + $0x9a4] ss:$8 sps:$4 sm:$0xff]   ;;  %v10286_v58 = vld [vmem:[%s12961_s1 + $0x390] ss:$8 sps:$4 sm:$0xff]  }
 0x130   : > { %6314 = vmatprep.mubr.bf16.mxu0 %v8395_v59  ;;  %v10200_v59 = vld [vmem:[%s11065_s21 + $0x3f8] ss:$100 sps:$4 sm:$0xff]  }
 0x136   : > { %5229 = vmatmul.mubr.bf16.gmra.mrb[56].mxu1 %v8382_v62  ;;  %v10207_v62 = vld [vmem:[%s11065_s21 + $0x4f4] ss:$100 sps:$4 sm:$0xff]  }
 0x137   : > { %6315 = vmatmul.mubr.bf16.gmra.mrb[56].mxu0 %v8394_v63  ;;  %5269 = vmatprep.mubr.bf16.mxu1 %v10150_v60  ;;  %v10201_v60 = vld [vmem:[%s11065_s21 + $0x428] ss:$100 sps:$4 sm:$0xff]  }
 0x138   : > { %6355 = vmatprep.mubr.bf16.mxu0 %v10153_v61  ;;  %v10205_v61 = vld [vmem:[%s11065_s21 + $0x4c4] ss:$100 sps:$4 sm:$0xff]  }
 0x139   : > { %v10253_v63 = vld [vmem:[%s12961_s1 + $0x9a0] ss:$8 sps:$4 sm:$0xff]  }
 0x13e   : > { %5270 = vmatmul.mubr.bf16.vlgmr.msra.gmra.mrb[0].mxu1 %v10148_v0  ;;  %v10296_v0 = vld [vmem:[%s12961_s1 + $0x3a4] ss:$8 sps:$4 sm:$0xff]  }
 0x13f   : > { %6356 = vmatmul.mubr.bf16.vlgmr.msra.gmra.mrb[0].mxu0 %v10151_v1  ;;  %5279 = vmatprep.mubr.bf16.mxu1 %v10157_v3  ;;  %v10270_v1 = vld [vmem:[%s12961_s1 + $0x9b4] ss:$8 sps:$4 sm:$0xff]   ;;  %v10268_v3 = vld [vmem:[%s12961_s1 + $0x9b0] ss:$8 sps:$4 sm:$0xff]  }
 0x140   : > { %6505 = vmatpush1.bf16.msra.mxu0 %v10154_v2  ;;  %6365 = vmatprep.mubr.bf16.mxu0 %v10159_v4  ;;  %v10294_v2 = vld [vmem:[%s12961_s1 + $0x3a0] ss:$8 sps:$4 sm:$0xff]   ;;  %v10303_v4 = vld [vmem:[%s12961_s1 + $0x3b4] ss:$8 sps:$4 sm:$0xff]  }
 0x141   : > { %6506 = vmatprep.subr.bf16.mxu0 %v10165_v5  ;;  %5419 = vmatpush1.bf16.msra.mxu1 %v10219_v6  ;;  %v10285_v5 = vld [vmem:[%s12961_s1 + $0x9c4] ss:$8 sps:$4 sm:$0xff]   ;;  %v10301_v6 = vld [vmem:[%s12961_s1 + $0x3b0] ss:$8 sps:$4 sm:$0xff]  }
 0x142   : > { %5420 = vmatprep.subr.bf16.mxu1 %v10225_v7  ;;  %v10209_v7 = vld [vmem:[%s11065_s21 + $0x4c0] ss:$100 sps:$4 sm:$0xff]  }
 0x144   : > { %6507 = vmatpush1.bf16.msra.mxu0 %v10163_v8  ;;  %v10210_v8 = vld [vmem:[%s11065_s21 + $0x4f0] ss:$100 sps:$4 sm:$0xff]  }
 0x145   : > { %6508 = vmatprep.subr.bf16.mxu0 %v10172_v9  ;;  %5421 = vmatpush1.bf16.msra.mxu1 %v10223_v12  ;;  %v10214_v9 = vld [vmem:[%s11065_s21 + $0x58c] ss:$100 sps:$4 sm:$0xff]   ;;  %v10300_v12 = vld [vmem:[%s12961_s1 + $0x9d4] ss:$8 sps:$4 sm:$0xff]  }
 0x146   : > { %5280 = vmatmul.mubr.bf16.gmra.mrb[4].mxu1 %v10161_v10  ;;  %5422 = vmatprep.subr.bf16.mxu1 %v10236_v18  ;;  %v10216_v10 = vld [vmem:[%s11065_s21 + $0x5bc] ss:$100 sps:$4 sm:$0xff]   ;;  %v10218_v18 = vld [vmem:[%s11065_s21 + $0x588] ss:$100 sps:$4 sm:$0xff]  }
 0x147   : > { %6366 = vmatmul.mubr.bf16.gmra.mrb[4].mxu0 %v10162_v11  ;;  %5289 = vmatprep.mubr.bf16.mxu1 %v10166_v13  ;;  %v10283_v11 = vld [vmem:[%s12961_s1 + $0x9c0] ss:$8 sps:$4 sm:$0xff]   ;;  %v10311_v13 = vld [vmem:[%s12961_s1 + $0x3c4] ss:$8 sps:$4 sm:$0xff]  }
 0x148   : > { %6375 = vmatprep.mubr.bf16.mxu0 %v10168_v14  ;;  %6509 = vmatpush1.bf16.msra.mxu0 %v10170_v15  ;;  %v10309_v14 = vld [vmem:[%s12961_s1 + $0x3c0] ss:$8 sps:$4 sm:$0xff]   ;;  %v10318_v15 = vld [vmem:[%s12961_s1 + $0x3d4] ss:$8 sps:$4 sm:$0xff]  }
 0x149   : > { %6510 = vmatprep.subr.bf16.mxu0 %v10181_v16  ;;  %5423 = vmatpush1.bf16.msra.mxu1 %v10234_v17  ;;  %v10298_v16 = vld [vmem:[%s12961_s1 + $0x9d0] ss:$8 sps:$4 sm:$0xff]   ;;  %v10315_v17 = vld [vmem:[%s12961_s1 + $0x9e4] ss:$8 sps:$4 sm:$0xff]  }
 0x14a   : > { %5424 = vmatprep.subr.bf16.mxu1 %v10240_v19  ;;  %v10222_v19 = vld [vmem:[%s11065_s21 + $0x5b8] ss:$100 sps:$4 sm:$0xff]  }
 0x14c   : > { %6511 = vmatpush1.bf16.msra.mxu0 %v10179_v20  ;;  %v10316_v20 = vld [vmem:[%s12961_s1 + $0x3d0] ss:$8 sps:$4 sm:$0xff]  }
 0x14d   : > { %6512 = vmatprep.subr.bf16.mxu0 %v10186_v21  ;;  %5425 = vmatpush1.bf16.msra.mxu1 %v10238_v24  ;;  %v10229_v21 = vld [vmem:[%s11065_s21 + $0x654] ss:$100 sps:$4 sm:$0xff]   ;;  %v10322_v24 = vld [vmem:[%s12961_s1 + $0x3e0] ss:$8 sps:$4 sm:$0xff]  }
 0x14e   : > { %5290 = vmatmul.mubr.bf16.gmra.mrb[8].mxu1 %v10173_v22  ;;  %5426 = vmatprep.subr.bf16.mxu1 %v10251_v28  ;;  %v10231_v22 = vld [vmem:[%s11065_s21 + $0x684] ss:$100 sps:$4 sm:$0xff]   ;;  %v10326_v28 = vld [vmem:[%s12961_s1 + $0x9f0] ss:$8 sps:$4 sm:$0xff]  }
 0x14f   : > { %6376 = vmatmul.mubr.bf16.gmra.mrb[8].mxu0 %v10174_v23  ;;  %5299 = vmatprep.mubr.bf16.mxu1 %v10175_v25  ;;  %v10313_v23 = vld [vmem:[%s12961_s1 + $0x9e0] ss:$8 sps:$4 sm:$0xff]   ;;  %v10324_v25 = vld [vmem:[%s12961_s1 + $0x3e4] ss:$8 sps:$4 sm:$0xff]  }
 0x150   : > { %6385 = vmatprep.mubr.bf16.mxu0 %v10177_v26  ;;  %6513 = vmatpush1.bf16.msra.mxu0 %v10184_v27  ;;  %v10328_v26 = vld [vmem:[%s12961_s1 + $0x9f4] ss:$8 sps:$4 sm:$0xff]  }
 0x151   : > { %6514 = vmatprep.subr.bf16.mxu0 %v10195_v29  ;;  %5427 = vmatpush1.bf16.msra.mxu1 %v10249_v30  ;;  %v10331_v27 = vld [vmem:[%s12961_s1 + $0x3f4] ss:$8 sps:$4 sm:$0xff]   ;;  %v10329_v29 = vld [vmem:[%s12961_s1 + $0x3f0] ss:$8 sps:$4 sm:$0xff]  }
 0x152   : > { %5428 = vmatprep.subr.bf16.mxu1 %v10258_v32  ;;  %v10233_v30 = vld [vmem:[%s11065_s21 + $0x650] ss:$100 sps:$4 sm:$0xff]   ;;  %v10340_v32 = vld [vmem:[%s12961_s1 + $0xa04] ss:$8 sps:$4 sm:$0xff]  }
 0x154   : > { %6515 = vmatpush1.bf16.msra.mxu0 %v10193_v31  ;;  %v10237_v31 = vld [vmem:[%s11065_s21 + $0x680] ss:$100 sps:$4 sm:$0xff]  }
 0x155   : > { %6516 = vmatprep.subr.bf16.mxu0 %v10204_v33  ;;  %5429 = vmatpush1.bf16.msra.mxu1 %v10256_v34  ;;  %v10244_v33 = vld [vmem:[%s11065_s21 + $0x71c] ss:$100 sps:$4 sm:$0xff]   ;;  %v10246_v34 = vld [vmem:[%s11065_s21 + $0x74c] ss:$100 sps:$4 sm:$0xff]  }
 0x156   : > { %5300 = vmatmul.mubr.bf16.gmra.mrb[12].mxu1 %v10182_v35  ;;  %5430 = vmatprep.subr.bf16.mxu1 %v10266_v40  ;;  %v10405_v35 = vld [vmem:[%s12961_s1 + $0x404] ss:$8 sps:$4 sm:$0xff]  }
 0x157   : > { %6386 = vmatmul.mubr.bf16.gmra.mrb[12].mxu0 %v10183_v36  ;;  %5309 = vmatprep.mubr.bf16.mxu1 %v10187_v37  ;;  %v10248_v36 = vld [vmem:[%s11065_s21 + $0x718] ss:$100 sps:$4 sm:$0xff]   ;;  %v10252_v37 = vld [vmem:[%s11065_s21 + $0x748] ss:$100 sps:$4 sm:$0xff]   ;;  %v10263_v40 = vld [vmem:[%s11065_s21 + $0x7e0] ss:$100 sps:$4 sm:$0xff]  }
 0x158   : > { %6395 = vmatprep.mubr.bf16.mxu0 %v10189_v38  ;;  %6517 = vmatpush1.bf16.msra.mxu0 %v10202_v39  ;;  %v10259_v38 = vld [vmem:[%s11065_s21 + $0x7e4] ss:$100 sps:$4 sm:$0xff]   ;;  %v10261_v39 = vld [vmem:[%s11065_s21 + $0x814] ss:$100 sps:$4 sm:$0xff]  }
 0x159   : > { %6518 = vmatprep.subr.bf16.mxu0 %v10213_v41  ;;  %5431 = vmatpush1.bf16.msra.mxu1 %v10264_v42  ;;  %v10267_v41 = vld [vmem:[%s11065_s21 + $0x810] ss:$100 sps:$4 sm:$0xff]  }
 0x15a   : > { %5432 = vmatprep.subr.bf16.mxu1 %v10273_v44  ;;  %v10274_v42 = vld [vmem:[%s11065_s21 + $0x8ac] ss:$100 sps:$4 sm:$0xff]  }
 0x15b   : > { %v10278_v44 = vld [vmem:[%s11065_s21 + $0x8a8] ss:$100 sps:$4 sm:$0xff]  }
 0x15c   : > { %6519 = vmatpush1.bf16.msra.mxu0 %v10211_v43  ;;  %v10276_v43 = vld [vmem:[%s11065_s21 + $0x8dc] ss:$100 sps:$4 sm:$0xff]  }
 0x15d   : > { %6520 = vmatprep.subr.bf16.mxu0 %v10228_v45  ;;  %5433 = vmatpush1.bf16.msra.mxu1 %v10271_v46  ;;  %v10282_v45 = vld [vmem:[%s11065_s21 + $0x8d8] ss:$100 sps:$4 sm:$0xff]  }
 0x15e   : > { %5310 = vmatmul.mubr.bf16.gmra.mrb[16].mxu1 %v10191_v47  ;;  %5434 = vmatprep.subr.bf16.mxu1 %v10281_v52  ;;  %v10289_v46 = vld [vmem:[%s11065_s21 + $0x974] ss:$100 sps:$4 sm:$0xff]   ;;  %v10291_v47 = vld [vmem:[%s11065_s21 + $0x9a4] ss:$100 sps:$4 sm:$0xff]  }
 0x15f   : > { %6396 = vmatmul.mubr.bf16.gmra.mrb[16].mxu0 %v10192_v48  ;;  %5319 = vmatprep.mubr.bf16.mxu1 %v10196_v49  ;;  %v10293_v48 = vld [vmem:[%s11065_s21 + $0x970] ss:$100 sps:$4 sm:$0xff]   ;;  %v10297_v49 = vld [vmem:[%s11065_s21 + $0x9a0] ss:$100 sps:$4 sm:$0xff]  }
 0x160   : > { %6405 = vmatprep.mubr.bf16.mxu0 %v10198_v50  ;;  %6521 = vmatpush1.bf16.msra.mxu0 %v10226_v51  ;;  %v10304_v50 = vld [vmem:[%s11065_s21 + $0xa3c] ss:$100 sps:$4 sm:$0xff]   ;;  %v10306_v51 = vld [vmem:[%s11065_s21 + $0xa6c] ss:$100 sps:$4 sm:$0xff]  }
 0x161   : > { %6522 = vmatprep.subr.bf16.mxu0 %v10243_v53  ;;  %5435 = vmatpush1.bf16.msra.mxu1 %v10279_v54  ;;  %v600_v52 = vld [vmem:[%s11065_s21 + $0xb00] sm:$0xff]  ;;  %v606_v53 = vld [vmem:[%s11065_s21 + $0xb30] sm:$0xff]  ;;  %v10308_v54 = vld [vmem:[%s11065_s21 + $0xa38] ss:$100 sps:$4 sm:$0xff]  }
 0x162   : > { %5436 = vmatprep.subr.bf16.mxu1 %v10288_v56  ;;  %v8385_v56 = vcombine.high %v600_v52, %v600_v52 }
 0x164   : > { %6523 = vmatpush1.bf16.msra.mxu0 %v10241_v55  ;;  %v10312_v55 = vld [vmem:[%s11065_s21 + $0xa68] ss:$100 sps:$4 sm:$0xff]  }
 0x165   : > { %6524 = vmatprep.subr.bf16.mxu0 %v10255_v57  ;;  %5437 = vmatpush1.bf16.msra.mxu1 %v10286_v58  ;;  %v8397_v57 = vcombine.high %v606_v53, %v606_v53  ;;  %v10334_v58 = vld [vmem:[%s11065_s21 + $0x1c] ss:$100 sps:$4 sm:$0xff]  }
 0x166   : > { %5320 = vmatmul.mubr.bf16.gmra.mrb[20].mxu1 %v10200_v59  ;;  %5438 = vmatprep.subr.bf16.mxu1 %v10296_v0  ;;  %v10337_v59 = vld [vmem:[%s11065_s21 + $0x4c] ss:$100 sps:$4 sm:$0xff]   ;;  %v10338_v0 = vld [vmem:[%s12961_s1 + $0xa00] ss:$8 sps:$4 sm:$0xff]  }
 0x167   : > { %6406 = vmatmul.mubr.bf16.gmra.mrb[20].mxu0 %v10201_v60  ;;  %5329 = vmatprep.mubr.bf16.mxu1 %v10205_v61  ;;  %v8384_v60 = vcombine.low %v600_v52, %v600_v52  ;;  %v8396_v61 = vcombine.low %v606_v53, %v606_v53  ;;  %v10463_v52 = vld [vmem:[%s12961_s1 + $0x480] ss:$8 sps:$4 sm:$0xff]   ;;  %v10425_v53 = vld [vmem:[%s12961_s1 + $0xa90] ss:$8 sps:$4 sm:$0xff]  }
 0x168   : > { %6415 = vmatprep.mubr.bf16.mxu0 %v10207_v62  ;;  %6525 = vmatpush1.bf16.msra.mxu0 %v10253_v63  ;;  %v10332_v62 = vld [vmem:[%s11065_s21 + $0x18] ss:$100 sps:$4 sm:$0xff]   ;;  %v10335_v63 = vld [vmem:[%s11065_s21 + $0x48] ss:$100 sps:$4 sm:$0xff]  }
 0x169   : > { %6526 = vmatprep.subr.bf16.mxu0 %v10270_v1  ;;  %5439 = vmatpush1.bf16.msra.mxu1 %v10294_v2  ;;  %v10341_v1 = vld [vmem:[%s11065_s21 + $0xe4] ss:$100 sps:$4 sm:$0xff]   ;;  %v10343_v2 = vld [vmem:[%s11065_s21 + $0x114] ss:$100 sps:$4 sm:$0xff]  }
 0x16a   : > { %5440 = vmatprep.subr.bf16.mxu1 %v10303_v4  ;;  %v10403_v4 = vld [vmem:[%s12961_s1 + $0x400] ss:$8 sps:$4 sm:$0xff]  }
 0x16c   : > { %6527 = vmatpush1.bf16.msra.mxu0 %v10268_v3  ;;  %v10349_v3 = vld [vmem:[%s12961_s1 + $0xa14] ss:$8 sps:$4 sm:$0xff]  }
 0x16d   : > { %6528 = vmatprep.subr.bf16.mxu0 %v10285_v5  ;;  %5441 = vmatpush1.bf16.msra.mxu1 %v10301_v6  ;;  %v10409_v5 = vld [vmem:[%s12961_s1 + $0x414] ss:$8 sps:$4 sm:$0xff]   ;;  %v10347_v6 = vld [vmem:[%s12961_s1 + $0xa10] ss:$8 sps:$4 sm:$0xff]  }
 0x16e   : > { %5330 = vmatmul.mubr.bf16.gmra.mrb[24].mxu1 %v10209_v7  ;;  %5442 = vmatprep.subr.bf16.mxu1 %v10311_v13  ;;  %v10356_v7 = vld [vmem:[%s12961_s1 + $0xa24] ss:$8 sps:$4 sm:$0xff]   ;;  %v10354_v13 = vld [vmem:[%s12961_s1 + $0xa20] ss:$8 sps:$4 sm:$0xff]  }
 0x16f   : > { %6416 = vmatmul.mubr.bf16.gmra.mrb[24].mxu0 %v10210_v8  ;;  %5339 = vmatprep.mubr.bf16.mxu1 %v10214_v9  ;;  %v10345_v8 = vld [vmem:[%s11065_s21 + $0xe0] ss:$100 sps:$4 sm:$0xff]   ;;  %v10346_v9 = vld [vmem:[%s11065_s21 + $0x110] ss:$100 sps:$4 sm:$0xff]  }
 0x170   : > { %6425 = vmatprep.mubr.bf16.mxu0 %v10216_v10  ;;  %6529 = vmatpush1.bf16.msra.mxu0 %v10283_v11  ;;  %v10407_v10 = vld [vmem:[%s12961_s1 + $0x410] ss:$8 sps:$4 sm:$0xff]  }
 0x171   : > { %6530 = vmatprep.subr.bf16.mxu0 %v10300_v12  ;;  %5443 = vmatpush1.bf16.msra.mxu1 %v10309_v14  ;;  %v10350_v11 = vld [vmem:[%s11065_s21 + $0x1ac] ss:$100 sps:$4 sm:$0xff]   ;;  %v10352_v12 = vld [vmem:[%s11065_s21 + $0x1dc] ss:$100 sps:$4 sm:$0xff]  }
 0x172   : > { %5444 = vmatprep.subr.bf16.mxu1 %v10318_v15  ;;  %v10420_v14 = vld [vmem:[%s12961_s1 + $0x424] ss:$8 sps:$4 sm:$0xff]   ;;  %v10365_v15 = vld [vmem:[%s12961_s1 + $0xa34] ss:$8 sps:$4 sm:$0xff]  }
 0x174   : > { %6531 = vmatpush1.bf16.msra.mxu0 %v10298_v16  ;;  %v10418_v16 = vld [vmem:[%s12961_s1 + $0x420] ss:$8 sps:$4 sm:$0xff]  }
 0x175   : > { %6532 = vmatprep.subr.bf16.mxu0 %v10315_v17  ;;  %5445 = vmatpush1.bf16.msra.mxu1 %v10316_v20  ;;  %v10424_v17 = vld [vmem:[%s12961_s1 + $0x434] ss:$8 sps:$4 sm:$0xff]   ;;  %v10357_v20 = vld [vmem:[%s11065_s21 + $0x1a8] ss:$100 sps:$4 sm:$0xff]  }
 0x176   : > { %5340 = vmatmul.mubr.bf16.gmra.mrb[28].mxu1 %v10218_v18  ;;  %5446 = vmatprep.subr.bf16.mxu1 %v10324_v25  ;;  %v10363_v18 = vld [vmem:[%s12961_s1 + $0xa30] ss:$8 sps:$4 sm:$0xff]   ;;  %v10368_v25 = vld [vmem:[%s12961_s1 + $0xa40] ss:$8 sps:$4 sm:$0xff]  }
 0x177   : > { %6426 = vmatmul.mubr.bf16.gmra.mrb[28].mxu0 %v10222_v19  ;;  %5349 = vmatprep.mubr.bf16.mxu1 %v10229_v21  ;;  %v10370_v19 = vld [vmem:[%s12961_s1 + $0xa44] ss:$8 sps:$4 sm:$0xff]   ;;  %v10358_v21 = vld [vmem:[%s11065_s21 + $0x1d8] ss:$100 sps:$4 sm:$0xff]  }
 0x178   : > { %6435 = vmatprep.mubr.bf16.mxu0 %v10231_v22  ;;  %6533 = vmatpush1.bf16.msra.mxu0 %v10313_v23  ;;  %v10422_v22 = vld [vmem:[%s12961_s1 + $0x430] ss:$8 sps:$4 sm:$0xff]  }
 0x179   : > { %5447 = vmatpush1.bf16.msra.mxu1 %v10322_v24  ;;  %6534 = vmatprep.subr.bf16.mxu0 %v10328_v26  ;;  %v10359_v23 = vld [vmem:[%s11065_s21 + $0x274] ss:$100 sps:$4 sm:$0xff]   ;;  %v10361_v24 = vld [vmem:[%s11065_s21 + $0x2a4] ss:$100 sps:$4 sm:$0xff]  }
 0x17a   : > { %5448 = vmatprep.subr.bf16.mxu1 %v10331_v27  ;;  %v10435_v26 = vld [vmem:[%s12961_s1 + $0x444] ss:$8 sps:$4 sm:$0xff]   ;;  %v10379_v27 = vld [vmem:[%s12961_s1 + $0xa54] ss:$8 sps:$4 sm:$0xff]  }
 0x17c   : > { %6535 = vmatpush1.bf16.msra.mxu0 %v10326_v28  ;;  %v10433_v28 = vld [vmem:[%s12961_s1 + $0x440] ss:$8 sps:$4 sm:$0xff]  }
 0x17d   : > { %5449 = vmatpush1.bf16.msra.mxu1 %v10329_v29  ;;  %6685 = vmatprep.subr.bf16.mxu0 %v10340_v32  ;;  %v10377_v29 = vld [vmem:[%s12961_s1 + $0xa50] ss:$8 sps:$4 sm:$0xff]  }
 0x17e   : > { %5350 = vmatmul.mubr.bf16.gmra.mrb[32].mxu1 %v10233_v30  ;;  %5599 = vmatprep.subr.bf16.mxu1 %v10405_v35  ;;  %v10442_v30 = vld [vmem:[%s12961_s1 + $0x454] ss:$8 sps:$4 sm:$0xff]   ;;  %v10440_v32 = vld [vmem:[%s12961_s1 + $0x450] ss:$8 sps:$4 sm:$0xff]  }
 0x17f   : > { %6436 = vmatmul.mubr.bf16.gmra.mrb[32].mxu0 %v10237_v31  ;;  %5359 = vmatprep.mubr.bf16.mxu1 %v10244_v33  ;;  %v10388_v31 = vld [vmem:[%s12961_s1 + $0xa64] ss:$8 sps:$4 sm:$0xff]   ;;  %v10366_v33 = vld [vmem:[%s11065_s21 + $0x270] ss:$100 sps:$4 sm:$0xff]   ;;  %v10371_v35 = vld [vmem:[%s11065_s21 + $0x33c] ss:$100 sps:$4 sm:$0xff]  }
 0x180   : > { %6445 = vmatprep.mubr.bf16.mxu0 %v10246_v34  ;;  %v10367_v34 = vld [vmem:[%s11065_s21 + $0x2a0] ss:$100 sps:$4 sm:$0xff]  }
 0x186   : > { %5360 = vmatmul.mubr.bf16.gmra.mrb[36].mxu1 %v10248_v36  ;;  %v10373_v36 = vld [vmem:[%s11065_s21 + $0x36c] ss:$100 sps:$4 sm:$0xff]  }
 0x187   : > { %6446 = vmatmul.mubr.bf16.gmra.mrb[36].mxu0 %v10252_v37  ;;  %5369 = vmatprep.mubr.bf16.mxu1 %v10259_v38  ;;  %v10386_v37 = vld [vmem:[%s12961_s1 + $0xa60] ss:$8 sps:$4 sm:$0xff]   ;;  %v10450_v38 = vld [vmem:[%s12961_s1 + $0x464] ss:$8 sps:$4 sm:$0xff]  }
 0x188   : > { %6455 = vmatprep.mubr.bf16.mxu0 %v10261_v39  ;;  %v10397_v39 = vld [vmem:[%s12961_s1 + $0xa74] ss:$8 sps:$4 sm:$0xff]  }
 0x18e   : > { %5370 = vmatmul.mubr.bf16.gmra.mrb[40].mxu1 %v10263_v40  ;;  %v10448_v40 = vld [vmem:[%s12961_s1 + $0x460] ss:$8 sps:$4 sm:$0xff]  }
 0x18f   : > { %6456 = vmatmul.mubr.bf16.gmra.mrb[40].mxu0 %v10267_v41  ;;  %5379 = vmatprep.mubr.bf16.mxu1 %v10274_v42  ;;  %v10395_v41 = vld [vmem:[%s12961_s1 + $0xa70] ss:$8 sps:$4 sm:$0xff]   ;;  %v10457_v42 = vld [vmem:[%s12961_s1 + $0x474] ss:$8 sps:$4 sm:$0xff]  }
 0x190   : > { %6465 = vmatprep.mubr.bf16.mxu0 %v10276_v43  ;;  %v10412_v43 = vld [vmem:[%s12961_s1 + $0xa84] ss:$8 sps:$4 sm:$0xff]  }
 0x196   : > { %5380 = vmatmul.mubr.bf16.gmra.mrb[44].mxu1 %v10278_v44  ;;  %v10455_v44 = vld [vmem:[%s12961_s1 + $0x470] ss:$8 sps:$4 sm:$0xff]  }
 0x197   : > { %6466 = vmatmul.mubr.bf16.gmra.mrb[44].mxu0 %v10282_v45  ;;  %5389 = vmatprep.mubr.bf16.mxu1 %v10289_v46  ;;  %v10375_v45 = vld [vmem:[%s11065_s21 + $0x338] ss:$100 sps:$4 sm:$0xff]   ;;  %v10376_v46 = vld [vmem:[%s11065_s21 + $0x368] ss:$100 sps:$4 sm:$0xff]  }
 0x198   : > { %6475 = vmatprep.mubr.bf16.mxu0 %v10291_v47  ;;  %v10380_v47 = vld [vmem:[%s11065_s21 + $0x404] ss:$100 sps:$4 sm:$0xff]  }
 0x19e   : > { %5390 = vmatmul.mubr.bf16.gmra.mrb[48].mxu1 %v10293_v48  ;;  %v10382_v48 = vld [vmem:[%s11065_s21 + $0x434] ss:$100 sps:$4 sm:$0xff]  }
 0x19f   : > { %6476 = vmatmul.mubr.bf16.gmra.mrb[48].mxu0 %v10297_v49  ;;  %5399 = vmatprep.mubr.bf16.mxu1 %v10304_v50  ;;  %v10410_v49 = vld [vmem:[%s12961_s1 + $0xa80] ss:$8 sps:$4 sm:$0xff]   ;;  %v10465_v50 = vld [vmem:[%s12961_s1 + $0x484] ss:$8 sps:$4 sm:$0xff]  }
 0x1a0   : > { %6485 = vmatprep.mubr.bf16.mxu0 %v10306_v51  ;;  %v10427_v51 = vld [vmem:[%s12961_s1 + $0xa94] ss:$8 sps:$4 sm:$0xff]  }
 0x1a6   : > { %5400 = vmatmul.mubr.bf16.gmra.mrb[52].mxu1 %v10308_v54  ;;  %v10472_v54 = vld [vmem:[%s12961_s1 + $0x494] ss:$8 sps:$4 sm:$0xff]  }
 0x1a7   : > { %6486 = vmatmul.mubr.bf16.gmra.mrb[52].mxu0 %v10312_v55  ;;  %5409 = vmatprep.mubr.bf16.mxu1 %v8385_v56  ;;  %v10439_v55 = vld [vmem:[%s12961_s1 + $0xaa4] ss:$8 sps:$4 sm:$0xff]   ;;  %v10470_v56 = vld [vmem:[%s12961_s1 + $0x490] ss:$8 sps:$4 sm:$0xff]  }
 0x1a8   : > { %6495 = vmatprep.mubr.bf16.mxu0 %v8397_v57  ;;  %v10384_v57 = vld [vmem:[%s11065_s21 + $0x400] ss:$100 sps:$4 sm:$0xff]  }
 0x1ae   : > { %5410 = vmatmul.mubr.bf16.gmra.mrb[56].mxu1 %v8384_v60  ;;  %v10391_v60 = vld [vmem:[%s11065_s21 + $0x4fc] ss:$100 sps:$4 sm:$0xff]  }
 0x1af   : > { %6496 = vmatmul.mubr.bf16.gmra.mrb[56].mxu0 %v8396_v61  ;;  %5450 = vmatprep.mubr.bf16.mxu1 %v10334_v58  ;;  %v10385_v58 = vld [vmem:[%s11065_s21 + $0x430] ss:$100 sps:$4 sm:$0xff]   ;;  %v10437_v61 = vld [vmem:[%s12961_s1 + $0xaa0] ss:$8 sps:$4 sm:$0xff]  }
 0x1b0   : > { %6536 = vmatprep.mubr.bf16.mxu0 %v10337_v59  ;;  %v10389_v59 = vld [vmem:[%s11065_s21 + $0x4cc] ss:$100 sps:$4 sm:$0xff]  }
 0x1b6   : > { %5451 = vmatmul.mubr.bf16.vlgmr.msra.gmra.mrb[0].mxu1 %v10332_v62  ;;  %v10480_v62 = vld [vmem:[%s12961_s1 + $0x4a4] ss:$8 sps:$4 sm:$0xff]  }
 0x1b7   : > { %6537 = vmatmul.mubr.bf16.vlgmr.msra.gmra.mrb[0].mxu0 %v10335_v63  ;;  %5460 = vmatprep.mubr.bf16.mxu1 %v10341_v1  ;;  %v10454_v63 = vld [vmem:[%s12961_s1 + $0xab4] ss:$8 sps:$4 sm:$0xff]  }
 0x1b8   : > { %6686 = vmatpush1.bf16.msra.mxu0 %v10338_v0  ;;  %6546 = vmatprep.mubr.bf16.mxu0 %v10343_v2  ;;  %v10478_v0 = vld [vmem:[%s12961_s1 + $0x4a0] ss:$8 sps:$4 sm:$0xff]   ;;  %v10487_v1 = vld [vmem:[%s12961_s1 + $0x4b4] ss:$8 sps:$4 sm:$0xff]   ;;  %v10452_v2 = vld [vmem:[%s12961_s1 + $0xab0] ss:$8 sps:$4 sm:$0xff]  }
 0x1b9   : > { %6687 = vmatprep.subr.bf16.mxu0 %v10349_v3  ;;  %5600 = vmatpush1.bf16.msra.mxu1 %v10403_v4  ;;  %v10469_v3 = vld [vmem:[%s12961_s1 + $0xac4] ss:$8 sps:$4 sm:$0xff]   ;;  %v10485_v4 = vld [vmem:[%s12961_s1 + $0x4b0] ss:$8 sps:$4 sm:$0xff]  }
 0x1ba   : > { %5601 = vmatprep.subr.bf16.mxu1 %v10409_v5  ;;  %v10393_v5 = vld [vmem:[%s11065_s21 + $0x4c8] ss:$100 sps:$4 sm:$0xff]  }
 0x1bc   : > { %6688 = vmatpush1.bf16.msra.mxu0 %v10347_v6  ;;  %v10394_v6 = vld [vmem:[%s11065_s21 + $0x4f8] ss:$100 sps:$4 sm:$0xff]  }
 0x1bd   : > { %6689 = vmatprep.subr.bf16.mxu0 %v10356_v7  ;;  %5602 = vmatpush1.bf16.msra.mxu1 %v10407_v10  ;;  %v10398_v7 = vld [vmem:[%s11065_s21 + $0x594] ss:$100 sps:$4 sm:$0xff]   ;;  %v10495_v10 = vld [vmem:[%s12961_s1 + $0x4c4] ss:$8 sps:$4 sm:$0xff]  }
 0x1be   : > { %5461 = vmatmul.mubr.bf16.gmra.mrb[4].mxu1 %v10345_v8  ;;  %5603 = vmatprep.subr.bf16.mxu1 %v10420_v14  ;;  %v10400_v8 = vld [vmem:[%s11065_s21 + $0x5c4] ss:$100 sps:$4 sm:$0xff]   ;;  %v10482_v14 = vld [vmem:[%s12961_s1 + $0xad0] ss:$8 sps:$4 sm:$0xff]  }
 0x1bf   : > { %6547 = vmatmul.mubr.bf16.gmra.mrb[4].mxu0 %v10346_v9  ;;  %5470 = vmatprep.mubr.bf16.mxu1 %v10350_v11  ;;  %v10467_v9 = vld [vmem:[%s12961_s1 + $0xac0] ss:$8 sps:$4 sm:$0xff]   ;;  %v10484_v11 = vld [vmem:[%s12961_s1 + $0xad4] ss:$8 sps:$4 sm:$0xff]  }
 0x1c0   : > { %6556 = vmatprep.mubr.bf16.mxu0 %v10352_v12  ;;  %6690 = vmatpush1.bf16.msra.mxu0 %v10354_v13  ;;  %v10493_v12 = vld [vmem:[%s12961_s1 + $0x4c0] ss:$8 sps:$4 sm:$0xff]   ;;  %v10502_v13 = vld [vmem:[%s12961_s1 + $0x4d4] ss:$8 sps:$4 sm:$0xff]  }
 0x1c1   : > { %6691 = vmatprep.subr.bf16.mxu0 %v10365_v15  ;;  %5604 = vmatpush1.bf16.msra.mxu1 %v10418_v16  ;;  %v10499_v15 = vld [vmem:[%s12961_s1 + $0xae4] ss:$8 sps:$4 sm:$0xff]   ;;  %v10500_v16 = vld [vmem:[%s12961_s1 + $0x4d0] ss:$8 sps:$4 sm:$0xff]  }
 0x1c2   : > { %5605 = vmatprep.subr.bf16.mxu1 %v10424_v17  ;;  %v10402_v17 = vld [vmem:[%s11065_s21 + $0x590] ss:$100 sps:$4 sm:$0xff]  }
 0x1c4   : > { %6692 = vmatpush1.bf16.msra.mxu0 %v10363_v18  ;;  %v10406_v18 = vld [vmem:[%s11065_s21 + $0x5c0] ss:$100 sps:$4 sm:$0xff]  }
 0x1c5   : > { %6693 = vmatprep.subr.bf16.mxu0 %v10370_v19  ;;  %5606 = vmatpush1.bf16.msra.mxu1 %v10422_v22  ;;  %v10413_v19 = vld [vmem:[%s11065_s21 + $0x65c] ss:$100 sps:$4 sm:$0xff]   ;;  %v10508_v22 = vld [vmem:[%s12961_s1 + $0x4e4] ss:$8 sps:$4 sm:$0xff]  }
 0x1c6   : > { %5471 = vmatmul.mubr.bf16.gmra.mrb[8].mxu1 %v10357_v20  ;;  %5607 = vmatprep.subr.bf16.mxu1 %v10435_v26  ;;  %v10415_v20 = vld [vmem:[%s11065_s21 + $0x68c] ss:$100 sps:$4 sm:$0xff]  }
 0x1c7   : > { %6557 = vmatmul.mubr.bf16.gmra.mrb[8].mxu0 %v10358_v21  ;;  %5480 = vmatprep.mubr.bf16.mxu1 %v10359_v23  ;;  %v10497_v21 = vld [vmem:[%s12961_s1 + $0xae0] ss:$8 sps:$4 sm:$0xff]   ;;  %v10510_v26 = vld [vmem:[%s12961_s1 + $0xaf0] ss:$8 sps:$4 sm:$0xff]  }
 0x1c8   : > { %6566 = vmatprep.mubr.bf16.mxu0 %v10361_v24  ;;  %6694 = vmatpush1.bf16.msra.mxu0 %v10368_v25  ;;  %v10506_v23 = vld [vmem:[%s12961_s1 + $0x4e0] ss:$8 sps:$4 sm:$0xff]   ;;  %v10512_v24 = vld [vmem:[%s12961_s1 + $0xaf4] ss:$8 sps:$4 sm:$0xff]  }
 0x1c9   : > { %6695 = vmatprep.subr.bf16.mxu0 %v10379_v27  ;;  %5608 = vmatpush1.bf16.msra.mxu1 %v10433_v28  ;;  %v10515_v25 = vld [vmem:[%s12961_s1 + $0x4f4] ss:$8 sps:$4 sm:$0xff]   ;;  %v10513_v27 = vld [vmem:[%s12961_s1 + $0x4f0] ss:$8 sps:$4 sm:$0xff]   ;;  %v10524_v28 = vld [vmem:[%s12961_s1 + $0xb04] ss:$8 sps:$4 sm:$0xff]  }
 0x1ca   : > { %5609 = vmatprep.subr.bf16.mxu1 %v10442_v30  ;;  %v10421_v30 = vld [vmem:[%s11065_s21 + $0x688] ss:$100 sps:$4 sm:$0xff]  }
 0x1cc   : > { %6696 = vmatpush1.bf16.msra.mxu0 %v10377_v29  ;;  %v10417_v29 = vld [vmem:[%s11065_s21 + $0x658] ss:$100 sps:$4 sm:$0xff]  }
 0x1cd   : > { %6697 = vmatprep.subr.bf16.mxu0 %v10388_v31  ;;  %5610 = vmatpush1.bf16.msra.mxu1 %v10440_v32  ;;  %v10428_v31 = vld [vmem:[%s11065_s21 + $0x724] ss:$100 sps:$4 sm:$0xff]   ;;  %v10430_v32 = vld [vmem:[%s11065_s21 + $0x754] ss:$100 sps:$4 sm:$0xff]  }
 0x1ce   : > { %5481 = vmatmul.mubr.bf16.gmra.mrb[12].mxu1 %v10366_v33  ;;  %5611 = vmatprep.subr.bf16.mxu1 %v10450_v38  ;;  %v10589_v33 = vld [vmem:[%s12961_s1 + $0x504] ss:$8 sps:$4 sm:$0xff]  }
 0x1cf   : > { %6567 = vmatmul.mubr.bf16.gmra.mrb[12].mxu0 %v10367_v34  ;;  %5490 = vmatprep.mubr.bf16.mxu1 %v10371_v35  ;;  %v10432_v34 = vld [vmem:[%s11065_s21 + $0x720] ss:$100 sps:$4 sm:$0xff]   ;;  %v10436_v35 = vld [vmem:[%s11065_s21 + $0x750] ss:$100 sps:$4 sm:$0xff]   ;;  %v10447_v38 = vld [vmem:[%s11065_s21 + $0x7e8] ss:$100 sps:$4 sm:$0xff]  }
 0x1d0   : > { %6576 = vmatprep.mubr.bf16.mxu0 %v10373_v36  ;;  %6698 = vmatpush1.bf16.msra.mxu0 %v10386_v37  ;;  %v10443_v36 = vld [vmem:[%s11065_s21 + $0x7ec] ss:$100 sps:$4 sm:$0xff]   ;;  %v10445_v37 = vld [vmem:[%s11065_s21 + $0x81c] ss:$100 sps:$4 sm:$0xff]  }
 0x1d1   : > { %6699 = vmatprep.subr.bf16.mxu0 %v10397_v39  ;;  %5612 = vmatpush1.bf16.msra.mxu1 %v10448_v40  ;;  %v10451_v39 = vld [vmem:[%s11065_s21 + $0x818] ss:$100 sps:$4 sm:$0xff]  }
 0x1d2   : > { %5613 = vmatprep.subr.bf16.mxu1 %v10457_v42  ;;  %v10458_v40 = vld [vmem:[%s11065_s21 + $0x8b4] ss:$100 sps:$4 sm:$0xff]  }
 0x1d3   : > { %v10462_v42 = vld [vmem:[%s11065_s21 + $0x8b0] ss:$100 sps:$4 sm:$0xff]  }
 0x1d4   : > { %6700 = vmatpush1.bf16.msra.mxu0 %v10395_v41  ;;  %v10460_v41 = vld [vmem:[%s11065_s21 + $0x8e4] ss:$100 sps:$4 sm:$0xff]  }
 0x1d5   : > { %6701 = vmatprep.subr.bf16.mxu0 %v10412_v43  ;;  %5614 = vmatpush1.bf16.msra.mxu1 %v10455_v44  ;;  %v10466_v43 = vld [vmem:[%s11065_s21 + $0x8e0] ss:$100 sps:$4 sm:$0xff]  }
 0x1d6   : > { %5491 = vmatmul.mubr.bf16.gmra.mrb[16].mxu1 %v10375_v45  ;;  %5615 = vmatprep.subr.bf16.mxu1 %v10465_v50  ;;  %v10473_v44 = vld [vmem:[%s11065_s21 + $0x97c] ss:$100 sps:$4 sm:$0xff]   ;;  %v10475_v45 = vld [vmem:[%s11065_s21 + $0x9ac] ss:$100 sps:$4 sm:$0xff]  }
 0x1d7   : > { %6577 = vmatmul.mubr.bf16.gmra.mrb[16].mxu0 %v10376_v46  ;;  %5500 = vmatprep.mubr.bf16.mxu1 %v10380_v47  ;;  %v10477_v46 = vld [vmem:[%s11065_s21 + $0x978] ss:$100 sps:$4 sm:$0xff]   ;;  %v10481_v47 = vld [vmem:[%s11065_s21 + $0x9a8] ss:$100 sps:$4 sm:$0xff]  }
 0x1d8   : > { %6586 = vmatprep.mubr.bf16.mxu0 %v10382_v48  ;;  %6702 = vmatpush1.bf16.msra.mxu0 %v10410_v49  ;;  %v10488_v48 = vld [vmem:[%s11065_s21 + $0xa44] ss:$100 sps:$4 sm:$0xff]   ;;  %v10490_v49 = vld [vmem:[%s11065_s21 + $0xa74] ss:$100 sps:$4 sm:$0xff]  }
 0x1d9   : > { %6703 = vmatprep.subr.bf16.mxu0 %v10427_v51  ;;  %5616 = vmatpush1.bf16.msra.mxu1 %v10463_v52  ;;  %v601_v50 = vld [vmem:[%s11065_s21 + $0xb08] sm:$0xff]  ;;  %v607_v51 = vld [vmem:[%s11065_s21 + $0xb38] sm:$0xff]  ;;  %v10492_v52 = vld [vmem:[%s11065_s21 + $0xa40] ss:$100 sps:$4 sm:$0xff]  }
 0x1da   : > { %5617 = vmatprep.subr.bf16.mxu1 %v10472_v54  ;;  %v8387_v54 = vcombine.high %v601_v50, %v601_v50 }
 0x1dc   : > { %6704 = vmatpush1.bf16.msra.mxu0 %v10425_v53  ;;  %v10496_v53 = vld [vmem:[%s11065_s21 + $0xa70] ss:$100 sps:$4 sm:$0xff]  }
 0x1dd   : > { %6705 = vmatprep.subr.bf16.mxu0 %v10439_v55  ;;  %5618 = vmatpush1.bf16.msra.mxu1 %v10470_v56  ;;  %v8399_v55 = vcombine.high %v607_v51, %v607_v51  ;;  %v8386_v56 = vcombine.low %v601_v50, %v601_v50  ;;  %v10647_v50 = vld [vmem:[%s12961_s1 + $0x580] ss:$8 sps:$4 sm:$0xff]  }
 0x1de   : > { %5501 = vmatmul.mubr.bf16.gmra.mrb[20].mxu1 %v10384_v57  ;;  %5619 = vmatprep.subr.bf16.mxu1 %v10480_v62  ;;  %v8398_v57 = vcombine.low %v607_v51, %v607_v51  ;;  %v10522_v62 = vld [vmem:[%s12961_s1 + $0xb00] ss:$8 sps:$4 sm:$0xff]   ;;  %v10656_v51 = vld [vmem:[%s12961_s1 + $0x594] ss:$8 sps:$4 sm:$0xff]  }
 0x1df   : > { %6587 = vmatmul.mubr.bf16.gmra.mrb[20].mxu0 %v10385_v58  ;;  %5510 = vmatprep.mubr.bf16.mxu1 %v10389_v59  ;;  %v10518_v58 = vld [vmem:[%s11065_s21 + $0x24] ss:$100 sps:$4 sm:$0xff]   ;;  %v10521_v59 = vld [vmem:[%s11065_s21 + $0x54] ss:$100 sps:$4 sm:$0xff]  }
 0x1e0   : > { %6596 = vmatprep.mubr.bf16.mxu0 %v10391_v60  ;;  %6706 = vmatpush1.bf16.msra.mxu0 %v10437_v61  ;;  %v10516_v60 = vld [vmem:[%s11065_s21 + $0x20] ss:$100 sps:$4 sm:$0xff]   ;;  %v10519_v61 = vld [vmem:[%s11065_s21 + $0x50] ss:$100 sps:$4 sm:$0xff]  }
 0x1e1   : > { %6707 = vmatprep.subr.bf16.mxu0 %v10454_v63  ;;  %5620 = vmatpush1.bf16.msra.mxu1 %v10478_v0  ;;  %v10525_v63 = vld [vmem:[%s11065_s21 + $0xec] ss:$100 sps:$4 sm:$0xff]   ;;  %v10527_v0 = vld [vmem:[%s11065_s21 + $0x11c] ss:$100 sps:$4 sm:$0xff]  }
 0x1e2   : > { %5621 = vmatprep.subr.bf16.mxu1 %v10487_v1  ;;  %v10533_v1 = vld [vmem:[%s12961_s1 + $0xb14] ss:$8 sps:$4 sm:$0xff]  }
 0x1e4   : > { %6708 = vmatpush1.bf16.msra.mxu0 %v10452_v2  ;;  %v10587_v2 = vld [vmem:[%s12961_s1 + $0x500] ss:$8 sps:$4 sm:$0xff]  }
 0x1e5   : > { %6709 = vmatprep.subr.bf16.mxu0 %v10469_v3  ;;  %5622 = vmatpush1.bf16.msra.mxu1 %v10485_v4  ;;  %v10593_v3 = vld [vmem:[%s12961_s1 + $0x514] ss:$8 sps:$4 sm:$0xff]   ;;  %v10531_v4 = vld [vmem:[%s12961_s1 + $0xb10] ss:$8 sps:$4 sm:$0xff]  }
 0x1e6   : > { %5511 = vmatmul.mubr.bf16.gmra.mrb[24].mxu1 %v10393_v5  ;;  %5623 = vmatprep.subr.bf16.mxu1 %v10495_v10  ;;  %v10540_v5 = vld [vmem:[%s12961_s1 + $0xb24] ss:$8 sps:$4 sm:$0xff]  }
 0x1e7   : > { %6597 = vmatmul.mubr.bf16.gmra.mrb[24].mxu0 %v10394_v6  ;;  %5520 = vmatprep.mubr.bf16.mxu1 %v10398_v7  ;;  %v10591_v6 = vld [vmem:[%s12961_s1 + $0x510] ss:$8 sps:$4 sm:$0xff]   ;;  %v10529_v7 = vld [vmem:[%s11065_s21 + $0xe8] ss:$100 sps:$4 sm:$0xff]  }
 0x1e8   : > { %6606 = vmatprep.mubr.bf16.mxu0 %v10400_v8  ;;  %6710 = vmatpush1.bf16.msra.mxu0 %v10467_v9  ;;  %v10530_v8 = vld [vmem:[%s11065_s21 + $0x118] ss:$100 sps:$4 sm:$0xff]   ;;  %v10536_v10 = vld [vmem:[%s11065_s21 + $0x1e4] ss:$100 sps:$4 sm:$0xff]  }
 0x1e9   : > { %6711 = vmatprep.subr.bf16.mxu0 %v10484_v11  ;;  %5624 = vmatpush1.bf16.msra.mxu1 %v10493_v12  ;;  %v10534_v9 = vld [vmem:[%s11065_s21 + $0x1b4] ss:$100 sps:$4 sm:$0xff]   ;;  %v10538_v11 = vld [vmem:[%s12961_s1 + $0xb20] ss:$8 sps:$4 sm:$0xff]   ;;  %v10604_v12 = vld [vmem:[%s12961_s1 + $0x524] ss:$8 sps:$4 sm:$0xff]  }
 0x1ea   : > { %5625 = vmatprep.subr.bf16.mxu1 %v10502_v13  ;;  %v10549_v13 = vld [vmem:[%s12961_s1 + $0xb34] ss:$8 sps:$4 sm:$0xff]  }
 0x1ec   : > { %6712 = vmatpush1.bf16.msra.mxu0 %v10482_v14  ;;  %v10602_v14 = vld [vmem:[%s12961_s1 + $0x520] ss:$8 sps:$4 sm:$0xff]  }
 0x1ed   : > { %6713 = vmatprep.subr.bf16.mxu0 %v10499_v15  ;;  %5626 = vmatpush1.bf16.msra.mxu1 %v10500_v16  ;;  %v10608_v15 = vld [vmem:[%s12961_s1 + $0x534] ss:$8 sps:$4 sm:$0xff]   ;;  %v10547_v16 = vld [vmem:[%s12961_s1 + $0xb30] ss:$8 sps:$4 sm:$0xff]  }
 0x1ee   : > { %5521 = vmatmul.mubr.bf16.gmra.mrb[28].mxu1 %v10402_v17  ;;  %5627 = vmatprep.subr.bf16.mxu1 %v10508_v22  ;;  %v10554_v17 = vld [vmem:[%s12961_s1 + $0xb44] ss:$8 sps:$4 sm:$0xff]  }
 0x1ef   : > { %6607 = vmatmul.mubr.bf16.gmra.mrb[28].mxu0 %v10406_v18  ;;  %5530 = vmatprep.mubr.bf16.mxu1 %v10413_v19  ;;  %v10606_v18 = vld [vmem:[%s12961_s1 + $0x530] ss:$8 sps:$4 sm:$0xff]  }
 0x1f0   : > { %6616 = vmatprep.mubr.bf16.mxu0 %v10415_v20  ;;  %6714 = vmatpush1.bf16.msra.mxu0 %v10497_v21  ;;  %v10541_v19 = vld [vmem:[%s11065_s21 + $0x1b0] ss:$100 sps:$4 sm:$0xff]   ;;  %v10542_v20 = vld [vmem:[%s11065_s21 + $0x1e0] ss:$100 sps:$4 sm:$0xff]  }
 0x1f1   : > { %5628 = vmatpush1.bf16.msra.mxu1 %v10506_v23  ;;  %6715 = vmatprep.subr.bf16.mxu0 %v10512_v24  ;;  %v10543_v21 = vld [vmem:[%s11065_s21 + $0x27c] ss:$100 sps:$4 sm:$0xff]   ;;  %v10545_v22 = vld [vmem:[%s11065_s21 + $0x2ac] ss:$100 sps:$4 sm:$0xff]  }
 0x1f2   : > { %5629 = vmatprep.subr.bf16.mxu1 %v10515_v25  ;;  %v10552_v23 = vld [vmem:[%s12961_s1 + $0xb40] ss:$8 sps:$4 sm:$0xff]   ;;  %v10619_v24 = vld [vmem:[%s12961_s1 + $0x544] ss:$8 sps:$4 sm:$0xff]   ;;  %v10563_v25 = vld [vmem:[%s12961_s1 + $0xb54] ss:$8 sps:$4 sm:$0xff]  }
 0x1f4   : > { %6716 = vmatpush1.bf16.msra.mxu0 %v10510_v26  ;;  %v10617_v26 = vld [vmem:[%s12961_s1 + $0x540] ss:$8 sps:$4 sm:$0xff]  }
 0x1f5   : > { %5630 = vmatpush1.bf16.msra.mxu1 %v10513_v27  ;;  %6866 = vmatprep.subr.bf16.mxu0 %v10524_v28  ;;  %v10626_v27 = vld [vmem:[%s12961_s1 + $0x554] ss:$8 sps:$4 sm:$0xff]   ;;  %v10561_v28 = vld [vmem:[%s12961_s1 + $0xb50] ss:$8 sps:$4 sm:$0xff]  }
 0x1f6   : > { %5531 = vmatmul.mubr.bf16.gmra.mrb[32].mxu1 %v10417_v29  ;;  %5780 = vmatprep.subr.bf16.mxu1 %v10589_v33  ;;  %v10572_v29 = vld [vmem:[%s12961_s1 + $0xb64] ss:$8 sps:$4 sm:$0xff]  }
 0x1f7   : > { %6617 = vmatmul.mubr.bf16.gmra.mrb[32].mxu0 %v10421_v30  ;;  %5540 = vmatprep.mubr.bf16.mxu1 %v10428_v31  ;;  %v10624_v30 = vld [vmem:[%s12961_s1 + $0x550] ss:$8 sps:$4 sm:$0xff]   ;;  %v10555_v33 = vld [vmem:[%s11065_s21 + $0x344] ss:$100 sps:$4 sm:$0xff]  }
 0x1f8   : > { %6626 = vmatprep.mubr.bf16.mxu0 %v10430_v32  ;;  %v10550_v31 = vld [vmem:[%s11065_s21 + $0x278] ss:$100 sps:$4 sm:$0xff]   ;;  %v10551_v32 = vld [vmem:[%s11065_s21 + $0x2a8] ss:$100 sps:$4 sm:$0xff]  }
 0x1fe   : > { %5541 = vmatmul.mubr.bf16.gmra.mrb[36].mxu1 %v10432_v34  ;;  %v10557_v34 = vld [vmem:[%s11065_s21 + $0x374] ss:$100 sps:$4 sm:$0xff]  }
 0x1ff   : > { %6627 = vmatmul.mubr.bf16.gmra.mrb[36].mxu0 %v10436_v35  ;;  %5550 = vmatprep.mubr.bf16.mxu1 %v10443_v36  ;;  %v10570_v35 = vld [vmem:[%s12961_s1 + $0xb60] ss:$8 sps:$4 sm:$0xff]   ;;  %v10634_v36 = vld [vmem:[%s12961_s1 + $0x564] ss:$8 sps:$4 sm:$0xff]  }
 0x200   : > { %6636 = vmatprep.mubr.bf16.mxu0 %v10445_v37  ;;  %v10581_v37 = vld [vmem:[%s12961_s1 + $0xb74] ss:$8 sps:$4 sm:$0xff]  }
 0x206   : > { %5551 = vmatmul.mubr.bf16.gmra.mrb[40].mxu1 %v10447_v38  ;;  %v10632_v38 = vld [vmem:[%s12961_s1 + $0x560] ss:$8 sps:$4 sm:$0xff]  }
 0x207   : > { %6637 = vmatmul.mubr.bf16.gmra.mrb[40].mxu0 %v10451_v39  ;;  %5560 = vmatprep.mubr.bf16.mxu1 %v10458_v40  ;;  %v10641_v39 = vld [vmem:[%s12961_s1 + $0x574] ss:$8 sps:$4 sm:$0xff]   ;;  %v10579_v40 = vld [vmem:[%s12961_s1 + $0xb70] ss:$8 sps:$4 sm:$0xff]  }
 0x208   : > { %6646 = vmatprep.mubr.bf16.mxu0 %v10460_v41  ;;  %v10596_v41 = vld [vmem:[%s12961_s1 + $0xb84] ss:$8 sps:$4 sm:$0xff]  }
 0x20e   : > { %5561 = vmatmul.mubr.bf16.gmra.mrb[44].mxu1 %v10462_v42  ;;  %v10639_v42 = vld [vmem:[%s12961_s1 + $0x570] ss:$8 sps:$4 sm:$0xff]  }
 0x20f   : > { %6647 = vmatmul.mubr.bf16.gmra.mrb[44].mxu0 %v10466_v43  ;;  %5570 = vmatprep.mubr.bf16.mxu1 %v10473_v44  ;;  %v10559_v43 = vld [vmem:[%s11065_s21 + $0x340] ss:$100 sps:$4 sm:$0xff]   ;;  %v10560_v44 = vld [vmem:[%s11065_s21 + $0x370] ss:$100 sps:$4 sm:$0xff]  }
 0x210   : > { %6656 = vmatprep.mubr.bf16.mxu0 %v10475_v45  ;;  %v10564_v45 = vld [vmem:[%s11065_s21 + $0x40c] ss:$100 sps:$4 sm:$0xff]  }
 0x216   : > { %5571 = vmatmul.mubr.bf16.gmra.mrb[48].mxu1 %v10477_v46  ;;  %v10566_v46 = vld [vmem:[%s11065_s21 + $0x43c] ss:$100 sps:$4 sm:$0xff]  }
 0x217   : > { %6657 = vmatmul.mubr.bf16.gmra.mrb[48].mxu0 %v10481_v47  ;;  %5580 = vmatprep.mubr.bf16.mxu1 %v10488_v48  ;;  %v10594_v47 = vld [vmem:[%s12961_s1 + $0xb80] ss:$8 sps:$4 sm:$0xff]   ;;  %v10649_v48 = vld [vmem:[%s12961_s1 + $0x584] ss:$8 sps:$4 sm:$0xff]  }
 0x218   : > { %6666 = vmatprep.mubr.bf16.mxu0 %v10490_v49  ;;  %v10611_v49 = vld [vmem:[%s12961_s1 + $0xb94] ss:$8 sps:$4 sm:$0xff]  }
 0x21e   : > { %5581 = vmatmul.mubr.bf16.gmra.mrb[52].mxu1 %v10492_v52  ;;  %v10609_v52 = vld [vmem:[%s12961_s1 + $0xb90] ss:$8 sps:$4 sm:$0xff]  }
 0x21f   : > { %6667 = vmatmul.mubr.bf16.gmra.mrb[52].mxu0 %v10496_v53  ;;  %5590 = vmatprep.mubr.bf16.mxu1 %v8387_v54  ;;  %v10623_v53 = vld [vmem:[%s12961_s1 + $0xba4] ss:$8 sps:$4 sm:$0xff]   ;;  %v10654_v54 = vld [vmem:[%s12961_s1 + $0x590] ss:$8 sps:$4 sm:$0xff]  }
 0x220   : > { %6676 = vmatprep.mubr.bf16.mxu0 %v8399_v55  ;;  %v10568_v55 = vld [vmem:[%s11065_s21 + $0x408] ss:$100 sps:$4 sm:$0xff]  }
 0x226   : > { %5591 = vmatmul.mubr.bf16.gmra.mrb[56].mxu1 %v8386_v56  ;;  %v10569_v56 = vld [vmem:[%s11065_s21 + $0x438] ss:$100 sps:$4 sm:$0xff]  }
 0x227   : > { %6677 = vmatmul.mubr.bf16.gmra.mrb[56].mxu0 %v8398_v57  ;;  %5631 = vmatprep.mubr.bf16.mxu1 %v10518_v58  ;;  %v10573_v57 = vld [vmem:[%s11065_s21 + $0x4d4] ss:$100 sps:$4 sm:$0xff]   ;;  %v10575_v58 = vld [vmem:[%s11065_s21 + $0x504] ss:$100 sps:$4 sm:$0xff]  }
 0x228   : > { %6717 = vmatprep.mubr.bf16.mxu0 %v10521_v59  ;;  %v10621_v59 = vld [vmem:[%s12961_s1 + $0xba0] ss:$8 sps:$4 sm:$0xff]  }
 0x22e   : > { %5632 = vmatmul.mubr.bf16.vlgmr.msra.gmra.mrb[0].mxu1 %v10516_v60  ;;  %v10664_v60 = vld [vmem:[%s12961_s1 + $0x5a4] ss:$8 sps:$4 sm:$0xff]  }
 0x22f   : > { %6718 = vmatmul.mubr.bf16.vlgmr.msra.gmra.mrb[0].mxu0 %v10519_v61  ;;  %5641 = vmatprep.mubr.bf16.mxu1 %v10525_v63  ;;  %v10638_v61 = vld [vmem:[%s12961_s1 + $0xbb4] ss:$8 sps:$4 sm:$0xff]  }
 0x230   : > { %6867 = vmatpush1.bf16.msra.mxu0 %v10522_v62  ;;  %6727 = vmatprep.mubr.bf16.mxu0 %v10527_v0  ;;  %v10662_v62 = vld [vmem:[%s12961_s1 + $0x5a0] ss:$8 sps:$4 sm:$0xff]   ;;  %v10671_v63 = vld [vmem:[%s12961_s1 + $0x5b4] ss:$8 sps:$4 sm:$0xff]   ;;  %v10636_v0 = vld [vmem:[%s12961_s1 + $0xbb0] ss:$8 sps:$4 sm:$0xff]  }
 0x231   : > { %6868 = vmatprep.subr.bf16.mxu0 %v10533_v1  ;;  %5781 = vmatpush1.bf16.msra.mxu1 %v10587_v2  ;;  %v10653_v1 = vld [vmem:[%s12961_s1 + $0xbc4] ss:$8 sps:$4 sm:$0xff]   ;;  %v10669_v2 = vld [vmem:[%s12961_s1 + $0x5b0] ss:$8 sps:$4 sm:$0xff]  }
 0x232   : > { %5782 = vmatprep.subr.bf16.mxu1 %v10593_v3  ;;  %v10577_v3 = vld [vmem:[%s11065_s21 + $0x4d0] ss:$100 sps:$4 sm:$0xff]  }
 0x234   : > { %6869 = vmatpush1.bf16.msra.mxu0 %v10531_v4  ;;  %v10578_v4 = vld [vmem:[%s11065_s21 + $0x500] ss:$100 sps:$4 sm:$0xff]  }
 0x235   : > { %6870 = vmatprep.subr.bf16.mxu0 %v10540_v5  ;;  %5783 = vmatpush1.bf16.msra.mxu1 %v10591_v6  ;;  %v10582_v5 = vld [vmem:[%s11065_s21 + $0x59c] ss:$100 sps:$4 sm:$0xff]   ;;  %v10584_v6 = vld [vmem:[%s11065_s21 + $0x5cc] ss:$100 sps:$4 sm:$0xff]  }
 0x236   : > { %5642 = vmatmul.mubr.bf16.gmra.mrb[4].mxu1 %v10529_v7  ;;  %5784 = vmatprep.subr.bf16.mxu1 %v10604_v12  ;;  %v10651_v7 = vld [vmem:[%s12961_s1 + $0xbc0] ss:$8 sps:$4 sm:$0xff]   ;;  %v10666_v12 = vld [vmem:[%s12961_s1 + $0xbd0] ss:$8 sps:$4 sm:$0xff]  }
 0x237   : > { %6728 = vmatmul.mubr.bf16.gmra.mrb[4].mxu0 %v10530_v8  ;;  %5651 = vmatprep.mubr.bf16.mxu1 %v10534_v9  ;;  %v10679_v8 = vld [vmem:[%s12961_s1 + $0x5c4] ss:$8 sps:$4 sm:$0xff]   ;;  %v10668_v9 = vld [vmem:[%s12961_s1 + $0xbd4] ss:$8 sps:$4 sm:$0xff]  }
 0x238   : > { %6737 = vmatprep.mubr.bf16.mxu0 %v10536_v10  ;;  %6871 = vmatpush1.bf16.msra.mxu0 %v10538_v11  ;;  %v10677_v10 = vld [vmem:[%s12961_s1 + $0x5c0] ss:$8 sps:$4 sm:$0xff]   ;;  %v10686_v11 = vld [vmem:[%s12961_s1 + $0x5d4] ss:$8 sps:$4 sm:$0xff]  }
 0x239   : > { %6872 = vmatprep.subr.bf16.mxu0 %v10549_v13  ;;  %5785 = vmatpush1.bf16.msra.mxu1 %v10602_v14  ;;  %v10683_v13 = vld [vmem:[%s12961_s1 + $0xbe4] ss:$8 sps:$4 sm:$0xff]   ;;  %v10684_v14 = vld [vmem:[%s12961_s1 + $0x5d0] ss:$8 sps:$4 sm:$0xff]  }
 0x23a   : > { %5786 = vmatprep.subr.bf16.mxu1 %v10608_v15  ;;  %v10586_v15 = vld [vmem:[%s11065_s21 + $0x598] ss:$100 sps:$4 sm:$0xff]  }
 0x23c   : > { %6873 = vmatpush1.bf16.msra.mxu0 %v10547_v16  ;;  %v10590_v16 = vld [vmem:[%s11065_s21 + $0x5c8] ss:$100 sps:$4 sm:$0xff]  }
 0x23d   : > { %6874 = vmatprep.subr.bf16.mxu0 %v10554_v17  ;;  %5787 = vmatpush1.bf16.msra.mxu1 %v10606_v18  ;;  %v10597_v17 = vld [vmem:[%s11065_s21 + $0x664] ss:$100 sps:$4 sm:$0xff]   ;;  %v10599_v18 = vld [vmem:[%s11065_s21 + $0x694] ss:$100 sps:$4 sm:$0xff]  }
 0x23e   : > { %5652 = vmatmul.mubr.bf16.gmra.mrb[8].mxu1 %v10541_v19  ;;  %5788 = vmatprep.subr.bf16.mxu1 %v10619_v24  ;;  %v10681_v19 = vld [vmem:[%s12961_s1 + $0xbe0] ss:$8 sps:$4 sm:$0xff]   ;;  %v10694_v24 = vld [vmem:[%s12961_s1 + $0xbf0] ss:$8 sps:$4 sm:$0xff]  }
 0x23f   : > { %6738 = vmatmul.mubr.bf16.gmra.mrb[8].mxu0 %v10542_v20  ;;  %5661 = vmatprep.mubr.bf16.mxu1 %v10543_v21  ;;  %v10692_v20 = vld [vmem:[%s12961_s1 + $0x5e4] ss:$8 sps:$4 sm:$0xff]   ;;  %v10690_v21 = vld [vmem:[%s12961_s1 + $0x5e0] ss:$8 sps:$4 sm:$0xff]  }
 0x240   : > { %6747 = vmatprep.mubr.bf16.mxu0 %v10545_v22  ;;  %6875 = vmatpush1.bf16.msra.mxu0 %v10552_v23  ;;  %v10696_v22 = vld [vmem:[%s12961_s1 + $0xbf4] ss:$8 sps:$4 sm:$0xff]  }
 0x241   : > { %6876 = vmatprep.subr.bf16.mxu0 %v10563_v25  ;;  %5789 = vmatpush1.bf16.msra.mxu1 %v10617_v26  ;;  %v10699_v23 = vld [vmem:[%s12961_s1 + $0x5f4] ss:$8 sps:$4 sm:$0xff]   ;;  %v10697_v25 = vld [vmem:[%s12961_s1 + $0x5f0] ss:$8 sps:$4 sm:$0xff]   ;;  %v10708_v26 = vld [vmem:[%s12961_s1 + $0xc04] ss:$8 sps:$4 sm:$0xff]  }
 0x242   : > { %5790 = vmatprep.subr.bf16.mxu1 %v10626_v27  ;;  %v10601_v27 = vld [vmem:[%s11065_s21 + $0x660] ss:$100 sps:$4 sm:$0xff]  }
 0x244   : > { %6877 = vmatpush1.bf16.msra.mxu0 %v10561_v28  ;;  %v10605_v28 = vld [vmem:[%s11065_s21 + $0x690] ss:$100 sps:$4 sm:$0xff]  }
 0x245   : > { %6878 = vmatprep.subr.bf16.mxu0 %v10572_v29  ;;  %5791 = vmatpush1.bf16.msra.mxu1 %v10624_v30  ;;  %v10612_v29 = vld [vmem:[%s11065_s21 + $0x72c] ss:$100 sps:$4 sm:$0xff]   ;;  %v10614_v30 = vld [vmem:[%s11065_s21 + $0x75c] ss:$100 sps:$4 sm:$0xff]  }
 0x246   : > { %5662 = vmatmul.mubr.bf16.gmra.mrb[12].mxu1 %v10550_v31  ;;  %5792 = vmatprep.subr.bf16.mxu1 %v10634_v36  ;;  %v10616_v31 = vld [vmem:[%s11065_s21 + $0x728] ss:$100 sps:$4 sm:$0xff]   ;;  %v10635_v36 = vld [vmem:[%s11065_s21 + $0x820] ss:$100 sps:$4 sm:$0xff]  }
 0x247   : > { %6748 = vmatmul.mubr.bf16.gmra.mrb[12].mxu0 %v10551_v32  ;;  %5671 = vmatprep.mubr.bf16.mxu1 %v10555_v33  ;;  %v10620_v32 = vld [vmem:[%s11065_s21 + $0x758] ss:$100 sps:$4 sm:$0xff]  }
 0x248   : > { %6757 = vmatprep.mubr.bf16.mxu0 %v10557_v34  ;;  %6879 = vmatpush1.bf16.msra.mxu0 %v10570_v35  ;;  %v10627_v33 = vld [vmem:[%s11065_s21 + $0x7f4] ss:$100 sps:$4 sm:$0xff]   ;;  %v10629_v34 = vld [vmem:[%s11065_s21 + $0x824] ss:$100 sps:$4 sm:$0xff]  }
 0x249   : > { %6880 = vmatprep.subr.bf16.mxu0 %v10581_v37  ;;  %5793 = vmatpush1.bf16.msra.mxu1 %v10632_v38  ;;  %v10631_v35 = vld [vmem:[%s11065_s21 + $0x7f0] ss:$100 sps:$4 sm:$0xff]   ;;  %v10642_v37 = vld [vmem:[%s11065_s21 + $0x8bc] ss:$100 sps:$4 sm:$0xff]  }
 0x24a   : > { %5794 = vmatprep.subr.bf16.mxu1 %v10641_v39  ;;  %v10644_v38 = vld [vmem:[%s11065_s21 + $0x8ec] ss:$100 sps:$4 sm:$0xff]   ;;  %v10646_v39 = vld [vmem:[%s11065_s21 + $0x8b8] ss:$100 sps:$4 sm:$0xff]  }
 0x24c   : > { %6881 = vmatpush1.bf16.msra.mxu0 %v10579_v40  ;;  %v10650_v40 = vld [vmem:[%s11065_s21 + $0x8e8] ss:$100 sps:$4 sm:$0xff]  }
 0x24d   : > { %6882 = vmatprep.subr.bf16.mxu0 %v10596_v41  ;;  %5795 = vmatpush1.bf16.msra.mxu1 %v10639_v42  ;;  %v10657_v41 = vld [vmem:[%s11065_s21 + $0x984] ss:$100 sps:$4 sm:$0xff]   ;;  %v10659_v42 = vld [vmem:[%s11065_s21 + $0x9b4] ss:$100 sps:$4 sm:$0xff]  }
 0x24e   : > { %5672 = vmatmul.mubr.bf16.gmra.mrb[16].mxu1 %v10559_v43  ;;  %5796 = vmatprep.subr.bf16.mxu1 %v10649_v48  ;;  %v10661_v43 = vld [vmem:[%s11065_s21 + $0x980] ss:$100 sps:$4 sm:$0xff]  }
 0x24f   : > { %6758 = vmatmul.mubr.bf16.gmra.mrb[16].mxu0 %v10560_v44  ;;  %5681 = vmatprep.mubr.bf16.mxu1 %v10564_v45  ;;  %v10665_v44 = vld [vmem:[%s11065_s21 + $0x9b0] ss:$100 sps:$4 sm:$0xff]   ;;  %v608_v48 = vld [vmem:[%s11065_s21 + $0xb40] sm:$0xff] }
 0x250   : > { %6767 = vmatprep.mubr.bf16.mxu0 %v10566_v46  ;;  %6883 = vmatpush1.bf16.msra.mxu0 %v10594_v47  ;;  %v10672_v45 = vld [vmem:[%s11065_s21 + $0xa4c] ss:$100 sps:$4 sm:$0xff]   ;;  %v10674_v46 = vld [vmem:[%s11065_s21 + $0xa7c] ss:$100 sps:$4 sm:$0xff]  }
 0x251   : > { %6884 = vmatprep.subr.bf16.mxu0 %v10611_v49  ;;  %5797 = vmatpush1.bf16.msra.mxu1 %v10647_v50  ;;  %v602_v47 = vld [vmem:[%s11065_s21 + $0xb10] sm:$0xff]  ;;  %v10676_v49 = vld [vmem:[%s11065_s21 + $0xa48] ss:$100 sps:$4 sm:$0xff]   ;;  %v10680_v50 = vld [vmem:[%s11065_s21 + $0xa78] ss:$100 sps:$4 sm:$0xff]  }
 0x252   : > { %5798 = vmatprep.subr.bf16.mxu1 %v10656_v51  ;;  %v8389_v51 = vcombine.high %v602_v47, %v602_v47 }
 0x254   : > { %6885 = vmatpush1.bf16.msra.mxu0 %v10609_v52  ;;  %v8401_v52 = vcombine.high %v608_v48, %v608_v48 }
 0x255   : > { %6886 = vmatprep.subr.bf16.mxu0 %v10623_v53  ;;  %5799 = vmatpush1.bf16.msra.mxu1 %v10654_v54  ;;  %v8388_v53 = vcombine.low %v602_v47, %v602_v47  ;;  %v8400_v54 = vcombine.low %v608_v48, %v608_v48  ;;  %v10780_v47 = vld [vmem:[%s11065_s21 + $0x82c] ss:$100 sps:$4 sm:$0xff]   ;;  %v10782_v48 = vld [vmem:[%s11065_s21 + $0x7f8] ss:$100 sps:$4 sm:$0xff]  }
 0x256   : > { %5682 = vmatmul.mubr.bf16.gmra.mrb[20].mxu1 %v10568_v55  ;;  %5800 = vmatprep.subr.bf16.mxu1 %v10664_v60  ;;  %v10702_v55 = vld [vmem:[%s11065_s21 + $0x2c] ss:$100 sps:$4 sm:$0xff]   ;;  %v10709_v60 = vld [vmem:[%s11065_s21 + $0xf4] ss:$100 sps:$4 sm:$0xff]  }
 0x257   : > { %6768 = vmatmul.mubr.bf16.gmra.mrb[20].mxu0 %v10569_v56  ;;  %5691 = vmatprep.mubr.bf16.mxu1 %v10573_v57  ;;  %v10705_v56 = vld [vmem:[%s11065_s21 + $0x5c] ss:$100 sps:$4 sm:$0xff]   ;;  %v10700_v57 = vld [vmem:[%s11065_s21 + $0x28] ss:$100 sps:$4 sm:$0xff]  }
 0x258   : > { %6777 = vmatprep.mubr.bf16.mxu0 %v10575_v58  ;;  %6887 = vmatpush1.bf16.msra.mxu0 %v10621_v59  ;;  %v10703_v58 = vld [vmem:[%s11065_s21 + $0x58] ss:$100 sps:$4 sm:$0xff]   ;;  %v10706_v59 = vld [vmem:[%s12961_s1 + $0xc00] ss:$8 sps:$4 sm:$0xff]  }
 0x259   : > { %6888 = vmatprep.subr.bf16.mxu0 %v10638_v61  ;;  %5801 = vmatpush1.bf16.msra.mxu1 %v10662_v62  ;;  %v10711_v61 = vld [vmem:[%s11065_s21 + $0x124] ss:$100 sps:$4 sm:$0xff]   ;;  %v10721_v62 = vld [vmem:[%s12961_s1 + $0xc14] ss:$8 sps:$4 sm:$0xff]  }
 0x25a   : > { %5802 = vmatprep.subr.bf16.mxu1 %v10671_v63  ;;  %v10719_v63 = vld [vmem:[%s12961_s1 + $0xc10] ss:$8 sps:$4 sm:$0xff]  }
 0x25c   : > { %6889 = vmatpush1.bf16.msra.mxu0 %v10636_v0  ;;  %v10732_v0 = vld [vmem:[%s12961_s1 + $0xc24] ss:$8 sps:$4 sm:$0xff]  }
 0x25d   : > { %6890 = vmatprep.subr.bf16.mxu0 %v10653_v1  ;;  %5803 = vmatpush1.bf16.msra.mxu1 %v10669_v2  ;;  %v10713_v1 = vld [vmem:[%s11065_s21 + $0xf0] ss:$100 sps:$4 sm:$0xff]   ;;  %v10714_v2 = vld [vmem:[%s11065_s21 + $0x120] ss:$100 sps:$4 sm:$0xff]  }
 0x25e   : > { %5692 = vmatmul.mubr.bf16.gmra.mrb[24].mxu1 %v10577_v3  ;;  %5804 = vmatprep.subr.bf16.mxu1 %v10679_v8  ;;  %v10715_v3 = vld [vmem:[%s11065_s21 + $0x1bc] ss:$100 sps:$4 sm:$0xff]   ;;  %v10762_v8 = vld [vmem:[%s12961_s1 + $0xc44] ss:$8 sps:$4 sm:$0xff]  }
 0x25f   : > { %6778 = vmatmul.mubr.bf16.gmra.mrb[24].mxu0 %v10578_v4  ;;  %5701 = vmatprep.mubr.bf16.mxu1 %v10582_v5  ;;  %v10717_v4 = vld [vmem:[%s11065_s21 + $0x1ec] ss:$100 sps:$4 sm:$0xff]   ;;  %v10730_v5 = vld [vmem:[%s12961_s1 + $0xc20] ss:$8 sps:$4 sm:$0xff]  }
 0x260   : > { %6787 = vmatprep.mubr.bf16.mxu0 %v10584_v6  ;;  %6891 = vmatpush1.bf16.msra.mxu0 %v10651_v7  ;;  %v10747_v6 = vld [vmem:[%s12961_s1 + $0xc34] ss:$8 sps:$4 sm:$0xff]   ;;  %v10745_v7 = vld [vmem:[%s12961_s1 + $0xc30] ss:$8 sps:$4 sm:$0xff]  }
 0x261   : > { %6892 = vmatprep.subr.bf16.mxu0 %v10668_v9  ;;  %5805 = vmatpush1.bf16.msra.mxu1 %v10677_v10  ;;  %v10722_v9 = vld [vmem:[%s11065_s21 + $0x1b8] ss:$100 sps:$4 sm:$0xff]   ;;  %v10723_v10 = vld [vmem:[%s11065_s21 + $0x1e8] ss:$100 sps:$4 sm:$0xff]  }
 0x262   : > { %5806 = vmatprep.subr.bf16.mxu1 %v10686_v11  ;;  %v10724_v11 = vld [vmem:[%s11065_s21 + $0x284] ss:$100 sps:$4 sm:$0xff]  }
 0x264   : > { %6893 = vmatpush1.bf16.msra.mxu0 %v10666_v12  ;;  %v10726_v12 = vld [vmem:[%s11065_s21 + $0x2b4] ss:$100 sps:$4 sm:$0xff]  }
 0x265   : > { %6894 = vmatprep.subr.bf16.mxu0 %v10683_v13  ;;  %5807 = vmatpush1.bf16.msra.mxu1 %v10684_v14  ;;  %v10760_v13 = vld [vmem:[%s12961_s1 + $0xc40] ss:$8 sps:$4 sm:$0xff]   ;;  %v10777_v14 = vld [vmem:[%s12961_s1 + $0xc54] ss:$8 sps:$4 sm:$0xff]  }
 0x266   : > { %5702 = vmatmul.mubr.bf16.gmra.mrb[28].mxu1 %v10586_v15  ;;  %5808 = vmatprep.subr.bf16.mxu1 %v10692_v20  ;;  %v10775_v15 = vld [vmem:[%s12961_s1 + $0xc50] ss:$8 sps:$4 sm:$0xff]   ;;  %v10735_v20 = vld [vmem:[%s11065_s21 + $0x37c] ss:$100 sps:$4 sm:$0xff]  }
 0x267   : > { %6788 = vmatmul.mubr.bf16.gmra.mrb[28].mxu0 %v10590_v16  ;;  %5711 = vmatprep.mubr.bf16.mxu1 %v10597_v17  ;;  %v10792_v16 = vld [vmem:[%s12961_s1 + $0xc64] ss:$8 sps:$4 sm:$0xff]  }
 0x268   : > { %6797 = vmatprep.mubr.bf16.mxu0 %v10599_v18  ;;  %6895 = vmatpush1.bf16.msra.mxu0 %v10681_v19  ;;  %v10728_v17 = vld [vmem:[%s11065_s21 + $0x280] ss:$100 sps:$4 sm:$0xff]   ;;  %v10729_v18 = vld [vmem:[%s11065_s21 + $0x2b0] ss:$100 sps:$4 sm:$0xff]  }
 0x269   : > { %5809 = vmatpush1.bf16.msra.mxu1 %v10690_v21  ;;  %6896 = vmatprep.subr.bf16.mxu0 %v10696_v22  ;;  %v10733_v19 = vld [vmem:[%s11065_s21 + $0x34c] ss:$100 sps:$4 sm:$0xff]   ;;  %v10790_v21 = vld [vmem:[%s12961_s1 + $0xc60] ss:$8 sps:$4 sm:$0xff]   ;;  %v10807_v22 = vld [vmem:[%s12961_s1 + $0xc74] ss:$8 sps:$4 sm:$0xff]  }
 0x26a   : > { %5810 = vmatprep.subr.bf16.mxu1 %v10699_v23  ;;  %v10805_v23 = vld [vmem:[%s12961_s1 + $0xc70] ss:$8 sps:$4 sm:$0xff]  }
 0x26c   : > { %6897 = vmatpush1.bf16.msra.mxu0 %v10694_v24  ;;  %v10737_v24 = vld [vmem:[%s11065_s21 + $0x348] ss:$100 sps:$4 sm:$0xff]  }
 0x26d   : > { %5811 = vmatpush1.bf16.msra.mxu1 %v10697_v25  ;;  %7047 = vmatprep.subr.bf16.mxu0 %v10708_v26  ;;  %v10738_v25 = vld [vmem:[%s11065_s21 + $0x378] ss:$100 sps:$4 sm:$0xff]  }
 0x26e   : > { %5712 = vmatmul.mubr.bf16.gmra.mrb[32].mxu1 %v10601_v27  ;;  %v10739_v26 = vld [vmem:[%s11065_s21 + $0x414] ss:$100 sps:$4 sm:$0xff]   ;;  %v10741_v27 = vld [vmem:[%s11065_s21 + $0x444] ss:$100 sps:$4 sm:$0xff]  }
 0x26f   : > { %6798 = vmatmul.mubr.bf16.gmra.mrb[32].mxu0 %v10605_v28  ;;  %5721 = vmatprep.mubr.bf16.mxu1 %v10612_v29  ;;  %v10743_v28 = vld [vmem:[%s11065_s21 + $0x410] ss:$100 sps:$4 sm:$0xff]   ;;  %v10744_v29 = vld [vmem:[%s11065_s21 + $0x440] ss:$100 sps:$4 sm:$0xff]  }
 0x270   : > { %6807 = vmatprep.mubr.bf16.mxu0 %v10614_v30  ;;  %v10748_v30 = vld [vmem:[%s11065_s21 + $0x4dc] ss:$100 sps:$4 sm:$0xff]  }
 0x276   : > { %5722 = vmatmul.mubr.bf16.gmra.mrb[36].mxu1 %v10616_v31  ;;  %v10750_v31 = vld [vmem:[%s11065_s21 + $0x50c] ss:$100 sps:$4 sm:$0xff]  }
 0x277   : > { %6808 = vmatmul.mubr.bf16.gmra.mrb[36].mxu0 %v10620_v32  ;;  %5731 = vmatprep.mubr.bf16.mxu1 %v10627_v33  ;;  %v10752_v32 = vld [vmem:[%s11065_s21 + $0x4d8] ss:$100 sps:$4 sm:$0xff]   ;;  %v10753_v33 = vld [vmem:[%s11065_s21 + $0x508] ss:$100 sps:$4 sm:$0xff]  }
 0x278   : > { %6817 = vmatprep.mubr.bf16.mxu0 %v10629_v34  ;;  %v10754_v34 = vld [vmem:[%s11065_s21 + $0x5a4] ss:$100 sps:$4 sm:$0xff]  }
 0x27e   : > { %5732 = vmatmul.mubr.bf16.gmra.mrb[40].mxu1 %v10631_v35  ;;  %v10756_v35 = vld [vmem:[%s11065_s21 + $0x5d4] ss:$100 sps:$4 sm:$0xff]  }
 0x27f   : > { %6818 = vmatmul.mubr.bf16.gmra.mrb[40].mxu0 %v10635_v36  ;;  %5741 = vmatprep.mubr.bf16.mxu1 %v10642_v37  ;;  %v10758_v36 = vld [vmem:[%s11065_s21 + $0x5a0] ss:$100 sps:$4 sm:$0xff]   ;;  %v10759_v37 = vld [vmem:[%s11065_s21 + $0x5d0] ss:$100 sps:$4 sm:$0xff]  }
 0x280   : > { %6827 = vmatprep.mubr.bf16.mxu0 %v10644_v38  ;;  %v10763_v38 = vld [vmem:[%s11065_s21 + $0x66c] ss:$100 sps:$4 sm:$0xff]  }
 0x286   : > { %5742 = vmatmul.mubr.bf16.gmra.mrb[44].mxu1 %v10646_v39  ;;  %v10765_v39 = vld [vmem:[%s11065_s21 + $0x69c] ss:$100 sps:$4 sm:$0xff]  }
 0x287   : > { %6828 = vmatmul.mubr.bf16.gmra.mrb[44].mxu0 %v10650_v40  ;;  %5751 = vmatprep.mubr.bf16.mxu1 %v10657_v41  ;;  %v10767_v40 = vld [vmem:[%s11065_s21 + $0x668] ss:$100 sps:$4 sm:$0xff]   ;;  %v10768_v41 = vld [vmem:[%s11065_s21 + $0x698] ss:$100 sps:$4 sm:$0xff]  }
 0x288   : > { %6837 = vmatprep.mubr.bf16.mxu0 %v10659_v42  ;;  %v10769_v42 = vld [vmem:[%s11065_s21 + $0x734] ss:$100 sps:$4 sm:$0xff]  }
 0x28e   : > { %5752 = vmatmul.mubr.bf16.gmra.mrb[48].mxu1 %v10661_v43  ;;  %v10771_v43 = vld [vmem:[%s11065_s21 + $0x764] ss:$100 sps:$4 sm:$0xff]  }
 0x28f   : > { %6838 = vmatmul.mubr.bf16.gmra.mrb[48].mxu0 %v10665_v44  ;;  %5761 = vmatprep.mubr.bf16.mxu1 %v10672_v45  ;;  %v10773_v44 = vld [vmem:[%s11065_s21 + $0x730] ss:$100 sps:$4 sm:$0xff]   ;;  %v10774_v45 = vld [vmem:[%s11065_s21 + $0x760] ss:$100 sps:$4 sm:$0xff]  }
 0x290   : > { %6847 = vmatprep.mubr.bf16.mxu0 %v10674_v46  ;;  %v10778_v46 = vld [vmem:[%s11065_s21 + $0x7fc] ss:$100 sps:$4 sm:$0xff]  }
 0x296   : > { %5762 = vmatmul.mubr.bf16.gmra.mrb[52].mxu1 %v10676_v49  ;;  %v10783_v49 = vld [vmem:[%s11065_s21 + $0x828] ss:$100 sps:$4 sm:$0xff]  }
 0x297   : > { %6848 = vmatmul.mubr.bf16.gmra.mrb[52].mxu0 %v10680_v50  ;;  %5771 = vmatprep.mubr.bf16.mxu1 %v8389_v51  ;;  %v10784_v50 = vld [vmem:[%s11065_s21 + $0x8c4] ss:$100 sps:$4 sm:$0xff]   ;;  %v10786_v51 = vld [vmem:[%s11065_s21 + $0x8f4] ss:$100 sps:$4 sm:$0xff]  }
 0x298   : > { %6857 = vmatprep.mubr.bf16.mxu0 %v8401_v52  ;;  %v10788_v52 = vld [vmem:[%s11065_s21 + $0x8c0] ss:$100 sps:$4 sm:$0xff]  }
 0x29e   : > { %5772 = vmatmul.mubr.bf16.gmra.mrb[56].mxu1 %v8388_v53  ;;  %v10789_v53 = vld [vmem:[%s11065_s21 + $0x8f0] ss:$100 sps:$4 sm:$0xff]  }
 0x29f   : > { %6858 = vmatmul.mubr.bf16.gmra.mrb[56].mxu0 %v8400_v54  ;;  %5812 = vmatprep.mubr.bf16.mxu1 %v10702_v55  ;;  %v10793_v54 = vld [vmem:[%s11065_s21 + $0x98c] ss:$100 sps:$4 sm:$0xff]   ;;  %v10795_v55 = vld [vmem:[%s11065_s21 + $0x9bc] ss:$100 sps:$4 sm:$0xff]  }
 0x2a0   : > { %6898 = vmatprep.mubr.bf16.mxu0 %v10705_v56  ;;  %v10797_v56 = vld [vmem:[%s11065_s21 + $0x988] ss:$100 sps:$4 sm:$0xff]  }
 0x2a6   : > { %5813 = vmatmul.mubr.bf16.vlgmr.msra.gmra.mrb[0].mxu1 %v10700_v57  ;;  %v10798_v57 = vld [vmem:[%s11065_s21 + $0x9b8] ss:$100 sps:$4 sm:$0xff]  }
 0x2a7   : > { %6899 = vmatmul.mubr.bf16.vlgmr.msra.gmra.mrb[0].mxu0 %v10703_v58  ;;  %5822 = vmatprep.mubr.bf16.mxu1 %v10709_v60  ;;  %v10799_v58 = vld [vmem:[%s11065_s21 + $0xa54] ss:$100 sps:$4 sm:$0xff]   ;;  %v10825_v60 = vld [vmem:[%s12963_s3] ss:$8 sps:$4 sm:$0xff]  }
 0x2a8   : > { %7048 = vmatpush1.bf16.msra.mxu0 %v10706_v59  ;;  %6908 = vmatprep.mubr.bf16.mxu0 %v10711_v61  ;;  %v10801_v59 = vld [vmem:[%s11065_s21 + $0xa84] ss:$100 sps:$4 sm:$0xff]  }
 0x2a9   : > { %7049 = vmatprep.subr.bf16.mxu0 %v10721_v62  ;;  %v10827_v61 = vld [vmem:[%s12963_s3 + $0x4] ss:$8 sps:$4 sm:$0xff]   ;;  %v603_v62 = vld [vmem:[%s11065_s21 + $0xb18] sm:$0xff] }
 0x2aa   : > { %7520 = vmatprep.subr.bf16.mxu1 %v10827_v61  ;;  %v10832_v61 = vld [vmem:[%s11065_s21 + $0xb50] ss:$0 sps:$4 sm:$0xff]  }
 0x2ab   : > { %7521 = vmatpush1.bf16.msra.mxu1 %v10825_v60 }
 0x2ac   : > { %7050 = vmatpush1.bf16.msra.mxu0 %v10719_v63  ;;  %v609_v63 = vld [vmem:[%s11065_s21 + $0xb48] sm:$0xff] }
 0x2ad   : > { %7051 = vmatprep.subr.bf16.mxu0 %v10732_v0  ;;  %v10803_v0 = vld [vmem:[%s11065_s21 + $0xa50] ss:$100 sps:$4 sm:$0xff]  }
 0x2ae   : > { %5823 = vmatmul.mubr.bf16.gmra.mrb[4].mxu1 %v10713_v1  ;;  %v10804_v1 = vld [vmem:[%s11065_s21 + $0xa80] ss:$100 sps:$4 sm:$0xff]  }
 0x2af   : > { %6909 = vmatmul.mubr.bf16.gmra.mrb[4].mxu0 %v10714_v2  ;;  %5832 = vmatprep.mubr.bf16.mxu1 %v10715_v3  ;;  %v8391_v2 = vcombine.high %v603_v62, %v603_v62  ;;  %v8403_v3 = vcombine.high %v609_v63, %v609_v63 }
 0x2b0   : > { %6918 = vmatprep.mubr.bf16.mxu0 %v10717_v4  ;;  %7052 = vmatpush1.bf16.msra.mxu0 %v10730_v5  ;;  %v10829_v4 = vld [vmem:[%s12963_s3 + $0x10] ss:$8 sps:$4 sm:$0xff]   ;;  %v10831_v5 = vld [vmem:[%s12963_s3 + $0x14] ss:$8 sps:$4 sm:$0xff]  }
 0x2b1   : > { %7053 = vmatprep.subr.bf16.mxu0 %v10747_v6  ;;  %7522 = vmatprep.subr.bf16.mxu1 %v10831_v5  ;;  %v8390_v6 = vcombine.low %v603_v62, %v603_v62 }
 0x2b2   : > { %7523 = vmatpush1.bf16.msra.mxu1 %v10829_v4 }
 0x2b4   : > { %7054 = vmatpush1.bf16.msra.mxu0 %v10745_v7  ;;  %v8402_v7 = vcombine.low %v609_v63, %v609_v63 }
 0x2b5   : > { %7055 = vmatprep.subr.bf16.mxu0 %v10762_v8  ;;  %v10833_v8 = vld [vmem:[%s12963_s3 + $0x20] ss:$8 sps:$4 sm:$0xff]  }
 0x2b6   : > { %5833 = vmatmul.mubr.bf16.gmra.mrb[8].mxu1 %v10722_v9  ;;  %v10835_v9 = vld [vmem:[%s12963_s3 + $0x24] ss:$8 sps:$4 sm:$0xff]  }
 0x2b7   : > { %6919 = vmatmul.mubr.bf16.gmra.mrb[8].mxu0 %v10723_v10  ;;  %5842 = vmatprep.mubr.bf16.mxu1 %v10724_v11  ;;  %v10883_v10 = vmov 0   ;;  %v10812_v11 = vld [vmem:[%s11065_s21 + $0x60] ss:$100 sps:$4 sm:$0xff]  }
 0x2b8   : > { %6928 = vmatprep.mubr.bf16.mxu0 %v10726_v12  ;;  %7056 = vmatpush1.bf16.msra.mxu0 %v10760_v13  ;;  %v10836_v12 = vld [vmem:[%s12963_s3 + $0x30] ss:$8 sps:$4 sm:$0xff]   ;;  %v10838_v13 = vld [vmem:[%s12963_s3 + $0x34] ss:$8 sps:$4 sm:$0xff]  }
 0x2b9   : > { %7057 = vmatprep.subr.bf16.mxu0 %v10777_v14  ;;  %7524 = vmatprep.subr.bf16.mxu1 %v10835_v9  ;;  %v10813_v14 = vld [vmem:[%s11065_s21 + $0x128] ss:$100 sps:$4 sm:$0xff]  }
 0x2ba   : > { %7525 = vmatpush1.bf16.msra.mxu1 %v10833_v8 }
 0x2bb   : > { %7526 = vmatprep.subr.bf16.mxu1 %v10838_v13 }
 0x2bc   : > { %7058 = vmatpush1.bf16.msra.mxu0 %v10775_v15  ;;  %v10839_v15 = vld [vmem:[%s12963_s3 + $0x40] ss:$8 sps:$4 sm:$0xff]  }
 0x2bd   : > { %7059 = vmatprep.subr.bf16.mxu0 %v10792_v16  ;;  %v10841_v16 = vld [vmem:[%s12963_s3 + $0x44] ss:$8 sps:$4 sm:$0xff]  }
 0x2be   : > { %5843 = vmatmul.mubr.bf16.gmra.mrb[12].mxu1 %v10728_v17  ;;  %v10814_v17 = vld [vmem:[%s11065_s21 + $0x1f0] ss:$100 sps:$4 sm:$0xff]  }
 0x2bf   : > { %6929 = vmatmul.mubr.bf16.gmra.mrb[12].mxu0 %v10729_v18  ;;  %5852 = vmatprep.mubr.bf16.mxu1 %v10733_v19  ;;  %v10842_v18 = vld [vmem:[%s12963_s3 + $0x50] ss:$8 sps:$4 sm:$0xff]   ;;  %v10844_v19 = vld [vmem:[%s12963_s3 + $0x54] ss:$8 sps:$4 sm:$0xff]  }
 0x2c0   : > { %6938 = vmatprep.mubr.bf16.mxu0 %v10735_v20  ;;  %7060 = vmatpush1.bf16.msra.mxu0 %v10790_v21  ;;  %v10815_v20 = vld [vmem:[%s11065_s21 + $0x2b8] ss:$100 sps:$4 sm:$0xff]   ;;  %v10845_v21 = vld [vmem:[%s12963_s3 + $0x60] ss:$8 sps:$4 sm:$0xff]  }
 0x2c1   : > { %7061 = vmatprep.subr.bf16.mxu0 %v10807_v22  ;;  %7527 = vmatpush1.bf16.msra.mxu1 %v10836_v12  ;;  %v10847_v22 = vld [vmem:[%s12963_s3 + $0x64] ss:$8 sps:$4 sm:$0xff]  }
 0x2c2   : > { %7528 = vmatprep.subr.bf16.mxu1 %v10841_v16 }
 0x2c4   : > { %7062 = vmatpush1.bf16.msra.mxu0 %v10805_v23  ;;  %v10816_v23 = vld [vmem:[%s11065_s21 + $0x380] ss:$100 sps:$4 sm:$0xff]  }
 0x2c5   : > { %7529 = vmatpush1.bf16.msra.mxu1 %v10839_v15 }
 0x2c6   : > { %5853 = vmatmul.mubr.bf16.gmra.mrb[16].mxu1 %v10737_v24  ;;  %7530 = vmatprep.subr.bf16.mxu1 %v10844_v19  ;;  %v10848_v24 = vld [vmem:[%s12963_s3 + $0x70] ss:$8 sps:$4 sm:$0xff]  }
 0x2c7   : > { %6939 = vmatmul.mubr.bf16.gmra.mrb[16].mxu0 %v10738_v25  ;;  %5862 = vmatprep.mubr.bf16.mxu1 %v10739_v26  ;;  %v10850_v25 = vld [vmem:[%s12963_s3 + $0x74] ss:$8 sps:$4 sm:$0xff]   ;;  %v10851_v26 = vld [vmem:[%s12963_s3 + $0x80] ss:$8 sps:$4 sm:$0xff]  }
 0x2c8   : > { %6948 = vmatprep.mubr.bf16.mxu0 %v10741_v27  ;;  %v10853_v27 = vld [vmem:[%s12963_s3 + $0x84] ss:$8 sps:$4 sm:$0xff]  }
 0x2c9   : > { %7531 = vmatpush1.bf16.msra.mxu1 %v10842_v18 }
 0x2ca   : > { %7532 = vmatprep.subr.bf16.mxu1 %v10847_v22 }
 0x2cd   : > { %7533 = vmatpush1.bf16.msra.mxu1 %v10845_v21 }
 0x2ce   : > { %5863 = vmatmul.mubr.bf16.gmra.mrb[20].mxu1 %v10743_v28  ;;  %7534 = vmatprep.subr.bf16.mxu1 %v10850_v25  ;;  %v10817_v28 = vld [vmem:[%s11065_s21 + $0x448] ss:$100 sps:$4 sm:$0xff]  }
 0x2cf   : > { %6949 = vmatmul.mubr.bf16.gmra.mrb[20].mxu0 %v10744_v29  ;;  %5872 = vmatprep.mubr.bf16.mxu1 %v10748_v30  ;;  %v10854_v29 = vld [vmem:[%s12963_s3 + $0x90] ss:$8 sps:$4 sm:$0xff]   ;;  %v10856_v30 = vld [vmem:[%s12963_s3 + $0x94] ss:$8 sps:$4 sm:$0xff]  }
 0x2d0   : > { %6958 = vmatprep.mubr.bf16.mxu0 %v10750_v31  ;;  %v10818_v31 = vld [vmem:[%s11065_s21 + $0x510] ss:$100 sps:$4 sm:$0xff]  }
 0x2d1   : > { %7535 = vmatpush1.bf16.msra.mxu1 %v10848_v24 }
 0x2d2   : > { %7536 = vmatprep.subr.bf16.mxu1 %v10853_v27 }
 0x2d5   : > { %7537 = vmatpush1.bf16.msra.mxu1 %v10851_v26 }
 0x2d6   : > { %5873 = vmatmul.mubr.bf16.gmra.mrb[24].mxu1 %v10752_v32  ;;  %7538 = vmatprep.subr.bf16.mxu1 %v10856_v30  ;;  %v10857_v32 = vld [vmem:[%s12963_s3 + $0xa0] ss:$8 sps:$4 sm:$0xff]  }
 0x2d7   : > { %6959 = vmatmul.mubr.bf16.gmra.mrb[24].mxu0 %v10753_v33  ;;  %5882 = vmatprep.mubr.bf16.mxu1 %v10754_v34  ;;  %v10859_v33 = vld [vmem:[%s12963_s3 + $0xa4] ss:$8 sps:$4 sm:$0xff]   ;;  %v10819_v34 = vld [vmem:[%s11065_s21 + $0x5d8] ss:$100 sps:$4 sm:$0xff]  }
 0x2d8   : > { %6968 = vmatprep.mubr.bf16.mxu0 %v10756_v35  ;;  %v10860_v35 = vld [vmem:[%s12963_s3 + $0xb0] ss:$8 sps:$4 sm:$0xff]  }
 0x2d9   : > { %7539 = vmatpush1.bf16.msra.mxu1 %v10854_v29 }
 0x2da   : > { %7540 = vmatprep.subr.bf16.mxu1 %v10859_v33 }
 0x2dd   : > { %7541 = vmatpush1.bf16.msra.mxu1 %v10857_v32 }
 0x2de   : > { %5883 = vmatmul.mubr.bf16.gmra.mrb[28].mxu1 %v10758_v36  ;;  %v10862_v36 = vld [vmem:[%s12963_s3 + $0xb4] ss:$8 sps:$4 sm:$0xff]  }
 0x2df   : > { %6969 = vmatmul.mubr.bf16.gmra.mrb[28].mxu0 %v10759_v37  ;;  %5892 = vmatprep.mubr.bf16.mxu1 %v10763_v38  ;;  %v10820_v37 = vld [vmem:[%s11065_s21 + $0x6a0] ss:$100 sps:$4 sm:$0xff]  }
 0x2e0   : > { %6978 = vmatprep.mubr.bf16.mxu0 %v10765_v39  ;;  %7542 = vmatprep.subr.bf16.mxu1 %v10862_v36  ;;  %v10863_v38 = vld [vmem:[%s12963_s3 + $0xc0] ss:$8 sps:$4 sm:$0xff]   ;;  %v10865_v39 = vld [vmem:[%s12963_s3 + $0xc4] ss:$8 sps:$4 sm:$0xff]  }
 0x2e1   : > { %7543 = vmatpush1.bf16.msra.mxu1 %v10860_v35 }
 0x2e2   : > { %7544 = vmatprep.subr.bf16.mxu1 %v10865_v39 }
 0x2e5   : > { %7545 = vmatpush1.bf16.msra.mxu1 %v10863_v38 }
 0x2e6   : > { %5893 = vmatmul.mubr.bf16.gmra.mrb[32].mxu1 %v10767_v40  ;;  %v10821_v40 = vld [vmem:[%s11065_s21 + $0x768] ss:$100 sps:$4 sm:$0xff]  }
 0x2e7   : > { %6979 = vmatmul.mubr.bf16.gmra.mrb[32].mxu0 %v10768_v41  ;;  %5902 = vmatprep.mubr.bf16.mxu1 %v10769_v42  ;;  %v10866_v41 = vld [vmem:[%s12963_s3 + $0xd0] ss:$8 sps:$4 sm:$0xff]   ;;  %v10868_v42 = vld [vmem:[%s12963_s3 + $0xd4] ss:$8 sps:$4 sm:$0xff]  }
 0x2e8   : > { %6988 = vmatprep.mubr.bf16.mxu0 %v10771_v43  ;;  %7546 = vmatprep.subr.bf16.mxu1 %v10868_v42  ;;  %v10822_v43 = vld [vmem:[%s11065_s21 + $0x830] ss:$100 sps:$4 sm:$0xff]  }
 0x2e9   : > { %7547 = vmatpush1.bf16.msra.mxu1 %v10866_v41 }
 0x2ee   : > { %5903 = vmatmul.mubr.bf16.gmra.mrb[36].mxu1 %v10773_v44  ;;  %v10869_v44 = vld [vmem:[%s12963_s3 + $0xe0] ss:$8 sps:$4 sm:$0xff]  }
 0x2ef   : > { %6989 = vmatmul.mubr.bf16.gmra.mrb[36].mxu0 %v10774_v45  ;;  %5912 = vmatprep.mubr.bf16.mxu1 %v10778_v46  ;;  %v10871_v45 = vld [vmem:[%s12963_s3 + $0xe4] ss:$8 sps:$4 sm:$0xff]   ;;  %v10823_v46 = vld [vmem:[%s11065_s21 + $0x8f8] ss:$100 sps:$4 sm:$0xff]  }
 0x2f0   : > { %6998 = vmatprep.mubr.bf16.mxu0 %v10780_v47  ;;  %7548 = vmatprep.subr.bf16.mxu1 %v10871_v45  ;;  %v10874_v47 = vld [vmem:[%s12963_s3 + $0xf4] ss:$8 sps:$4 sm:$0xff]  }
 0x2f1   : > { %7549 = vmatpush1.bf16.msra.mxu1 %v10869_v44 }
 0x2f2   : > { %7550 = vmatprep.subr.bf16.mxu1 %v10874_v47  ;;  %v1011_v47 = vld [vmem:[%s12962_s2] sm:$0x3] }
 0x2f6   : > { %5913 = vmatmul.mubr.bf16.gmra.mrb[40].mxu1 %v10782_v48  ;;  %v10872_v48 = vld [vmem:[%s12963_s3 + $0xf0] ss:$8 sps:$4 sm:$0xff]  }
 0x2f7   : > { %6999 = vmatmul.mubr.bf16.gmra.mrb[40].mxu0 %v10783_v49  ;;  %5922 = vmatprep.mubr.bf16.mxu1 %v10784_v50 }
 0x2f8   : > { %7008 = vmatprep.mubr.bf16.mxu0 %v10786_v51  ;;  %7551 = vmatpush1.bf16.msra.mxu1 %v10872_v48  ;;  %v10824_v51 = vld [vmem:[%s11065_s21 + $0x9c0] ss:$100 sps:$4 sm:$0xff]  }
 0x2fe   : > { %5923 = vmatmul.mubr.bf16.gmra.mrb[44].mxu1 %v10788_v52 }
 0x2ff   : > { %7009 = vmatmul.mubr.bf16.gmra.mrb[44].mxu0 %v10789_v53  ;;  %5932 = vmatprep.mubr.bf16.mxu1 %v10793_v54 }
 0x300   : > { %7018 = vmatprep.mubr.bf16.mxu0 %v10795_v55 }
 0x306   : > { %5933 = vmatmul.mubr.bf16.gmra.mrb[48].mxu1 %v10797_v56  ;;  %v10828_v56 = vld [vmem:[%s11065_s21 + $0xa88] ss:$100 sps:$4 sm:$0xff]  }
 0x307   : > { %7019 = vmatmul.mubr.bf16.gmra.mrb[48].mxu0 %v10798_v57  ;;  %5942 = vmatprep.mubr.bf16.mxu1 %v10799_v58 }
 0x308   : > { %7028 = vmatprep.mubr.bf16.mxu0 %v10801_v59 }
 0x30e   : > { %5943 = vmatmul.mubr.bf16.gmra.mrb[52].mxu1 %v10803_v0 }
 0x30f   : > { %7029 = vmatmul.mubr.bf16.gmra.mrb[52].mxu0 %v10804_v1  ;;  %5952 = vmatprep.mubr.bf16.mxu1 %v8391_v2 }
 0x310   : > { %7038 = vmatprep.mubr.bf16.mxu0 %v8403_v3 }
 0x316   : > { %5953 = vmatmul.mubr.bf16.gmra.mrb[56].mxu1 %v8390_v6 }
 0x317   : > { %7039 = vmatmul.mubr.bf16.gmra.mrb[56].mxu0 %v8402_v7 }
 0x318   : > { %7079 = vmatprep.mubr.bf16.mxu0 %v10883_v10 }
 0x31f   : > { %7080 = vmatmul.mubr.bf16.vlgmr.msra.gmra.mrb[0].mxu0 %v10812_v11 }
 0x320   : > { %7089 = vmatprep.mubr.bf16.mxu0 %v10883_v10 }
 0x327   : > { %7090 = vmatmul.mubr.bf16.gmra.mrb[4].mxu0 %v10813_v14 }
 0x328   : > { %7099 = vmatprep.mubr.bf16.mxu0 %v10883_v10 }
 0x32f   : > { %7100 = vmatmul.mubr.bf16.gmra.mrb[8].mxu0 %v10814_v17 }
 0x330   : > { %7109 = vmatprep.mubr.bf16.mxu0 %v10883_v10 }
 0x337   : > { %7110 = vmatmul.mubr.bf16.gmra.mrb[12].mxu0 %v10815_v20 }
 0x338   : > { %7119 = vmatprep.mubr.bf16.mxu0 %v10883_v10 }
 0x33f   : > { %7120 = vmatmul.mubr.bf16.gmra.mrb[16].mxu0 %v10816_v23 }
 0x340   : > { %7129 = vmatprep.mubr.bf16.mxu0 %v10883_v10 }
 0x347   : > { %7130 = vmatmul.mubr.bf16.gmra.mrb[20].mxu0 %v10817_v28 }
 0x348   : > { %7139 = vmatprep.mubr.bf16.mxu0 %v10883_v10 }
 0x34f   : > { %7140 = vmatmul.mubr.bf16.gmra.mrb[24].mxu0 %v10818_v31 }
 0x350   : > { %7149 = vmatprep.mubr.bf16.mxu0 %v10883_v10 }
 0x357   : > { %7150 = vmatmul.mubr.bf16.gmra.mrb[28].mxu0 %v10819_v34 }
 0x358   : > { %7159 = vmatprep.mubr.bf16.mxu0 %v10883_v10 }
 0x35f   : > { %7160 = vmatmul.mubr.bf16.gmra.mrb[32].mxu0 %v10820_v37 }
 0x360   : > { %7169 = vmatprep.mubr.bf16.mxu0 %v10883_v10 }
 0x367   : > { %7170 = vmatmul.mubr.bf16.gmra.mrb[36].mxu0 %v10821_v40  ;;  %v1013_v40 = vlaneseq }
 0x368   : > { %7179 = vmatprep.mubr.bf16.mxu0 %v10883_v10 }
 0x369   : > { %v12716_v44 = vshrl.u32 %v1013_v40, 7 }
 0x36b   : > { %12979 = vst [vmem:[#allocation11_spill] sm:$0xff] %v12716_v44  ;;  %v12969_v48 = vsub.s32 1, %v12716_v44 }
 0x36f   : > { %7180 = vmatmul.mubr.bf16.gmra.mrb[40].mxu0 %v10822_v43 }
 0x370   : > { %7189 = vmatprep.mubr.bf16.mxu0 %v10883_v10 }
 0x377   : > { %7190 = vmatmul.mubr.bf16.gmra.mrb[44].mxu0 %v10823_v46  ;;  %v12966_v46 = vsub.s32 0, %v12716_v44 }
 0x378   : > { %7199 = vmatprep.mubr.bf16.mxu0 %v10883_v10 }
 0x379   : > { %v12601_v49 = vpop.f32.mrb[0].mxu1 }
 0x37a   : > { %v12603_v50 = vpop.f32.mrb[1].mxu1 }
 0x37b   : > { %v12606_v52 = vpop.f32.mrb[2].mxu1 }
 0x37c   : > { %v12608_v53 = vpop.f32.mrb[3].mxu1 }
 0x37f   : > { %7200 = vmatmul.mubr.bf16.gmra.mrb[48].mxu0 %v10824_v51 }
 0x380   : > { %7209 = vmatprep.mubr.bf16.mxu0 %v10883_v10 }
 0x381   : > { %v12611_v54 = vpop.f32.mrb[4].mxu1 }
 0x382   : > { %v12613_v55 = vpop.f32.mrb[5].mxu1 }
 0x383   : > { %v12616_v57 = vpop.f32.mrb[6].mxu1 }
 0x384   : > { %v12618_v58 = vpop.f32.mrb[7].mxu1 }
 0x387   : > { %7210 = vmatmul.mubr.bf16.gmra.mrb[52].mxu0 %v10828_v56 }
 0x388   : > { %7219 = vmatprep.mubr.bf16.mxu0 %v10883_v10 }
 0x389   : > { %v12621_v59 = vpop.f32.mrb[8].mxu1 }
 0x38a   : > { %v12623_v60 = vpop.f32.mrb[9].mxu1 }
 0x38b   : > { %v12626_v62 = vpop.f32.mrb[10].mxu1 }
 0x38c   : > { %v12628_v63 = vpop.f32.mrb[11].mxu1 }
 0x38f   : > { %7220 = vmatmul.mubr.bf16.gmra.mrb[56].mxu0 %v10832_v61 }
 0x391   : > { %v12630_v0 = vpop.f32.mrb[12].mxu1 }
 0x392   : > { %v12632_v1 = vpop.f32.mrb[13].mxu1 }
 0x393   : > { %v12634_v2 = vpop.f32.mrb[14].mxu1 }
 0x394   : > { %v12636_v3 = vpop.f32.mrb[15].mxu1 }
 0x399   : > { %v12638_v4 = vpop.f32.mrb[16].mxu1 }
 0x39a   : > { %v12640_v5 = vpop.f32.mrb[17].mxu1 }
 0x39b   : > { %v12642_v6 = vpop.f32.mrb[18].mxu1 }
 0x39c   : > { %v12644_v7 = vpop.f32.mrb[19].mxu1 }
 0x3a1   : > { %v12646_v8 = vpop.f32.mrb[20].mxu1 }
 0x3a2   : > { %v12648_v9 = vpop.f32.mrb[21].mxu1 }
 0x3a3   : > { %v12650_v10 = vpop.f32.mrb[22].mxu1 }
 0x3a4   : > { %v12652_v11 = vpop.f32.mrb[23].mxu1 }
 0x3a9   : > { %v12654_v12 = vpop.f32.mrb[24].mxu1 }
 0x3aa   : > { %v12656_v13 = vpop.f32.mrb[25].mxu1 }
 0x3ab   : > { %v12658_v14 = vpop.f32.mrb[26].mxu1 }
 0x3ac   : > { %v12660_v15 = vpop.f32.mrb[27].mxu1 }
 0x3b1   : > { %v12662_v16 = vpop.f32.mrb[28].mxu1 }
 0x3b2   : > { %v12664_v17 = vpop.f32.mrb[29].mxu1 }
 0x3b3   : > { %v12666_v18 = vpop.f32.mrb[30].mxu1 }
 0x3b4   : > { %v12668_v19 = vpop.f32.mrb[31].mxu1 }
 0x3b9   : > { %v12670_v20 = vpop.f32.mrb[32].mxu1 }
 0x3ba   : > { %v12672_v21 = vpop.f32.mrb[33].mxu1 }
 0x3bb   : > { %v12674_v22 = vpop.f32.mrb[34].mxu1 }
 0x3bc   : > { %v12676_v23 = vpop.f32.mrb[35].mxu1 }
 0x3c1   : > { %v12678_v24 = vpop.f32.mrb[36].mxu1 }
 0x3c2   : > { %v12680_v25 = vpop.f32.mrb[37].mxu1 }
 0x3c3   : > { %v12682_v26 = vpop.f32.mrb[38].mxu1 }
 0x3c4   : > { %v12684_v27 = vpop.f32.mrb[39].mxu1 }
 0x3c9   : > { %v12686_v28 = vpop.f32.mrb[40].mxu1 }
 0x3ca   : > { %v12688_v29 = vpop.f32.mrb[41].mxu1 }
 0x3cb   : > { %v12690_v30 = vpop.f32.mrb[42].mxu1 }
 0x3cc   : > { %v12692_v31 = vpop.f32.mrb[43].mxu1 }
 0x3d1   : > { %v12694_v32 = vpop.f32.mrb[44].mxu1 }
 0x3d2   : > { %v12696_v33 = vpop.f32.mrb[45].mxu1 }
 0x3d3   : > { %v12698_v34 = vpop.f32.mrb[46].mxu1 }
 0x3d4   : > { %12970 = vst [vmem:[#allocation2_spill] sm:$0xff] %v12698_v34  ;;  %v12700_v35 = vpop.f32.mrb[47].mxu1 }
 0x3d5   : > { %12971 = vst [vmem:[#allocation3_spill] sm:$0xff] %v12700_v35 }
 0x3d9   : > { %v12702_v36 = vpop.f32.mrb[48].mxu1 }
 0x3da   : > { %12972 = vst [vmem:[#allocation4_spill] sm:$0xff] %v12702_v36  ;;  %v12704_v37 = vpop.f32.mrb[49].mxu1 }
 0x3db   : > { %12973 = vst [vmem:[#allocation5_spill] sm:$0xff] %v12704_v37  ;;  %v12706_v38 = vpop.f32.mrb[50].mxu1 }
 0x3dc   : > { %12974 = vst [vmem:[#allocation6_spill] sm:$0xff] %v12706_v38  ;;  %v12708_v39 = vpop.f32.mrb[51].mxu1 }
 0x3dd   : > { %12975 = vst [vmem:[#allocation7_spill] sm:$0xff] %v12708_v39 }
 0x3e1   : > { %v12710_v41 = vpop.f32.mrb[52].mxu1 }
 0x3e2   : > { %12976 = vst [vmem:[#allocation8_spill] sm:$0xff] %v12710_v41  ;;  %v12712_v42 = vpop.f32.mrb[53].mxu1 }
 0x3e3   : > { %12977 = vst [vmem:[#allocation9_spill] sm:$0xff] %v12712_v42  ;;  %v12714_v43 = vpop.f32.mrb[54].mxu1 }
 0x3e4   : > { %12978 = vst [vmem:[#allocation10_spill] sm:$0xff] %v12714_v43  ;;  %v12718_v45 = vpop.f32.mrb[55].mxu1  ;;  %v12731_v43 = vrot.slane %v1011_v47, %v12966_v46 }
 0x3e5   : > { %12980 = vst [vmem:[#allocation12_spill] sm:$0xff] %v12718_v45  ;;  %v12735_v45 = vrot.slane %v1011_v47, %v12969_v48 }
 0x3e6   : > { %v8898_v42 = vadd.f32 %v12601_v49, %v12731_v43 }
 0x3e7   : > { %v8900_v41 = vadd.f32 %v12603_v50, %v12735_v45  ;;  %v8904_v46 = vadd.f32 %v12608_v53, %v12735_v45  ;;  %v8906_v50 = vadd.f32 %v12611_v54, %v12731_v43  ;;  %v8910_v53 = vadd.f32 %v12616_v57, %v12731_v43 }
 0x3e9   : > { %v12725_v51 = vpop.f32.mrb[56].mxu1 }
 0x3ea   : > { %12981 = vst [vmem:[#allocation13_spill] sm:$0xff] %v12725_v51  ;;  %v12727_v56 = vpop.f32.mrb[57].mxu1 }
 0x3eb   : > { %12982 = vst [vmem:[#allocation14_spill] sm:$0xff] %v12727_v56  ;;  %v5958_v61 = vpop.f32.mrb[58].mxu1  ;;  %v8902_v56 = vadd.f32 %v12606_v52, %v12731_v43  ;;  %v8908_v52 = vadd.f32 %v12613_v55, %v12735_v45 }
 0x3ec   : > { %v5959_v40 = vpop.f32.mrb[59].mxu1 }
 0x3f2   : > { %v7081_v39 = vpop.f32.mrb[0].mxu0 }
 0x3f3   : > { %v8899_v61 = vadd.f32 %v8898_v42, %v7081_v39  ;;  %v7083_v51 = vpop.f32.mrb[1].mxu0 }
 0x3f4   : > { %v8901_v40 = vadd.f32 %v8900_v41, %v7083_v51  ;;  %v7085_v38 = vpop.f32.mrb[2].mxu0 }
 0x3f5   : > { %v8903_v44 = vadd.f32 %v8902_v56, %v7085_v38  ;;  %v7087_v47 = vpop.f32.mrb[3].mxu0  ;;  %v7228_v37 = vmax.f32 %v8899_v61, 0.0  ;;  %v8914_v61 = vadd.f32 %v12621_v59, %v12731_v43 }
 0x3f6   : > { %v8905_v48 = vadd.f32 %v8904_v46, %v7087_v47  ;;  %v7229_v49 = vmax.f32 %v8901_v40, 0.0  ;;  %v8912_v46 = vadd.f32 %v12618_v58, %v12735_v45  ;;  %v8916_v40 = vadd.f32 %v12623_v60, %v12735_v45 }
 0x3f7   : > { %v7230_v36 = vmax.f32 %v8903_v44, 0.0 }
 0x3f8   : > { %v7231_v35 = vmax.f32 %v8905_v48, 0.0 }
 0x3f9   : > { %v7286_v34 = vpack.c.bf16 %v7230_v36, %v7228_v37 }
 0x3fa   : > { %v7287_v39 = vpack.c.bf16 %v7231_v35, %v7229_v49  ;;  %v7091_v42 = vpop.f32.mrb[4].mxu0  ;;  %v8918_v49 = vadd.f32 %v12626_v62, %v12731_v43 }
 0x3fb   : > { %v8907_v41 = vadd.f32 %v8906_v50, %v7091_v42  ;;  %v7093_v38 = vpop.f32.mrb[5].mxu0 }
 0x3fc   : > { %v8909_v44 = vadd.f32 %v8908_v52, %v7093_v38  ;;  %v7095_v51 = vpop.f32.mrb[6].mxu0  ;;  %7552 = vmatprep.mubr.bf16.mxu1 %v7287_v39 }
 0x3fd   : > { %v8911_v48 = vadd.f32 %v8910_v53, %v7095_v51  ;;  %v7097_v56 = vpop.f32.mrb[7].mxu0  ;;  %7553 = vmatmul.mubr.bf16.vlgmr.msra.gmra.mrb[60].mxu1 %v7286_v34  ;;  %v7232_v36 = vmax.f32 %v8907_v41, 0.0  ;;  %v8920_v34 = vadd.f32 %v12628_v63, %v12735_v45  ;;  %v8922_v51 = vadd.f32 %v12630_v0, %v12731_v43 }
 0x3fe   : > { %v8913_v54 = vadd.f32 %v8912_v46, %v7097_v56  ;;  %v7233_v55 = vmax.f32 %v8909_v44, 0.0 }
 0x3ff   : > { %v7234_v37 = vmax.f32 %v8911_v48, 0.0  ;;  %v8924_v48 = vadd.f32 %v12632_v1, %v12735_v45 }
 0x400   : > { %v7235_v35 = vmax.f32 %v8913_v54, 0.0  ;;  %v8926_v54 = vadd.f32 %v12634_v2, %v12731_v43 }
 0x401   : > { %v7288_v57 = vpack.c.bf16 %v7234_v37, %v7232_v36 }
 0x402   : > { %v7289_v47 = vpack.c.bf16 %v7235_v35, %v7233_v55  ;;  %v7101_v58 = vpop.f32.mrb[8].mxu0  ;;  %v8928_v55 = vadd.f32 %v12636_v3, %v12735_v45 }
 0x403   : > { %v8915_v50 = vadd.f32 %v8914_v61, %v7101_v58  ;;  %v7103_v52 = vpop.f32.mrb[9].mxu0 }
 0x404   : > { %v8917_v39 = vadd.f32 %v8916_v40, %v7103_v52  ;;  %v7105_v42 = vpop.f32.mrb[10].mxu0  ;;  %7562 = vmatprep.mubr.bf16.mxu1 %v7289_v47  ;;  %v8932_v52 = vadd.f32 %v12640_v5, %v12735_v45 }
 0x405   : > { %v8919_v53 = vadd.f32 %v8918_v49, %v7105_v42  ;;  %v7107_v41 = vpop.f32.mrb[11].mxu0  ;;  %7563 = vmatmul.mubr.bf16.gmra.mrb[64].mxu1 %v7288_v57  ;;  %v7236_v38 = vmax.f32 %v8915_v50, 0.0  ;;  %v8930_v50 = vadd.f32 %v12638_v4, %v12731_v43 }
 0x406   : > { %v8921_v59 = vadd.f32 %v8920_v34, %v7107_v41  ;;  %v7237_v60 = vmax.f32 %v8917_v39, 0.0  ;;  %v8934_v39 = vadd.f32 %v12642_v6, %v12731_v43  ;;  %v8936_v41 = vadd.f32 %v12644_v7, %v12735_v45 }
 0x407   : > { %v7238_v46 = vmax.f32 %v8919_v53, 0.0 }
 0x408   : > { %v7239_v44 = vmax.f32 %v8921_v59, 0.0 }
 0x409   : > { %v7290_v62 = vpack.c.bf16 %v7238_v46, %v7236_v38 }
 0x40a   : > { %v7291_v56 = vpack.c.bf16 %v7239_v44, %v7237_v60  ;;  %v7111_v63 = vpop.f32.mrb[12].mxu0 }
 0x40b   : > { %v8923_v36 = vadd.f32 %v8922_v51, %v7111_v63  ;;  %v7113_v37 = vpop.f32.mrb[13].mxu0 }
 0x40c   : > { %v8925_v35 = vadd.f32 %v8924_v48, %v7113_v37  ;;  %v7115_v61 = vpop.f32.mrb[14].mxu0  ;;  %7572 = vmatprep.mubr.bf16.mxu1 %v7291_v56  ;;  %v8938_v48 = vadd.f32 %v12646_v8, %v12731_v43  ;;  %v8940_v56 = vadd.f32 %v12648_v9, %v12735_v45 }
 0x40d   : > { %v8927_v57 = vadd.f32 %v8926_v54, %v7115_v61  ;;  %v7117_v40 = vpop.f32.mrb[15].mxu0  ;;  %7573 = vmatmul.mubr.bf16.gmra.mrb[68].mxu1 %v7290_v62  ;;  %v7240_v47 = vmax.f32 %v8923_v36, 0.0  ;;  %v8942_v54 = vadd.f32 %v12650_v10, %v12731_v43 }
 0x40e   : > { %v8929_v0 = vadd.f32 %v8928_v55, %v7117_v40  ;;  %v7241_v1 = vmax.f32 %v8925_v35, 0.0  ;;  %v8944_v55 = vadd.f32 %v12652_v11, %v12735_v45 }
 0x40f   : > { %v7242_v58 = vmax.f32 %v8927_v57, 0.0 }
 0x410   : > { %v7243_v49 = vmax.f32 %v8929_v0, 0.0 }
 0x411   : > { %v7292_v2 = vpack.c.bf16 %v7242_v58, %v7240_v47 }
 0x412   : > { %v7293_v34 = vpack.c.bf16 %v7243_v49, %v7241_v1  ;;  %v7121_v3 = vpop.f32.mrb[16].mxu0  ;;  %v8946_v1 = vadd.f32 %v12654_v12, %v12731_v43  ;;  %v8948_v49 = vadd.f32 %v12656_v13, %v12735_v45 }
 0x413   : > { %v8931_v42 = vadd.f32 %v8930_v50, %v7121_v3  ;;  %v7123_v53 = vpop.f32.mrb[17].mxu0  ;;  %v8952_v3 = vadd.f32 %v12660_v15, %v12735_v45 }
 0x414   : > { %v8933_v59 = vadd.f32 %v8932_v52, %v7123_v53  ;;  %v7125_v38 = vpop.f32.mrb[18].mxu0  ;;  %7582 = vmatprep.mubr.bf16.mxu1 %v7293_v34 }
 0x415   : > { %v8935_v46 = vadd.f32 %v8934_v39, %v7125_v38  ;;  %v7127_v60 = vpop.f32.mrb[19].mxu0  ;;  %7583 = vmatmul.mubr.bf16.gmra.mrb[72].mxu1 %v7292_v2  ;;  %v7244_v44 = vmax.f32 %v8931_v42, 0.0  ;;  %v8950_v2 = vadd.f32 %v12658_v14, %v12731_v43 }
 0x416   : > { %v8937_v4 = vadd.f32 %v8936_v41, %v7127_v60  ;;  %v7245_v5 = vmax.f32 %v8933_v59, 0.0  ;;  %v8954_v60 = vadd.f32 %v12662_v16, %v12731_v43 }
 0x417   : > { %v7246_v51 = vmax.f32 %v8935_v46, 0.0 }
 0x418   : > { %v7247_v62 = vmax.f32 %v8937_v4, 0.0  ;;  %v8956_v4 = vadd.f32 %v12664_v17, %v12735_v45 }
 0x419   : > { %v7294_v6 = vpack.c.bf16 %v7246_v51, %v7244_v44  ;;  %v8958_v51 = vadd.f32 %v12666_v18, %v12731_v43 }
 0x41a   : > { %v7295_v63 = vpack.c.bf16 %v7247_v62, %v7245_v5  ;;  %v7131_v7 = vpop.f32.mrb[20].mxu0 }
 0x41b   : > { %v8939_v36 = vadd.f32 %v8938_v48, %v7131_v7  ;;  %v7133_v37 = vpop.f32.mrb[21].mxu0  ;;  %v8960_v48 = vadd.f32 %v12668_v19, %v12735_v45 }
 0x41c   : > { %v8941_v35 = vadd.f32 %v8940_v56, %v7133_v37  ;;  %v7135_v61 = vpop.f32.mrb[22].mxu0  ;;  %7592 = vmatprep.mubr.bf16.mxu1 %v7295_v63 }
 0x41d   : > { %v8943_v57 = vadd.f32 %v8942_v54, %v7135_v61  ;;  %v7137_v40 = vpop.f32.mrb[23].mxu0  ;;  %7593 = vmatmul.mubr.bf16.gmra.mrb[76].mxu1 %v7294_v6  ;;  %v7248_v0 = vmax.f32 %v8939_v36, 0.0 }
 0x41e   : > { %v8945_v8 = vadd.f32 %v8944_v55, %v7137_v40  ;;  %v7249_v9 = vmax.f32 %v8941_v35, 0.0  ;;  %v8962_v55 = vadd.f32 %v12670_v20, %v12731_v43  ;;  %v8964_v35 = vadd.f32 %v12672_v21, %v12735_v45 }
 0x41f   : > { %v7250_v47 = vmax.f32 %v8943_v57, 0.0  ;;  %v8966_v57 = vadd.f32 %v12674_v22, %v12731_v43 }
 0x420   : > { %v7251_v58 = vmax.f32 %v8945_v8, 0.0 }
 0x421   : > { %v7296_v10 = vpack.c.bf16 %v7250_v47, %v7248_v0  ;;  %v8968_v0 = vadd.f32 %v12676_v23, %v12735_v45 }
 0x422   : > { %v7297_v50 = vpack.c.bf16 %v7251_v58, %v7249_v9  ;;  %v7141_v11 = vpop.f32.mrb[24].mxu0 }
 0x423   : > { %v8947_v52 = vadd.f32 %v8946_v1, %v7141_v11  ;;  %v7143_v34 = vpop.f32.mrb[25].mxu0  ;;  %v8970_v11 = vadd.f32 %v12678_v24, %v12731_v43 }
 0x424   : > { %v8949_v39 = vadd.f32 %v8948_v49, %v7143_v34  ;;  %v7145_v42 = vpop.f32.mrb[26].mxu0  ;;  %7602 = vmatprep.mubr.bf16.mxu1 %v7297_v50  ;;  %v8974_v34 = vadd.f32 %v12682_v26, %v12731_v43 }
 0x425   : > { %v8951_v53 = vadd.f32 %v8950_v2, %v7145_v42  ;;  %v7147_v41 = vpop.f32.mrb[27].mxu0  ;;  %7603 = vmatmul.mubr.bf16.gmra.mrb[80].mxu1 %v7296_v10  ;;  %v7252_v59 = vmax.f32 %v8947_v52, 0.0  ;;  %v8972_v2 = vadd.f32 %v12680_v25, %v12735_v45  ;;  %v8976_v42 = vadd.f32 %v12684_v27, %v12735_v45 }
 0x426   : > { %v8953_v12 = vadd.f32 %v8952_v3, %v7147_v41  ;;  %v7253_v13 = vmax.f32 %v8949_v39, 0.0 }
 0x427   : > { %v7254_v38 = vmax.f32 %v8951_v53, 0.0 }
 0x428   : > { %v7255_v46 = vmax.f32 %v8953_v12, 0.0 }
 0x429   : > { %v7298_v14 = vpack.c.bf16 %v7254_v38, %v7252_v59 }
 0x42a   : > { %v7299_v44 = vpack.c.bf16 %v7255_v46, %v7253_v13  ;;  %v7151_v15 = vpop.f32.mrb[28].mxu0 }
 0x42b   : > { %v8955_v5 = vadd.f32 %v8954_v60, %v7151_v15  ;;  %v7153_v62 = vpop.f32.mrb[29].mxu0  ;;  %v8978_v60 = vadd.f32 %v12686_v28, %v12731_v43 }
 0x42c   : > { %v8957_v6 = vadd.f32 %v8956_v4, %v7153_v62  ;;  %v7155_v56 = vpop.f32.mrb[30].mxu0  ;;  %7612 = vmatprep.mubr.bf16.mxu1 %v7299_v44  ;;  %v8982_v44 = vadd.f32 %v12690_v30, %v12731_v43 }
 0x42d   : > { %v8959_v63 = vadd.f32 %v8958_v51, %v7155_v56  ;;  %v7157_v7 = vpop.f32.mrb[31].mxu0  ;;  %7613 = vmatmul.mubr.bf16.gmra.mrb[84].mxu1 %v7298_v14  ;;  %v7256_v54 = vmax.f32 %v8955_v5, 0.0  ;;  %v8980_v14 = vadd.f32 %v12688_v29, %v12735_v45  ;;  %v8984_v5 = vadd.f32 %v12692_v31, %v12735_v45 }
 0x42e   : > { %v8961_v16 = vadd.f32 %v8960_v48, %v7157_v7  ;;  %v7257_v17 = vmax.f32 %v8957_v6, 0.0 }
 0x42f   : > { %v7258_v36 = vmax.f32 %v8959_v63, 0.0 }
 0x430   : > { %v7259_v37 = vmax.f32 %v8961_v16, 0.0 }
 0x431   : > { %v7300_v18 = vpack.c.bf16 %v7258_v36, %v7256_v54  ;;  %v8986_v54 = vadd.f32 %v12694_v32, %v12731_v43  ;;  %v8988_v36 = vadd.f32 %v12696_v33, %v12735_v45 }
 0x432   : > { %v7301_v61 = vpack.c.bf16 %v7259_v37, %v7257_v17  ;;  %v7161_v19 = vpop.f32.mrb[32].mxu0  ;;  %v12983_v37 = vld [vmem:[#allocation2_spill] sm:$0xff] }
 0x433   : > { %v8963_v40 = vadd.f32 %v8962_v55, %v7161_v19  ;;  %v7163_v8 = vpop.f32.mrb[33].mxu0  ;;  %v8990_v55 = vadd.f32 %v12983_v37, %v12731_v43  ;;  %v12994_v37 = vld [vmem:[#allocation14_spill] sm:$0xff] }
 0x434   : > { %v8965_v47 = vadd.f32 %v8964_v35, %v7163_v8  ;;  %v7165_v9 = vpop.f32.mrb[34].mxu0  ;;  %7622 = vmatprep.mubr.bf16.mxu1 %v7301_v61  ;;  %v12984_v61 = vld [vmem:[#allocation3_spill] sm:$0xff] }
 0x435   : > { %v8967_v58 = vadd.f32 %v8966_v57, %v7165_v9  ;;  %v7167_v1 = vpop.f32.mrb[35].mxu0  ;;  %7623 = vmatmul.mubr.bf16.gmra.mrb[88].mxu1 %v7300_v18  ;;  %v7260_v10 = vmax.f32 %v8963_v40, 0.0  ;;  %v8992_v19 = vadd.f32 %v12984_v61, %v12735_v45 }
 0x436   : > { %v8969_v20 = vadd.f32 %v8968_v0, %v7167_v1  ;;  %v7261_v21 = vmax.f32 %v8965_v47, 0.0  ;;  %v12985_v1 = vld [vmem:[#allocation4_spill] sm:$0xff] }
 0x437   : > { %v7262_v49 = vmax.f32 %v8967_v58, 0.0 }
 0x438   : > { %v7263_v50 = vmax.f32 %v8969_v20, 0.0  ;;  %v8994_v20 = vadd.f32 %v12985_v1, %v12731_v43 }
 0x439   : > { %v7302_v22 = vpack.c.bf16 %v7262_v49, %v7260_v10  ;;  %v12986_v49 = vld [vmem:[#allocation5_spill] sm:$0xff] }
 0x43a   : > { %v7303_v52 = vpack.c.bf16 %v7263_v50, %v7261_v21  ;;  %v7171_v23 = vpop.f32.mrb[36].mxu0  ;;  %v8996_v21 = vadd.f32 %v12986_v49, %v12735_v45 }
 0x43b   : > { %v8971_v3 = vadd.f32 %v8970_v11, %v7171_v23  ;;  %v7173_v39 = vpop.f32.mrb[37].mxu0 }
 0x43c   : > { %v8973_v53 = vadd.f32 %v8972_v2, %v7173_v39  ;;  %v7175_v41 = vpop.f32.mrb[38].mxu0  ;;  %7632 = vmatprep.mubr.bf16.mxu1 %v7303_v52 }
 0x43d   : > { %v8975_v12 = vadd.f32 %v8974_v34, %v7175_v41  ;;  %v7177_v59 = vpop.f32.mrb[39].mxu0  ;;  %7633 = vmatmul.mubr.bf16.gmra.mrb[92].mxu1 %v7302_v22  ;;  %v7264_v38 = vmax.f32 %v8971_v3, 0.0  ;;  %v12987_v22 = vld [vmem:[#allocation6_spill] sm:$0xff]  ;;  %v12988_v34 = vld [vmem:[#allocation7_spill] sm:$0xff] }
 0x43e   : > { %v8977_v24 = vadd.f32 %v8976_v42, %v7177_v59  ;;  %v7265_v25 = vmax.f32 %v8973_v53, 0.0  ;;  %v8998_v2 = vadd.f32 %v12987_v22, %v12731_v43  ;;  %v9000_v3 = vadd.f32 %v12988_v34, %v12735_v45 }
 0x43f   : > { %v7266_v13 = vmax.f32 %v8975_v12, 0.0 }
 0x440   : > { %v7267_v46 = vmax.f32 %v8977_v24, 0.0 }
 0x441   : > { %v7304_v26 = vpack.c.bf16 %v7266_v13, %v7264_v38 }
 0x442   : > { %v7305_v4 = vpack.c.bf16 %v7267_v46, %v7265_v25  ;;  %v7181_v27 = vpop.f32.mrb[40].mxu0  ;;  %v12989_v25 = vld [vmem:[#allocation8_spill] sm:$0xff] }
 0x443   : > { %v8979_v15 = vadd.f32 %v8978_v60, %v7181_v27  ;;  %v7183_v51 = vpop.f32.mrb[41].mxu0  ;;  %v9002_v46 = vadd.f32 %v12989_v25, %v12731_v43 }
 0x444   : > { %v8981_v62 = vadd.f32 %v8980_v14, %v7183_v51  ;;  %v7185_v48 = vpop.f32.mrb[42].mxu0  ;;  %7642 = vmatprep.mubr.bf16.mxu1 %v7305_v4 }
 0x445   : > { %v8983_v6 = vadd.f32 %v8982_v44, %v7185_v48  ;;  %v7187_v56 = vpop.f32.mrb[43].mxu0  ;;  %7643 = vmatmul.mubr.bf16.gmra.mrb[96].mxu1 %v7304_v26  ;;  %v7268_v63 = vmax.f32 %v8979_v15, 0.0  ;;  %v12990_v26 = vld [vmem:[#allocation9_spill] sm:$0xff]  ;;  %v12991_v44 = vld [vmem:[#allocation10_spill] sm:$0xff] }
 0x446   : > { %v8985_v28 = vadd.f32 %v8984_v5, %v7187_v56  ;;  %v7269_v29 = vmax.f32 %v8981_v62, 0.0  ;;  %v9004_v14 = vadd.f32 %v12990_v26, %v12735_v45  ;;  %v9006_v15 = vadd.f32 %v12991_v44, %v12731_v43  ;;  %v12992_v62 = vld [vmem:[#allocation12_spill] sm:$0xff] }
 0x447   : > { %v7270_v7 = vmax.f32 %v8983_v6, 0.0  ;;  %v9008_v48 = vadd.f32 %v12992_v62, %v12735_v45 }
 0x448   : > { %v7271_v16 = vmax.f32 %v8985_v28, 0.0 }
 0x449   : > { %v7306_v30 = vpack.c.bf16 %v7270_v7, %v7268_v63 }
 0x44a   : > { %v7307_v17 = vpack.c.bf16 %v7271_v16, %v7269_v29  ;;  %v7191_v31 = vpop.f32.mrb[44].mxu0 }
 0x44b   : > { %v8987_v18 = vadd.f32 %v8986_v54, %v7191_v31  ;;  %v7193_v35 = vpop.f32.mrb[45].mxu0 }
 0x44c   : > { %v8989_v57 = vadd.f32 %v8988_v36, %v7193_v35  ;;  %v7195_v40 = vpop.f32.mrb[46].mxu0  ;;  %7652 = vmatprep.mubr.bf16.mxu1 %v7307_v17  ;;  %v12993_v36 = vld [vmem:[#allocation13_spill] sm:$0xff] }
 0x44d   : > { %v8991_v8 = vadd.f32 %v8990_v55, %v7195_v40  ;;  %v7197_v0 = vpop.f32.mrb[47].mxu0  ;;  %7653 = vmatmul.mubr.bf16.gmra.mrb[100].mxu1 %v7306_v30  ;;  %v7272_v47 = vmax.f32 %v8987_v18, 0.0  ;;  %v9010_v17 = vadd.f32 %v12993_v36, %v12731_v43  ;;  %v9012_v55 = vadd.f32 %v12994_v37, %v12735_v45  ;;  %v7348_v43 = vld [vmem:[%s12964_s4] sm:$0x3]  ;;  %v12995_v45 = vld [vmem:[#allocation11_spill] sm:$0xff] }
 0x44e   : > { %v8993_v32 = vadd.f32 %v8992_v19, %v7197_v0  ;;  %v7273_v33 = vmax.f32 %v8989_v57, 0.0  ;;  %v12997_v1 = vsub.s32 1, %v12995_v45 }
 0x44f   : > { %v7274_v9 = vmax.f32 %v8991_v8, 0.0 }
 0x450   : > { %v7275_v58 = vmax.f32 %v8993_v32, 0.0 }
 0x451   : > { %v7308_v10 = vpack.c.bf16 %v7274_v9, %v7272_v47 }
 0x452   : > { %v7309_v50 = vpack.c.bf16 %v7275_v58, %v7273_v33  ;;  %v7201_v11 = vpop.f32.mrb[48].mxu0  ;;  %v12996_v33 = vsub.s32 0, %v12995_v45 }
 0x453   : > { %v8995_v52 = vadd.f32 %v8994_v20, %v7201_v11  ;;  %v7203_v23 = vpop.f32.mrb[49].mxu0  ;;  %v12862_v20 = vrot.slane %v7348_v43, %v12997_v1 }
 0x454   : > { %v8997_v39 = vadd.f32 %v8996_v21, %v7203_v23  ;;  %v7205_v42 = vpop.f32.mrb[50].mxu0  ;;  %7662 = vmatprep.mubr.bf16.mxu1 %v7309_v50  ;;  %v12858_v58 = vrot.slane %v7348_v43, %v12996_v33 }
 0x455   : > { %v8999_v53 = vadd.f32 %v8998_v2, %v7205_v42  ;;  %v7207_v41 = vpop.f32.mrb[51].mxu0  ;;  %7663 = vmatmul.mubr.bf16.gmra.mrb[104].mxu1 %v7308_v10  ;;  %v7276_v59 = vmax.f32 %v8995_v52, 0.0 }
 0x456   : > { %v9001_v12 = vadd.f32 %v9000_v3, %v7207_v41  ;;  %v7277_v38 = vmax.f32 %v8997_v39, 0.0 }
 0x457   : > { %v7278_v24 = vmax.f32 %v8999_v53, 0.0 }
 0x458   : > { %v7279_v13 = vmax.f32 %v9001_v12, 0.0 }
 0x459   : > { %v7310_v60 = vpack.c.bf16 %v7278_v24, %v7276_v59 }
 0x45a   : > { %v7311_v4 = vpack.c.bf16 %v7279_v13, %v7277_v38  ;;  %v7211_v27 = vpop.f32.mrb[52].mxu0 }
 0x45b   : > { %v9003_v51 = vadd.f32 %v9002_v46, %v7211_v27  ;;  %v7213_v5 = vpop.f32.mrb[53].mxu0 }
 0x45c   : > { %v9005_v6 = vadd.f32 %v9004_v14, %v7213_v5  ;;  %v7215_v56 = vpop.f32.mrb[54].mxu0  ;;  %7672 = vmatprep.mubr.bf16.mxu1 %v7311_v4 }
 0x45d   : > { %v9007_v28 = vadd.f32 %v9006_v15, %v7215_v56  ;;  %v7217_v63 = vpop.f32.mrb[55].mxu0  ;;  %7673 = vmatmul.mubr.bf16.gmra.mrb[108].mxu1 %v7310_v60  ;;  %v7280_v29 = vmax.f32 %v9003_v51, 0.0 }
 0x45e   : > { %v9009_v7 = vadd.f32 %v9008_v48, %v7217_v63  ;;  %v7281_v54 = vmax.f32 %v9005_v6, 0.0 }
 0x45f   : > { %v7282_v16 = vmax.f32 %v9007_v28, 0.0 }
 0x460   : > { %v7283_v30 = vmax.f32 %v9009_v7, 0.0 }
 0x461   : > { %v7312_v31 = vpack.c.bf16 %v7282_v16, %v7280_v29 }
 0x462   : > { %v7313_v18 = vpack.c.bf16 %v7283_v30, %v7281_v54  ;;  %v7221_v35 = vpop.f32.mrb[56].mxu0 }
 0x463   : > { %v9011_v61 = vadd.f32 %v9010_v17, %v7221_v35  ;;  %v7223_v19 = vpop.f32.mrb[57].mxu0 }
 0x464   : > { %v9013_v57 = vadd.f32 %v9012_v55, %v7223_v19  ;;  %v7225_v40 = vpop.f32.mrb[58].mxu0  ;;  %7682 = vmatprep.mubr.bf16.mxu1 %v7313_v18 }
 0x465   : > { %v7226_v8 = vpop.f32.mrb[59].mxu0  ;;  %7683 = vmatmul.mubr.bf16.gmra.mrb[112].mxu1 %v7312_v31  ;;  %v7284_v32 = vmax.f32 %v9011_v61, 0.0 }
 0x466   : > { %v7285_v0 = vmax.f32 %v9013_v57, 0.0 }
 0x467   : > { %v7314_v9 = vpack.c.bf16 %v7284_v32, %v7284_v32 }
 0x468   : > { %v7315_v47 = vpack.c.bf16 %v7285_v0, %v7285_v0 }
 0x46a   : > { %7692 = vmatprep.mubr.bf16.mxu1 %v7315_v47 }
 0x46d   : > { %7693 = vmatmul.mubr.bf16.gmra.mrb[116].mxu1 %v7314_v9 }
 0x4d0   : > { %v7554_v10 = vpop.f32.mrb[60].mxu1 }
 0x4d1   : > { %v7555_v49 = vadd.f32 %v7554_v10, %v12858_v58  ;;  %v7556_v21 = vpop.f32.mrb[61].mxu1 }
 0x4d2   : > { %v7557_v50 = vadd.f32 %v7556_v21, %v12862_v20  ;;  %v7558_v11 = vpop.f32.mrb[62].mxu1 }
 0x4d3   : > { %v7701_v22 = vmax.f32 %v7555_v49, 0.0  ;;  %v7559_v2 = vadd.f32 %v7558_v11, %v12858_v58  ;;  %v7560_v52 = vpop.f32.mrb[63].mxu1 }
 0x4d4   : > { %v7702_v23 = vmax.f32 %v7557_v50, 0.0  ;;  %v7561_v34 = vadd.f32 %v7560_v52, %v12862_v20 }
 0x4d5   : > { %v7703_v3 = vmax.f32 %v7559_v2, 0.0 }
 0x4d6   : > { %v8869_v39 = vpack.c.bf16 %v7702_v23, %v7701_v22  ;;  %v7704_v42 = vmax.f32 %v7561_v34, 0.0 }
 0x4d8   : > { %7935 = vst [vmem:[%s12872_s8] sm:$0xff] %v8869_v39  ;;  %v8870_v53 = vpack.c.bf16 %v7704_v42, %v7703_v3  ;;  %v7564_v41 = vpop.f32.mrb[64].mxu1 }
 0x4d9   : > { %v7565_v12 = vadd.f32 %v7564_v41, %v12858_v58  ;;  %v7566_v59 = vpop.f32.mrb[65].mxu1 }
 0x4da   : > { %7936 = vst [vmem:[%s12872_s8 + $0x8] sm:$0xff] %v8870_v53  ;;  %v7567_v24 = vadd.f32 %v7566_v59, %v12862_v20  ;;  %v7568_v38 = vpop.f32.mrb[66].mxu1 }
 0x4db   : > { %v7705_v13 = vmax.f32 %v7565_v12, 0.0  ;;  %v7569_v25 = vadd.f32 %v7568_v38, %v12858_v58  ;;  %v7570_v46 = vpop.f32.mrb[67].mxu1 }
 0x4dc   : > { %v7706_v60 = vmax.f32 %v7567_v24, 0.0  ;;  %v7571_v26 = vadd.f32 %v7570_v46, %v12862_v20 }
 0x4dd   : > { %v7707_v14 = vmax.f32 %v7569_v25, 0.0 }
 0x4de   : > { %v8871_v4 = vpack.c.bf16 %v7706_v60, %v7705_v13  ;;  %v7708_v27 = vmax.f32 %v7571_v26, 0.0 }
 0x4e0   : > { %7937 = vst [vmem:[%s12872_s8 + $0x10] sm:$0xff] %v8871_v4  ;;  %v8872_v44 = vpack.c.bf16 %v7708_v27, %v7707_v14  ;;  %v7574_v15 = vpop.f32.mrb[68].mxu1 }
 0x4e1   : > { %v7575_v51 = vadd.f32 %v7574_v15, %v12858_v58  ;;  %v7576_v5 = vpop.f32.mrb[69].mxu1 }
 0x4e2   : > { %7938 = vst [vmem:[%s12872_s8 + $0x18] sm:$0xff] %v8872_v44  ;;  %v7577_v62 = vadd.f32 %v7576_v5, %v12862_v20  ;;  %v7578_v48 = vpop.f32.mrb[70].mxu1 }
 0x4e3   : > { %v7709_v6 = vmax.f32 %v7575_v51, 0.0  ;;  %v7579_v56 = vadd.f32 %v7578_v48, %v12858_v58  ;;  %v7580_v28 = vpop.f32.mrb[71].mxu1 }
 0x4e4   : > { %v7710_v63 = vmax.f32 %v7577_v62, 0.0  ;;  %v7581_v7 = vadd.f32 %v7580_v28, %v12862_v20 }
 0x4e5   : > { %v7711_v29 = vmax.f32 %v7579_v56, 0.0 }
 0x4e6   : > { %v8873_v16 = vpack.c.bf16 %v7710_v63, %v7709_v6  ;;  %v7712_v54 = vmax.f32 %v7581_v7, 0.0 }
 0x4e8   : > { %7939 = vst [vmem:[%s12872_s8 + $0x20] sm:$0xff] %v8873_v16  ;;  %v8874_v30 = vpack.c.bf16 %v7712_v54, %v7711_v29  ;;  %v7584_v36 = vpop.f32.mrb[72].mxu1 }
 0x4e9   : > { %v7585_v17 = vadd.f32 %v7584_v36, %v12858_v58  ;;  %v7586_v31 = vpop.f32.mrb[73].mxu1 }
 0x4ea   : > { %7940 = vst [vmem:[%s12872_s8 + $0x28] sm:$0xff] %v8874_v30  ;;  %v7587_v37 = vadd.f32 %v7586_v31, %v12862_v20  ;;  %v7588_v55 = vpop.f32.mrb[74].mxu1 }
 0x4eb   : > { %v7713_v18 = vmax.f32 %v7585_v17, 0.0  ;;  %v7589_v35 = vadd.f32 %v7588_v55, %v12858_v58  ;;  %v7590_v61 = vpop.f32.mrb[75].mxu1 }
 0x4ec   : > { %v7714_v19 = vmax.f32 %v7587_v37, 0.0  ;;  %v7591_v57 = vadd.f32 %v7590_v61, %v12862_v20 }
 0x4ed   : > { %v7715_v40 = vmax.f32 %v7589_v35, 0.0 }
 0x4ee   : > { %v8875_v8 = vpack.c.bf16 %v7714_v19, %v7713_v18  ;;  %v7716_v0 = vmax.f32 %v7591_v57, 0.0 }
 0x4f0   : > { %7941 = vst [vmem:[%s12872_s8 + $0x30] sm:$0xff] %v8875_v8  ;;  %v8876_v32 = vpack.c.bf16 %v7716_v0, %v7715_v40  ;;  %v7594_v47 = vpop.f32.mrb[76].mxu1 }
 0x4f1   : > { %v7595_v9 = vadd.f32 %v7594_v47, %v12858_v58  ;;  %v7596_v43 = vpop.f32.mrb[77].mxu1 }
 0x4f2   : > { %7942 = vst [vmem:[%s12872_s8 + $0x38] sm:$0xff] %v8876_v32  ;;  %v7597_v45 = vadd.f32 %v7596_v43, %v12862_v20  ;;  %v7598_v33 = vpop.f32.mrb[78].mxu1 }
 0x4f3   : > { %v7717_v1 = vmax.f32 %v7595_v9, 0.0  ;;  %v7599_v10 = vadd.f32 %v7598_v33, %v12858_v58  ;;  %v7600_v49 = vpop.f32.mrb[79].mxu1 }
 0x4f4   : > { %v7718_v21 = vmax.f32 %v7597_v45, 0.0  ;;  %v7601_v50 = vadd.f32 %v7600_v49, %v12862_v20 }
 0x4f5   : > { %v7719_v11 = vmax.f32 %v7599_v10, 0.0 }
 0x4f6   : > { %v8877_v22 = vpack.c.bf16 %v7718_v21, %v7717_v1  ;;  %v7720_v2 = vmax.f32 %v7601_v50, 0.0 }
 0x4f8   : > { %7943 = vst [vmem:[%s12872_s8 + $0x40] sm:$0xff] %v8877_v22  ;;  %v8878_v52 = vpack.c.bf16 %v7720_v2, %v7719_v11  ;;  %v7604_v23 = vpop.f32.mrb[80].mxu1 }
 0x4f9   : > { %v7605_v34 = vadd.f32 %v7604_v23, %v12858_v58  ;;  %v7606_v3 = vpop.f32.mrb[81].mxu1 }
 0x4fa   : > { %7944 = vst [vmem:[%s12872_s8 + $0x48] sm:$0xff] %v8878_v52  ;;  %v7607_v39 = vadd.f32 %v7606_v3, %v12862_v20  ;;  %v7608_v42 = vpop.f32.mrb[82].mxu1 }
 0x4fb   : > { %v7721_v53 = vmax.f32 %v7605_v34, 0.0  ;;  %v7609_v41 = vadd.f32 %v7608_v42, %v12858_v58  ;;  %v7610_v12 = vpop.f32.mrb[83].mxu1 }
 0x4fc   : > { %v7722_v59 = vmax.f32 %v7607_v39, 0.0  ;;  %v7611_v24 = vadd.f32 %v7610_v12, %v12862_v20 }
 0x4fd   : > { %v7723_v38 = vmax.f32 %v7609_v41, 0.0 }
 0x4fe   : > { %v8879_v13 = vpack.c.bf16 %v7722_v59, %v7721_v53  ;;  %v7724_v25 = vmax.f32 %v7611_v24, 0.0 }
 0x500   : > { %7945 = vst [vmem:[%s12872_s8 + $0x50] sm:$0xff] %v8879_v13  ;;  %v8880_v46 = vpack.c.bf16 %v7724_v25, %v7723_v38  ;;  %v7614_v60 = vpop.f32.mrb[84].mxu1 }
 0x501   : > { %v7615_v26 = vadd.f32 %v7614_v60, %v12858_v58  ;;  %v7616_v14 = vpop.f32.mrb[85].mxu1 }
 0x502   : > { %7946 = vst [vmem:[%s12872_s8 + $0x58] sm:$0xff] %v8880_v46  ;;  %v7617_v4 = vadd.f32 %v7616_v14, %v12862_v20  ;;  %v7618_v27 = vpop.f32.mrb[86].mxu1 }
 0x503   : > { %v7725_v44 = vmax.f32 %v7615_v26, 0.0  ;;  %v7619_v15 = vadd.f32 %v7618_v27, %v12858_v58  ;;  %v7620_v51 = vpop.f32.mrb[87].mxu1 }
 0x504   : > { %v7726_v5 = vmax.f32 %v7617_v4, 0.0  ;;  %v7621_v62 = vadd.f32 %v7620_v51, %v12862_v20 }
 0x505   : > { %v7727_v48 = vmax.f32 %v7619_v15, 0.0 }
 0x506   : > { %v8881_v6 = vpack.c.bf16 %v7726_v5, %v7725_v44  ;;  %v7728_v56 = vmax.f32 %v7621_v62, 0.0 }
 0x508   : > { %7947 = vst [vmem:[%s12872_s8 + $0x60] sm:$0xff] %v8881_v6  ;;  %v8882_v28 = vpack.c.bf16 %v7728_v56, %v7727_v48  ;;  %v7624_v63 = vpop.f32.mrb[88].mxu1 }
 0x509   : > { %v7625_v7 = vadd.f32 %v7624_v63, %v12858_v58  ;;  %v7626_v29 = vpop.f32.mrb[89].mxu1 }
 0x50a   : > { %7948 = vst [vmem:[%s12872_s8 + $0x68] sm:$0xff] %v8882_v28  ;;  %v7627_v16 = vadd.f32 %v7626_v29, %v12862_v20  ;;  %v7628_v54 = vpop.f32.mrb[90].mxu1 }
 0x50b   : > { %v7729_v30 = vmax.f32 %v7625_v7, 0.0  ;;  %v7629_v36 = vadd.f32 %v7628_v54, %v12858_v58  ;;  %v7630_v17 = vpop.f32.mrb[91].mxu1 }
 0x50c   : > { %v7730_v31 = vmax.f32 %v7627_v16, 0.0  ;;  %v7631_v37 = vadd.f32 %v7630_v17, %v12862_v20 }
 0x50d   : > { %v7731_v55 = vmax.f32 %v7629_v36, 0.0 }
 0x50e   : > { %v8883_v18 = vpack.c.bf16 %v7730_v31, %v7729_v30  ;;  %v7732_v35 = vmax.f32 %v7631_v37, 0.0 }
 0x510   : > { %7949 = vst [vmem:[%s12872_s8 + $0x70] sm:$0xff] %v8883_v18  ;;  %v8884_v61 = vpack.c.bf16 %v7732_v35, %v7731_v55  ;;  %v7634_v19 = vpop.f32.mrb[92].mxu1 }
 0x511   : > { %v7635_v57 = vadd.f32 %v7634_v19, %v12858_v58  ;;  %v7636_v40 = vpop.f32.mrb[93].mxu1 }
 0x512   : > { %7950 = vst [vmem:[%s12872_s8 + $0x78] sm:$0xff] %v8884_v61  ;;  %v7637_v8 = vadd.f32 %v7636_v40, %v12862_v20  ;;  %v7638_v0 = vpop.f32.mrb[94].mxu1 }
 0x513   : > { %v7733_v32 = vmax.f32 %v7635_v57, 0.0  ;;  %v7639_v47 = vadd.f32 %v7638_v0, %v12858_v58  ;;  %v7640_v9 = vpop.f32.mrb[95].mxu1 }
 0x514   : > { %v7734_v43 = vmax.f32 %v7637_v8, 0.0  ;;  %v7641_v45 = vadd.f32 %v7640_v9, %v12862_v20 }
 0x515   : > { %v7735_v33 = vmax.f32 %v7639_v47, 0.0 }
 0x516   : > { %v8885_v1 = vpack.c.bf16 %v7734_v43, %v7733_v32  ;;  %v7736_v10 = vmax.f32 %v7641_v45, 0.0 }
 0x518   : > { %7951 = vst [vmem:[%s12872_s8 + $0x80] sm:$0xff] %v8885_v1  ;;  %v8886_v49 = vpack.c.bf16 %v7736_v10, %v7735_v33  ;;  %v7644_v21 = vpop.f32.mrb[96].mxu1 }
 0x519   : > { %v7645_v50 = vadd.f32 %v7644_v21, %v12858_v58  ;;  %v7646_v11 = vpop.f32.mrb[97].mxu1 }
 0x51a   : > { %7952 = vst [vmem:[%s12872_s8 + $0x88] sm:$0xff] %v8886_v49  ;;  %v7647_v22 = vadd.f32 %v7646_v11, %v12862_v20  ;;  %v7648_v2 = vpop.f32.mrb[98].mxu1 }
 0x51b   : > { %v7737_v52 = vmax.f32 %v7645_v50, 0.0  ;;  %v7649_v23 = vadd.f32 %v7648_v2, %v12858_v58  ;;  %v7650_v34 = vpop.f32.mrb[99].mxu1 }
 0x51c   : > { %v7738_v3 = vmax.f32 %v7647_v22, 0.0  ;;  %v7651_v39 = vadd.f32 %v7650_v34, %v12862_v20 }
 0x51d   : > { %v7739_v42 = vmax.f32 %v7649_v23, 0.0 }
 0x51e   : > { %v8887_v53 = vpack.c.bf16 %v7738_v3, %v7737_v52  ;;  %v7740_v41 = vmax.f32 %v7651_v39, 0.0 }
 0x520   : > { %7953 = vst [vmem:[%s12872_s8 + $0x90] sm:$0xff] %v8887_v53  ;;  %v8888_v12 = vpack.c.bf16 %v7740_v41, %v7739_v42  ;;  %v7654_v59 = vpop.f32.mrb[100].mxu1 }
 0x521   : > { %v7655_v24 = vadd.f32 %v7654_v59, %v12858_v58  ;;  %v7656_v38 = vpop.f32.mrb[101].mxu1 }
 0x522   : > { %7954 = vst [vmem:[%s12872_s8 + $0x98] sm:$0xff] %v8888_v12  ;;  %v7657_v13 = vadd.f32 %v7656_v38, %v12862_v20  ;;  %v7658_v25 = vpop.f32.mrb[102].mxu1 }
 0x523   : > { %v7741_v46 = vmax.f32 %v7655_v24, 0.0  ;;  %v7659_v60 = vadd.f32 %v7658_v25, %v12858_v58  ;;  %v7660_v26 = vpop.f32.mrb[103].mxu1 }
 0x524   : > { %v7742_v14 = vmax.f32 %v7657_v13, 0.0  ;;  %v7661_v4 = vadd.f32 %v7660_v26, %v12862_v20 }
 0x525   : > { %v7743_v27 = vmax.f32 %v7659_v60, 0.0 }
 0x526   : > { %v8889_v44 = vpack.c.bf16 %v7742_v14, %v7741_v46  ;;  %v7744_v15 = vmax.f32 %v7661_v4, 0.0 }
 0x528   : > { %7955 = vst [vmem:[%s12872_s8 + $0xa0] sm:$0xff] %v8889_v44  ;;  %v8890_v51 = vpack.c.bf16 %v7744_v15, %v7743_v27  ;;  %v7664_v5 = vpop.f32.mrb[104].mxu1 }
 0x529   : > { %v7665_v62 = vadd.f32 %v7664_v5, %v12858_v58  ;;  %v7666_v48 = vpop.f32.mrb[105].mxu1 }
 0x52a   : > { %7956 = vst [vmem:[%s12872_s8 + $0xa8] sm:$0xff] %v8890_v51  ;;  %v7667_v6 = vadd.f32 %v7666_v48, %v12862_v20  ;;  %v7668_v56 = vpop.f32.mrb[106].mxu1 }
 0x52b   : > { %v7745_v28 = vmax.f32 %v7665_v62, 0.0  ;;  %v7669_v63 = vadd.f32 %v7668_v56, %v12858_v58  ;;  %v7670_v7 = vpop.f32.mrb[107].mxu1 }
 0x52c   : > { %v7746_v29 = vmax.f32 %v7667_v6, 0.0  ;;  %v7671_v16 = vadd.f32 %v7670_v7, %v12862_v20 }
 0x52d   : > { %v7747_v54 = vmax.f32 %v7669_v63, 0.0 }
 0x52e   : > { %v8891_v30 = vpack.c.bf16 %v7746_v29, %v7745_v28  ;;  %v7748_v36 = vmax.f32 %v7671_v16, 0.0 }
 0x530   : > { %7957 = vst [vmem:[%s12872_s8 + $0xb0] sm:$0xff] %v8891_v30  ;;  %v8892_v17 = vpack.c.bf16 %v7748_v36, %v7747_v54  ;;  %v7674_v31 = vpop.f32.mrb[108].mxu1 }
 0x531   : > { %v7675_v37 = vadd.f32 %v7674_v31, %v12858_v58  ;;  %v7676_v55 = vpop.f32.mrb[109].mxu1 }
 0x532   : > { %7958 = vst [vmem:[%s12872_s8 + $0xb8] sm:$0xff] %v8892_v17  ;;  %v7677_v18 = vadd.f32 %v7676_v55, %v12862_v20  ;;  %v7678_v35 = vpop.f32.mrb[110].mxu1 }
 0x533   : > { %v7749_v61 = vmax.f32 %v7675_v37, 0.0  ;;  %v7679_v19 = vadd.f32 %v7678_v35, %v12858_v58  ;;  %v7680_v57 = vpop.f32.mrb[111].mxu1 }
 0x534   : > { %v7750_v40 = vmax.f32 %v7677_v18, 0.0  ;;  %v7681_v8 = vadd.f32 %v7680_v57, %v12862_v20 }
 0x535   : > { %v7751_v0 = vmax.f32 %v7679_v19, 0.0 }
 0x536   : > { %v8893_v32 = vpack.c.bf16 %v7750_v40, %v7749_v61  ;;  %v7752_v47 = vmax.f32 %v7681_v8, 0.0 }
 0x538   : > { %7959 = vst [vmem:[%s12872_s8 + $0xc0] sm:$0xff] %v8893_v32  ;;  %v8894_v9 = vpack.c.bf16 %v7752_v47, %v7751_v0  ;;  %v7684_v43 = vpop.f32.mrb[112].mxu1 }
 0x539   : > { %v7685_v45 = vadd.f32 %v7684_v43, %v12858_v58  ;;  %v7686_v33 = vpop.f32.mrb[113].mxu1 }
 0x53a   : > { %7960 = vst [vmem:[%s12872_s8 + $0xc8] sm:$0xff] %v8894_v9  ;;  %v7687_v1 = vadd.f32 %v7686_v33, %v12862_v20  ;;  %v7688_v10 = vpop.f32.mrb[114].mxu1 }
 0x53b   : > { %v7753_v49 = vmax.f32 %v7685_v45, 0.0  ;;  %v7689_v21 = vadd.f32 %v7688_v10, %v12858_v58  ;;  %v7690_v50 = vpop.f32.mrb[115].mxu1 }
 0x53c   : > { %v7754_v11 = vmax.f32 %v7687_v1, 0.0  ;;  %v7691_v22 = vadd.f32 %v7690_v50, %v12862_v20 }
 0x53d   : > { %v7755_v2 = vmax.f32 %v7689_v21, 0.0 }
 0x53e   : > { %v8895_v52 = vpack.c.bf16 %v7754_v11, %v7753_v49  ;;  %v7756_v23 = vmax.f32 %v7691_v22, 0.0 }
 0x540   : > { %7961 = vst [vmem:[%s12872_s8 + $0xd0] sm:$0xff] %v8895_v52  ;;  %v8896_v34 = vpack.c.bf16 %v7756_v23, %v7755_v2  ;;  %v7694_v3 = vpop.f32.mrb[116].mxu1 }
 0x541   : > { %v7695_v39 = vadd.f32 %v7694_v3, %v12858_v58  ;;  %v7696_v42 = vpop.f32.mrb[117].mxu1 }
 0x542   : > { %7962 = vst [vmem:[%s12872_s8 + $0xd8] sm:$0xff] %v8896_v34  ;;  %v7697_v53 = vadd.f32 %v7696_v42, %v12862_v20  ;;  %v7698_v41 = vpop.f32.mrb[118].mxu1 }
 0x543   : > { %v7757_v12 = vmax.f32 %v7695_v39, 0.0  ;;  %v7699_v59 = vpop.f32.mrb[119].mxu1 }
 0x544   : > { %v7758_v24 = vmax.f32 %v7697_v53, 0.0 }
 0x546   : > { %v8897_v38 = vpack.c.bf16 %v7758_v24, %v7757_v12 }
 0x548   : > { %7963 = vst [vmem:[%s12872_s8 + $0xe0] sm:$0xff] %v8897_v38 }
 0x549 PF: > { %s15_s18 = sadd.s32 1, %s10881_s18  }
 0x54a   : > { %p12_p4 = scmp.ge.s32.totalorder %s15_s18, 4  }
 0x54c   :  { %14 = sbr.rel (!%p12_p4) target bundleno = 1 (0x1), region = 70 }

// kernel: all_cnn_b_forward.8
= control target key start
LH: loop header
LB: loop body
LE: loop exit
PB: predicated region body
PF: predicated region fallthrough
CT: control target
= control target key end

     0   :  { %s6325_s1 = inlined_call_operand.vmem [shape: bf16[2304,256], index: 1, kind: input, shape index: {}]   ;;  %s6326_s0 = inlined_call_operand.vmem [shape: bf16[112,2304], index: 0, kind: input, shape index: {}]   ;;  %s6327_s2 = inlined_call_operand.vmem [shape: f32[1,256], index: 2, kind: input, shape index: {}]   ;;  %s6328_s3 = inlined_call_operand.vmem [shape: bf16[112,256], index: 3, kind: output, shape index: {}]  }
   0x1   :  { %v4293_v0 = vld [vmem:[%s6325_s1 + $0x4] ss:$8 sps:$4 sm:$0xff]   ;;  %v4297_v2 = vld [vmem:[%s6325_s1] ss:$8 sps:$4 sm:$0xff]   ;;  %v4299_v4 = vld [vmem:[%s6325_s1 + $0x14] ss:$8 sps:$4 sm:$0xff]  }
   0x2   :  { %v4295_v1 = vld [vmem:[%s6325_s1 + $0x404] ss:$8 sps:$4 sm:$0xff]   ;;  %2510 = vmatprep.subr.bf16.mxu1 %v4293_v0  ;;  %v4298_v3 = vld [vmem:[%s6325_s1 + $0x400] ss:$8 sps:$4 sm:$0xff]   ;;  %v4301_v5 = vld [vmem:[%s6325_s1 + $0x414] ss:$8 sps:$4 sm:$0xff]  }
   0x3   :  { %2922 = vmatprep.subr.bf16.mxu0 %v4295_v1  ;;  %2511 = vmatpush1.bf16.msra.mxu1 %v4297_v2  ;;  %v4303_v6 = vld [vmem:[%s6325_s1 + $0x10] ss:$8 sps:$4 sm:$0xff]   ;;  %v4305_v8 = vld [vmem:[%s6325_s1 + $0x24] ss:$8 sps:$4 sm:$0xff]   ;;  %v4309_v10 = vld [vmem:[%s6325_s1 + $0x20] ss:$8 sps:$4 sm:$0xff]  }
   0x4   :  { %2923 = vmatpush1.bf16.msra.mxu0 %v4298_v3  ;;  %2512 = vmatprep.subr.bf16.mxu1 %v4299_v4  ;;  %v4304_v7 = vld [vmem:[%s6325_s1 + $0x410] ss:$8 sps:$4 sm:$0xff]   ;;  %v4307_v9 = vld [vmem:[%s6325_s1 + $0x424] ss:$8 sps:$4 sm:$0xff]   ;;  %v4310_v11 = vld [vmem:[%s6325_s1 + $0x420] ss:$8 sps:$4 sm:$0xff]  }
   0x5   :  { %2924 = vmatprep.subr.bf16.mxu0 %v4301_v5  ;;  %v4311_v12 = vld [vmem:[%s6325_s1 + $0x34] ss:$8 sps:$4 sm:$0xff]   ;;  %v4315_v14 = vld [vmem:[%s6325_s1 + $0x30] ss:$8 sps:$4 sm:$0xff]   ;;  %v4317_v16 = vld [vmem:[%s6325_s1 + $0x44] ss:$8 sps:$4 sm:$0xff]  }
   0x6   :  { %v4313_v13 = vld [vmem:[%s6325_s1 + $0x434] ss:$8 sps:$4 sm:$0xff]   ;;  %v4316_v15 = vld [vmem:[%s6325_s1 + $0x430] ss:$8 sps:$4 sm:$0xff]   ;;  %v4319_v17 = vld [vmem:[%s6325_s1 + $0x444] ss:$8 sps:$4 sm:$0xff]  }
   0x7   :  { %2513 = vmatpush1.bf16.msra.mxu1 %v4303_v6  ;;  %v4321_v18 = vld [vmem:[%s6325_s1 + $0x40] ss:$8 sps:$4 sm:$0xff]   ;;  %v4323_v20 = vld [vmem:[%s6325_s1 + $0x54] ss:$8 sps:$4 sm:$0xff]   ;;  %v4327_v22 = vld [vmem:[%s6325_s1 + $0x50] ss:$8 sps:$4 sm:$0xff]  }
   0x8   :  { %2925 = vmatpush1.bf16.msra.mxu0 %v4304_v7  ;;  %2514 = vmatprep.subr.bf16.mxu1 %v4305_v8  ;;  %v4322_v19 = vld [vmem:[%s6325_s1 + $0x440] ss:$8 sps:$4 sm:$0xff]   ;;  %v4325_v21 = vld [vmem:[%s6325_s1 + $0x454] ss:$8 sps:$4 sm:$0xff]   ;;  %v4328_v23 = vld [vmem:[%s6325_s1 + $0x450] ss:$8 sps:$4 sm:$0xff]  }
   0x9   :  { %2926 = vmatprep.subr.bf16.mxu0 %v4307_v9  ;;  %v4329_v24 = vld [vmem:[%s6325_s1 + $0x64] ss:$8 sps:$4 sm:$0xff]   ;;  %v4333_v26 = vld [vmem:[%s6325_s1 + $0x60] ss:$8 sps:$4 sm:$0xff]   ;;  %v4335_v28 = vld [vmem:[%s6325_s1 + $0x74] ss:$8 sps:$4 sm:$0xff]  }
   0xa   :  { %v4331_v25 = vld [vmem:[%s6325_s1 + $0x464] ss:$8 sps:$4 sm:$0xff]   ;;  %v4334_v27 = vld [vmem:[%s6325_s1 + $0x460] ss:$8 sps:$4 sm:$0xff]   ;;  %v4337_v29 = vld [vmem:[%s6325_s1 + $0x474] ss:$8 sps:$4 sm:$0xff]  }
   0xb   :  { %2515 = vmatpush1.bf16.msra.mxu1 %v4309_v10  ;;  %v4339_v30 = vld [vmem:[%s6325_s1 + $0x70] ss:$8 sps:$4 sm:$0xff]   ;;  %v4341_v32 = vld [vmem:[%s6325_s1 + $0x84] ss:$8 sps:$4 sm:$0xff]   ;;  %v4345_v34 = vld [vmem:[%s6325_s1 + $0x80] ss:$8 sps:$4 sm:$0xff]  }
   0xc   :  { %2927 = vmatpush1.bf16.msra.mxu0 %v4310_v11  ;;  %2516 = vmatprep.subr.bf16.mxu1 %v4311_v12  ;;  %v4340_v31 = vld [vmem:[%s6325_s1 + $0x470] ss:$8 sps:$4 sm:$0xff]   ;;  %v4343_v33 = vld [vmem:[%s6325_s1 + $0x484] ss:$8 sps:$4 sm:$0xff]   ;;  %v4346_v35 = vld [vmem:[%s6325_s1 + $0x480] ss:$8 sps:$4 sm:$0xff]  }
   0xd   :  { %2928 = vmatprep.subr.bf16.mxu0 %v4313_v13  ;;  %v4347_v36 = vld [vmem:[%s6325_s1 + $0x94] ss:$8 sps:$4 sm:$0xff]   ;;  %v4351_v38 = vld [vmem:[%s6325_s1 + $0x90] ss:$8 sps:$4 sm:$0xff]   ;;  %v4353_v40 = vld [vmem:[%s6325_s1 + $0xa4] ss:$8 sps:$4 sm:$0xff]  }
   0xe   :  { %v4349_v37 = vld [vmem:[%s6325_s1 + $0x494] ss:$8 sps:$4 sm:$0xff]   ;;  %v4352_v39 = vld [vmem:[%s6325_s1 + $0x490] ss:$8 sps:$4 sm:$0xff]   ;;  %v4355_v41 = vld [vmem:[%s6325_s1 + $0x4a4] ss:$8 sps:$4 sm:$0xff]  }
   0xf   :  { %2517 = vmatpush1.bf16.msra.mxu1 %v4315_v14  ;;  %v4357_v42 = vld [vmem:[%s6325_s1 + $0xa0] ss:$8 sps:$4 sm:$0xff]   ;;  %v4359_v44 = vld [vmem:[%s6325_s1 + $0xb4] ss:$8 sps:$4 sm:$0xff]   ;;  %v4363_v46 = vld [vmem:[%s6325_s1 + $0xb0] ss:$8 sps:$4 sm:$0xff]  }
  0x10   :  { %2929 = vmatpush1.bf16.msra.mxu0 %v4316_v15  ;;  %2518 = vmatprep.subr.bf16.mxu1 %v4317_v16  ;;  %v4358_v43 = vld [vmem:[%s6325_s1 + $0x4a0] ss:$8 sps:$4 sm:$0xff]   ;;  %v4361_v45 = vld [vmem:[%s6325_s1 + $0x4b4] ss:$8 sps:$4 sm:$0xff]   ;;  %v4364_v47 = vld [vmem:[%s6325_s1 + $0x4b0] ss:$8 sps:$4 sm:$0xff]  }
  0x11   :  { %2930 = vmatprep.subr.bf16.mxu0 %v4319_v17  ;;  %v4391_v48 = vld [vmem:[%s6326_s0 + $0x4] ss:$72 sps:$4 sm:$0xff]   ;;  %v4369_v52 = vld [vmem:[%s6325_s1 + $0xc0] ss:$8 sps:$4 sm:$0xff]   ;;  %v4371_v54 = vld [vmem:[%s6325_s1 + $0xd4] ss:$8 sps:$4 sm:$0xff]  }
  0x12   :  { %v4365_v49 = vld [vmem:[%s6325_s1 + $0xc4] ss:$8 sps:$4 sm:$0xff]   ;;  %2542 = vmatprep.mubr.bf16.mxu1 %v4391_v48  ;;  %v4370_v53 = vld [vmem:[%s6325_s1 + $0x4c0] ss:$8 sps:$4 sm:$0xff]   ;;  %v4373_v55 = vld [vmem:[%s6325_s1 + $0x4d4] ss:$8 sps:$4 sm:$0xff]  }
  0x13   :  { %2519 = vmatpush1.bf16.msra.mxu1 %v4321_v18  ;;  %v4367_v50 = vld [vmem:[%s6325_s1 + $0x4c4] ss:$8 sps:$4 sm:$0xff]   ;;  %v4375_v56 = vld [vmem:[%s6325_s1 + $0xd0] ss:$8 sps:$4 sm:$0xff]   ;;  %v4381_v60 = vld [vmem:[%s6325_s1 + $0xe0] ss:$8 sps:$4 sm:$0xff]  }
  0x14   :  { %2931 = vmatpush1.bf16.msra.mxu0 %v4322_v19  ;;  %2520 = vmatprep.subr.bf16.mxu1 %v4323_v20  ;;  %v4397_v51 = vld [vmem:[%s6326_s0 + $0x24] ss:$72 sps:$4 sm:$0xff]   ;;  %v4376_v57 = vld [vmem:[%s6325_s1 + $0x4d0] ss:$8 sps:$4 sm:$0xff]   ;;  %v4382_v61 = vld [vmem:[%s6325_s1 + $0x4e0] ss:$8 sps:$4 sm:$0xff]  }
  0x15   :  { %2932 = vmatprep.subr.bf16.mxu0 %v4325_v21  ;;  %2954 = vmatprep.mubr.bf16.mxu0 %v4397_v51  ;;  %v4377_v58 = vld [vmem:[%s6325_s1 + $0xe4] ss:$8 sps:$4 sm:$0xff]   ;;  %v4383_v62 = vld [vmem:[%s6325_s1 + $0xf4] ss:$8 sps:$4 sm:$0xff]   ;;  %v4387_v0 = vld [vmem:[%s6325_s1 + $0xf0] ss:$8 sps:$4 sm:$0xff]  }
  0x16   :  { %v4379_v59 = vld [vmem:[%s6325_s1 + $0x4e4] ss:$8 sps:$4 sm:$0xff]   ;;  %v4385_v63 = vld [vmem:[%s6325_s1 + $0x4f4] ss:$8 sps:$4 sm:$0xff]   ;;  %v4388_v1 = vld [vmem:[%s6325_s1 + $0x4f0] ss:$8 sps:$4 sm:$0xff]  }
  0x17   :  { %2521 = vmatpush1.bf16.msra.mxu1 %v4327_v22  ;;  %v4394_v2 = vld [vmem:[%s6325_s1 + $0x104] ss:$8 sps:$4 sm:$0xff]   ;;  %v4389_v3 = vld [vmem:[%s6326_s0] ss:$72 sps:$4 sm:$0xff]   ;;  %v4403_v8 = vld [vmem:[%s6325_s1 + $0x114] ss:$8 sps:$4 sm:$0xff]  }
  0x18   :  { %2933 = vmatpush1.bf16.msra.mxu0 %v4328_v23  ;;  %2522 = vmatprep.subr.bf16.mxu1 %v4329_v24  ;;  %v4400_v4 = vld [vmem:[%s6325_s1 + $0x504] ss:$8 sps:$4 sm:$0xff]   ;;  %v4392_v5 = vld [vmem:[%s6325_s1 + $0x100] ss:$8 sps:$4 sm:$0xff]   ;;  %v4406_v9 = vld [vmem:[%s6325_s1 + $0x514] ss:$8 sps:$4 sm:$0xff]  }
  0x19   :  { %2934 = vmatprep.subr.bf16.mxu0 %v4331_v25  ;;  %v4395_v6 = vld [vmem:[%s6326_s0 + $0x20] ss:$72 sps:$4 sm:$0xff]   ;;  %v4419_v10 = vld [vmem:[%s6326_s0 + $0x94] ss:$72 sps:$4 sm:$0xff]   ;;  %v4401_v12 = vld [vmem:[%s6325_s1 + $0x110] ss:$8 sps:$4 sm:$0xff]  }
  0x1a   :  { %v4398_v7 = vld [vmem:[%s6325_s1 + $0x500] ss:$8 sps:$4 sm:$0xff]   ;;  %v4424_v11 = vld [vmem:[%s6326_s0 + $0xb4] ss:$72 sps:$4 sm:$0xff]   ;;  %v4404_v13 = vld [vmem:[%s6325_s1 + $0x510] ss:$8 sps:$4 sm:$0xff]  }
  0x1b   :  { %2523 = vmatpush1.bf16.msra.mxu1 %v4333_v26  ;;  %v4409_v14 = vld [vmem:[%s6325_s1 + $0x124] ss:$8 sps:$4 sm:$0xff]   ;;  %v4407_v16 = vld [vmem:[%s6325_s1 + $0x120] ss:$8 sps:$4 sm:$0xff]   ;;  %v4415_v18 = vld [vmem:[%s6325_s1 + $0x134] ss:$8 sps:$4 sm:$0xff]  }
  0x1c   :  { %2935 = vmatpush1.bf16.msra.mxu0 %v4334_v27  ;;  %2524 = vmatprep.subr.bf16.mxu1 %v4335_v28  ;;  %v4412_v15 = vld [vmem:[%s6325_s1 + $0x524] ss:$8 sps:$4 sm:$0xff]   ;;  %v4410_v17 = vld [vmem:[%s6325_s1 + $0x520] ss:$8 sps:$4 sm:$0xff]   ;;  %v4429_v19 = vld [vmem:[%s6326_s0 + $0x90] ss:$72 sps:$4 sm:$0xff]  }
  0x1d   :  { %2936 = vmatprep.subr.bf16.mxu0 %v4337_v29  ;;  %v4430_v20 = vld [vmem:[%s6326_s0 + $0xb0] ss:$72 sps:$4 sm:$0xff]   ;;  %v4418_v21 = vld [vmem:[%s6325_s1 + $0x534] ss:$8 sps:$4 sm:$0xff]   ;;  %v4437_v22 = vld [vmem:[%s6326_s0 + $0x124] ss:$72 sps:$4 sm:$0xff]  }
  0x1e   :  { %v4442_v23 = vld [vmem:[%s6326_s0 + $0x144] ss:$72 sps:$4 sm:$0xff]   ;;  %v4413_v24 = vld [vmem:[%s6325_s1 + $0x130] ss:$8 sps:$4 sm:$0xff]   ;;  %v4421_v28 = vld [vmem:[%s6325_s1 + $0x140] ss:$8 sps:$4 sm:$0xff]  }
  0x1f   :  { %2525 = vmatpush1.bf16.msra.mxu1 %v4339_v30  ;;  %v4416_v25 = vld [vmem:[%s6325_s1 + $0x530] ss:$8 sps:$4 sm:$0xff]   ;;  %v4423_v26 = vld [vmem:[%s6325_s1 + $0x144] ss:$8 sps:$4 sm:$0xff]   ;;  %v4426_v29 = vld [vmem:[%s6325_s1 + $0x540] ss:$8 sps:$4 sm:$0xff]  }
  0x20   :  { %2937 = vmatpush1.bf16.msra.mxu0 %v4340_v31  ;;  %2526 = vmatprep.subr.bf16.mxu1 %v4341_v32  ;;  %v4428_v27 = vld [vmem:[%s6325_s1 + $0x544] ss:$8 sps:$4 sm:$0xff]   ;;  %v4433_v30 = vld [vmem:[%s6325_s1 + $0x154] ss:$8 sps:$4 sm:$0xff]   ;;  %v4447_v31 = vld [vmem:[%s6326_s0 + $0x120] ss:$72 sps:$4 sm:$0xff]  }
  0x21   :  { %2938 = vmatprep.subr.bf16.mxu0 %v4343_v33  ;;  %v4448_v32 = vld [vmem:[%s6326_s0 + $0x140] ss:$72 sps:$4 sm:$0xff]   ;;  %v4436_v33 = vld [vmem:[%s6325_s1 + $0x554] ss:$8 sps:$4 sm:$0xff]   ;;  %v4449_v48 = vld [vmem:[%s6325_s1 + $0x170] ss:$8 sps:$4 sm:$0xff]  }
  0x22   :  { %v4464_v51 = vld [vmem:[%s6325_s1 + $0x584] ss:$8 sps:$4 sm:$0xff]  }
  0x23   :  { %2527 = vmatpush1.bf16.msra.mxu1 %v4345_v34  ;;  %v4455_v34 = vld [vmem:[%s6326_s0 + $0x1b4] ss:$72 sps:$4 sm:$0xff]  }
  0x24   :  { %2939 = vmatpush1.bf16.msra.mxu0 %v4346_v35  ;;  %2528 = vmatprep.subr.bf16.mxu1 %v4347_v36  ;;  %v4460_v35 = vld [vmem:[%s6326_s0 + $0x1d4] ss:$72 sps:$4 sm:$0xff]   ;;  %v4431_v36 = vld [vmem:[%s6325_s1 + $0x150] ss:$8 sps:$4 sm:$0xff]  }
  0x25   :  { %2940 = vmatprep.subr.bf16.mxu0 %v4349_v37  ;;  %v4434_v37 = vld [vmem:[%s6325_s1 + $0x550] ss:$8 sps:$4 sm:$0xff]  }
  0x27   :  { %2529 = vmatpush1.bf16.msra.mxu1 %v4351_v38  ;;  %v4441_v38 = vld [vmem:[%s6325_s1 + $0x164] ss:$8 sps:$4 sm:$0xff]  }
  0x28   :  { %2941 = vmatpush1.bf16.msra.mxu0 %v4352_v39  ;;  %2530 = vmatprep.subr.bf16.mxu1 %v4353_v40  ;;  %v4446_v39 = vld [vmem:[%s6325_s1 + $0x564] ss:$8 sps:$4 sm:$0xff]   ;;  %v4439_v40 = vld [vmem:[%s6325_s1 + $0x160] ss:$8 sps:$4 sm:$0xff]  }
  0x29   :  { %2942 = vmatprep.subr.bf16.mxu0 %v4355_v41  ;;  %v4444_v41 = vld [vmem:[%s6325_s1 + $0x560] ss:$8 sps:$4 sm:$0xff]  }
  0x2b   :  { %2531 = vmatpush1.bf16.msra.mxu1 %v4357_v42  ;;  %v4451_v42 = vld [vmem:[%s6325_s1 + $0x174] ss:$8 sps:$4 sm:$0xff]  }
  0x2c   :  { %2943 = vmatpush1.bf16.msra.mxu0 %v4358_v43  ;;  %2532 = vmatprep.subr.bf16.mxu1 %v4359_v44  ;;  %v4465_v43 = vld [vmem:[%s6326_s0 + $0x1b0] ss:$72 sps:$4 sm:$0xff]  }
  0x2d   :  { %2944 = vmatprep.subr.bf16.mxu0 %v4361_v45  ;;  %v4466_v44 = vld [vmem:[%s6326_s0 + $0x1d0] ss:$72 sps:$4 sm:$0xff]   ;;  %v4454_v45 = vld [vmem:[%s6325_s1 + $0x574] ss:$8 sps:$4 sm:$0xff]  }
  0x2f   :  { %2533 = vmatpush1.bf16.msra.mxu1 %v4363_v46  ;;  %v4473_v46 = vld [vmem:[%s6326_s0 + $0x244] ss:$72 sps:$4 sm:$0xff]  }
  0x30   :  { %2945 = vmatpush1.bf16.msra.mxu0 %v4364_v47  ;;  %2534 = vmatprep.subr.bf16.mxu1 %v4365_v49  ;;  %v4478_v47 = vld [vmem:[%s6326_s0 + $0x264] ss:$72 sps:$4 sm:$0xff]   ;;  %v4452_v49 = vld [vmem:[%s6325_s1 + $0x570] ss:$8 sps:$4 sm:$0xff]  }
  0x31   :  { %2946 = vmatprep.subr.bf16.mxu0 %v4367_v50  ;;  %v4459_v50 = vld [vmem:[%s6325_s1 + $0x184] ss:$8 sps:$4 sm:$0xff]  }
  0x33   :  { %2535 = vmatpush1.bf16.msra.mxu1 %v4369_v52  ;;  %v4457_v52 = vld [vmem:[%s6325_s1 + $0x180] ss:$8 sps:$4 sm:$0xff]  }
  0x34   :  { %2947 = vmatpush1.bf16.msra.mxu0 %v4370_v53  ;;  %2536 = vmatprep.subr.bf16.mxu1 %v4371_v54  ;;  %v4462_v53 = vld [vmem:[%s6325_s1 + $0x580] ss:$8 sps:$4 sm:$0xff]   ;;  %v4469_v54 = vld [vmem:[%s6325_s1 + $0x194] ss:$8 sps:$4 sm:$0xff]  }
  0x35   :  { %2948 = vmatprep.subr.bf16.mxu0 %v4373_v55  ;;  %v4483_v55 = vld [vmem:[%s6326_s0 + $0x240] ss:$72 sps:$4 sm:$0xff]  }
  0x37   :  { %2537 = vmatpush1.bf16.msra.mxu1 %v4375_v56  ;;  %v4484_v56 = vld [vmem:[%s6326_s0 + $0x260] ss:$72 sps:$4 sm:$0xff]  }
  0x38   :  { %2949 = vmatpush1.bf16.msra.mxu0 %v4376_v57  ;;  %2538 = vmatprep.subr.bf16.mxu1 %v4377_v58  ;;  %v4472_v57 = vld [vmem:[%s6325_s1 + $0x594] ss:$8 sps:$4 sm:$0xff]  }
  0x39   :  { %2950 = vmatprep.subr.bf16.mxu0 %v4379_v59  ;;  %v4491_v58 = vld [vmem:[%s6326_s0 + $0x2d4] ss:$72 sps:$4 sm:$0xff]  }
  0x3a   :  { %v4496_v59 = vld [vmem:[%s6326_s0 + $0x2f4] ss:$72 sps:$4 sm:$0xff]  }
  0x3b   :  { %2539 = vmatpush1.bf16.msra.mxu1 %v4381_v60  ;;  %v4467_v60 = vld [vmem:[%s6325_s1 + $0x190] ss:$8 sps:$4 sm:$0xff]  }
  0x3c   :  { %2951 = vmatpush1.bf16.msra.mxu0 %v4382_v61  ;;  %2540 = vmatprep.subr.bf16.mxu1 %v4383_v62  ;;  %v4470_v61 = vld [vmem:[%s6325_s1 + $0x590] ss:$8 sps:$4 sm:$0xff]   ;;  %v4477_v62 = vld [vmem:[%s6325_s1 + $0x1a4] ss:$8 sps:$4 sm:$0xff]  }
  0x3d   :  { %2952 = vmatprep.subr.bf16.mxu0 %v4385_v63  ;;  %v4482_v63 = vld [vmem:[%s6325_s1 + $0x5a4] ss:$8 sps:$4 sm:$0xff]  }
  0x3f   :  { %2541 = vmatpush1.bf16.msra.mxu1 %v4387_v0  ;;  %v4475_v0 = vld [vmem:[%s6325_s1 + $0x1a0] ss:$8 sps:$4 sm:$0xff]  }
  0x40   :  { %2953 = vmatpush1.bf16.msra.mxu0 %v4388_v1  ;;  %2613 = vmatprep.subr.bf16.mxu1 %v4394_v2  ;;  %v4480_v1 = vld [vmem:[%s6325_s1 + $0x5a0] ss:$8 sps:$4 sm:$0xff]   ;;  %v4501_v2 = vld [vmem:[%s6326_s0 + $0x2d0] ss:$72 sps:$4 sm:$0xff]  }
  0x41   :  { %3025 = vmatprep.subr.bf16.mxu0 %v4400_v4  ;;  %v4487_v4 = vld [vmem:[%s6325_s1 + $0x1b4] ss:$8 sps:$4 sm:$0xff]  }
  0x42   :  { %2543 = vmatmul.mubr.bf16.vlgmr.msra.gmra.mrb[0].mxu1 %v4389_v3  ;;  %v4502_v3 = vld [vmem:[%s6326_s0 + $0x2f0] ss:$72 sps:$4 sm:$0xff]  }
  0x43   :  { %2955 = vmatmul.mubr.bf16.vlgmr.msra.gmra.mrb[0].mxu0 %v4395_v6  ;;  %2614 = vmatpush1.bf16.msra.mxu1 %v4392_v5  ;;  %v4490_v5 = vld [vmem:[%s6325_s1 + $0x5b4] ss:$8 sps:$4 sm:$0xff]   ;;  %v4509_v6 = vld [vmem:[%s6326_s0 + $0x364] ss:$72 sps:$4 sm:$0xff]  }
  0x44   :  { %3026 = vmatpush1.bf16.msra.mxu0 %v4398_v7  ;;  %2615 = vmatprep.subr.bf16.mxu1 %v4403_v8  ;;  %v4514_v7 = vld [vmem:[%s6326_s0 + $0x384] ss:$72 sps:$4 sm:$0xff]   ;;  %v4485_v8 = vld [vmem:[%s6325_s1 + $0x1b0] ss:$8 sps:$4 sm:$0xff]  }
  0x45   :  { %3027 = vmatprep.subr.bf16.mxu0 %v4406_v9  ;;  %2552 = vmatprep.mubr.bf16.mxu1 %v4419_v10  ;;  %v4488_v9 = vld [vmem:[%s6325_s1 + $0x5b0] ss:$8 sps:$4 sm:$0xff]   ;;  %v4495_v10 = vld [vmem:[%s6325_s1 + $0x1c4] ss:$8 sps:$4 sm:$0xff]  }
  0x46   :  { %2964 = vmatprep.mubr.bf16.mxu0 %v4424_v11  ;;  %v4500_v11 = vld [vmem:[%s6325_s1 + $0x5c4] ss:$8 sps:$4 sm:$0xff]  }
  0x47   :  { %2616 = vmatpush1.bf16.msra.mxu1 %v4401_v12  ;;  %v4493_v12 = vld [vmem:[%s6325_s1 + $0x1c0] ss:$8 sps:$4 sm:$0xff]  }
  0x48   :  { %3028 = vmatpush1.bf16.msra.mxu0 %v4404_v13  ;;  %2617 = vmatprep.subr.bf16.mxu1 %v4409_v14  ;;  %v4498_v13 = vld [vmem:[%s6325_s1 + $0x5c0] ss:$8 sps:$4 sm:$0xff]  }
  0x49   :  { %3029 = vmatprep.subr.bf16.mxu0 %v4412_v15  ;;  %v4519_v14 = vld [vmem:[%s6326_s0 + $0x360] ss:$72 sps:$4 sm:$0xff]  }
  0x4a   :  { %2553 = vmatmul.mubr.bf16.gmra.mrb[4].mxu1 %v4429_v19  ;;  %v4520_v15 = vld [vmem:[%s6326_s0 + $0x380] ss:$72 sps:$4 sm:$0xff]   ;;  %v4535_v19 = vld [vmem:[%s6326_s0 + $0x2c] ss:$72 sps:$4 sm:$0xff]  }
  0x4b   :  { %2965 = vmatmul.mubr.bf16.gmra.mrb[4].mxu0 %v4430_v20  ;;  %2618 = vmatpush1.bf16.msra.mxu1 %v4407_v16  ;;  %v4505_v16 = vld [vmem:[%s6325_s1 + $0x1d4] ss:$8 sps:$4 sm:$0xff]   ;;  %v4503_v20 = vld [vmem:[%s6325_s1 + $0x1d0] ss:$8 sps:$4 sm:$0xff]  }
  0x4c   :  { %3030 = vmatpush1.bf16.msra.mxu0 %v4410_v17  ;;  %2619 = vmatprep.subr.bf16.mxu1 %v4415_v18  ;;  %v4508_v17 = vld [vmem:[%s6325_s1 + $0x5d4] ss:$8 sps:$4 sm:$0xff]  }
  0x4d   :  { %3031 = vmatprep.subr.bf16.mxu0 %v4418_v21  ;;  %2562 = vmatprep.mubr.bf16.mxu1 %v4437_v22  ;;  %v4529_v18 = vld [vmem:[%s6326_s0 + $0xc] ss:$72 sps:$4 sm:$0xff]   ;;  %v4506_v21 = vld [vmem:[%s6325_s1 + $0x5d0] ss:$8 sps:$4 sm:$0xff]  }
  0x4e   :  { %2974 = vmatprep.mubr.bf16.mxu0 %v4442_v23  ;;  %v4513_v22 = vld [vmem:[%s6325_s1 + $0x1e4] ss:$8 sps:$4 sm:$0xff]  }
  0x4f   :  { %2620 = vmatpush1.bf16.msra.mxu1 %v4413_v24  ;;  %v4518_v23 = vld [vmem:[%s6325_s1 + $0x5e4] ss:$8 sps:$4 sm:$0xff]   ;;  %v4511_v24 = vld [vmem:[%s6325_s1 + $0x1e0] ss:$8 sps:$4 sm:$0xff]  }
  0x50   :  { %3032 = vmatpush1.bf16.msra.mxu0 %v4416_v25  ;;  %2621 = vmatprep.subr.bf16.mxu1 %v4423_v26  ;;  %v4516_v25 = vld [vmem:[%s6325_s1 + $0x5e0] ss:$8 sps:$4 sm:$0xff]   ;;  %v4523_v26 = vld [vmem:[%s6325_s1 + $0x1f4] ss:$8 sps:$4 sm:$0xff]  }
  0x51   :  { %3033 = vmatprep.subr.bf16.mxu0 %v4428_v27  ;;  %v4526_v27 = vld [vmem:[%s6325_s1 + $0x5f4] ss:$8 sps:$4 sm:$0xff]  }
  0x52   :  { %2563 = vmatmul.mubr.bf16.gmra.mrb[8].mxu1 %v4447_v31  ;;  %v4538_v31 = vld [vmem:[%s6325_s1 + $0x604] ss:$8 sps:$4 sm:$0xff]  }
  0x53   :  { %2975 = vmatmul.mubr.bf16.gmra.mrb[8].mxu0 %v4448_v32  ;;  %2622 = vmatpush1.bf16.msra.mxu1 %v4421_v28  ;;  %v4521_v28 = vld [vmem:[%s6325_s1 + $0x1f0] ss:$8 sps:$4 sm:$0xff]  }
  0x54   :  { %3034 = vmatpush1.bf16.msra.mxu0 %v4426_v29  ;;  %2623 = vmatprep.subr.bf16.mxu1 %v4433_v30  ;;  %v4524_v29 = vld [vmem:[%s6325_s1 + $0x5f0] ss:$8 sps:$4 sm:$0xff]   ;;  %v4532_v30 = vld [vmem:[%s6325_s1 + $0x204] ss:$8 sps:$4 sm:$0xff]  }
  0x55   :  { %3035 = vmatprep.subr.bf16.mxu0 %v4436_v33  ;;  %2572 = vmatprep.mubr.bf16.mxu1 %v4455_v34  ;;  %v4527_v32 = vld [vmem:[%s6326_s0 + $0x8] ss:$72 sps:$4 sm:$0xff]  }
  0x56   :  { %2984 = vmatprep.mubr.bf16.mxu0 %v4460_v35  ;;  %v4530_v33 = vld [vmem:[%s6325_s1 + $0x200] ss:$8 sps:$4 sm:$0xff]  }
  0x57   :  { %2624 = vmatpush1.bf16.msra.mxu1 %v4431_v36  ;;  %v4533_v34 = vld [vmem:[%s6326_s0 + $0x28] ss:$72 sps:$4 sm:$0xff]   ;;  %v4541_v36 = vld [vmem:[%s6325_s1 + $0x214] ss:$8 sps:$4 sm:$0xff]  }
  0x58   :  { %3036 = vmatpush1.bf16.msra.mxu0 %v4434_v37  ;;  %2625 = vmatprep.subr.bf16.mxu1 %v4441_v38  ;;  %v4536_v35 = vld [vmem:[%s6325_s1 + $0x600] ss:$8 sps:$4 sm:$0xff]   ;;  %v4544_v37 = vld [vmem:[%s6325_s1 + $0x614] ss:$8 sps:$4 sm:$0xff]  }
  0x59   :  { %3037 = vmatprep.subr.bf16.mxu0 %v4446_v39  ;;  %v4557_v38 = vld [vmem:[%s6326_s0 + $0x9c] ss:$72 sps:$4 sm:$0xff]  }
  0x5a   :  { %2573 = vmatmul.mubr.bf16.gmra.mrb[12].mxu1 %v4465_v43  ;;  %v4562_v39 = vld [vmem:[%s6326_s0 + $0xbc] ss:$72 sps:$4 sm:$0xff]  }
  0x5b   :  { %2985 = vmatmul.mubr.bf16.gmra.mrb[12].mxu0 %v4466_v44  ;;  %2626 = vmatpush1.bf16.msra.mxu1 %v4439_v40  ;;  %v4539_v40 = vld [vmem:[%s6325_s1 + $0x210] ss:$8 sps:$4 sm:$0xff]   ;;  %v4550_v43 = vld [vmem:[%s6325_s1 + $0x624] ss:$8 sps:$4 sm:$0xff]   ;;  %v4545_v44 = vld [vmem:[%s6325_s1 + $0x220] ss:$8 sps:$4 sm:$0xff]  }
  0x5c   :  { %3038 = vmatpush1.bf16.msra.mxu0 %v4444_v41  ;;  %2627 = vmatprep.subr.bf16.mxu1 %v4451_v42  ;;  %v4542_v41 = vld [vmem:[%s6325_s1 + $0x610] ss:$8 sps:$4 sm:$0xff]   ;;  %v4547_v42 = vld [vmem:[%s6325_s1 + $0x224] ss:$8 sps:$4 sm:$0xff]  }
  0x5d   :  { %3039 = vmatprep.subr.bf16.mxu0 %v4454_v45  ;;  %2582 = vmatprep.mubr.bf16.mxu1 %v4473_v46  ;;  %v4567_v45 = vld [vmem:[%s6326_s0 + $0x98] ss:$72 sps:$4 sm:$0xff]  }
  0x5e   :  { %2994 = vmatprep.mubr.bf16.mxu0 %v4478_v47  ;;  %v4568_v46 = vld [vmem:[%s6326_s0 + $0xb8] ss:$72 sps:$4 sm:$0xff]  }
  0x5f   :  { %2628 = vmatpush1.bf16.msra.mxu1 %v4449_v48  ;;  %v4548_v47 = vld [vmem:[%s6325_s1 + $0x620] ss:$8 sps:$4 sm:$0xff]   ;;  %v4553_v48 = vld [vmem:[%s6325_s1 + $0x234] ss:$8 sps:$4 sm:$0xff]  }
  0x60   :  { %3040 = vmatpush1.bf16.msra.mxu0 %v4452_v49  ;;  %2629 = vmatprep.subr.bf16.mxu1 %v4459_v50  ;;  %v4556_v49 = vld [vmem:[%s6325_s1 + $0x634] ss:$8 sps:$4 sm:$0xff]  }
  0x61   :  { %3041 = vmatprep.subr.bf16.mxu0 %v4464_v51  ;;  %v4575_v50 = vld [vmem:[%s6326_s0 + $0x12c] ss:$72 sps:$4 sm:$0xff]  }
  0x62   :  { %2583 = vmatmul.mubr.bf16.gmra.mrb[16].mxu1 %v4483_v55  ;;  %v4580_v51 = vld [vmem:[%s6326_s0 + $0x14c] ss:$72 sps:$4 sm:$0xff]  }
  0x63   :  { %2995 = vmatmul.mubr.bf16.gmra.mrb[16].mxu0 %v4484_v56  ;;  %2630 = vmatpush1.bf16.msra.mxu1 %v4457_v52  ;;  %v4551_v52 = vld [vmem:[%s6325_s1 + $0x230] ss:$8 sps:$4 sm:$0xff]   ;;  %v4566_v55 = vld [vmem:[%s6325_s1 + $0x644] ss:$8 sps:$4 sm:$0xff]   ;;  %v4559_v56 = vld [vmem:[%s6325_s1 + $0x240] ss:$8 sps:$4 sm:$0xff]  }
  0x64   :  { %3042 = vmatpush1.bf16.msra.mxu0 %v4462_v53  ;;  %2631 = vmatprep.subr.bf16.mxu1 %v4469_v54  ;;  %v4554_v53 = vld [vmem:[%s6325_s1 + $0x630] ss:$8 sps:$4 sm:$0xff]   ;;  %v4561_v54 = vld [vmem:[%s6325_s1 + $0x244] ss:$8 sps:$4 sm:$0xff]  }
  0x65   :  { %3043 = vmatprep.subr.bf16.mxu0 %v4472_v57  ;;  %2592 = vmatprep.mubr.bf16.mxu1 %v4491_v58  ;;  %v4585_v57 = vld [vmem:[%s6326_s0 + $0x128] ss:$72 sps:$4 sm:$0xff]  }
  0x66   :  { %3004 = vmatprep.mubr.bf16.mxu0 %v4496_v59  ;;  %v4586_v58 = vld [vmem:[%s6326_s0 + $0x148] ss:$72 sps:$4 sm:$0xff]  }
  0x67   :  { %2632 = vmatpush1.bf16.msra.mxu1 %v4467_v60  ;;  %v4564_v59 = vld [vmem:[%s6325_s1 + $0x640] ss:$8 sps:$4 sm:$0xff]   ;;  %v4571_v60 = vld [vmem:[%s6325_s1 + $0x254] ss:$8 sps:$4 sm:$0xff]  }
  0x68   :  { %3044 = vmatpush1.bf16.msra.mxu0 %v4470_v61  ;;  %2633 = vmatprep.subr.bf16.mxu1 %v4477_v62  ;;  %v4574_v61 = vld [vmem:[%s6325_s1 + $0x654] ss:$8 sps:$4 sm:$0xff]  }
  0x69   :  { %3045 = vmatprep.subr.bf16.mxu0 %v4482_v63  ;;  %v4593_v62 = vld [vmem:[%s6326_s0 + $0x1bc] ss:$72 sps:$4 sm:$0xff]  }
  0x6a   :  { %2593 = vmatmul.mubr.bf16.gmra.mrb[20].mxu1 %v4501_v2  ;;  %v4598_v63 = vld [vmem:[%s6326_s0 + $0x1dc] ss:$72 sps:$4 sm:$0xff]  }
  0x6b   :  { %3005 = vmatmul.mubr.bf16.gmra.mrb[20].mxu0 %v4502_v3  ;;  %2634 = vmatpush1.bf16.msra.mxu1 %v4475_v0  ;;  %v4569_v0 = vld [vmem:[%s6325_s1 + $0x250] ss:$8 sps:$4 sm:$0xff]   ;;  %v4579_v2 = vld [vmem:[%s6325_s1 + $0x264] ss:$8 sps:$4 sm:$0xff]  }
  0x6c   :  { %3046 = vmatpush1.bf16.msra.mxu0 %v4480_v1  ;;  %2635 = vmatprep.subr.bf16.mxu1 %v4487_v4  ;;  %v4572_v1 = vld [vmem:[%s6325_s1 + $0x650] ss:$8 sps:$4 sm:$0xff]   ;;  %v4584_v3 = vld [vmem:[%s6325_s1 + $0x664] ss:$8 sps:$4 sm:$0xff]   ;;  %v4577_v4 = vld [vmem:[%s6325_s1 + $0x260] ss:$8 sps:$4 sm:$0xff]  }
  0x6d   :  { %3047 = vmatprep.subr.bf16.mxu0 %v4490_v5  ;;  %2602 = vmatprep.mubr.bf16.mxu1 %v4509_v6  ;;  %v4603_v5 = vld [vmem:[%s6326_s0 + $0x1b8] ss:$72 sps:$4 sm:$0xff]  }
  0x6e   :  { %3014 = vmatprep.mubr.bf16.mxu0 %v4514_v7  ;;  %v4604_v6 = vld [vmem:[%s6326_s0 + $0x1d8] ss:$72 sps:$4 sm:$0xff]  }
  0x6f   :  { %2636 = vmatpush1.bf16.msra.mxu1 %v4485_v8  ;;  %v4582_v7 = vld [vmem:[%s6325_s1 + $0x660] ss:$8 sps:$4 sm:$0xff]   ;;  %v4589_v8 = vld [vmem:[%s6325_s1 + $0x274] ss:$8 sps:$4 sm:$0xff]  }
  0x70   :  { %3048 = vmatpush1.bf16.msra.mxu0 %v4488_v9  ;;  %2637 = vmatprep.subr.bf16.mxu1 %v4495_v10  ;;  %v4592_v9 = vld [vmem:[%s6325_s1 + $0x674] ss:$8 sps:$4 sm:$0xff]  }
  0x71   :  { %3049 = vmatprep.subr.bf16.mxu0 %v4500_v11  ;;  %v4611_v10 = vld [vmem:[%s6326_s0 + $0x24c] ss:$72 sps:$4 sm:$0xff]  }
  0x72   :  { %2603 = vmatmul.mubr.bf16.gmra.mrb[24].mxu1 %v4519_v14  ;;  %v4616_v11 = vld [vmem:[%s6326_s0 + $0x26c] ss:$72 sps:$4 sm:$0xff]  }
  0x73   :  { %3015 = vmatmul.mubr.bf16.gmra.mrb[24].mxu0 %v4520_v15  ;;  %2638 = vmatpush1.bf16.msra.mxu1 %v4493_v12  ;;  %v4587_v12 = vld [vmem:[%s6325_s1 + $0x270] ss:$8 sps:$4 sm:$0xff]   ;;  %v4597_v14 = vld [vmem:[%s6325_s1 + $0x284] ss:$8 sps:$4 sm:$0xff]  }
  0x74   :  { %3050 = vmatpush1.bf16.msra.mxu0 %v4498_v13  ;;  %2639 = vmatprep.subr.bf16.mxu1 %v4505_v16  ;;  %v4590_v13 = vld [vmem:[%s6325_s1 + $0x670] ss:$8 sps:$4 sm:$0xff]   ;;  %v4602_v15 = vld [vmem:[%s6325_s1 + $0x684] ss:$8 sps:$4 sm:$0xff]   ;;  %v4595_v16 = vld [vmem:[%s6325_s1 + $0x280] ss:$8 sps:$4 sm:$0xff]  }
  0x75   :  { %3051 = vmatprep.subr.bf16.mxu0 %v4508_v17  ;;  %2645 = vmatprep.mubr.bf16.mxu1 %v4529_v18  ;;  %v4621_v17 = vld [vmem:[%s6326_s0 + $0x248] ss:$72 sps:$4 sm:$0xff]  }
  0x76   :  { %3057 = vmatprep.mubr.bf16.mxu0 %v4535_v19  ;;  %v4622_v18 = vld [vmem:[%s6326_s0 + $0x268] ss:$72 sps:$4 sm:$0xff]  }
  0x77   :  { %2640 = vmatpush1.bf16.msra.mxu1 %v4503_v20  ;;  %v4600_v19 = vld [vmem:[%s6325_s1 + $0x680] ss:$8 sps:$4 sm:$0xff]   ;;  %v4607_v20 = vld [vmem:[%s6325_s1 + $0x294] ss:$8 sps:$4 sm:$0xff]  }
  0x78   :  { %3052 = vmatpush1.bf16.msra.mxu0 %v4506_v21  ;;  %2641 = vmatprep.subr.bf16.mxu1 %v4513_v22  ;;  %v4610_v21 = vld [vmem:[%s6325_s1 + $0x694] ss:$8 sps:$4 sm:$0xff]  }
  0x79   :  { %3053 = vmatprep.subr.bf16.mxu0 %v4518_v23  ;;  %v4629_v22 = vld [vmem:[%s6326_s0 + $0x2dc] ss:$72 sps:$4 sm:$0xff]  }
  0x7a   :  { %v4634_v23 = vld [vmem:[%s6326_s0 + $0x2fc] ss:$72 sps:$4 sm:$0xff]  }
  0x7b   :  { %2642 = vmatpush1.bf16.msra.mxu1 %v4511_v24  ;;  %v4605_v24 = vld [vmem:[%s6325_s1 + $0x290] ss:$8 sps:$4 sm:$0xff]  }
  0x7c   :  { %3054 = vmatpush1.bf16.msra.mxu0 %v4516_v25  ;;  %2643 = vmatprep.subr.bf16.mxu1 %v4523_v26  ;;  %v4608_v25 = vld [vmem:[%s6325_s1 + $0x690] ss:$8 sps:$4 sm:$0xff]   ;;  %v4615_v26 = vld [vmem:[%s6325_s1 + $0x2a4] ss:$8 sps:$4 sm:$0xff]  }
  0x7d   :  { %3055 = vmatprep.subr.bf16.mxu0 %v4526_v27  ;;  %v4620_v27 = vld [vmem:[%s6325_s1 + $0x6a4] ss:$8 sps:$4 sm:$0xff]  }
  0x7f   :  { %2644 = vmatpush1.bf16.msra.mxu1 %v4521_v28  ;;  %v4613_v28 = vld [vmem:[%s6325_s1 + $0x2a0] ss:$8 sps:$4 sm:$0xff]  }
  0x80   :  { %3056 = vmatpush1.bf16.msra.mxu0 %v4524_v29  ;;  %2716 = vmatprep.subr.bf16.mxu1 %v4532_v30  ;;  %v4618_v29 = vld [vmem:[%s6325_s1 + $0x6a0] ss:$8 sps:$4 sm:$0xff]  }
  0x81   :  { %3128 = vmatprep.subr.bf16.mxu0 %v4538_v31  ;;  %v4639_v30 = vld [vmem:[%s6326_s0 + $0x2d8] ss:$72 sps:$4 sm:$0xff]  }
  0x82   :  { %2646 = vmatmul.mubr.bf16.vlgmr.msra.gmra.mrb[0].mxu1 %v4527_v32  ;;  %v4640_v31 = vld [vmem:[%s6326_s0 + $0x2f8] ss:$72 sps:$4 sm:$0xff]   ;;  %v4625_v32 = vld [vmem:[%s6325_s1 + $0x2b4] ss:$8 sps:$4 sm:$0xff]  }
  0x83   :  { %3058 = vmatmul.mubr.bf16.vlgmr.msra.gmra.mrb[0].mxu0 %v4533_v34  ;;  %2717 = vmatpush1.bf16.msra.mxu1 %v4530_v33  ;;  %v4628_v33 = vld [vmem:[%s6325_s1 + $0x6b4] ss:$8 sps:$4 sm:$0xff]  }
  0x84   :  { %3129 = vmatpush1.bf16.msra.mxu0 %v4536_v35  ;;  %2718 = vmatprep.subr.bf16.mxu1 %v4541_v36  ;;  %v4647_v34 = vld [vmem:[%s6326_s0 + $0x36c] ss:$72 sps:$4 sm:$0xff]   ;;  %v4623_v36 = vld [vmem:[%s6325_s1 + $0x2b0] ss:$8 sps:$4 sm:$0xff]  }
  0x85   :  { %3130 = vmatprep.subr.bf16.mxu0 %v4544_v37  ;;  %2655 = vmatprep.mubr.bf16.mxu1 %v4557_v38  ;;  %v4652_v35 = vld [vmem:[%s6326_s0 + $0x38c] ss:$72 sps:$4 sm:$0xff]   ;;  %v4626_v37 = vld [vmem:[%s6325_s1 + $0x6b0] ss:$8 sps:$4 sm:$0xff]  }
  0x86   :  { %3067 = vmatprep.mubr.bf16.mxu0 %v4562_v39  ;;  %v4633_v38 = vld [vmem:[%s6325_s1 + $0x2c4] ss:$8 sps:$4 sm:$0xff]  }
  0x87   :  { %2719 = vmatpush1.bf16.msra.mxu1 %v4539_v40  ;;  %v4638_v39 = vld [vmem:[%s6325_s1 + $0x6c4] ss:$8 sps:$4 sm:$0xff]   ;;  %v4631_v40 = vld [vmem:[%s6325_s1 + $0x2c0] ss:$8 sps:$4 sm:$0xff]  }
  0x88   :  { %3131 = vmatpush1.bf16.msra.mxu0 %v4542_v41  ;;  %2720 = vmatprep.subr.bf16.mxu1 %v4547_v42  ;;  %v4636_v41 = vld [vmem:[%s6325_s1 + $0x6c0] ss:$8 sps:$4 sm:$0xff]  }
  0x89   :  { %3132 = vmatprep.subr.bf16.mxu0 %v4550_v43  ;;  %v4657_v42 = vld [vmem:[%s6326_s0 + $0x368] ss:$72 sps:$4 sm:$0xff]  }
  0x8a   :  { %2656 = vmatmul.mubr.bf16.gmra.mrb[4].mxu1 %v4567_v45  ;;  %v4658_v43 = vld [vmem:[%s6326_s0 + $0x388] ss:$72 sps:$4 sm:$0xff]   ;;  %v4646_v45 = vld [vmem:[%s6325_s1 + $0x6d4] ss:$8 sps:$4 sm:$0xff]  }
  0x8b   :  { %3068 = vmatmul.mubr.bf16.gmra.mrb[4].mxu0 %v4568_v46  ;;  %2721 = vmatpush1.bf16.msra.mxu1 %v4545_v44  ;;  %v4643_v44 = vld [vmem:[%s6325_s1 + $0x2d4] ss:$8 sps:$4 sm:$0xff]  }
  0x8c   :  { %3133 = vmatpush1.bf16.msra.mxu0 %v4548_v47  ;;  %2722 = vmatprep.subr.bf16.mxu1 %v4553_v48  ;;  %v4667_v46 = vld [vmem:[%s6326_s0 + $0x14] ss:$72 sps:$4 sm:$0xff]   ;;  %v4641_v48 = vld [vmem:[%s6325_s1 + $0x2d0] ss:$8 sps:$4 sm:$0xff]  }
  0x8d   :  { %3134 = vmatprep.subr.bf16.mxu0 %v4556_v49  ;;  %2665 = vmatprep.mubr.bf16.mxu1 %v4575_v50  ;;  %v4673_v47 = vld [vmem:[%s6326_s0 + $0x34] ss:$72 sps:$4 sm:$0xff]   ;;  %v4644_v49 = vld [vmem:[%s6325_s1 + $0x6d0] ss:$8 sps:$4 sm:$0xff]   ;;  %v4651_v50 = vld [vmem:[%s6325_s1 + $0x2e4] ss:$8 sps:$4 sm:$0xff]  }
  0x8e   :  { %3077 = vmatprep.mubr.bf16.mxu0 %v4580_v51  ;;  %v4656_v51 = vld [vmem:[%s6325_s1 + $0x6e4] ss:$8 sps:$4 sm:$0xff]  }
  0x8f   :  { %2723 = vmatpush1.bf16.msra.mxu1 %v4551_v52  ;;  %v4649_v52 = vld [vmem:[%s6325_s1 + $0x2e0] ss:$8 sps:$4 sm:$0xff]  }
  0x90   :  { %3135 = vmatpush1.bf16.msra.mxu0 %v4554_v53  ;;  %2724 = vmatprep.subr.bf16.mxu1 %v4561_v54  ;;  %v4654_v53 = vld [vmem:[%s6325_s1 + $0x6e0] ss:$8 sps:$4 sm:$0xff]   ;;  %v4661_v54 = vld [vmem:[%s6325_s1 + $0x2f4] ss:$8 sps:$4 sm:$0xff]  }
  0x91   :  { %3136 = vmatprep.subr.bf16.mxu0 %v4566_v55  ;;  %v4664_v55 = vld [vmem:[%s6325_s1 + $0x6f4] ss:$8 sps:$4 sm:$0xff]  }
  0x92   :  { %2666 = vmatmul.mubr.bf16.gmra.mrb[8].mxu1 %v4585_v57  ;;  %v4662_v57 = vld [vmem:[%s6325_s1 + $0x6f0] ss:$8 sps:$4 sm:$0xff]  }
  0x93   :  { %3078 = vmatmul.mubr.bf16.gmra.mrb[8].mxu0 %v4586_v58  ;;  %2725 = vmatpush1.bf16.msra.mxu1 %v4559_v56  ;;  %v4659_v56 = vld [vmem:[%s6325_s1 + $0x2f0] ss:$8 sps:$4 sm:$0xff]   ;;  %v4670_v58 = vld [vmem:[%s6325_s1 + $0x304] ss:$8 sps:$4 sm:$0xff]  }
  0x94   :  { %3137 = vmatpush1.bf16.msra.mxu0 %v4564_v59  ;;  %2726 = vmatprep.subr.bf16.mxu1 %v4571_v60  ;;  %v4676_v59 = vld [vmem:[%s6325_s1 + $0x704] ss:$8 sps:$4 sm:$0xff]   ;;  %v4665_v60 = vld [vmem:[%s6326_s0 + $0x10] ss:$72 sps:$4 sm:$0xff]  }
  0x95   :  { %3138 = vmatprep.subr.bf16.mxu0 %v4574_v61  ;;  %2675 = vmatprep.mubr.bf16.mxu1 %v4593_v62  ;;  %v4668_v61 = vld [vmem:[%s6325_s1 + $0x300] ss:$8 sps:$4 sm:$0xff]   ;;  %v4671_v62 = vld [vmem:[%s6326_s0 + $0x30] ss:$72 sps:$4 sm:$0xff]  }
  0x96   :  { %3087 = vmatprep.mubr.bf16.mxu0 %v4598_v63  ;;  %v4674_v63 = vld [vmem:[%s6325_s1 + $0x700] ss:$8 sps:$4 sm:$0xff]  }
  0x97   :  { %2727 = vmatpush1.bf16.msra.mxu1 %v4569_v0  ;;  %v4679_v0 = vld [vmem:[%s6325_s1 + $0x314] ss:$8 sps:$4 sm:$0xff]  }
  0x98   :  { %3139 = vmatpush1.bf16.msra.mxu0 %v4572_v1  ;;  %2728 = vmatprep.subr.bf16.mxu1 %v4579_v2  ;;  %v4682_v1 = vld [vmem:[%s6325_s1 + $0x714] ss:$8 sps:$4 sm:$0xff]   ;;  %v4695_v2 = vld [vmem:[%s6326_s0 + $0xa4] ss:$72 sps:$4 sm:$0xff]  }
  0x99   :  { %3140 = vmatprep.subr.bf16.mxu0 %v4584_v3  ;;  %v4697_v3 = vld [vmem:[%s6326_s0 + $0xc4] ss:$72 sps:$4 sm:$0xff]  }
  0x9a   :  { %2676 = vmatmul.mubr.bf16.gmra.mrb[12].mxu1 %v4603_v5  ;;  %v4680_v5 = vld [vmem:[%s6325_s1 + $0x710] ss:$8 sps:$4 sm:$0xff]  }
  0x9b   :  { %3088 = vmatmul.mubr.bf16.gmra.mrb[12].mxu0 %v4604_v6  ;;  %2729 = vmatpush1.bf16.msra.mxu1 %v4577_v4  ;;  %v4677_v4 = vld [vmem:[%s6325_s1 + $0x310] ss:$8 sps:$4 sm:$0xff]   ;;  %v4685_v6 = vld [vmem:[%s6325_s1 + $0x324] ss:$8 sps:$4 sm:$0xff]  }
  0x9c   :  { %3141 = vmatpush1.bf16.msra.mxu0 %v4582_v7  ;;  %2730 = vmatprep.subr.bf16.mxu1 %v4589_v8  ;;  %v4688_v7 = vld [vmem:[%s6325_s1 + $0x724] ss:$8 sps:$4 sm:$0xff]   ;;  %v4683_v8 = vld [vmem:[%s6325_s1 + $0x320] ss:$8 sps:$4 sm:$0xff]  }
  0x9d   :  { %3142 = vmatprep.subr.bf16.mxu0 %v4592_v9  ;;  %2685 = vmatprep.mubr.bf16.mxu1 %v4611_v10  ;;  %v4686_v9 = vld [vmem:[%s6325_s1 + $0x720] ss:$8 sps:$4 sm:$0xff]  }
  0x9e   :  { %3097 = vmatprep.mubr.bf16.mxu0 %v4616_v11  ;;  %v4699_v10 = vld [vmem:[%s6326_s0 + $0xa0] ss:$72 sps:$4 sm:$0xff]  }
  0x9f   :  { %2731 = vmatpush1.bf16.msra.mxu1 %v4587_v12  ;;  %v4703_v11 = vld [vmem:[%s6326_s0 + $0xc0] ss:$72 sps:$4 sm:$0xff]   ;;  %v4691_v12 = vld [vmem:[%s6325_s1 + $0x334] ss:$8 sps:$4 sm:$0xff]  }
  0xa0   :  { %3143 = vmatpush1.bf16.msra.mxu0 %v4590_v13  ;;  %2732 = vmatprep.subr.bf16.mxu1 %v4597_v14  ;;  %v4694_v13 = vld [vmem:[%s6325_s1 + $0x734] ss:$8 sps:$4 sm:$0xff]  }
  0xa1   :  { %3144 = vmatprep.subr.bf16.mxu0 %v4602_v15  ;;  %v4713_v14 = vld [vmem:[%s6326_s0 + $0x134] ss:$72 sps:$4 sm:$0xff]  }
  0xa2   :  { %2686 = vmatmul.mubr.bf16.gmra.mrb[16].mxu1 %v4621_v17  ;;  %v4715_v15 = vld [vmem:[%s6326_s0 + $0x154] ss:$72 sps:$4 sm:$0xff]   ;;  %v4692_v17 = vld [vmem:[%s6325_s1 + $0x730] ss:$8 sps:$4 sm:$0xff]  }
  0xa3   :  { %3098 = vmatmul.mubr.bf16.gmra.mrb[16].mxu0 %v4622_v18  ;;  %2733 = vmatpush1.bf16.msra.mxu1 %v4595_v16  ;;  %v4689_v16 = vld [vmem:[%s6325_s1 + $0x330] ss:$8 sps:$4 sm:$0xff]   ;;  %v4702_v18 = vld [vmem:[%s6325_s1 + $0x344] ss:$8 sps:$4 sm:$0xff]  }
  0xa4   :  { %3145 = vmatpush1.bf16.msra.mxu0 %v4600_v19  ;;  %2734 = vmatprep.subr.bf16.mxu1 %v4607_v20  ;;  %v4706_v19 = vld [vmem:[%s6325_s1 + $0x744] ss:$8 sps:$4 sm:$0xff]   ;;  %v4700_v20 = vld [vmem:[%s6325_s1 + $0x340] ss:$8 sps:$4 sm:$0xff]  }
  0xa5   :  { %3146 = vmatprep.subr.bf16.mxu0 %v4610_v21  ;;  %2695 = vmatprep.mubr.bf16.mxu1 %v4629_v22  ;;  %v4704_v21 = vld [vmem:[%s6325_s1 + $0x740] ss:$8 sps:$4 sm:$0xff]   ;;  %v4717_v22 = vld [vmem:[%s6326_s0 + $0x130] ss:$72 sps:$4 sm:$0xff]  }
  0xa6   :  { %3107 = vmatprep.mubr.bf16.mxu0 %v4634_v23  ;;  %v4721_v23 = vld [vmem:[%s6326_s0 + $0x150] ss:$72 sps:$4 sm:$0xff]  }
  0xa7   :  { %2735 = vmatpush1.bf16.msra.mxu1 %v4605_v24  ;;  %v4709_v24 = vld [vmem:[%s6325_s1 + $0x354] ss:$8 sps:$4 sm:$0xff]  }
  0xa8   :  { %3147 = vmatpush1.bf16.msra.mxu0 %v4608_v25  ;;  %2736 = vmatprep.subr.bf16.mxu1 %v4615_v26  ;;  %v4712_v25 = vld [vmem:[%s6325_s1 + $0x754] ss:$8 sps:$4 sm:$0xff]   ;;  %v4731_v26 = vld [vmem:[%s6326_s0 + $0x1c4] ss:$72 sps:$4 sm:$0xff]  }
  0xa9   :  { %3148 = vmatprep.subr.bf16.mxu0 %v4620_v27  ;;  %v4733_v27 = vld [vmem:[%s6326_s0 + $0x1e4] ss:$72 sps:$4 sm:$0xff]  }
  0xaa   :  { %2696 = vmatmul.mubr.bf16.gmra.mrb[20].mxu1 %v4639_v30  ;;  %v4720_v30 = vld [vmem:[%s6325_s1 + $0x364] ss:$8 sps:$4 sm:$0xff]  }
  0xab   :  { %3108 = vmatmul.mubr.bf16.gmra.mrb[20].mxu0 %v4640_v31  ;;  %2737 = vmatpush1.bf16.msra.mxu1 %v4613_v28  ;;  %v4707_v28 = vld [vmem:[%s6325_s1 + $0x350] ss:$8 sps:$4 sm:$0xff]   ;;  %v4724_v31 = vld [vmem:[%s6325_s1 + $0x764] ss:$8 sps:$4 sm:$0xff]  }
  0xac   :  { %3149 = vmatpush1.bf16.msra.mxu0 %v4618_v29  ;;  %2738 = vmatprep.subr.bf16.mxu1 %v4625_v32  ;;  %v4710_v29 = vld [vmem:[%s6325_s1 + $0x750] ss:$8 sps:$4 sm:$0xff]   ;;  %v4718_v32 = vld [vmem:[%s6325_s1 + $0x360] ss:$8 sps:$4 sm:$0xff]  }
  0xad   :  { %3150 = vmatprep.subr.bf16.mxu0 %v4628_v33  ;;  %2705 = vmatprep.mubr.bf16.mxu1 %v4647_v34  ;;  %v4722_v33 = vld [vmem:[%s6325_s1 + $0x760] ss:$8 sps:$4 sm:$0xff]  }
  0xae   :  { %3117 = vmatprep.mubr.bf16.mxu0 %v4652_v35  ;;  %v4735_v34 = vld [vmem:[%s6326_s0 + $0x1c0] ss:$72 sps:$4 sm:$0xff]  }
  0xaf   :  { %2739 = vmatpush1.bf16.msra.mxu1 %v4623_v36  ;;  %v4739_v35 = vld [vmem:[%s6326_s0 + $0x1e0] ss:$72 sps:$4 sm:$0xff]   ;;  %v4727_v36 = vld [vmem:[%s6325_s1 + $0x374] ss:$8 sps:$4 sm:$0xff]  }
  0xb0   :  { %3151 = vmatpush1.bf16.msra.mxu0 %v4626_v37  ;;  %2740 = vmatprep.subr.bf16.mxu1 %v4633_v38  ;;  %v4730_v37 = vld [vmem:[%s6325_s1 + $0x774] ss:$8 sps:$4 sm:$0xff]  }
  0xb1   :  { %3152 = vmatprep.subr.bf16.mxu0 %v4638_v39  ;;  %v4749_v38 = vld [vmem:[%s6326_s0 + $0x254] ss:$72 sps:$4 sm:$0xff]  }
  0xb2   :  { %2706 = vmatmul.mubr.bf16.gmra.mrb[24].mxu1 %v4657_v42  ;;  %v4751_v39 = vld [vmem:[%s6326_s0 + $0x274] ss:$72 sps:$4 sm:$0xff]   ;;  %v4738_v42 = vld [vmem:[%s6325_s1 + $0x384] ss:$8 sps:$4 sm:$0xff]  }
  0xb3   :  { %3118 = vmatmul.mubr.bf16.gmra.mrb[24].mxu0 %v4658_v43  ;;  %2741 = vmatpush1.bf16.msra.mxu1 %v4631_v40  ;;  %v4725_v40 = vld [vmem:[%s6325_s1 + $0x370] ss:$8 sps:$4 sm:$0xff]   ;;  %v4742_v43 = vld [vmem:[%s6325_s1 + $0x784] ss:$8 sps:$4 sm:$0xff]  }
  0xb4   :  { %3153 = vmatpush1.bf16.msra.mxu0 %v4636_v41  ;;  %2742 = vmatprep.subr.bf16.mxu1 %v4643_v44  ;;  %v4728_v41 = vld [vmem:[%s6325_s1 + $0x770] ss:$8 sps:$4 sm:$0xff]   ;;  %v4736_v44 = vld [vmem:[%s6325_s1 + $0x380] ss:$8 sps:$4 sm:$0xff]  }
  0xb5   :  { %3154 = vmatprep.subr.bf16.mxu0 %v4646_v45  ;;  %2748 = vmatprep.mubr.bf16.mxu1 %v4667_v46  ;;  %v4740_v45 = vld [vmem:[%s6325_s1 + $0x780] ss:$8 sps:$4 sm:$0xff]   ;;  %v4753_v46 = vld [vmem:[%s6326_s0 + $0x250] ss:$72 sps:$4 sm:$0xff]  }
  0xb6   :  { %3160 = vmatprep.mubr.bf16.mxu0 %v4673_v47  ;;  %v4757_v47 = vld [vmem:[%s6326_s0 + $0x270] ss:$72 sps:$4 sm:$0xff]  }
  0xb7   :  { %2743 = vmatpush1.bf16.msra.mxu1 %v4641_v48  ;;  %v4745_v48 = vld [vmem:[%s6325_s1 + $0x394] ss:$8 sps:$4 sm:$0xff]  }
  0xb8   :  { %3155 = vmatpush1.bf16.msra.mxu0 %v4644_v49  ;;  %2744 = vmatprep.subr.bf16.mxu1 %v4651_v50  ;;  %v4748_v49 = vld [vmem:[%s6325_s1 + $0x794] ss:$8 sps:$4 sm:$0xff]   ;;  %v4767_v50 = vld [vmem:[%s6326_s0 + $0x2e4] ss:$72 sps:$4 sm:$0xff]  }
  0xb9   :  { %3156 = vmatprep.subr.bf16.mxu0 %v4656_v51  ;;  %v4769_v51 = vld [vmem:[%s6326_s0 + $0x304] ss:$72 sps:$4 sm:$0xff]  }
  0xbb   :  { %2745 = vmatpush1.bf16.msra.mxu1 %v4649_v52  ;;  %v4743_v52 = vld [vmem:[%s6325_s1 + $0x390] ss:$8 sps:$4 sm:$0xff]  }
  0xbc   :  { %3157 = vmatpush1.bf16.msra.mxu0 %v4654_v53  ;;  %2746 = vmatprep.subr.bf16.mxu1 %v4661_v54  ;;  %v4746_v53 = vld [vmem:[%s6325_s1 + $0x790] ss:$8 sps:$4 sm:$0xff]   ;;  %v4756_v54 = vld [vmem:[%s6325_s1 + $0x3a4] ss:$8 sps:$4 sm:$0xff]  }
  0xbd   :  { %3158 = vmatprep.subr.bf16.mxu0 %v4664_v55  ;;  %v4760_v55 = vld [vmem:[%s6325_s1 + $0x7a4] ss:$8 sps:$4 sm:$0xff]  }
  0xbf   :  { %2747 = vmatpush1.bf16.msra.mxu1 %v4659_v56  ;;  %v4754_v56 = vld [vmem:[%s6325_s1 + $0x3a0] ss:$8 sps:$4 sm:$0xff]  }
  0xc0   :  { %3159 = vmatpush1.bf16.msra.mxu0 %v4662_v57  ;;  %2819 = vmatprep.subr.bf16.mxu1 %v4670_v58  ;;  %v4758_v57 = vld [vmem:[%s6325_s1 + $0x7a0] ss:$8 sps:$4 sm:$0xff]  }
  0xc1   :  { %3231 = vmatprep.subr.bf16.mxu0 %v4676_v59  ;;  %v4771_v58 = vld [vmem:[%s6326_s0 + $0x2e0] ss:$72 sps:$4 sm:$0xff]  }
  0xc2   :  { %2749 = vmatmul.mubr.bf16.vlgmr.msra.gmra.mrb[0].mxu1 %v4665_v60  ;;  %v4775_v59 = vld [vmem:[%s6326_s0 + $0x300] ss:$72 sps:$4 sm:$0xff]   ;;  %v4763_v60 = vld [vmem:[%s6325_s1 + $0x3b4] ss:$8 sps:$4 sm:$0xff]  }
  0xc3   :  { %3161 = vmatmul.mubr.bf16.vlgmr.msra.gmra.mrb[0].mxu0 %v4671_v62  ;;  %2820 = vmatpush1.bf16.msra.mxu1 %v4668_v61  ;;  %v4766_v61 = vld [vmem:[%s6325_s1 + $0x7b4] ss:$8 sps:$4 sm:$0xff]  }
  0xc4   :  { %3232 = vmatpush1.bf16.msra.mxu0 %v4674_v63  ;;  %2821 = vmatprep.subr.bf16.mxu1 %v4679_v0  ;;  %v4785_v62 = vld [vmem:[%s6326_s0 + $0x374] ss:$72 sps:$4 sm:$0xff]   ;;  %v4761_v0 = vld [vmem:[%s6325_s1 + $0x3b0] ss:$8 sps:$4 sm:$0xff]  }
  0xc5   :  { %3233 = vmatprep.subr.bf16.mxu0 %v4682_v1  ;;  %2758 = vmatprep.mubr.bf16.mxu1 %v4695_v2  ;;  %v4787_v63 = vld [vmem:[%s6326_s0 + $0x394] ss:$72 sps:$4 sm:$0xff]   ;;  %v4764_v1 = vld [vmem:[%s6325_s1 + $0x7b0] ss:$8 sps:$4 sm:$0xff]   ;;  %v4774_v2 = vld [vmem:[%s6325_s1 + $0x3c4] ss:$8 sps:$4 sm:$0xff]  }
  0xc6   :  { %3170 = vmatprep.mubr.bf16.mxu0 %v4697_v3  ;;  %v4778_v3 = vld [vmem:[%s6325_s1 + $0x7c4] ss:$8 sps:$4 sm:$0xff]  }
  0xc7   :  { %2822 = vmatpush1.bf16.msra.mxu1 %v4677_v4  ;;  %v4772_v4 = vld [vmem:[%s6325_s1 + $0x3c0] ss:$8 sps:$4 sm:$0xff]  }
  0xc8   :  { %3234 = vmatpush1.bf16.msra.mxu0 %v4680_v5  ;;  %2823 = vmatprep.subr.bf16.mxu1 %v4685_v6  ;;  %v4776_v5 = vld [vmem:[%s6325_s1 + $0x7c0] ss:$8 sps:$4 sm:$0xff]   ;;  %v4789_v6 = vld [vmem:[%s6326_s0 + $0x370] ss:$72 sps:$4 sm:$0xff]  }
  0xc9   :  { %3235 = vmatprep.subr.bf16.mxu0 %v4688_v7  ;;  %v4793_v7 = vld [vmem:[%s6326_s0 + $0x390] ss:$72 sps:$4 sm:$0xff]  }
  0xca   :  { %2759 = vmatmul.mubr.bf16.gmra.mrb[4].mxu1 %v4699_v10  ;;  %v4805_v10 = vld [vmem:[%s6326_s0 + $0x1c] ss:$72 sps:$4 sm:$0xff]  }
  0xcb   :  { %3171 = vmatmul.mubr.bf16.gmra.mrb[4].mxu0 %v4703_v11  ;;  %2824 = vmatpush1.bf16.msra.mxu1 %v4683_v8  ;;  %v4781_v8 = vld [vmem:[%s6325_s1 + $0x3d4] ss:$8 sps:$4 sm:$0xff]  }
  0xcc   :  { %3236 = vmatpush1.bf16.msra.mxu0 %v4686_v9  ;;  %2825 = vmatprep.subr.bf16.mxu1 %v4691_v12  ;;  %v4784_v9 = vld [vmem:[%s6325_s1 + $0x7d4] ss:$8 sps:$4 sm:$0xff]   ;;  %v4779_v12 = vld [vmem:[%s6325_s1 + $0x3d0] ss:$8 sps:$4 sm:$0xff]  }
  0xcd   :  { %3237 = vmatprep.subr.bf16.mxu0 %v4694_v13  ;;  %2768 = vmatprep.mubr.bf16.mxu1 %v4713_v14  ;;  %v4808_v11 = vld [vmem:[%s6326_s0 + $0x3c] ss:$72 sps:$4 sm:$0xff]   ;;  %v4782_v13 = vld [vmem:[%s6325_s1 + $0x7d0] ss:$8 sps:$4 sm:$0xff]  }
  0xce   :  { %3180 = vmatprep.mubr.bf16.mxu0 %v4715_v15  ;;  %v4792_v14 = vld [vmem:[%s6325_s1 + $0x3e4] ss:$8 sps:$4 sm:$0xff]  }
  0xcf   :  { %2826 = vmatpush1.bf16.msra.mxu1 %v4689_v16  ;;  %v4796_v15 = vld [vmem:[%s6325_s1 + $0x7e4] ss:$8 sps:$4 sm:$0xff]   ;;  %v4790_v16 = vld [vmem:[%s6325_s1 + $0x3e0] ss:$8 sps:$4 sm:$0xff]  }
  0xd0   :  { %3238 = vmatpush1.bf16.msra.mxu0 %v4692_v17  ;;  %2827 = vmatprep.subr.bf16.mxu1 %v4702_v18  ;;  %v4794_v17 = vld [vmem:[%s6325_s1 + $0x7e0] ss:$8 sps:$4 sm:$0xff]   ;;  %v4799_v18 = vld [vmem:[%s6325_s1 + $0x3f4] ss:$8 sps:$4 sm:$0xff]  }
  0xd1   :  { %3239 = vmatprep.subr.bf16.mxu0 %v4706_v19  ;;  %v4802_v19 = vld [vmem:[%s6325_s1 + $0x7f4] ss:$8 sps:$4 sm:$0xff]  }
  0xd2   :  { %2769 = vmatmul.mubr.bf16.gmra.mrb[8].mxu1 %v4717_v22  ;;  %v4811_v22 = vld [vmem:[%s6325_s1 + $0x804] ss:$8 sps:$4 sm:$0xff]  }
  0xd3   :  { %3181 = vmatmul.mubr.bf16.gmra.mrb[8].mxu0 %v4721_v23  ;;  %2828 = vmatpush1.bf16.msra.mxu1 %v4700_v20  ;;  %v4797_v20 = vld [vmem:[%s6325_s1 + $0x3f0] ss:$8 sps:$4 sm:$0xff]  }
  0xd4   :  { %3240 = vmatpush1.bf16.msra.mxu0 %v4704_v21  ;;  %2829 = vmatprep.subr.bf16.mxu1 %v4709_v24  ;;  %v4800_v21 = vld [vmem:[%s6325_s1 + $0x7f0] ss:$8 sps:$4 sm:$0xff]  }
  0xd5   :  { %3241 = vmatprep.subr.bf16.mxu0 %v4712_v25  ;;  %2778 = vmatprep.mubr.bf16.mxu1 %v4731_v26  ;;  %v4803_v23 = vld [vmem:[%s6326_s0 + $0x18] ss:$72 sps:$4 sm:$0xff]   ;;  %v4814_v26 = vld [vmem:[%s6325_s1 + $0x814] ss:$8 sps:$4 sm:$0xff]  }
  0xd6   :  { %3190 = vmatprep.mubr.bf16.mxu0 %v4733_v27  ;;  %v4806_v24 = vld [vmem:[%s6326_s0 + $0x38] ss:$72 sps:$4 sm:$0xff]   ;;  %v4815_v27 = vld [vmem:[%s6326_s0 + $0xac] ss:$72 sps:$4 sm:$0xff]  }
  0xd7   :  { %2830 = vmatpush1.bf16.msra.mxu1 %v4707_v28  ;;  %v4809_v25 = vld [vmem:[%s6325_s1 + $0x800] ss:$8 sps:$4 sm:$0xff]   ;;  %v4817_v28 = vld [vmem:[%s6326_s0 + $0xcc] ss:$72 sps:$4 sm:$0xff]  }
  0xd8   :  { %3242 = vmatpush1.bf16.msra.mxu0 %v4710_v29  ;;  %2831 = vmatprep.subr.bf16.mxu1 %v4720_v30  ;;  %v4812_v29 = vld [vmem:[%s6325_s1 + $0x810] ss:$8 sps:$4 sm:$0xff]   ;;  %v4823_v30 = vld [vmem:[%s6325_s1 + $0x824] ss:$8 sps:$4 sm:$0xff]  }
  0xd9   :  { %3243 = vmatprep.subr.bf16.mxu0 %v4724_v31  ;;  %v4819_v31 = vld [vmem:[%s6326_s0 + $0xa8] ss:$72 sps:$4 sm:$0xff]  }
  0xda   :  { %2779 = vmatmul.mubr.bf16.gmra.mrb[12].mxu1 %v4735_v34  ;;  %v4826_v34 = vld [vmem:[%s6325_s1 + $0x834] ss:$8 sps:$4 sm:$0xff]  }
  0xdb   :  { %3191 = vmatmul.mubr.bf16.gmra.mrb[12].mxu0 %v4739_v35  ;;  %2832 = vmatpush1.bf16.msra.mxu1 %v4718_v32  ;;  %v4820_v32 = vld [vmem:[%s6326_s0 + $0xc8] ss:$72 sps:$4 sm:$0xff]   ;;  %v4827_v35 = vld [vmem:[%s6326_s0 + $0x13c] ss:$72 sps:$4 sm:$0xff]  }
  0xdc   :  { %3244 = vmatpush1.bf16.msra.mxu0 %v4722_v33  ;;  %2833 = vmatprep.subr.bf16.mxu1 %v4727_v36  ;;  %v4821_v33 = vld [vmem:[%s6325_s1 + $0x820] ss:$8 sps:$4 sm:$0xff]   ;;  %v4829_v36 = vld [vmem:[%s6326_s0 + $0x15c] ss:$72 sps:$4 sm:$0xff]  }
  0xdd   :  { %3245 = vmatprep.subr.bf16.mxu0 %v4730_v37  ;;  %2788 = vmatprep.mubr.bf16.mxu1 %v4749_v38  ;;  %v4824_v37 = vld [vmem:[%s6325_s1 + $0x830] ss:$8 sps:$4 sm:$0xff]   ;;  %v4835_v38 = vld [vmem:[%s6325_s1 + $0x844] ss:$8 sps:$4 sm:$0xff]  }
  0xde   :  { %3200 = vmatprep.mubr.bf16.mxu0 %v4751_v39  ;;  %v4831_v39 = vld [vmem:[%s6326_s0 + $0x138] ss:$72 sps:$4 sm:$0xff]  }
  0xdf   :  { %2834 = vmatpush1.bf16.msra.mxu1 %v4725_v40  ;;  %v4832_v40 = vld [vmem:[%s6326_s0 + $0x158] ss:$72 sps:$4 sm:$0xff]  }
  0xe0   :  { %3246 = vmatpush1.bf16.msra.mxu0 %v4728_v41  ;;  %2835 = vmatprep.subr.bf16.mxu1 %v4738_v42  ;;  %v4833_v41 = vld [vmem:[%s6325_s1 + $0x840] ss:$8 sps:$4 sm:$0xff]   ;;  %v4838_v42 = vld [vmem:[%s6325_s1 + $0x854] ss:$8 sps:$4 sm:$0xff]  }
  0xe1   :  { %3247 = vmatprep.subr.bf16.mxu0 %v4742_v43  ;;  %v4839_v43 = vld [vmem:[%s6326_s0 + $0x1cc] ss:$72 sps:$4 sm:$0xff]  }
  0xe2   :  { %2789 = vmatmul.mubr.bf16.gmra.mrb[16].mxu1 %v4753_v46  ;;  %v4847_v46 = vld [vmem:[%s6325_s1 + $0x864] ss:$8 sps:$4 sm:$0xff]  }
  0xe3   :  { %3201 = vmatmul.mubr.bf16.gmra.mrb[16].mxu0 %v4757_v47  ;;  %2836 = vmatpush1.bf16.msra.mxu1 %v4736_v44  ;;  %v4841_v44 = vld [vmem:[%s6326_s0 + $0x1ec] ss:$72 sps:$4 sm:$0xff]   ;;  %v4843_v47 = vld [vmem:[%s6326_s0 + $0x1c8] ss:$72 sps:$4 sm:$0xff]  }
  0xe4   :  { %3248 = vmatpush1.bf16.msra.mxu0 %v4740_v45  ;;  %2837 = vmatprep.subr.bf16.mxu1 %v4745_v48  ;;  %v4836_v45 = vld [vmem:[%s6325_s1 + $0x850] ss:$8 sps:$4 sm:$0xff]  }
  0xe5   :  { %3249 = vmatprep.subr.bf16.mxu0 %v4748_v49  ;;  %2798 = vmatprep.mubr.bf16.mxu1 %v4767_v50  ;;  %v4844_v48 = vld [vmem:[%s6326_s0 + $0x1e8] ss:$72 sps:$4 sm:$0xff]   ;;  %v4850_v50 = vld [vmem:[%s6325_s1 + $0x874] ss:$8 sps:$4 sm:$0xff]  }
  0xe6   :  { %3210 = vmatprep.mubr.bf16.mxu0 %v4769_v51  ;;  %v4845_v49 = vld [vmem:[%s6325_s1 + $0x860] ss:$8 sps:$4 sm:$0xff]   ;;  %v4851_v51 = vld [vmem:[%s6326_s0 + $0x25c] ss:$72 sps:$4 sm:$0xff]  }
  0xe7   :  { %2838 = vmatpush1.bf16.msra.mxu1 %v4743_v52  ;;  %v4853_v52 = vld [vmem:[%s6326_s0 + $0x27c] ss:$72 sps:$4 sm:$0xff]  }
  0xe8   :  { %3250 = vmatpush1.bf16.msra.mxu0 %v4746_v53  ;;  %2839 = vmatprep.subr.bf16.mxu1 %v4756_v54  ;;  %v4848_v53 = vld [vmem:[%s6325_s1 + $0x870] ss:$8 sps:$4 sm:$0xff]   ;;  %v4859_v54 = vld [vmem:[%s6325_s1 + $0x884] ss:$8 sps:$4 sm:$0xff]  }
  0xe9   :  { %3251 = vmatprep.subr.bf16.mxu0 %v4760_v55  ;;  %v4855_v55 = vld [vmem:[%s6326_s0 + $0x258] ss:$72 sps:$4 sm:$0xff]  }
  0xea   :  { %2799 = vmatmul.mubr.bf16.gmra.mrb[20].mxu1 %v4771_v58  ;;  %v4862_v58 = vld [vmem:[%s6325_s1 + $0x894] ss:$8 sps:$4 sm:$0xff]  }
  0xeb   :  { %3211 = vmatmul.mubr.bf16.gmra.mrb[20].mxu0 %v4775_v59  ;;  %2840 = vmatpush1.bf16.msra.mxu1 %v4754_v56  ;;  %v4856_v56 = vld [vmem:[%s6326_s0 + $0x278] ss:$72 sps:$4 sm:$0xff]   ;;  %v4863_v59 = vld [vmem:[%s6326_s0 + $0x2ec] ss:$72 sps:$4 sm:$0xff]  }
  0xec   :  { %3252 = vmatpush1.bf16.msra.mxu0 %v4758_v57  ;;  %2841 = vmatprep.subr.bf16.mxu1 %v4763_v60  ;;  %v4857_v57 = vld [vmem:[%s6325_s1 + $0x880] ss:$8 sps:$4 sm:$0xff]   ;;  %v4865_v60 = vld [vmem:[%s6326_s0 + $0x30c] ss:$72 sps:$4 sm:$0xff]  }
  0xed   :  { %3253 = vmatprep.subr.bf16.mxu0 %v4766_v61  ;;  %2808 = vmatprep.mubr.bf16.mxu1 %v4785_v62  ;;  %v4860_v61 = vld [vmem:[%s6325_s1 + $0x890] ss:$8 sps:$4 sm:$0xff]   ;;  %v4871_v62 = vld [vmem:[%s6325_s1 + $0x8a4] ss:$8 sps:$4 sm:$0xff]  }
  0xee   :  { %3220 = vmatprep.mubr.bf16.mxu0 %v4787_v63  ;;  %v4867_v63 = vld [vmem:[%s6326_s0 + $0x2e8] ss:$72 sps:$4 sm:$0xff]  }
  0xef   :  { %2842 = vmatpush1.bf16.msra.mxu1 %v4761_v0  ;;  %v4868_v0 = vld [vmem:[%s6326_s0 + $0x308] ss:$72 sps:$4 sm:$0xff]  }
  0xf0   :  { %3254 = vmatpush1.bf16.msra.mxu0 %v4764_v1  ;;  %2843 = vmatprep.subr.bf16.mxu1 %v4774_v2  ;;  %v4869_v1 = vld [vmem:[%s6325_s1 + $0x8a0] ss:$8 sps:$4 sm:$0xff]   ;;  %v4874_v2 = vld [vmem:[%s6325_s1 + $0x8b4] ss:$8 sps:$4 sm:$0xff]  }
  0xf1   :  { %3255 = vmatprep.subr.bf16.mxu0 %v4778_v3  ;;  %v4875_v3 = vld [vmem:[%s6326_s0 + $0x37c] ss:$72 sps:$4 sm:$0xff]  }
  0xf2   :  { %2809 = vmatmul.mubr.bf16.gmra.mrb[24].mxu1 %v4789_v6  ;;  %v4883_v6 = vld [vmem:[%s6325_s1 + $0x8c4] ss:$8 sps:$4 sm:$0xff]  }
  0xf3   :  { %3221 = vmatmul.mubr.bf16.gmra.mrb[24].mxu0 %v4793_v7  ;;  %2844 = vmatpush1.bf16.msra.mxu1 %v4772_v4  ;;  %v4877_v4 = vld [vmem:[%s6326_s0 + $0x39c] ss:$72 sps:$4 sm:$0xff]   ;;  %v4879_v7 = vld [vmem:[%s6326_s0 + $0x378] ss:$72 sps:$4 sm:$0xff]  }
  0xf4   :  { %3256 = vmatpush1.bf16.msra.mxu0 %v4776_v5  ;;  %2845 = vmatprep.subr.bf16.mxu1 %v4781_v8  ;;  %v4872_v5 = vld [vmem:[%s6325_s1 + $0x8b0] ss:$8 sps:$4 sm:$0xff]  }
  0xf5   :  { %3257 = vmatprep.subr.bf16.mxu0 %v4784_v9  ;;  %2851 = vmatprep.mubr.bf16.mxu1 %v4805_v10  ;;  %v4880_v8 = vld [vmem:[%s6326_s0 + $0x398] ss:$72 sps:$4 sm:$0xff]   ;;  %v4886_v10 = vld [vmem:[%s6325_s1 + $0x8d4] ss:$8 sps:$4 sm:$0xff]  }
  0xf6   :  { %3263 = vmatprep.mubr.bf16.mxu0 %v4808_v11  ;;  %v4881_v9 = vld [vmem:[%s6325_s1 + $0x8c0] ss:$8 sps:$4 sm:$0xff]   ;;  %v4895_v11 = vld [vmem:[%s6326_s0 + $0x44] ss:$72 sps:$4 sm:$0xff]  }
  0xf7   :  { %2846 = vmatpush1.bf16.msra.mxu1 %v4779_v12  ;;  %v4898_v12 = vld [vmem:[%s6326_s0 + $0x284] ss:$72 sps:$4 sm:$0xff]  }
  0xf8   :  { %3258 = vmatpush1.bf16.msra.mxu0 %v4782_v13  ;;  %2847 = vmatprep.subr.bf16.mxu1 %v4792_v14  ;;  %v4884_v13 = vld [vmem:[%s6325_s1 + $0x8d0] ss:$8 sps:$4 sm:$0xff]   ;;  %v4889_v14 = vld [vmem:[%s6325_s1 + $0x8e4] ss:$8 sps:$4 sm:$0xff]  }
  0xf9   :  { %3259 = vmatprep.subr.bf16.mxu0 %v4796_v15  ;;  %v4887_v15 = vld [vmem:[%s6325_s1 + $0x8e0] ss:$8 sps:$4 sm:$0xff]  }
  0xfb   :  { %2848 = vmatpush1.bf16.msra.mxu1 %v4790_v16  ;;  %v4892_v16 = vld [vmem:[%s6325_s1 + $0x8f4] ss:$8 sps:$4 sm:$0xff]  }
  0xfc   :  { %3260 = vmatpush1.bf16.msra.mxu0 %v4794_v17  ;;  %2849 = vmatprep.subr.bf16.mxu1 %v4799_v18  ;;  %v4890_v17 = vld [vmem:[%s6325_s1 + $0x8f0] ss:$8 sps:$4 sm:$0xff]   ;;  %v4893_v18 = vld [vmem:[%s6326_s0 + $0x40] ss:$72 sps:$4 sm:$0xff]  }
  0xfd   :  { %3261 = vmatprep.subr.bf16.mxu0 %v4802_v19  ;;  %v4896_v19 = vld [vmem:[%s6326_s0 + $0x280] ss:$72 sps:$4 sm:$0xff]  }
  0xff   :  { %2850 = vmatpush1.bf16.msra.mxu1 %v4797_v20  ;;  %v4899_v20 = vld [vmem:[%s6326_s0 + $0xd4] ss:$72 sps:$4 sm:$0xff]  }
 0x100   :  { %3262 = vmatpush1.bf16.msra.mxu0 %v4800_v21  ;;  %4009 = vmatprep.subr.bf16.mxu1 %v4811_v22  ;;  %v4901_v21 = vld [vmem:[%s6326_s0 + $0x314] ss:$72 sps:$4 sm:$0xff]  }
 0x101   :  { %3334 = vmatprep.subr.bf16.mxu0 %v4811_v22  ;;  %v4903_v22 = vld [vmem:[%s6326_s0 + $0xd0] ss:$72 sps:$4 sm:$0xff]  }
 0x102   :  { %2852 = vmatmul.mubr.bf16.vlgmr.msra.gmra.mrb[0].mxu1 %v4803_v23  ;;  %v4904_v23 = vld [vmem:[%s6326_s0 + $0x310] ss:$72 sps:$4 sm:$0xff]  }
 0x103   :  { %3264 = vmatmul.mubr.bf16.vlgmr.msra.gmra.mrb[0].mxu0 %v4806_v24  ;;  %4025 = vmatpush1.bf16.msra.mxu1 %v4809_v25  ;;  %v4905_v24 = vld [vmem:[%s6326_s0 + $0x164] ss:$72 sps:$4 sm:$0xff]  }
 0x104   :  { %3335 = vmatpush1.bf16.msra.mxu0 %v4809_v25  ;;  %4010 = vmatprep.subr.bf16.mxu1 %v4814_v26  ;;  %v4907_v25 = vld [vmem:[%s6326_s0 + $0x3a4] ss:$72 sps:$4 sm:$0xff]  }
 0x105   :  { %3336 = vmatprep.subr.bf16.mxu0 %v4814_v26  ;;  %2861 = vmatprep.mubr.bf16.mxu1 %v4815_v27  ;;  %v4909_v26 = vld [vmem:[%s6326_s0 + $0x160] ss:$72 sps:$4 sm:$0xff]  }
 0x106   :  { %3273 = vmatprep.mubr.bf16.mxu0 %v4817_v28  ;;  %v4910_v27 = vld [vmem:[%s6326_s0 + $0x3a0] ss:$72 sps:$4 sm:$0xff]   ;;  %v4911_v28 = vld [vmem:[%s6326_s0 + $0x1f4] ss:$72 sps:$4 sm:$0xff]  }
 0x107   :  { %4026 = vmatpush1.bf16.msra.mxu1 %v4812_v29 }
 0x108   :  { %3337 = vmatpush1.bf16.msra.mxu0 %v4812_v29  ;;  %4011 = vmatprep.subr.bf16.mxu1 %v4823_v30  ;;  %v4913_v29 = vld [vmem:[%s6326_s0 + $0x1f0] ss:$72 sps:$4 sm:$0xff]  }
 0x109   :  { %3338 = vmatprep.subr.bf16.mxu0 %v4823_v30 }
 0x10a   :  { %2862 = vmatmul.mubr.bf16.gmra.mrb[4].mxu1 %v4819_v31 }
 0x10b   :  { %3274 = vmatmul.mubr.bf16.gmra.mrb[4].mxu0 %v4820_v32  ;;  %4027 = vmatpush1.bf16.msra.mxu1 %v4821_v33 }
 0x10c   :  { %3339 = vmatpush1.bf16.msra.mxu0 %v4821_v33  ;;  %4012 = vmatprep.subr.bf16.mxu1 %v4826_v34 }
 0x10d   :  { %3340 = vmatprep.subr.bf16.mxu0 %v4826_v34  ;;  %2871 = vmatprep.mubr.bf16.mxu1 %v4827_v35 }
 0x10e   :  { %3283 = vmatprep.mubr.bf16.mxu0 %v4829_v36 }
 0x10f   :  { %4028 = vmatpush1.bf16.msra.mxu1 %v4824_v37 }
 0x110   :  { %3341 = vmatpush1.bf16.msra.mxu0 %v4824_v37  ;;  %4013 = vmatprep.subr.bf16.mxu1 %v4835_v38 }
 0x111   :  { %3342 = vmatprep.subr.bf16.mxu0 %v4835_v38 }
 0x112   :  { %2872 = vmatmul.mubr.bf16.gmra.mrb[8].mxu1 %v4831_v39 }
 0x113   :  { %3284 = vmatmul.mubr.bf16.gmra.mrb[8].mxu0 %v4832_v40  ;;  %4029 = vmatpush1.bf16.msra.mxu1 %v4833_v41 }
 0x114   :  { %3343 = vmatpush1.bf16.msra.mxu0 %v4833_v41  ;;  %4014 = vmatprep.subr.bf16.mxu1 %v4838_v42  ;;  %v430_v41 = vlaneseq }
 0x115   :  { %3344 = vmatprep.subr.bf16.mxu0 %v4838_v42  ;;  %2881 = vmatprep.mubr.bf16.mxu1 %v4839_v43 }
 0x116   :  { %3293 = vmatprep.mubr.bf16.mxu0 %v4841_v44  ;;  %v431_v43 = vshrl.u32 %v430_v41, 7 }
 0x117   :  { %4030 = vmatpush1.bf16.msra.mxu1 %v4836_v45 }
 0x118   :  { %3345 = vmatpush1.bf16.msra.mxu0 %v4836_v45  ;;  %4015 = vmatprep.subr.bf16.mxu1 %v4847_v46 }
 0x119   :  { %3346 = vmatprep.subr.bf16.mxu0 %v4847_v46 }
 0x11a   :  { %2882 = vmatmul.mubr.bf16.gmra.mrb[12].mxu1 %v4843_v47  ;;  %v432_v47 = vsub.s32 0, %v431_v43 }
 0x11b   :  { %3294 = vmatmul.mubr.bf16.gmra.mrb[12].mxu0 %v4844_v48  ;;  %4031 = vmatpush1.bf16.msra.mxu1 %v4845_v49 }
 0x11c   :  { %3347 = vmatpush1.bf16.msra.mxu0 %v4845_v49  ;;  %4016 = vmatprep.subr.bf16.mxu1 %v4850_v50  ;;  %v428_v49 = vld [vmem:[%s6327_s2] sm:$0x3] }
 0x11d   :  { %3348 = vmatprep.subr.bf16.mxu0 %v4850_v50  ;;  %2891 = vmatprep.mubr.bf16.mxu1 %v4851_v51  ;;  %v436_v50 = vsub.s32 1, %v431_v43  ;;  %v6211_v51 = vrot.slane %v428_v49, %v432_v47 }
 0x11e   :  { %3303 = vmatprep.mubr.bf16.mxu0 %v4853_v52 }
 0x11f   :  { %4032 = vmatpush1.bf16.msra.mxu1 %v4848_v53  ;;  %v6213_v52 = vrot.slane %v428_v49, %v436_v50 }
 0x120   :  { %3349 = vmatpush1.bf16.msra.mxu0 %v4848_v53  ;;  %4017 = vmatprep.subr.bf16.mxu1 %v4859_v54 }
 0x121   :  { %3350 = vmatprep.subr.bf16.mxu0 %v4859_v54 }
 0x122   :  { %2892 = vmatmul.mubr.bf16.gmra.mrb[16].mxu1 %v4855_v55 }
 0x123   :  { %3304 = vmatmul.mubr.bf16.gmra.mrb[16].mxu0 %v4856_v56  ;;  %4033 = vmatpush1.bf16.msra.mxu1 %v4857_v57 }
 0x124   :  { %3351 = vmatpush1.bf16.msra.mxu0 %v4857_v57  ;;  %4018 = vmatprep.subr.bf16.mxu1 %v4862_v58 }
 0x125   :  { %3352 = vmatprep.subr.bf16.mxu0 %v4862_v58  ;;  %2901 = vmatprep.mubr.bf16.mxu1 %v4863_v59 }
 0x126   :  { %3313 = vmatprep.mubr.bf16.mxu0 %v4865_v60 }
 0x127   :  { %4034 = vmatpush1.bf16.msra.mxu1 %v4860_v61 }
 0x128   :  { %3353 = vmatpush1.bf16.msra.mxu0 %v4860_v61  ;;  %4019 = vmatprep.subr.bf16.mxu1 %v4871_v62 }
 0x129   :  { %3354 = vmatprep.subr.bf16.mxu0 %v4871_v62 }
 0x12a   :  { %2902 = vmatmul.mubr.bf16.gmra.mrb[20].mxu1 %v4867_v63 }
 0x12b   :  { %3314 = vmatmul.mubr.bf16.gmra.mrb[20].mxu0 %v4868_v0  ;;  %4035 = vmatpush1.bf16.msra.mxu1 %v4869_v1 }
 0x12c   :  { %3355 = vmatpush1.bf16.msra.mxu0 %v4869_v1  ;;  %4020 = vmatprep.subr.bf16.mxu1 %v4874_v2 }
 0x12d   :  { %3356 = vmatprep.subr.bf16.mxu0 %v4874_v2  ;;  %2911 = vmatprep.mubr.bf16.mxu1 %v4875_v3 }
 0x12e   :  { %3323 = vmatprep.mubr.bf16.mxu0 %v4877_v4 }
 0x12f   :  { %4036 = vmatpush1.bf16.msra.mxu1 %v4872_v5 }
 0x130   :  { %3357 = vmatpush1.bf16.msra.mxu0 %v4872_v5  ;;  %4021 = vmatprep.subr.bf16.mxu1 %v4883_v6 }
 0x131   :  { %3358 = vmatprep.subr.bf16.mxu0 %v4883_v6 }
 0x132   :  { %2912 = vmatmul.mubr.bf16.gmra.mrb[24].mxu1 %v4879_v7 }
 0x133   :  { %3324 = vmatmul.mubr.bf16.gmra.mrb[24].mxu0 %v4880_v8  ;;  %4037 = vmatpush1.bf16.msra.mxu1 %v4881_v9 }
 0x134   :  { %3359 = vmatpush1.bf16.msra.mxu0 %v4881_v9  ;;  %4022 = vmatprep.subr.bf16.mxu1 %v4886_v10 }
 0x135   :  { %3360 = vmatprep.subr.bf16.mxu0 %v4886_v10  ;;  %3366 = vmatprep.mubr.bf16.mxu0 %v4895_v11 }
 0x136   :  { %3406 = vmatprep.mubr.bf16.mxu1 %v4898_v12 }
 0x137   :  { %4038 = vmatpush1.bf16.msra.mxu1 %v4884_v13 }
 0x138   :  { %3361 = vmatpush1.bf16.msra.mxu0 %v4884_v13  ;;  %4023 = vmatprep.subr.bf16.mxu1 %v4889_v14 }
 0x139   :  { %3362 = vmatprep.subr.bf16.mxu0 %v4889_v14 }
 0x13b   :  { %4039 = vmatpush1.bf16.msra.mxu1 %v4887_v15 }
 0x13c   :  { %3363 = vmatpush1.bf16.msra.mxu0 %v4887_v15  ;;  %4024 = vmatprep.subr.bf16.mxu1 %v4892_v16 }
 0x13d   :  { %3364 = vmatprep.subr.bf16.mxu0 %v4892_v16 }
 0x13f   :  { %4040 = vmatpush1.bf16.msra.mxu1 %v4890_v17 }
 0x140   :  { %3365 = vmatpush1.bf16.msra.mxu0 %v4890_v17 }
 0x142   :  { %3407 = vmatmul.mubr.bf16.vlgmr.msra.gmra.mrb[28].mxu1 %v4896_v19 }
 0x143   :  { %3367 = vmatmul.mubr.bf16.vlgmr.msra.gmra.mrb[0].mxu0 %v4893_v18  ;;  %3416 = vmatprep.mubr.bf16.mxu1 %v4901_v21 }
 0x144   :  { %3376 = vmatprep.mubr.bf16.mxu0 %v4899_v20 }
 0x14a   :  { %3417 = vmatmul.mubr.bf16.gmra.mrb[32].mxu1 %v4904_v23 }
 0x14b   :  { %3377 = vmatmul.mubr.bf16.gmra.mrb[4].mxu0 %v4903_v22  ;;  %3426 = vmatprep.mubr.bf16.mxu1 %v4907_v25 }
 0x14c   :  { %3386 = vmatprep.mubr.bf16.mxu0 %v4905_v24 }
 0x152   :  { %3427 = vmatmul.mubr.bf16.gmra.mrb[36].mxu1 %v4910_v27 }
 0x153   :  { %3387 = vmatmul.mubr.bf16.gmra.mrb[8].mxu0 %v4909_v26 }
 0x154   :  { %3396 = vmatprep.mubr.bf16.mxu0 %v4911_v28 }
 0x15b   :  { %3397 = vmatmul.mubr.bf16.gmra.mrb[12].mxu0 %v4913_v29 }
 0x1d5   :  { %v6176_v30 = vpop.f32.mrb[0].mxu1 }
 0x1d6   :  { %v6178_v31 = vpop.f32.mrb[1].mxu1 }
 0x1d7   :  { %v6180_v32 = vpop.f32.mrb[2].mxu1 }
 0x1d8   :  { %v6182_v33 = vpop.f32.mrb[3].mxu1 }
 0x1dd   :  { %v6184_v34 = vpop.f32.mrb[4].mxu1 }
 0x1de   :  { %v6186_v35 = vpop.f32.mrb[5].mxu1 }
 0x1df   :  { %v6188_v36 = vpop.f32.mrb[6].mxu1 }
 0x1e0   :  { %v6190_v37 = vpop.f32.mrb[7].mxu1 }
 0x1e5   :  { %v6192_v38 = vpop.f32.mrb[8].mxu1 }
 0x1e6   :  { %v6194_v39 = vpop.f32.mrb[9].mxu1 }
 0x1e7   :  { %v6196_v40 = vpop.f32.mrb[10].mxu1 }
 0x1e8   :  { %v6198_v42 = vpop.f32.mrb[11].mxu1 }
 0x1ed   :  { %v6200_v44 = vpop.f32.mrb[12].mxu1 }
 0x1ee   :  { %v6202_v45 = vpop.f32.mrb[13].mxu1 }
 0x1ef   :  { %v6204_v46 = vpop.f32.mrb[14].mxu1 }
 0x1f0   :  { %v6206_v48 = vpop.f32.mrb[15].mxu1 }
 0x1f5   :  { %v2893_v53 = vpop.f32.mrb[16].mxu1 }
 0x1f6   :  { %v3305_v54 = vpop.f32.mrb[16].mxu0  ;;  %v4073_v55 = vadd.f32 %v2893_v53, %v6211_v51  ;;  %v2895_v56 = vpop.f32.mrb[17].mxu1 }
 0x1f7   :  { %v3307_v57 = vpop.f32.mrb[17].mxu0  ;;  %v4076_v58 = vadd.f32 %v2895_v56, %v6213_v52  ;;  %v2897_v59 = vpop.f32.mrb[18].mxu1  ;;  %v4043_v56 = vadd.f32 %v6178_v31, %v6213_v52 }
 0x1f8   :  { %v3309_v60 = vpop.f32.mrb[18].mxu0  ;;  %v4074_v61 = vadd.f32 %v4073_v55, %v3305_v54  ;;  %v4079_v62 = vadd.f32 %v2897_v59, %v6211_v51  ;;  %v2899_v63 = vpop.f32.mrb[19].mxu1  ;;  %v4041_v55 = vadd.f32 %v6176_v30, %v6211_v51  ;;  %v4045_v59 = vadd.f32 %v6180_v32, %v6211_v51 }
 0x1f9   :  { %v3311_v0 = vpop.f32.mrb[19].mxu0  ;;  %v4077_v1 = vadd.f32 %v4076_v58, %v3307_v57  ;;  %v4082_v2 = vadd.f32 %v2899_v63, %v6213_v52 }
 0x1fa   :  { %v4080_v3 = vadd.f32 %v4079_v62, %v3309_v60 }
 0x1fb   :  { %v4083_v4 = vadd.f32 %v4082_v2, %v3311_v0  ;;  %v4047_v2 = vadd.f32 %v6182_v33, %v6213_v52 }
 0x1fd   :  { %v2903_v5 = vpop.f32.mrb[20].mxu1 }
 0x1fe   :  { %v3315_v6 = vpop.f32.mrb[20].mxu0  ;;  %v4085_v7 = vadd.f32 %v2903_v5, %v6211_v51  ;;  %v2905_v8 = vpop.f32.mrb[21].mxu1 }
 0x1ff   :  { %v3317_v9 = vpop.f32.mrb[21].mxu0  ;;  %v4088_v10 = vadd.f32 %v2905_v8, %v6213_v52  ;;  %v2907_v11 = vpop.f32.mrb[22].mxu1 }
 0x200   :  { %v3319_v12 = vpop.f32.mrb[22].mxu0  ;;  %v6221_v13 = vadd.f32 %v4085_v7, %v3315_v6  ;;  %v4091_v14 = vadd.f32 %v2907_v11, %v6211_v51  ;;  %v2909_v15 = vpop.f32.mrb[23].mxu1 }
 0x201   :  { %v3321_v16 = vpop.f32.mrb[23].mxu0  ;;  %v6224_v17 = vadd.f32 %v4088_v10, %v3317_v9  ;;  %v4094_v18 = vadd.f32 %v2909_v15, %v6213_v52 }
 0x202   :  { %v6227_v19 = vadd.f32 %v4091_v14, %v3319_v12 }
 0x203   :  { %v6229_v20 = vadd.f32 %v4094_v18, %v3321_v16 }
 0x205   :  { %v2913_v21 = vpop.f32.mrb[24].mxu1 }
 0x206   :  { %v3325_v22 = vpop.f32.mrb[24].mxu0  ;;  %v4097_v23 = vadd.f32 %v2913_v21, %v6211_v51  ;;  %v2915_v24 = vpop.f32.mrb[25].mxu1 }
 0x207   :  { %v3327_v25 = vpop.f32.mrb[25].mxu0  ;;  %v4100_v26 = vadd.f32 %v2915_v24, %v6213_v52  ;;  %v2917_v27 = vpop.f32.mrb[26].mxu1  ;;  %v4051_v24 = vadd.f32 %v6186_v35, %v6213_v52 }
 0x208   :  { %v3329_v28 = vpop.f32.mrb[26].mxu0  ;;  %v6233_v29 = vadd.f32 %v4097_v23, %v3325_v22  ;;  %v4103_v41 = vadd.f32 %v2917_v27, %v6211_v51  ;;  %v2919_v43 = vpop.f32.mrb[27].mxu1  ;;  %v4053_v27 = vadd.f32 %v6188_v36, %v6211_v51 }
 0x209   :  { %v3331_v47 = vpop.f32.mrb[27].mxu0  ;;  %v6236_v49 = vadd.f32 %v4100_v26, %v3327_v25  ;;  %v4106_v50 = vadd.f32 %v2919_v43, %v6213_v52  ;;  %v4055_v43 = vadd.f32 %v6190_v37, %v6213_v52 }
 0x20a   :  { %v6239_v53 = vadd.f32 %v4103_v41, %v3329_v28 }
 0x20b   :  { %v6241_v54 = vadd.f32 %v4106_v50, %v3331_v47 }
 0x215   :  { %v3408_v58 = vpop.f32.mrb[28].mxu1 }
 0x216   :  { %v3368_v57 = vpop.f32.mrb[0].mxu0  ;;  %v4075_v62 = vadd.f32 %v4074_v61, %v3408_v58  ;;  %v3410_v0 = vpop.f32.mrb[29].mxu1 }
 0x217   :  { %v4042_v60 = vadd.f32 %v4041_v55, %v3368_v57  ;;  %v3370_v63 = vpop.f32.mrb[1].mxu0  ;;  %v4078_v6 = vadd.f32 %v4077_v1, %v3410_v0  ;;  %v3412_v8 = vpop.f32.mrb[30].mxu1  ;;  %v4049_v1 = vadd.f32 %v6184_v34, %v6211_v51 }
 0x218   :  { %v4044_v5 = vadd.f32 %v4043_v56, %v3370_v63  ;;  %v3372_v7 = vpop.f32.mrb[2].mxu0  ;;  %v3453_v9 = vmax.f32 %v4075_v62, 0.0  ;;  %v4081_v31 = vadd.f32 %v4080_v3, %v3412_v8  ;;  %v3414_v12 = vpop.f32.mrb[31].mxu1 }
 0x219   :  { %v3437_v30 = vmax.f32 %v4042_v60, 0.0  ;;  %v4046_v10 = vadd.f32 %v4045_v59, %v3372_v7  ;;  %v3374_v11 = vpop.f32.mrb[3].mxu0  ;;  %v3454_v15 = vmax.f32 %v4078_v6, 0.0  ;;  %v4084_v16 = vadd.f32 %v4083_v4, %v3414_v12 }
 0x21a   :  { %v3438_v14 = vmax.f32 %v4044_v5, 0.0  ;;  %v4048_v32 = vadd.f32 %v4047_v2, %v3374_v11  ;;  %v3455_v18 = vmax.f32 %v4081_v31, 0.0  ;;  %v4061_v11 = vadd.f32 %v6196_v40, %v6211_v51 }
 0x21b   :  { %v3439_v61 = vmax.f32 %v4046_v10, 0.0  ;;  %v4003_v22 = vpack.c.bf16 %v3454_v15, %v3453_v9  ;;  %v3456_v33 = vmax.f32 %v4084_v16, 0.0  ;;  %v4059_v9 = vadd.f32 %v6194_v39, %v6213_v52 }
 0x21c   :  { %v3995_v21 = vpack.c.bf16 %v3438_v14, %v3437_v30  ;;  %v3440_v23 = vmax.f32 %v4048_v32, 0.0  ;;  %v4057_v30 = vadd.f32 %v6192_v38, %v6211_v51  ;;  %v4063_v15 = vadd.f32 %v6198_v42, %v6213_v52 }
 0x21d   :  { %3557 = vst [vmem:[%s6328_s3 + $0x40] sm:$0xff] %v4003_v22  ;;  %v4004_v4 = vpack.c.bf16 %v3456_v33, %v3455_v18  ;;  %v3418_v26 = vpop.f32.mrb[32].mxu1 }
 0x21e   :  { %3549 = vst [vmem:[%s6328_s3] sm:$0xff] %v3995_v21  ;;  %v3996_v3 = vpack.c.bf16 %v3440_v23, %v3439_v61  ;;  %v3378_v25 = vpop.f32.mrb[4].mxu0  ;;  %v4087_v34 = vadd.f32 %v6221_v13, %v3418_v26  ;;  %v3420_v35 = vpop.f32.mrb[33].mxu1 }
 0x21f   :  { %v4050_v28 = vadd.f32 %v4049_v1, %v3378_v25  ;;  %v3380_v41 = vpop.f32.mrb[5].mxu0  ;;  %3558 = vst [vmem:[%s6328_s3 + $0x48] sm:$0xff] %v4004_v4  ;;  %v4090_v50 = vadd.f32 %v6224_v17, %v3420_v35  ;;  %v3422_v55 = vpop.f32.mrb[34].mxu1 }
 0x220   :  { %3550 = vst [vmem:[%s6328_s3 + $0x8] sm:$0xff] %v3996_v3  ;;  %v4052_v47 = vadd.f32 %v4051_v24, %v3380_v41  ;;  %v3382_v36 = vpop.f32.mrb[6].mxu0  ;;  %v3457_v13 = vmax.f32 %v4087_v34, 0.0  ;;  %v4093_v58 = vadd.f32 %v6227_v19, %v3422_v55  ;;  %v3424_v37 = vpop.f32.mrb[35].mxu1  ;;  %v4065_v34 = vadd.f32 %v6200_v44, %v6211_v51 }
 0x221   :  { %v3441_v56 = vmax.f32 %v4050_v28, 0.0  ;;  %v4054_v57 = vadd.f32 %v4053_v27, %v3382_v36  ;;  %v3384_v59 = vpop.f32.mrb[7].mxu0  ;;  %v3458_v62 = vmax.f32 %v4090_v50, 0.0  ;;  %v4096_v0 = vadd.f32 %v6229_v20, %v3424_v37 }
 0x222   :  { %v3442_v60 = vmax.f32 %v4052_v47, 0.0  ;;  %v4056_v63 = vadd.f32 %v4055_v43, %v3384_v59  ;;  %v3459_v5 = vmax.f32 %v4093_v58, 0.0  ;;  %v4067_v41 = vadd.f32 %v6202_v45, %v6213_v52 }
 0x223   :  { %v3443_v2 = vmax.f32 %v4054_v57, 0.0  ;;  %v4005_v7 = vpack.c.bf16 %v3458_v62, %v3457_v13  ;;  %v3460_v17 = vmax.f32 %v4096_v0, 0.0  ;;  %v4069_v43 = vadd.f32 %v6204_v46, %v6211_v51 }
 0x224   :  { %v3997_v6 = vpack.c.bf16 %v3442_v60, %v3441_v56  ;;  %v3444_v8 = vmax.f32 %v4056_v63, 0.0  ;;  %v4071_v44 = vadd.f32 %v6206_v48, %v6213_v52 }
 0x225   :  { %3559 = vst [vmem:[%s6328_s3 + $0x50] sm:$0xff] %v4005_v7  ;;  %v4006_v20 = vpack.c.bf16 %v3460_v17, %v3459_v5  ;;  %v3428_v31 = vpop.f32.mrb[36].mxu1 }
 0x226   :  { %3551 = vst [vmem:[%s6328_s3 + $0x10] sm:$0xff] %v3997_v6  ;;  %v3998_v19 = vpack.c.bf16 %v3444_v8, %v3443_v2  ;;  %v3388_v10 = vpop.f32.mrb[8].mxu0  ;;  %v4099_v38 = vadd.f32 %v6233_v29, %v3428_v31  ;;  %v3430_v39 = vpop.f32.mrb[37].mxu1 }
 0x227   :  { %v4058_v12 = vadd.f32 %v4057_v30, %v3388_v10  ;;  %v3390_v14 = vpop.f32.mrb[9].mxu0  ;;  %3560 = vst [vmem:[%s6328_s3 + $0x58] sm:$0xff] %v4006_v20  ;;  %v4102_v16 = vadd.f32 %v6236_v49, %v3430_v39  ;;  %v3432_v61 = vpop.f32.mrb[38].mxu1 }
 0x228   :  { %3552 = vst [vmem:[%s6328_s3 + $0x18] sm:$0xff] %v3998_v19  ;;  %v4060_v32 = vadd.f32 %v4059_v9, %v3390_v14  ;;  %v3392_v40 = vpop.f32.mrb[10].mxu0  ;;  %v3461_v29 = vmax.f32 %v4099_v38, 0.0  ;;  %v4105_v22 = vadd.f32 %v6239_v53, %v3432_v61  ;;  %v3434_v42 = vpop.f32.mrb[39].mxu1 }
 0x229   :  { %v3445_v18 = vmax.f32 %v4058_v12, 0.0  ;;  %v4062_v21 = vadd.f32 %v4061_v11, %v3392_v40  ;;  %v3394_v23 = vpop.f32.mrb[11].mxu0  ;;  %v3462_v1 = vmax.f32 %v4102_v16, 0.0  ;;  %v4108_v3 = vadd.f32 %v6241_v54, %v3434_v42 }
 0x22a   :  { %v3446_v33 = vmax.f32 %v4060_v32, 0.0  ;;  %v4064_v24 = vadd.f32 %v4063_v15, %v3394_v23  ;;  %v3463_v25 = vmax.f32 %v4105_v22, 0.0 }
 0x22b   :  { %v3447_v4 = vmax.f32 %v4062_v21, 0.0  ;;  %v4007_v27 = vpack.c.bf16 %v3462_v1, %v3461_v29  ;;  %v3464_v49 = vmax.f32 %v4108_v3, 0.0 }
 0x22c   :  { %v3999_v26 = vpack.c.bf16 %v3446_v33, %v3445_v18  ;;  %v3448_v28 = vmax.f32 %v4064_v24, 0.0 }
 0x22d   :  { %3561 = vst [vmem:[%s6328_s3 + $0x60] sm:$0xff] %v4007_v27  ;;  %v4008_v54 = vpack.c.bf16 %v3464_v49, %v3463_v25 }
 0x22e   :  { %3553 = vst [vmem:[%s6328_s3 + $0x20] sm:$0xff] %v3999_v26  ;;  %v4000_v53 = vpack.c.bf16 %v3448_v28, %v3447_v4  ;;  %v3398_v35 = vpop.f32.mrb[12].mxu0 }
 0x22f   :  { %v4066_v47 = vadd.f32 %v4065_v34, %v3398_v35  ;;  %v3400_v50 = vpop.f32.mrb[13].mxu0  ;;  %3562 = vst [vmem:[%s6328_s3 + $0x68] sm:$0xff] %v4008_v54 }
 0x230   :  { %3554 = vst [vmem:[%s6328_s3 + $0x28] sm:$0xff] %v4000_v53  ;;  %v4068_v45 = vadd.f32 %v4067_v41, %v3400_v50  ;;  %v3402_v36 = vpop.f32.mrb[14].mxu0 }
 0x231   :  { %v3449_v55 = vmax.f32 %v4066_v47, 0.0  ;;  %v4070_v56 = vadd.f32 %v4069_v43, %v3402_v36  ;;  %v3404_v13 = vpop.f32.mrb[15].mxu0 }
 0x232   :  { %v3450_v57 = vmax.f32 %v4068_v45, 0.0  ;;  %v4072_v46 = vadd.f32 %v4071_v44, %v3404_v13 }
 0x233   :  { %v3451_v51 = vmax.f32 %v4070_v56, 0.0 }
 0x234   :  { %v4001_v58 = vpack.c.bf16 %v3450_v57, %v3449_v55  ;;  %v3452_v59 = vmax.f32 %v4072_v46, 0.0 }
 0x236   :  { %3555 = vst [vmem:[%s6328_s3 + $0x30] sm:$0xff] %v4001_v58  ;;  %v4002_v48 = vpack.c.bf16 %v3452_v59, %v3451_v51 }
 0x238   :  { %3556 = vst [vmem:[%s6328_s3 + $0x38] sm:$0xff] %v4002_v48 }

// kernel: all_cnn_b_forward.9
= control target key start
LH: loop header
LB: loop body
LE: loop exit
PB: predicated region body
PF: predicated region fallthrough
CT: control target
= control target key end

     0   :  { %vm5056_vm0 = vmmov 0   ;;  %vm3623_vm1 = vcmask 654336   ;;  %s6528_s1 = inlined_call_operand.vmem [shape: bf16[2304,256], index: 1, kind: input, shape index: {}]   ;;  %s6529_s0 = inlined_call_operand.vmem [shape: bf16[80,2304], index: 0, kind: input, shape index: {}]   ;;  %s6530_s3 = inlined_call_operand.vmem [shape: bf16[256,256], index: 3, kind: input, shape index: {}]   ;;  %s6531_s5 = inlined_call_operand.vmem [shape: bf16[256,128], index: 5, kind: input, shape index: {}]   ;;  %s6532_s2 = inlined_call_operand.vmem [shape: f32[1,256], index: 2, kind: input, shape index: {}]   ;;  %s6533_s4 = inlined_call_operand.vmem [shape: f32[1,256], index: 4, kind: input, shape index: {}]   ;;  %s6534_s6 = inlined_call_operand.vmem [shape: f32[1,128], index: 6, kind: input, shape index: {}]   ;;  %s6535_s7 = inlined_call_operand.vmem [shape: f32[8,80], index: 7, kind: input, shape index: {}]   ;;  %s6536_s8 = inlined_call_operand.vmem [shape: f32[8,128], index: 8, kind: output, shape index: {}]  }
   0x1   :  { %v4424_v0 = vld [vmem:[%s6528_s1 + $0x4] ss:$8 sps:$4 sm:$0xff]   ;;  %v4428_v2 = vld [vmem:[%s6528_s1] ss:$8 sps:$4 sm:$0xff]   ;;  %v4430_v4 = vld [vmem:[%s6528_s1 + $0x14] ss:$8 sps:$4 sm:$0xff]  }
   0x2   :  { %v4426_v1 = vld [vmem:[%s6528_s1 + $0x404] ss:$8 sps:$4 sm:$0xff]   ;;  %2310 = vmatprep.subr.bf16.mxu1 %v4424_v0  ;;  %v4429_v3 = vld [vmem:[%s6528_s1 + $0x400] ss:$8 sps:$4 sm:$0xff]   ;;  %v4432_v5 = vld [vmem:[%s6528_s1 + $0x414] ss:$8 sps:$4 sm:$0xff]  }
   0x3   :  { %2642 = vmatprep.subr.bf16.mxu0 %v4426_v1  ;;  %2311 = vmatpush1.bf16.msra.mxu1 %v4428_v2  ;;  %v4434_v6 = vld [vmem:[%s6528_s1 + $0x10] ss:$8 sps:$4 sm:$0xff]   ;;  %v4436_v8 = vld [vmem:[%s6528_s1 + $0x24] ss:$8 sps:$4 sm:$0xff]   ;;  %v4440_v10 = vld [vmem:[%s6528_s1 + $0x20] ss:$8 sps:$4 sm:$0xff]  }
   0x4   :  { %2643 = vmatpush1.bf16.msra.mxu0 %v4429_v3  ;;  %2312 = vmatprep.subr.bf16.mxu1 %v4430_v4  ;;  %v4435_v7 = vld [vmem:[%s6528_s1 + $0x410] ss:$8 sps:$4 sm:$0xff]   ;;  %v4438_v9 = vld [vmem:[%s6528_s1 + $0x424] ss:$8 sps:$4 sm:$0xff]   ;;  %v4441_v11 = vld [vmem:[%s6528_s1 + $0x420] ss:$8 sps:$4 sm:$0xff]  }
   0x5   :  { %2644 = vmatprep.subr.bf16.mxu0 %v4432_v5  ;;  %v4442_v12 = vld [vmem:[%s6528_s1 + $0x34] ss:$8 sps:$4 sm:$0xff]   ;;  %v4446_v14 = vld [vmem:[%s6528_s1 + $0x30] ss:$8 sps:$4 sm:$0xff]   ;;  %v4448_v16 = vld [vmem:[%s6528_s1 + $0x44] ss:$8 sps:$4 sm:$0xff]  }
   0x6   :  { %v4444_v13 = vld [vmem:[%s6528_s1 + $0x434] ss:$8 sps:$4 sm:$0xff]   ;;  %v4447_v15 = vld [vmem:[%s6528_s1 + $0x430] ss:$8 sps:$4 sm:$0xff]   ;;  %v4450_v17 = vld [vmem:[%s6528_s1 + $0x444] ss:$8 sps:$4 sm:$0xff]  }
   0x7   :  { %2313 = vmatpush1.bf16.msra.mxu1 %v4434_v6  ;;  %v4452_v18 = vld [vmem:[%s6528_s1 + $0x40] ss:$8 sps:$4 sm:$0xff]   ;;  %v4454_v20 = vld [vmem:[%s6528_s1 + $0x54] ss:$8 sps:$4 sm:$0xff]   ;;  %v4458_v22 = vld [vmem:[%s6528_s1 + $0x50] ss:$8 sps:$4 sm:$0xff]  }
   0x8   :  { %2645 = vmatpush1.bf16.msra.mxu0 %v4435_v7  ;;  %2314 = vmatprep.subr.bf16.mxu1 %v4436_v8  ;;  %v4453_v19 = vld [vmem:[%s6528_s1 + $0x440] ss:$8 sps:$4 sm:$0xff]   ;;  %v4456_v21 = vld [vmem:[%s6528_s1 + $0x454] ss:$8 sps:$4 sm:$0xff]   ;;  %v4459_v23 = vld [vmem:[%s6528_s1 + $0x450] ss:$8 sps:$4 sm:$0xff]  }
   0x9   :  { %2646 = vmatprep.subr.bf16.mxu0 %v4438_v9  ;;  %v4460_v24 = vld [vmem:[%s6528_s1 + $0x64] ss:$8 sps:$4 sm:$0xff]   ;;  %v4464_v26 = vld [vmem:[%s6528_s1 + $0x60] ss:$8 sps:$4 sm:$0xff]   ;;  %v4466_v28 = vld [vmem:[%s6528_s1 + $0x74] ss:$8 sps:$4 sm:$0xff]  }
   0xa   :  { %v4462_v25 = vld [vmem:[%s6528_s1 + $0x464] ss:$8 sps:$4 sm:$0xff]   ;;  %v4465_v27 = vld [vmem:[%s6528_s1 + $0x460] ss:$8 sps:$4 sm:$0xff]   ;;  %v4468_v29 = vld [vmem:[%s6528_s1 + $0x474] ss:$8 sps:$4 sm:$0xff]  }
   0xb   :  { %2315 = vmatpush1.bf16.msra.mxu1 %v4440_v10  ;;  %v4470_v30 = vld [vmem:[%s6528_s1 + $0x70] ss:$8 sps:$4 sm:$0xff]   ;;  %v4472_v32 = vld [vmem:[%s6528_s1 + $0x84] ss:$8 sps:$4 sm:$0xff]   ;;  %v4476_v34 = vld [vmem:[%s6528_s1 + $0x80] ss:$8 sps:$4 sm:$0xff]  }
   0xc   :  { %2647 = vmatpush1.bf16.msra.mxu0 %v4441_v11  ;;  %2316 = vmatprep.subr.bf16.mxu1 %v4442_v12  ;;  %v4471_v31 = vld [vmem:[%s6528_s1 + $0x470] ss:$8 sps:$4 sm:$0xff]   ;;  %v4474_v33 = vld [vmem:[%s6528_s1 + $0x484] ss:$8 sps:$4 sm:$0xff]   ;;  %v4477_v35 = vld [vmem:[%s6528_s1 + $0x480] ss:$8 sps:$4 sm:$0xff]  }
   0xd   :  { %2648 = vmatprep.subr.bf16.mxu0 %v4444_v13  ;;  %v4478_v36 = vld [vmem:[%s6528_s1 + $0x94] ss:$8 sps:$4 sm:$0xff]   ;;  %v4482_v38 = vld [vmem:[%s6528_s1 + $0x90] ss:$8 sps:$4 sm:$0xff]   ;;  %v4484_v40 = vld [vmem:[%s6528_s1 + $0xa4] ss:$8 sps:$4 sm:$0xff]  }
   0xe   :  { %v4480_v37 = vld [vmem:[%s6528_s1 + $0x494] ss:$8 sps:$4 sm:$0xff]   ;;  %v4483_v39 = vld [vmem:[%s6528_s1 + $0x490] ss:$8 sps:$4 sm:$0xff]   ;;  %v4486_v41 = vld [vmem:[%s6528_s1 + $0x4a4] ss:$8 sps:$4 sm:$0xff]  }
   0xf   :  { %2317 = vmatpush1.bf16.msra.mxu1 %v4446_v14  ;;  %v4488_v42 = vld [vmem:[%s6528_s1 + $0xa0] ss:$8 sps:$4 sm:$0xff]   ;;  %v4490_v44 = vld [vmem:[%s6528_s1 + $0xb4] ss:$8 sps:$4 sm:$0xff]   ;;  %v4494_v46 = vld [vmem:[%s6528_s1 + $0xb0] ss:$8 sps:$4 sm:$0xff]  }
  0x10   :  { %2649 = vmatpush1.bf16.msra.mxu0 %v4447_v15  ;;  %2318 = vmatprep.subr.bf16.mxu1 %v4448_v16  ;;  %v4489_v43 = vld [vmem:[%s6528_s1 + $0x4a0] ss:$8 sps:$4 sm:$0xff]   ;;  %v4492_v45 = vld [vmem:[%s6528_s1 + $0x4b4] ss:$8 sps:$4 sm:$0xff]   ;;  %v4495_v47 = vld [vmem:[%s6528_s1 + $0x4b0] ss:$8 sps:$4 sm:$0xff]  }
  0x11   :  { %2650 = vmatprep.subr.bf16.mxu0 %v4450_v17  ;;  %v4522_v48 = vld [vmem:[%s6529_s0 + $0x4] ss:$72 sps:$4 sm:$0xff]   ;;  %v4500_v52 = vld [vmem:[%s6528_s1 + $0xc0] ss:$8 sps:$4 sm:$0xff]   ;;  %v4502_v54 = vld [vmem:[%s6528_s1 + $0xd4] ss:$8 sps:$4 sm:$0xff]  }
  0x12   :  { %v4496_v49 = vld [vmem:[%s6528_s1 + $0xc4] ss:$8 sps:$4 sm:$0xff]   ;;  %2342 = vmatprep.mubr.bf16.mxu1 %v4522_v48  ;;  %v4501_v53 = vld [vmem:[%s6528_s1 + $0x4c0] ss:$8 sps:$4 sm:$0xff]   ;;  %v4504_v55 = vld [vmem:[%s6528_s1 + $0x4d4] ss:$8 sps:$4 sm:$0xff]  }
  0x13   :  { %2319 = vmatpush1.bf16.msra.mxu1 %v4452_v18  ;;  %v4498_v50 = vld [vmem:[%s6528_s1 + $0x4c4] ss:$8 sps:$4 sm:$0xff]   ;;  %v4506_v56 = vld [vmem:[%s6528_s1 + $0xd0] ss:$8 sps:$4 sm:$0xff]   ;;  %v4512_v60 = vld [vmem:[%s6528_s1 + $0xe0] ss:$8 sps:$4 sm:$0xff]  }
  0x14   :  { %2651 = vmatpush1.bf16.msra.mxu0 %v4453_v19  ;;  %2320 = vmatprep.subr.bf16.mxu1 %v4454_v20  ;;  %v4528_v51 = vld [vmem:[%s6529_s0 + $0x24] ss:$72 sps:$4 sm:$0xff]   ;;  %v4507_v57 = vld [vmem:[%s6528_s1 + $0x4d0] ss:$8 sps:$4 sm:$0xff]   ;;  %v4513_v61 = vld [vmem:[%s6528_s1 + $0x4e0] ss:$8 sps:$4 sm:$0xff]  }
  0x15   :  { %2652 = vmatprep.subr.bf16.mxu0 %v4456_v21  ;;  %2674 = vmatprep.mubr.bf16.mxu0 %v4528_v51  ;;  %v4508_v58 = vld [vmem:[%s6528_s1 + $0xe4] ss:$8 sps:$4 sm:$0xff]   ;;  %v4514_v62 = vld [vmem:[%s6528_s1 + $0xf4] ss:$8 sps:$4 sm:$0xff]   ;;  %v4518_v0 = vld [vmem:[%s6528_s1 + $0xf0] ss:$8 sps:$4 sm:$0xff]  }
  0x16   :  { %v4510_v59 = vld [vmem:[%s6528_s1 + $0x4e4] ss:$8 sps:$4 sm:$0xff]   ;;  %v4516_v63 = vld [vmem:[%s6528_s1 + $0x4f4] ss:$8 sps:$4 sm:$0xff]   ;;  %v4519_v1 = vld [vmem:[%s6528_s1 + $0x4f0] ss:$8 sps:$4 sm:$0xff]  }
  0x17   :  { %2321 = vmatpush1.bf16.msra.mxu1 %v4458_v22  ;;  %v4525_v2 = vld [vmem:[%s6528_s1 + $0x104] ss:$8 sps:$4 sm:$0xff]   ;;  %v4520_v4 = vld [vmem:[%s6529_s0] ss:$72 sps:$4 sm:$0xff]   ;;  %v4534_v8 = vld [vmem:[%s6528_s1 + $0x114] ss:$8 sps:$4 sm:$0xff]  }
  0x18   :  { %2653 = vmatpush1.bf16.msra.mxu0 %v4459_v23  ;;  %2322 = vmatprep.subr.bf16.mxu1 %v4460_v24  ;;  %v4531_v3 = vld [vmem:[%s6528_s1 + $0x504] ss:$8 sps:$4 sm:$0xff]   ;;  %v4523_v5 = vld [vmem:[%s6528_s1 + $0x100] ss:$8 sps:$4 sm:$0xff]   ;;  %v4537_v9 = vld [vmem:[%s6528_s1 + $0x514] ss:$8 sps:$4 sm:$0xff]  }
  0x19   :  { %2654 = vmatprep.subr.bf16.mxu0 %v4462_v25  ;;  %v4526_v6 = vld [vmem:[%s6529_s0 + $0x20] ss:$72 sps:$4 sm:$0xff]   ;;  %v4532_v10 = vld [vmem:[%s6528_s1 + $0x110] ss:$8 sps:$4 sm:$0xff]   ;;  %v4574_v12 = vld [vmem:[%s6529_s0 + $0x94] ss:$72 sps:$4 sm:$0xff]  }
  0x1a   :  { %v4529_v7 = vld [vmem:[%s6528_s1 + $0x500] ss:$8 sps:$4 sm:$0xff]   ;;  %v4535_v11 = vld [vmem:[%s6528_s1 + $0x510] ss:$8 sps:$4 sm:$0xff]   ;;  %v4540_v13 = vld [vmem:[%s6528_s1 + $0x124] ss:$8 sps:$4 sm:$0xff]  }
  0x1b   :  { %2323 = vmatpush1.bf16.msra.mxu1 %v4464_v26  ;;  %v4543_v14 = vld [vmem:[%s6528_s1 + $0x524] ss:$8 sps:$4 sm:$0xff]   ;;  %v4579_v15 = vld [vmem:[%s6529_s0 + $0xb4] ss:$72 sps:$4 sm:$0xff]   ;;  %v4538_v16 = vld [vmem:[%s6528_s1 + $0x120] ss:$8 sps:$4 sm:$0xff]  }
  0x1c   :  { %2655 = vmatpush1.bf16.msra.mxu0 %v4465_v27  ;;  %2324 = vmatprep.subr.bf16.mxu1 %v4466_v28  ;;  %v4541_v17 = vld [vmem:[%s6528_s1 + $0x520] ss:$8 sps:$4 sm:$0xff]   ;;  %v4584_v18 = vld [vmem:[%s6529_s0 + $0x90] ss:$72 sps:$4 sm:$0xff]   ;;  %v4546_v20 = vld [vmem:[%s6528_s1 + $0x134] ss:$8 sps:$4 sm:$0xff]  }
  0x1d   :  { %2656 = vmatprep.subr.bf16.mxu0 %v4468_v29  ;;  %v4585_v19 = vld [vmem:[%s6529_s0 + $0xb0] ss:$72 sps:$4 sm:$0xff]   ;;  %v4549_v21 = vld [vmem:[%s6528_s1 + $0x534] ss:$8 sps:$4 sm:$0xff]   ;;  %v4592_v24 = vld [vmem:[%s6529_s0 + $0x124] ss:$72 sps:$4 sm:$0xff]  }
  0x1e   :  { %v4544_v22 = vld [vmem:[%s6528_s1 + $0x130] ss:$8 sps:$4 sm:$0xff]   ;;  %v4552_v25 = vld [vmem:[%s6528_s1 + $0x144] ss:$8 sps:$4 sm:$0xff]   ;;  %v4550_v28 = vld [vmem:[%s6528_s1 + $0x140] ss:$8 sps:$4 sm:$0xff]  }
  0x1f   :  { %2325 = vmatpush1.bf16.msra.mxu1 %v4470_v30  ;;  %v4547_v23 = vld [vmem:[%s6528_s1 + $0x530] ss:$8 sps:$4 sm:$0xff]   ;;  %v4555_v26 = vld [vmem:[%s6528_s1 + $0x544] ss:$8 sps:$4 sm:$0xff]   ;;  %v4553_v29 = vld [vmem:[%s6528_s1 + $0x540] ss:$8 sps:$4 sm:$0xff]  }
  0x20   :  { %2657 = vmatpush1.bf16.msra.mxu0 %v4471_v31  ;;  %2326 = vmatprep.subr.bf16.mxu1 %v4472_v32  ;;  %v4597_v27 = vld [vmem:[%s6529_s0 + $0x144] ss:$72 sps:$4 sm:$0xff]   ;;  %v4602_v30 = vld [vmem:[%s6529_s0 + $0x120] ss:$72 sps:$4 sm:$0xff]   ;;  %v4558_v32 = vld [vmem:[%s6528_s1 + $0x154] ss:$8 sps:$4 sm:$0xff]  }
  0x21   :  { %2658 = vmatprep.subr.bf16.mxu0 %v4474_v33  ;;  %v4603_v31 = vld [vmem:[%s6529_s0 + $0x140] ss:$72 sps:$4 sm:$0xff]   ;;  %v4561_v33 = vld [vmem:[%s6528_s1 + $0x554] ss:$8 sps:$4 sm:$0xff]   ;;  %v4628_v48 = vld [vmem:[%s6529_s0 + $0x244] ss:$72 sps:$4 sm:$0xff]  }
  0x22   :  { %v4633_v51 = vld [vmem:[%s6529_s0 + $0x264] ss:$72 sps:$4 sm:$0xff]  }
  0x23   :  { %2327 = vmatpush1.bf16.msra.mxu1 %v4476_v34  ;;  %v4556_v34 = vld [vmem:[%s6528_s1 + $0x150] ss:$8 sps:$4 sm:$0xff]  }
  0x24   :  { %2659 = vmatpush1.bf16.msra.mxu0 %v4477_v35  ;;  %2328 = vmatprep.subr.bf16.mxu1 %v4478_v36  ;;  %v4559_v35 = vld [vmem:[%s6528_s1 + $0x550] ss:$8 sps:$4 sm:$0xff]   ;;  %v4610_v36 = vld [vmem:[%s6529_s0 + $0x1b4] ss:$72 sps:$4 sm:$0xff]  }
  0x25   :  { %2660 = vmatprep.subr.bf16.mxu0 %v4480_v37  ;;  %v4564_v37 = vld [vmem:[%s6528_s1 + $0x164] ss:$8 sps:$4 sm:$0xff]  }
  0x27   :  { %2329 = vmatpush1.bf16.msra.mxu1 %v4482_v38  ;;  %v4567_v38 = vld [vmem:[%s6528_s1 + $0x564] ss:$8 sps:$4 sm:$0xff]  }
  0x28   :  { %2661 = vmatpush1.bf16.msra.mxu0 %v4483_v39  ;;  %2330 = vmatprep.subr.bf16.mxu1 %v4484_v40  ;;  %v4615_v39 = vld [vmem:[%s6529_s0 + $0x1d4] ss:$72 sps:$4 sm:$0xff]   ;;  %v4562_v40 = vld [vmem:[%s6528_s1 + $0x160] ss:$8 sps:$4 sm:$0xff]  }
  0x29   :  { %2662 = vmatprep.subr.bf16.mxu0 %v4486_v41  ;;  %v4565_v41 = vld [vmem:[%s6528_s1 + $0x560] ss:$8 sps:$4 sm:$0xff]  }
  0x2b   :  { %2331 = vmatpush1.bf16.msra.mxu1 %v4488_v42  ;;  %v4620_v42 = vld [vmem:[%s6529_s0 + $0x1b0] ss:$72 sps:$4 sm:$0xff]  }
  0x2c   :  { %2663 = vmatpush1.bf16.msra.mxu0 %v4489_v43  ;;  %2332 = vmatprep.subr.bf16.mxu1 %v4490_v44  ;;  %v4621_v43 = vld [vmem:[%s6529_s0 + $0x1d0] ss:$72 sps:$4 sm:$0xff]   ;;  %v4570_v44 = vld [vmem:[%s6528_s1 + $0x174] ss:$8 sps:$4 sm:$0xff]  }
  0x2d   :  { %2664 = vmatprep.subr.bf16.mxu0 %v4492_v45  ;;  %v4573_v45 = vld [vmem:[%s6528_s1 + $0x574] ss:$8 sps:$4 sm:$0xff]  }
  0x2f   :  { %2333 = vmatpush1.bf16.msra.mxu1 %v4494_v46  ;;  %v4568_v46 = vld [vmem:[%s6528_s1 + $0x170] ss:$8 sps:$4 sm:$0xff]  }
  0x30   :  { %2665 = vmatpush1.bf16.msra.mxu0 %v4495_v47  ;;  %2334 = vmatprep.subr.bf16.mxu1 %v4496_v49  ;;  %v4571_v47 = vld [vmem:[%s6528_s1 + $0x570] ss:$8 sps:$4 sm:$0xff]   ;;  %v4578_v49 = vld [vmem:[%s6528_s1 + $0x184] ss:$8 sps:$4 sm:$0xff]  }
  0x31   :  { %2666 = vmatprep.subr.bf16.mxu0 %v4498_v50  ;;  %v4583_v50 = vld [vmem:[%s6528_s1 + $0x584] ss:$8 sps:$4 sm:$0xff]  }
  0x33   :  { %2335 = vmatpush1.bf16.msra.mxu1 %v4500_v52  ;;  %v4576_v52 = vld [vmem:[%s6528_s1 + $0x180] ss:$8 sps:$4 sm:$0xff]  }
  0x34   :  { %2667 = vmatpush1.bf16.msra.mxu0 %v4501_v53  ;;  %2336 = vmatprep.subr.bf16.mxu1 %v4502_v54  ;;  %v4581_v53 = vld [vmem:[%s6528_s1 + $0x580] ss:$8 sps:$4 sm:$0xff]  }
  0x35   :  { %2668 = vmatprep.subr.bf16.mxu0 %v4504_v55  ;;  %v4638_v54 = vld [vmem:[%s6529_s0 + $0x240] ss:$72 sps:$4 sm:$0xff]  }
  0x36   :  { %v4639_v55 = vld [vmem:[%s6529_s0 + $0x260] ss:$72 sps:$4 sm:$0xff]  }
  0x37   :  { %2337 = vmatpush1.bf16.msra.mxu1 %v4506_v56  ;;  %v4588_v56 = vld [vmem:[%s6528_s1 + $0x194] ss:$8 sps:$4 sm:$0xff]  }
  0x38   :  { %2669 = vmatpush1.bf16.msra.mxu0 %v4507_v57  ;;  %2338 = vmatprep.subr.bf16.mxu1 %v4508_v58  ;;  %v4591_v57 = vld [vmem:[%s6528_s1 + $0x594] ss:$8 sps:$4 sm:$0xff]   ;;  %v4586_v58 = vld [vmem:[%s6528_s1 + $0x190] ss:$8 sps:$4 sm:$0xff]  }
  0x39   :  { %2670 = vmatprep.subr.bf16.mxu0 %v4510_v59  ;;  %v4589_v59 = vld [vmem:[%s6528_s1 + $0x590] ss:$8 sps:$4 sm:$0xff]  }
  0x3b   :  { %2339 = vmatpush1.bf16.msra.mxu1 %v4512_v60  ;;  %v4648_v60 = vld [vmem:[%s6529_s0 + $0xc] ss:$72 sps:$4 sm:$0xff]  }
  0x3c   :  { %2671 = vmatpush1.bf16.msra.mxu0 %v4513_v61  ;;  %2340 = vmatprep.subr.bf16.mxu1 %v4514_v62  ;;  %v4596_v61 = vld [vmem:[%s6528_s1 + $0x1a4] ss:$8 sps:$4 sm:$0xff]  }
  0x3d   :  { %2672 = vmatprep.subr.bf16.mxu0 %v4516_v63  ;;  %v4601_v62 = vld [vmem:[%s6528_s1 + $0x5a4] ss:$8 sps:$4 sm:$0xff]  }
  0x3e   :  { %v4654_v63 = vld [vmem:[%s6529_s0 + $0x2c] ss:$72 sps:$4 sm:$0xff]  }
  0x3f   :  { %2341 = vmatpush1.bf16.msra.mxu1 %v4518_v0  ;;  %v4594_v0 = vld [vmem:[%s6528_s1 + $0x1a0] ss:$8 sps:$4 sm:$0xff]  }
  0x40   :  { %2673 = vmatpush1.bf16.msra.mxu0 %v4519_v1  ;;  %2393 = vmatprep.subr.bf16.mxu1 %v4525_v2  ;;  %v4599_v1 = vld [vmem:[%s6528_s1 + $0x5a0] ss:$8 sps:$4 sm:$0xff]   ;;  %v4606_v2 = vld [vmem:[%s6528_s1 + $0x1b4] ss:$8 sps:$4 sm:$0xff]  }
  0x41   :  { %2725 = vmatprep.subr.bf16.mxu0 %v4531_v3  ;;  %v4609_v3 = vld [vmem:[%s6528_s1 + $0x5b4] ss:$8 sps:$4 sm:$0xff]  }
  0x42   :  { %2343 = vmatmul.mubr.bf16.vlgmr.msra.gmra.mrb[0].mxu1 %v4520_v4  ;;  %v4604_v4 = vld [vmem:[%s6528_s1 + $0x1b0] ss:$8 sps:$4 sm:$0xff]  }
  0x43   :  { %2675 = vmatmul.mubr.bf16.vlgmr.msra.gmra.mrb[0].mxu0 %v4526_v6  ;;  %2394 = vmatpush1.bf16.msra.mxu1 %v4523_v5  ;;  %v4607_v5 = vld [vmem:[%s6528_s1 + $0x5b0] ss:$8 sps:$4 sm:$0xff]   ;;  %v4614_v6 = vld [vmem:[%s6528_s1 + $0x1c4] ss:$8 sps:$4 sm:$0xff]  }
  0x44   :  { %2726 = vmatpush1.bf16.msra.mxu0 %v4529_v7  ;;  %2395 = vmatprep.subr.bf16.mxu1 %v4534_v8  ;;  %v4619_v7 = vld [vmem:[%s6528_s1 + $0x5c4] ss:$8 sps:$4 sm:$0xff]   ;;  %v4612_v8 = vld [vmem:[%s6528_s1 + $0x1c0] ss:$8 sps:$4 sm:$0xff]  }
  0x45   :  { %2727 = vmatprep.subr.bf16.mxu0 %v4537_v9  ;;  %2352 = vmatprep.mubr.bf16.mxu1 %v4574_v12  ;;  %v4617_v9 = vld [vmem:[%s6528_s1 + $0x5c0] ss:$8 sps:$4 sm:$0xff]   ;;  %v4622_v12 = vld [vmem:[%s6528_s1 + $0x1d0] ss:$8 sps:$4 sm:$0xff]  }
  0x46   :  { %2684 = vmatprep.mubr.bf16.mxu0 %v4579_v15  ;;  %v4637_v15 = vld [vmem:[%s6528_s1 + $0x5e4] ss:$8 sps:$4 sm:$0xff]  }
  0x47   :  { %2396 = vmatpush1.bf16.msra.mxu1 %v4532_v10  ;;  %v4624_v10 = vld [vmem:[%s6528_s1 + $0x1d4] ss:$8 sps:$4 sm:$0xff]  }
  0x48   :  { %2728 = vmatpush1.bf16.msra.mxu0 %v4535_v11  ;;  %2397 = vmatprep.subr.bf16.mxu1 %v4540_v13  ;;  %v4627_v11 = vld [vmem:[%s6528_s1 + $0x5d4] ss:$8 sps:$4 sm:$0xff]   ;;  %v4625_v13 = vld [vmem:[%s6528_s1 + $0x5d0] ss:$8 sps:$4 sm:$0xff]  }
  0x49   :  { %2729 = vmatprep.subr.bf16.mxu0 %v4543_v14  ;;  %v4632_v14 = vld [vmem:[%s6528_s1 + $0x1e4] ss:$8 sps:$4 sm:$0xff]  }
  0x4a   :  { %2353 = vmatmul.mubr.bf16.gmra.mrb[4].mxu1 %v4584_v18  ;;  %v4642_v18 = vld [vmem:[%s6528_s1 + $0x1f4] ss:$8 sps:$4 sm:$0xff]  }
  0x4b   :  { %2685 = vmatmul.mubr.bf16.gmra.mrb[4].mxu0 %v4585_v19  ;;  %2398 = vmatpush1.bf16.msra.mxu1 %v4538_v16  ;;  %v4630_v16 = vld [vmem:[%s6528_s1 + $0x1e0] ss:$8 sps:$4 sm:$0xff]   ;;  %v4645_v19 = vld [vmem:[%s6528_s1 + $0x5f4] ss:$8 sps:$4 sm:$0xff]  }
  0x4c   :  { %2730 = vmatpush1.bf16.msra.mxu0 %v4541_v17  ;;  %2399 = vmatprep.subr.bf16.mxu1 %v4546_v20  ;;  %v4635_v17 = vld [vmem:[%s6528_s1 + $0x5e0] ss:$8 sps:$4 sm:$0xff]   ;;  %v4640_v20 = vld [vmem:[%s6528_s1 + $0x1f0] ss:$8 sps:$4 sm:$0xff]  }
  0x4d   :  { %2731 = vmatprep.subr.bf16.mxu0 %v4549_v21  ;;  %2362 = vmatprep.mubr.bf16.mxu1 %v4592_v24  ;;  %v4643_v21 = vld [vmem:[%s6528_s1 + $0x5f0] ss:$8 sps:$4 sm:$0xff]  }
  0x4e   :  { %2694 = vmatprep.mubr.bf16.mxu0 %v4597_v27  ;;  %v4646_v24 = vld [vmem:[%s6529_s0 + $0x8] ss:$72 sps:$4 sm:$0xff]  }
  0x4f   :  { %2400 = vmatpush1.bf16.msra.mxu1 %v4544_v22  ;;  %v4651_v22 = vld [vmem:[%s6528_s1 + $0x204] ss:$8 sps:$4 sm:$0xff]   ;;  %v4655_v27 = vld [vmem:[%s6528_s1 + $0x600] ss:$8 sps:$4 sm:$0xff]  }
  0x50   :  { %2732 = vmatpush1.bf16.msra.mxu0 %v4547_v23  ;;  %2401 = vmatprep.subr.bf16.mxu1 %v4552_v25  ;;  %v4657_v23 = vld [vmem:[%s6528_s1 + $0x604] ss:$8 sps:$4 sm:$0xff]   ;;  %v4649_v25 = vld [vmem:[%s6528_s1 + $0x200] ss:$8 sps:$4 sm:$0xff]  }
  0x51   :  { %2733 = vmatprep.subr.bf16.mxu0 %v4555_v26  ;;  %v4652_v26 = vld [vmem:[%s6529_s0 + $0x28] ss:$72 sps:$4 sm:$0xff]  }
  0x52   :  { %2363 = vmatmul.mubr.bf16.gmra.mrb[8].mxu1 %v4602_v30  ;;  %v4700_v30 = vld [vmem:[%s6529_s0 + $0x9c] ss:$72 sps:$4 sm:$0xff]  }
  0x53   :  { %2695 = vmatmul.mubr.bf16.gmra.mrb[8].mxu0 %v4603_v31  ;;  %2402 = vmatpush1.bf16.msra.mxu1 %v4550_v28  ;;  %v4660_v28 = vld [vmem:[%s6528_s1 + $0x214] ss:$8 sps:$4 sm:$0xff]  }
  0x54   :  { %2734 = vmatpush1.bf16.msra.mxu0 %v4553_v29  ;;  %2403 = vmatprep.subr.bf16.mxu1 %v4558_v32  ;;  %v4663_v29 = vld [vmem:[%s6528_s1 + $0x614] ss:$8 sps:$4 sm:$0xff]   ;;  %v4658_v32 = vld [vmem:[%s6528_s1 + $0x210] ss:$8 sps:$4 sm:$0xff]  }
  0x55   :  { %2735 = vmatprep.subr.bf16.mxu0 %v4561_v33  ;;  %2372 = vmatprep.mubr.bf16.mxu1 %v4610_v36  ;;  %v4705_v31 = vld [vmem:[%s6529_s0 + $0xbc] ss:$72 sps:$4 sm:$0xff]   ;;  %v4661_v33 = vld [vmem:[%s6528_s1 + $0x610] ss:$8 sps:$4 sm:$0xff]   ;;  %v4664_v36 = vld [vmem:[%s6528_s1 + $0x220] ss:$8 sps:$4 sm:$0xff]  }
  0x56   :  { %2704 = vmatprep.mubr.bf16.mxu0 %v4615_v39  ;;  %v4711_v39 = vld [vmem:[%s6529_s0 + $0xb8] ss:$72 sps:$4 sm:$0xff]  }
  0x57   :  { %2404 = vmatpush1.bf16.msra.mxu1 %v4556_v34  ;;  %v4666_v34 = vld [vmem:[%s6528_s1 + $0x224] ss:$8 sps:$4 sm:$0xff]  }
  0x58   :  { %2736 = vmatpush1.bf16.msra.mxu0 %v4559_v35  ;;  %2405 = vmatprep.subr.bf16.mxu1 %v4564_v37  ;;  %v4669_v35 = vld [vmem:[%s6528_s1 + $0x624] ss:$8 sps:$4 sm:$0xff]   ;;  %v4667_v37 = vld [vmem:[%s6528_s1 + $0x620] ss:$8 sps:$4 sm:$0xff]  }
  0x59   :  { %2737 = vmatprep.subr.bf16.mxu0 %v4567_v38  ;;  %v4710_v38 = vld [vmem:[%s6529_s0 + $0x98] ss:$72 sps:$4 sm:$0xff]  }
  0x5a   :  { %2373 = vmatmul.mubr.bf16.gmra.mrb[12].mxu1 %v4620_v42  ;;  %v4718_v42 = vld [vmem:[%s6529_s0 + $0x12c] ss:$72 sps:$4 sm:$0xff]  }
  0x5b   :  { %2705 = vmatmul.mubr.bf16.gmra.mrb[12].mxu0 %v4621_v43  ;;  %2406 = vmatpush1.bf16.msra.mxu1 %v4562_v40  ;;  %v4672_v40 = vld [vmem:[%s6528_s1 + $0x234] ss:$8 sps:$4 sm:$0xff]  }
  0x5c   :  { %2738 = vmatpush1.bf16.msra.mxu0 %v4565_v41  ;;  %2407 = vmatprep.subr.bf16.mxu1 %v4570_v44  ;;  %v4675_v41 = vld [vmem:[%s6528_s1 + $0x634] ss:$8 sps:$4 sm:$0xff]   ;;  %v4670_v44 = vld [vmem:[%s6528_s1 + $0x230] ss:$8 sps:$4 sm:$0xff]  }
  0x5d   :  { %2739 = vmatprep.subr.bf16.mxu0 %v4573_v45  ;;  %2382 = vmatprep.mubr.bf16.mxu1 %v4628_v48  ;;  %v4723_v43 = vld [vmem:[%s6529_s0 + $0x14c] ss:$72 sps:$4 sm:$0xff]   ;;  %v4673_v45 = vld [vmem:[%s6528_s1 + $0x630] ss:$8 sps:$4 sm:$0xff]   ;;  %v4676_v48 = vld [vmem:[%s6528_s1 + $0x240] ss:$8 sps:$4 sm:$0xff]  }
  0x5e   :  { %2714 = vmatprep.mubr.bf16.mxu0 %v4633_v51  ;;  %v4729_v51 = vld [vmem:[%s6529_s0 + $0x148] ss:$72 sps:$4 sm:$0xff]  }
  0x5f   :  { %2408 = vmatpush1.bf16.msra.mxu1 %v4568_v46  ;;  %v4678_v46 = vld [vmem:[%s6528_s1 + $0x244] ss:$8 sps:$4 sm:$0xff]  }
  0x60   :  { %2740 = vmatpush1.bf16.msra.mxu0 %v4571_v47  ;;  %2409 = vmatprep.subr.bf16.mxu1 %v4578_v49  ;;  %v4681_v47 = vld [vmem:[%s6528_s1 + $0x644] ss:$8 sps:$4 sm:$0xff]   ;;  %v4679_v49 = vld [vmem:[%s6528_s1 + $0x640] ss:$8 sps:$4 sm:$0xff]  }
  0x61   :  { %2741 = vmatprep.subr.bf16.mxu0 %v4583_v50  ;;  %v4728_v50 = vld [vmem:[%s6529_s0 + $0x128] ss:$72 sps:$4 sm:$0xff]  }
  0x62   :  { %2383 = vmatmul.mubr.bf16.gmra.mrb[16].mxu1 %v4638_v54  ;;  %v4736_v54 = vld [vmem:[%s6529_s0 + $0x1bc] ss:$72 sps:$4 sm:$0xff]  }
  0x63   :  { %2715 = vmatmul.mubr.bf16.gmra.mrb[16].mxu0 %v4639_v55  ;;  %2410 = vmatpush1.bf16.msra.mxu1 %v4576_v52  ;;  %v4684_v52 = vld [vmem:[%s6528_s1 + $0x254] ss:$8 sps:$4 sm:$0xff]  }
  0x64   :  { %2742 = vmatpush1.bf16.msra.mxu0 %v4581_v53  ;;  %2411 = vmatprep.subr.bf16.mxu1 %v4588_v56  ;;  %v4687_v53 = vld [vmem:[%s6528_s1 + $0x654] ss:$8 sps:$4 sm:$0xff]   ;;  %v4682_v56 = vld [vmem:[%s6528_s1 + $0x250] ss:$8 sps:$4 sm:$0xff]  }
  0x65   :  { %2743 = vmatprep.subr.bf16.mxu0 %v4591_v57  ;;  %2425 = vmatprep.mubr.bf16.mxu1 %v4648_v60  ;;  %v4741_v55 = vld [vmem:[%s6529_s0 + $0x1dc] ss:$72 sps:$4 sm:$0xff]   ;;  %v4685_v57 = vld [vmem:[%s6528_s1 + $0x650] ss:$8 sps:$4 sm:$0xff]   ;;  %v4688_v60 = vld [vmem:[%s6528_s1 + $0x260] ss:$8 sps:$4 sm:$0xff]  }
  0x66   :  { %2757 = vmatprep.mubr.bf16.mxu0 %v4654_v63  ;;  %v4747_v63 = vld [vmem:[%s6529_s0 + $0x1d8] ss:$72 sps:$4 sm:$0xff]  }
  0x67   :  { %2412 = vmatpush1.bf16.msra.mxu1 %v4586_v58  ;;  %v4690_v58 = vld [vmem:[%s6528_s1 + $0x264] ss:$8 sps:$4 sm:$0xff]  }
  0x68   :  { %2744 = vmatpush1.bf16.msra.mxu0 %v4589_v59  ;;  %2413 = vmatprep.subr.bf16.mxu1 %v4596_v61  ;;  %v4693_v59 = vld [vmem:[%s6528_s1 + $0x664] ss:$8 sps:$4 sm:$0xff]   ;;  %v4691_v61 = vld [vmem:[%s6528_s1 + $0x660] ss:$8 sps:$4 sm:$0xff]  }
  0x69   :  { %2745 = vmatprep.subr.bf16.mxu0 %v4601_v62  ;;  %v4746_v62 = vld [vmem:[%s6529_s0 + $0x1b8] ss:$72 sps:$4 sm:$0xff]  }
  0x6b   :  { %2414 = vmatpush1.bf16.msra.mxu1 %v4594_v0  ;;  %v4696_v0 = vld [vmem:[%s6528_s1 + $0x274] ss:$8 sps:$4 sm:$0xff]  }
  0x6c   :  { %2746 = vmatpush1.bf16.msra.mxu0 %v4599_v1  ;;  %2415 = vmatprep.subr.bf16.mxu1 %v4606_v2  ;;  %v4699_v1 = vld [vmem:[%s6528_s1 + $0x674] ss:$8 sps:$4 sm:$0xff]  }
  0x6d   :  { %2747 = vmatprep.subr.bf16.mxu0 %v4609_v3  ;;  %v4754_v2 = vld [vmem:[%s6529_s0 + $0x24c] ss:$72 sps:$4 sm:$0xff]  }
  0x6e   :  { %v4759_v3 = vld [vmem:[%s6529_s0 + $0x26c] ss:$72 sps:$4 sm:$0xff]  }
  0x6f   :  { %2416 = vmatpush1.bf16.msra.mxu1 %v4604_v4  ;;  %v4694_v4 = vld [vmem:[%s6528_s1 + $0x270] ss:$8 sps:$4 sm:$0xff]  }
  0x70   :  { %2748 = vmatpush1.bf16.msra.mxu0 %v4607_v5  ;;  %2417 = vmatprep.subr.bf16.mxu1 %v4614_v6  ;;  %v4697_v5 = vld [vmem:[%s6528_s1 + $0x670] ss:$8 sps:$4 sm:$0xff]   ;;  %v4704_v6 = vld [vmem:[%s6528_s1 + $0x284] ss:$8 sps:$4 sm:$0xff]  }
  0x71   :  { %2749 = vmatprep.subr.bf16.mxu0 %v4619_v7  ;;  %v4709_v7 = vld [vmem:[%s6528_s1 + $0x684] ss:$8 sps:$4 sm:$0xff]  }
  0x73   :  { %2418 = vmatpush1.bf16.msra.mxu1 %v4612_v8  ;;  %v4702_v8 = vld [vmem:[%s6528_s1 + $0x280] ss:$8 sps:$4 sm:$0xff]  }
  0x74   :  { %2750 = vmatpush1.bf16.msra.mxu0 %v4617_v9  ;;  %2419 = vmatprep.subr.bf16.mxu1 %v4624_v10  ;;  %v4707_v9 = vld [vmem:[%s6528_s1 + $0x680] ss:$8 sps:$4 sm:$0xff]  }
  0x75   :  { %2751 = vmatprep.subr.bf16.mxu0 %v4627_v11  ;;  %v4764_v10 = vld [vmem:[%s6529_s0 + $0x248] ss:$72 sps:$4 sm:$0xff]  }
  0x76   :  { %v4765_v11 = vld [vmem:[%s6529_s0 + $0x268] ss:$72 sps:$4 sm:$0xff]  }
  0x77   :  { %2420 = vmatpush1.bf16.msra.mxu1 %v4622_v12  ;;  %v4714_v12 = vld [vmem:[%s6528_s1 + $0x294] ss:$8 sps:$4 sm:$0xff]  }
  0x78   :  { %2752 = vmatpush1.bf16.msra.mxu0 %v4625_v13  ;;  %2421 = vmatprep.subr.bf16.mxu1 %v4632_v14  ;;  %v4717_v13 = vld [vmem:[%s6528_s1 + $0x694] ss:$8 sps:$4 sm:$0xff]  }
  0x79   :  { %2753 = vmatprep.subr.bf16.mxu0 %v4637_v15  ;;  %v4774_v14 = vld [vmem:[%s6529_s0 + $0x14] ss:$72 sps:$4 sm:$0xff]  }
  0x7a   :  { %v4780_v15 = vld [vmem:[%s6529_s0 + $0x34] ss:$72 sps:$4 sm:$0xff]  }
  0x7b   :  { %2422 = vmatpush1.bf16.msra.mxu1 %v4630_v16  ;;  %v4712_v16 = vld [vmem:[%s6528_s1 + $0x290] ss:$8 sps:$4 sm:$0xff]  }
  0x7c   :  { %2754 = vmatpush1.bf16.msra.mxu0 %v4635_v17  ;;  %2423 = vmatprep.subr.bf16.mxu1 %v4642_v18  ;;  %v4715_v17 = vld [vmem:[%s6528_s1 + $0x690] ss:$8 sps:$4 sm:$0xff]   ;;  %v4722_v18 = vld [vmem:[%s6528_s1 + $0x2a4] ss:$8 sps:$4 sm:$0xff]  }
  0x7d   :  { %2755 = vmatprep.subr.bf16.mxu0 %v4645_v19  ;;  %v4727_v19 = vld [vmem:[%s6528_s1 + $0x6a4] ss:$8 sps:$4 sm:$0xff]  }
  0x7f   :  { %2424 = vmatpush1.bf16.msra.mxu1 %v4640_v20  ;;  %v4720_v20 = vld [vmem:[%s6528_s1 + $0x2a0] ss:$8 sps:$4 sm:$0xff]  }
  0x80   :  { %2756 = vmatpush1.bf16.msra.mxu0 %v4643_v21  ;;  %2476 = vmatprep.subr.bf16.mxu1 %v4651_v22  ;;  %v4725_v21 = vld [vmem:[%s6528_s1 + $0x6a0] ss:$8 sps:$4 sm:$0xff]   ;;  %v4732_v22 = vld [vmem:[%s6528_s1 + $0x2b4] ss:$8 sps:$4 sm:$0xff]  }
  0x81   :  { %2808 = vmatprep.subr.bf16.mxu0 %v4657_v23  ;;  %v4735_v23 = vld [vmem:[%s6528_s1 + $0x6b4] ss:$8 sps:$4 sm:$0xff]  }
  0x82   :  { %2426 = vmatmul.mubr.bf16.vlgmr.msra.gmra.mrb[0].mxu1 %v4646_v24  ;;  %v4730_v24 = vld [vmem:[%s6528_s1 + $0x2b0] ss:$8 sps:$4 sm:$0xff]  }
  0x83   :  { %2758 = vmatmul.mubr.bf16.vlgmr.msra.gmra.mrb[0].mxu0 %v4652_v26  ;;  %2477 = vmatpush1.bf16.msra.mxu1 %v4649_v25  ;;  %v4733_v25 = vld [vmem:[%s6528_s1 + $0x6b0] ss:$8 sps:$4 sm:$0xff]   ;;  %v4740_v26 = vld [vmem:[%s6528_s1 + $0x2c4] ss:$8 sps:$4 sm:$0xff]  }
  0x84   :  { %2809 = vmatpush1.bf16.msra.mxu0 %v4655_v27  ;;  %2478 = vmatprep.subr.bf16.mxu1 %v4660_v28  ;;  %v4745_v27 = vld [vmem:[%s6528_s1 + $0x6c4] ss:$8 sps:$4 sm:$0xff]   ;;  %v4738_v28 = vld [vmem:[%s6528_s1 + $0x2c0] ss:$8 sps:$4 sm:$0xff]  }
  0x85   :  { %2810 = vmatprep.subr.bf16.mxu0 %v4663_v29  ;;  %2435 = vmatprep.mubr.bf16.mxu1 %v4700_v30  ;;  %v4743_v29 = vld [vmem:[%s6528_s1 + $0x6c0] ss:$8 sps:$4 sm:$0xff]   ;;  %v4750_v30 = vld [vmem:[%s6528_s1 + $0x2d4] ss:$8 sps:$4 sm:$0xff]  }
  0x86   :  { %2767 = vmatprep.mubr.bf16.mxu0 %v4705_v31  ;;  %v4753_v31 = vld [vmem:[%s6528_s1 + $0x6d4] ss:$8 sps:$4 sm:$0xff]  }
  0x87   :  { %2479 = vmatpush1.bf16.msra.mxu1 %v4658_v32  ;;  %v4748_v32 = vld [vmem:[%s6528_s1 + $0x2d0] ss:$8 sps:$4 sm:$0xff]  }
  0x88   :  { %2811 = vmatpush1.bf16.msra.mxu0 %v4661_v33  ;;  %2480 = vmatprep.subr.bf16.mxu1 %v4666_v34  ;;  %v4751_v33 = vld [vmem:[%s6528_s1 + $0x6d0] ss:$8 sps:$4 sm:$0xff]   ;;  %v4758_v34 = vld [vmem:[%s6528_s1 + $0x2e4] ss:$8 sps:$4 sm:$0xff]  }
  0x89   :  { %2812 = vmatprep.subr.bf16.mxu0 %v4669_v35  ;;  %v4763_v35 = vld [vmem:[%s6528_s1 + $0x6e4] ss:$8 sps:$4 sm:$0xff]  }
  0x8a   :  { %2436 = vmatmul.mubr.bf16.gmra.mrb[4].mxu1 %v4710_v38  ;;  %v4768_v38 = vld [vmem:[%s6528_s1 + $0x2f4] ss:$8 sps:$4 sm:$0xff]  }
  0x8b   :  { %2768 = vmatmul.mubr.bf16.gmra.mrb[4].mxu0 %v4711_v39  ;;  %2481 = vmatpush1.bf16.msra.mxu1 %v4664_v36  ;;  %v4756_v36 = vld [vmem:[%s6528_s1 + $0x2e0] ss:$8 sps:$4 sm:$0xff]   ;;  %v4771_v39 = vld [vmem:[%s6528_s1 + $0x6f4] ss:$8 sps:$4 sm:$0xff]  }
  0x8c   :  { %2813 = vmatpush1.bf16.msra.mxu0 %v4667_v37  ;;  %2482 = vmatprep.subr.bf16.mxu1 %v4672_v40  ;;  %v4761_v37 = vld [vmem:[%s6528_s1 + $0x6e0] ss:$8 sps:$4 sm:$0xff]   ;;  %v4766_v40 = vld [vmem:[%s6528_s1 + $0x2f0] ss:$8 sps:$4 sm:$0xff]  }
  0x8d   :  { %2814 = vmatprep.subr.bf16.mxu0 %v4675_v41  ;;  %2445 = vmatprep.mubr.bf16.mxu1 %v4718_v42  ;;  %v4769_v41 = vld [vmem:[%s6528_s1 + $0x6f0] ss:$8 sps:$4 sm:$0xff]   ;;  %v4777_v42 = vld [vmem:[%s6528_s1 + $0x304] ss:$8 sps:$4 sm:$0xff]  }
  0x8e   :  { %2777 = vmatprep.mubr.bf16.mxu0 %v4723_v43  ;;  %v4783_v43 = vld [vmem:[%s6528_s1 + $0x704] ss:$8 sps:$4 sm:$0xff]  }
  0x8f   :  { %2483 = vmatpush1.bf16.msra.mxu1 %v4670_v44  ;;  %v4772_v44 = vld [vmem:[%s6529_s0 + $0x10] ss:$72 sps:$4 sm:$0xff]  }
  0x90   :  { %2815 = vmatpush1.bf16.msra.mxu0 %v4673_v45  ;;  %2484 = vmatprep.subr.bf16.mxu1 %v4678_v46  ;;  %v4775_v45 = vld [vmem:[%s6528_s1 + $0x300] ss:$8 sps:$4 sm:$0xff]   ;;  %v4778_v46 = vld [vmem:[%s6529_s0 + $0x30] ss:$72 sps:$4 sm:$0xff]  }
  0x91   :  { %2816 = vmatprep.subr.bf16.mxu0 %v4681_v47  ;;  %v4781_v47 = vld [vmem:[%s6528_s1 + $0x700] ss:$8 sps:$4 sm:$0xff]  }
  0x92   :  { %2446 = vmatmul.mubr.bf16.gmra.mrb[8].mxu1 %v4728_v50  ;;  %v4826_v50 = vld [vmem:[%s6529_s0 + $0xa4] ss:$72 sps:$4 sm:$0xff]  }
  0x93   :  { %2778 = vmatmul.mubr.bf16.gmra.mrb[8].mxu0 %v4729_v51  ;;  %2485 = vmatpush1.bf16.msra.mxu1 %v4676_v48  ;;  %v4786_v48 = vld [vmem:[%s6528_s1 + $0x314] ss:$8 sps:$4 sm:$0xff]   ;;  %v4832_v51 = vld [vmem:[%s6529_s0 + $0xc4] ss:$72 sps:$4 sm:$0xff]  }
  0x94   :  { %2817 = vmatpush1.bf16.msra.mxu0 %v4679_v49  ;;  %2486 = vmatprep.subr.bf16.mxu1 %v4684_v52  ;;  %v4789_v49 = vld [vmem:[%s6528_s1 + $0x714] ss:$8 sps:$4 sm:$0xff]   ;;  %v4784_v52 = vld [vmem:[%s6528_s1 + $0x310] ss:$8 sps:$4 sm:$0xff]  }
  0x95   :  { %2818 = vmatprep.subr.bf16.mxu0 %v4687_v53  ;;  %2455 = vmatprep.mubr.bf16.mxu1 %v4736_v54  ;;  %v4787_v53 = vld [vmem:[%s6528_s1 + $0x710] ss:$8 sps:$4 sm:$0xff]   ;;  %v4792_v54 = vld [vmem:[%s6528_s1 + $0x324] ss:$8 sps:$4 sm:$0xff]  }
  0x96   :  { %2787 = vmatprep.mubr.bf16.mxu0 %v4741_v55  ;;  %v4795_v55 = vld [vmem:[%s6528_s1 + $0x724] ss:$8 sps:$4 sm:$0xff]  }
  0x97   :  { %2487 = vmatpush1.bf16.msra.mxu1 %v4682_v56  ;;  %v4790_v56 = vld [vmem:[%s6528_s1 + $0x320] ss:$8 sps:$4 sm:$0xff]  }
  0x98   :  { %2819 = vmatpush1.bf16.msra.mxu0 %v4685_v57  ;;  %2488 = vmatprep.subr.bf16.mxu1 %v4690_v58  ;;  %v4793_v57 = vld [vmem:[%s6528_s1 + $0x720] ss:$8 sps:$4 sm:$0xff]  }
  0x99   :  { %2820 = vmatprep.subr.bf16.mxu0 %v4693_v59  ;;  %v4828_v58 = vld [vmem:[%s6529_s0 + $0xa0] ss:$72 sps:$4 sm:$0xff]  }
  0x9a   :  { %2456 = vmatmul.mubr.bf16.gmra.mrb[12].mxu1 %v4746_v62  ;;  %v4837_v59 = vld [vmem:[%s6529_s0 + $0xc0] ss:$72 sps:$4 sm:$0xff]   ;;  %v4844_v62 = vld [vmem:[%s6529_s0 + $0x134] ss:$72 sps:$4 sm:$0xff]  }
  0x9b   :  { %2788 = vmatmul.mubr.bf16.gmra.mrb[12].mxu0 %v4747_v63  ;;  %2489 = vmatpush1.bf16.msra.mxu1 %v4688_v60  ;;  %v4798_v60 = vld [vmem:[%s6528_s1 + $0x334] ss:$8 sps:$4 sm:$0xff]  }
  0x9c   :  { %2821 = vmatpush1.bf16.msra.mxu0 %v4691_v61  ;;  %2490 = vmatprep.subr.bf16.mxu1 %v4696_v0  ;;  %v4801_v61 = vld [vmem:[%s6528_s1 + $0x734] ss:$8 sps:$4 sm:$0xff]   ;;  %v4796_v0 = vld [vmem:[%s6528_s1 + $0x330] ss:$8 sps:$4 sm:$0xff]  }
  0x9d   :  { %2822 = vmatprep.subr.bf16.mxu0 %v4699_v1  ;;  %2465 = vmatprep.mubr.bf16.mxu1 %v4754_v2  ;;  %v4850_v63 = vld [vmem:[%s6529_s0 + $0x154] ss:$72 sps:$4 sm:$0xff]   ;;  %v4799_v1 = vld [vmem:[%s6528_s1 + $0x730] ss:$8 sps:$4 sm:$0xff]   ;;  %v4804_v2 = vld [vmem:[%s6528_s1 + $0x344] ss:$8 sps:$4 sm:$0xff]  }
  0x9e   :  { %2797 = vmatprep.mubr.bf16.mxu0 %v4759_v3  ;;  %v4807_v3 = vld [vmem:[%s6528_s1 + $0x744] ss:$8 sps:$4 sm:$0xff]  }
  0x9f   :  { %2491 = vmatpush1.bf16.msra.mxu1 %v4694_v4  ;;  %v4802_v4 = vld [vmem:[%s6528_s1 + $0x340] ss:$8 sps:$4 sm:$0xff]  }
  0xa0   :  { %2823 = vmatpush1.bf16.msra.mxu0 %v4697_v5  ;;  %2492 = vmatprep.subr.bf16.mxu1 %v4704_v6  ;;  %v4805_v5 = vld [vmem:[%s6528_s1 + $0x740] ss:$8 sps:$4 sm:$0xff]   ;;  %v4846_v6 = vld [vmem:[%s6529_s0 + $0x130] ss:$72 sps:$4 sm:$0xff]  }
  0xa1   :  { %2824 = vmatprep.subr.bf16.mxu0 %v4709_v7  ;;  %v4855_v7 = vld [vmem:[%s6529_s0 + $0x150] ss:$72 sps:$4 sm:$0xff]  }
  0xa2   :  { %2466 = vmatmul.mubr.bf16.gmra.mrb[16].mxu1 %v4764_v10  ;;  %v4862_v10 = vld [vmem:[%s6529_s0 + $0x1c4] ss:$72 sps:$4 sm:$0xff]  }
  0xa3   :  { %2798 = vmatmul.mubr.bf16.gmra.mrb[16].mxu0 %v4765_v11  ;;  %2493 = vmatpush1.bf16.msra.mxu1 %v4702_v8  ;;  %v4810_v8 = vld [vmem:[%s6528_s1 + $0x354] ss:$8 sps:$4 sm:$0xff]   ;;  %v4868_v11 = vld [vmem:[%s6529_s0 + $0x1e4] ss:$72 sps:$4 sm:$0xff]  }
  0xa4   :  { %2825 = vmatpush1.bf16.msra.mxu0 %v4707_v9  ;;  %2494 = vmatprep.subr.bf16.mxu1 %v4714_v12  ;;  %v4813_v9 = vld [vmem:[%s6528_s1 + $0x754] ss:$8 sps:$4 sm:$0xff]   ;;  %v4808_v12 = vld [vmem:[%s6528_s1 + $0x350] ss:$8 sps:$4 sm:$0xff]  }
  0xa5   :  { %2826 = vmatprep.subr.bf16.mxu0 %v4717_v13  ;;  %2508 = vmatprep.mubr.bf16.mxu1 %v4774_v14  ;;  %v4811_v13 = vld [vmem:[%s6528_s1 + $0x750] ss:$8 sps:$4 sm:$0xff]   ;;  %v4816_v14 = vld [vmem:[%s6528_s1 + $0x364] ss:$8 sps:$4 sm:$0xff]  }
  0xa6   :  { %2840 = vmatprep.mubr.bf16.mxu0 %v4780_v15  ;;  %v4819_v15 = vld [vmem:[%s6528_s1 + $0x764] ss:$8 sps:$4 sm:$0xff]  }
  0xa7   :  { %2495 = vmatpush1.bf16.msra.mxu1 %v4712_v16  ;;  %v4814_v16 = vld [vmem:[%s6528_s1 + $0x360] ss:$8 sps:$4 sm:$0xff]  }
  0xa8   :  { %2827 = vmatpush1.bf16.msra.mxu0 %v4715_v17  ;;  %2496 = vmatprep.subr.bf16.mxu1 %v4722_v18  ;;  %v4817_v17 = vld [vmem:[%s6528_s1 + $0x760] ss:$8 sps:$4 sm:$0xff]  }
  0xa9   :  { %2828 = vmatprep.subr.bf16.mxu0 %v4727_v19  ;;  %v4864_v18 = vld [vmem:[%s6529_s0 + $0x1c0] ss:$72 sps:$4 sm:$0xff]  }
  0xaa   :  { %v4873_v19 = vld [vmem:[%s6529_s0 + $0x1e0] ss:$72 sps:$4 sm:$0xff]  }
  0xab   :  { %2497 = vmatpush1.bf16.msra.mxu1 %v4720_v20  ;;  %v4822_v20 = vld [vmem:[%s6528_s1 + $0x374] ss:$8 sps:$4 sm:$0xff]  }
  0xac   :  { %2829 = vmatpush1.bf16.msra.mxu0 %v4725_v21  ;;  %2498 = vmatprep.subr.bf16.mxu1 %v4732_v22  ;;  %v4825_v21 = vld [vmem:[%s6528_s1 + $0x774] ss:$8 sps:$4 sm:$0xff]  }
  0xad   :  { %2830 = vmatprep.subr.bf16.mxu0 %v4735_v23  ;;  %v4880_v22 = vld [vmem:[%s6529_s0 + $0x254] ss:$72 sps:$4 sm:$0xff]  }
  0xae   :  { %v4886_v23 = vld [vmem:[%s6529_s0 + $0x274] ss:$72 sps:$4 sm:$0xff]  }
  0xaf   :  { %2499 = vmatpush1.bf16.msra.mxu1 %v4730_v24  ;;  %v4820_v24 = vld [vmem:[%s6528_s1 + $0x370] ss:$8 sps:$4 sm:$0xff]  }
  0xb0   :  { %2831 = vmatpush1.bf16.msra.mxu0 %v4733_v25  ;;  %2500 = vmatprep.subr.bf16.mxu1 %v4740_v26  ;;  %v4823_v25 = vld [vmem:[%s6528_s1 + $0x770] ss:$8 sps:$4 sm:$0xff]   ;;  %v4831_v26 = vld [vmem:[%s6528_s1 + $0x384] ss:$8 sps:$4 sm:$0xff]  }
  0xb1   :  { %2832 = vmatprep.subr.bf16.mxu0 %v4745_v27  ;;  %v4836_v27 = vld [vmem:[%s6528_s1 + $0x784] ss:$8 sps:$4 sm:$0xff]  }
  0xb3   :  { %2501 = vmatpush1.bf16.msra.mxu1 %v4738_v28  ;;  %v4829_v28 = vld [vmem:[%s6528_s1 + $0x380] ss:$8 sps:$4 sm:$0xff]  }
  0xb4   :  { %2833 = vmatpush1.bf16.msra.mxu0 %v4743_v29  ;;  %2502 = vmatprep.subr.bf16.mxu1 %v4750_v30  ;;  %v4834_v29 = vld [vmem:[%s6528_s1 + $0x780] ss:$8 sps:$4 sm:$0xff]   ;;  %v4882_v30 = vld [vmem:[%s6529_s0 + $0x250] ss:$72 sps:$4 sm:$0xff]  }
  0xb5   :  { %2834 = vmatprep.subr.bf16.mxu0 %v4753_v31  ;;  %v4891_v31 = vld [vmem:[%s6529_s0 + $0x270] ss:$72 sps:$4 sm:$0xff]  }
  0xb7   :  { %2503 = vmatpush1.bf16.msra.mxu1 %v4748_v32  ;;  %v4840_v32 = vld [vmem:[%s6528_s1 + $0x394] ss:$8 sps:$4 sm:$0xff]  }
  0xb8   :  { %2835 = vmatpush1.bf16.msra.mxu0 %v4751_v33  ;;  %2504 = vmatprep.subr.bf16.mxu1 %v4758_v34  ;;  %v4843_v33 = vld [vmem:[%s6528_s1 + $0x794] ss:$8 sps:$4 sm:$0xff]  }
  0xb9   :  { %2836 = vmatprep.subr.bf16.mxu0 %v4763_v35  ;;  %v4900_v34 = vld [vmem:[%s6529_s0 + $0x1c] ss:$72 sps:$4 sm:$0xff]  }
  0xba   :  { %v4903_v35 = vld [vmem:[%s6529_s0 + $0x3c] ss:$72 sps:$4 sm:$0xff]  }
  0xbb   :  { %2505 = vmatpush1.bf16.msra.mxu1 %v4756_v36  ;;  %v4838_v36 = vld [vmem:[%s6528_s1 + $0x390] ss:$8 sps:$4 sm:$0xff]  }
  0xbc   :  { %2837 = vmatpush1.bf16.msra.mxu0 %v4761_v37  ;;  %2506 = vmatprep.subr.bf16.mxu1 %v4768_v38  ;;  %v4841_v37 = vld [vmem:[%s6528_s1 + $0x790] ss:$8 sps:$4 sm:$0xff]   ;;  %v4849_v38 = vld [vmem:[%s6528_s1 + $0x3a4] ss:$8 sps:$4 sm:$0xff]  }
  0xbd   :  { %2838 = vmatprep.subr.bf16.mxu0 %v4771_v39  ;;  %v4854_v39 = vld [vmem:[%s6528_s1 + $0x7a4] ss:$8 sps:$4 sm:$0xff]  }
  0xbf   :  { %2507 = vmatpush1.bf16.msra.mxu1 %v4766_v40  ;;  %v4847_v40 = vld [vmem:[%s6528_s1 + $0x3a0] ss:$8 sps:$4 sm:$0xff]  }
  0xc0   :  { %2839 = vmatpush1.bf16.msra.mxu0 %v4769_v41  ;;  %2559 = vmatprep.subr.bf16.mxu1 %v4777_v42  ;;  %v4852_v41 = vld [vmem:[%s6528_s1 + $0x7a0] ss:$8 sps:$4 sm:$0xff]   ;;  %v4858_v42 = vld [vmem:[%s6528_s1 + $0x3b4] ss:$8 sps:$4 sm:$0xff]  }
  0xc1   :  { %2891 = vmatprep.subr.bf16.mxu0 %v4783_v43  ;;  %v4861_v43 = vld [vmem:[%s6528_s1 + $0x7b4] ss:$8 sps:$4 sm:$0xff]  }
  0xc2   :  { %2509 = vmatmul.mubr.bf16.vlgmr.msra.gmra.mrb[0].mxu1 %v4772_v44  ;;  %v4856_v44 = vld [vmem:[%s6528_s1 + $0x3b0] ss:$8 sps:$4 sm:$0xff]  }
  0xc3   :  { %2841 = vmatmul.mubr.bf16.vlgmr.msra.gmra.mrb[0].mxu0 %v4778_v46  ;;  %2560 = vmatpush1.bf16.msra.mxu1 %v4775_v45  ;;  %v4859_v45 = vld [vmem:[%s6528_s1 + $0x7b0] ss:$8 sps:$4 sm:$0xff]   ;;  %v4867_v46 = vld [vmem:[%s6528_s1 + $0x3c4] ss:$8 sps:$4 sm:$0xff]  }
  0xc4   :  { %2892 = vmatpush1.bf16.msra.mxu0 %v4781_v47  ;;  %2561 = vmatprep.subr.bf16.mxu1 %v4786_v48  ;;  %v4872_v47 = vld [vmem:[%s6528_s1 + $0x7c4] ss:$8 sps:$4 sm:$0xff]   ;;  %v4865_v48 = vld [vmem:[%s6528_s1 + $0x3c0] ss:$8 sps:$4 sm:$0xff]  }
  0xc5   :  { %2893 = vmatprep.subr.bf16.mxu0 %v4789_v49  ;;  %2518 = vmatprep.mubr.bf16.mxu1 %v4826_v50  ;;  %v4870_v49 = vld [vmem:[%s6528_s1 + $0x7c0] ss:$8 sps:$4 sm:$0xff]   ;;  %v4876_v50 = vld [vmem:[%s6528_s1 + $0x3d4] ss:$8 sps:$4 sm:$0xff]  }
  0xc6   :  { %2850 = vmatprep.mubr.bf16.mxu0 %v4832_v51  ;;  %v4879_v51 = vld [vmem:[%s6528_s1 + $0x7d4] ss:$8 sps:$4 sm:$0xff]  }
  0xc7   :  { %2562 = vmatpush1.bf16.msra.mxu1 %v4784_v52  ;;  %v4874_v52 = vld [vmem:[%s6528_s1 + $0x3d0] ss:$8 sps:$4 sm:$0xff]  }
  0xc8   :  { %2894 = vmatpush1.bf16.msra.mxu0 %v4787_v53  ;;  %2563 = vmatprep.subr.bf16.mxu1 %v4792_v54  ;;  %v4877_v53 = vld [vmem:[%s6528_s1 + $0x7d0] ss:$8 sps:$4 sm:$0xff]   ;;  %v4885_v54 = vld [vmem:[%s6528_s1 + $0x3e4] ss:$8 sps:$4 sm:$0xff]  }
  0xc9   :  { %2895 = vmatprep.subr.bf16.mxu0 %v4795_v55  ;;  %v4890_v55 = vld [vmem:[%s6528_s1 + $0x7e4] ss:$8 sps:$4 sm:$0xff]  }
  0xca   :  { %2519 = vmatmul.mubr.bf16.gmra.mrb[4].mxu1 %v4828_v58  ;;  %v4894_v58 = vld [vmem:[%s6528_s1 + $0x3f4] ss:$8 sps:$4 sm:$0xff]  }
  0xcb   :  { %2851 = vmatmul.mubr.bf16.gmra.mrb[4].mxu0 %v4837_v59  ;;  %2564 = vmatpush1.bf16.msra.mxu1 %v4790_v56  ;;  %v4883_v56 = vld [vmem:[%s6528_s1 + $0x3e0] ss:$8 sps:$4 sm:$0xff]   ;;  %v4897_v59 = vld [vmem:[%s6528_s1 + $0x7f4] ss:$8 sps:$4 sm:$0xff]  }
  0xcc   :  { %2896 = vmatpush1.bf16.msra.mxu0 %v4793_v57  ;;  %2565 = vmatprep.subr.bf16.mxu1 %v4798_v60  ;;  %v4888_v57 = vld [vmem:[%s6528_s1 + $0x7e0] ss:$8 sps:$4 sm:$0xff]   ;;  %v4892_v60 = vld [vmem:[%s6528_s1 + $0x3f0] ss:$8 sps:$4 sm:$0xff]  }
  0xcd   :  { %2897 = vmatprep.subr.bf16.mxu0 %v4801_v61  ;;  %2528 = vmatprep.mubr.bf16.mxu1 %v4844_v62  ;;  %v4895_v61 = vld [vmem:[%s6528_s1 + $0x7f0] ss:$8 sps:$4 sm:$0xff]   ;;  %v4906_v62 = vld [vmem:[%s6528_s1 + $0x804] ss:$8 sps:$4 sm:$0xff]  }
  0xce   :  { %2860 = vmatprep.mubr.bf16.mxu0 %v4850_v63  ;;  %v4898_v63 = vld [vmem:[%s6529_s0 + $0x18] ss:$72 sps:$4 sm:$0xff]  }
  0xcf   :  { %2566 = vmatpush1.bf16.msra.mxu1 %v4796_v0  ;;  %v4901_v0 = vld [vmem:[%s6529_s0 + $0x38] ss:$72 sps:$4 sm:$0xff]  }
  0xd0   :  { %2898 = vmatpush1.bf16.msra.mxu0 %v4799_v1  ;;  %2567 = vmatprep.subr.bf16.mxu1 %v4804_v2  ;;  %v4904_v1 = vld [vmem:[%s6528_s1 + $0x800] ss:$8 sps:$4 sm:$0xff]   ;;  %v4910_v2 = vld [vmem:[%s6529_s0 + $0xac] ss:$72 sps:$4 sm:$0xff]  }
  0xd1   :  { %2899 = vmatprep.subr.bf16.mxu0 %v4807_v3  ;;  %v4909_v3 = vld [vmem:[%s6528_s1 + $0x814] ss:$8 sps:$4 sm:$0xff]  }
  0xd2   :  { %2529 = vmatmul.mubr.bf16.gmra.mrb[8].mxu1 %v4846_v6  ;;  %v4915_v6 = vld [vmem:[%s6528_s1 + $0x824] ss:$8 sps:$4 sm:$0xff]  }
  0xd3   :  { %2861 = vmatmul.mubr.bf16.gmra.mrb[8].mxu0 %v4855_v7  ;;  %2568 = vmatpush1.bf16.msra.mxu1 %v4802_v4  ;;  %v4939_v4 = vld [vmem:[%s6529_s0 + $0xcc] ss:$72 sps:$4 sm:$0xff]   ;;  %v4912_v7 = vld [vmem:[%s6529_s0 + $0xa8] ss:$72 sps:$4 sm:$0xff]  }
  0xd4   :  { %2900 = vmatpush1.bf16.msra.mxu0 %v4805_v5  ;;  %2569 = vmatprep.subr.bf16.mxu1 %v4810_v8  ;;  %v4907_v5 = vld [vmem:[%s6528_s1 + $0x810] ss:$8 sps:$4 sm:$0xff]  }
  0xd5   :  { %2901 = vmatprep.subr.bf16.mxu0 %v4813_v9  ;;  %2538 = vmatprep.mubr.bf16.mxu1 %v4862_v10  ;;  %v4942_v8 = vld [vmem:[%s6529_s0 + $0xc8] ss:$72 sps:$4 sm:$0xff]   ;;  %v4919_v10 = vld [vmem:[%s6529_s0 + $0x13c] ss:$72 sps:$4 sm:$0xff]  }
  0xd6   :  { %2870 = vmatprep.mubr.bf16.mxu0 %v4868_v11  ;;  %v4913_v9 = vld [vmem:[%s6528_s1 + $0x820] ss:$8 sps:$4 sm:$0xff]   ;;  %v4918_v11 = vld [vmem:[%s6528_s1 + $0x834] ss:$8 sps:$4 sm:$0xff]  }
  0xd7   :  { %2570 = vmatpush1.bf16.msra.mxu1 %v4808_v12  ;;  %v4949_v12 = vld [vmem:[%s6529_s0 + $0x15c] ss:$72 sps:$4 sm:$0xff]  }
  0xd8   :  { %2902 = vmatpush1.bf16.msra.mxu0 %v4811_v13  ;;  %2571 = vmatprep.subr.bf16.mxu1 %v4816_v14  ;;  %v4916_v13 = vld [vmem:[%s6528_s1 + $0x830] ss:$8 sps:$4 sm:$0xff]   ;;  %v4924_v14 = vld [vmem:[%s6528_s1 + $0x844] ss:$8 sps:$4 sm:$0xff]  }
  0xd9   :  { %2903 = vmatprep.subr.bf16.mxu0 %v4819_v15  ;;  %v4921_v15 = vld [vmem:[%s6529_s0 + $0x138] ss:$72 sps:$4 sm:$0xff]  }
  0xda   :  { %2539 = vmatmul.mubr.bf16.gmra.mrb[12].mxu1 %v4864_v18  ;;  %v4928_v18 = vld [vmem:[%s6529_s0 + $0x1cc] ss:$72 sps:$4 sm:$0xff]  }
  0xdb   :  { %2871 = vmatmul.mubr.bf16.gmra.mrb[12].mxu0 %v4873_v19  ;;  %2572 = vmatpush1.bf16.msra.mxu1 %v4814_v16  ;;  %v4951_v16 = vld [vmem:[%s6529_s0 + $0x158] ss:$72 sps:$4 sm:$0xff]   ;;  %v4927_v19 = vld [vmem:[%s6528_s1 + $0x854] ss:$8 sps:$4 sm:$0xff]  }
  0xdc   :  { %2904 = vmatpush1.bf16.msra.mxu0 %v4817_v17  ;;  %2573 = vmatprep.subr.bf16.mxu1 %v4822_v20  ;;  %v4922_v17 = vld [vmem:[%s6528_s1 + $0x840] ss:$8 sps:$4 sm:$0xff]   ;;  %v4958_v20 = vld [vmem:[%s6529_s0 + $0x1ec] ss:$72 sps:$4 sm:$0xff]  }
  0xdd   :  { %2905 = vmatprep.subr.bf16.mxu0 %v4825_v21  ;;  %2548 = vmatprep.mubr.bf16.mxu1 %v4880_v22  ;;  %v4925_v21 = vld [vmem:[%s6528_s1 + $0x850] ss:$8 sps:$4 sm:$0xff]   ;;  %v4933_v22 = vld [vmem:[%s6528_s1 + $0x864] ss:$8 sps:$4 sm:$0xff]  }
  0xde   :  { %2880 = vmatprep.mubr.bf16.mxu0 %v4886_v23  ;;  %v4930_v23 = vld [vmem:[%s6529_s0 + $0x1c8] ss:$72 sps:$4 sm:$0xff]  }
  0xdf   :  { %2574 = vmatpush1.bf16.msra.mxu1 %v4820_v24  ;;  %v4960_v24 = vld [vmem:[%s6529_s0 + $0x1e8] ss:$72 sps:$4 sm:$0xff]  }
  0xe0   :  { %2906 = vmatpush1.bf16.msra.mxu0 %v4823_v25  ;;  %2575 = vmatprep.subr.bf16.mxu1 %v4831_v26  ;;  %v4931_v25 = vld [vmem:[%s6528_s1 + $0x860] ss:$8 sps:$4 sm:$0xff]   ;;  %v4937_v26 = vld [vmem:[%s6529_s0 + $0x25c] ss:$72 sps:$4 sm:$0xff]  }
  0xe1   :  { %2907 = vmatprep.subr.bf16.mxu0 %v4836_v27  ;;  %v4936_v27 = vld [vmem:[%s6528_s1 + $0x874] ss:$8 sps:$4 sm:$0xff]  }
  0xe2   :  { %2549 = vmatmul.mubr.bf16.gmra.mrb[16].mxu1 %v4882_v30  ;;  %v4945_v30 = vld [vmem:[%s6528_s1 + $0x884] ss:$8 sps:$4 sm:$0xff]  }
  0xe3   :  { %2881 = vmatmul.mubr.bf16.gmra.mrb[16].mxu0 %v4891_v31  ;;  %2576 = vmatpush1.bf16.msra.mxu1 %v4829_v28  ;;  %v4967_v28 = vld [vmem:[%s6529_s0 + $0x27c] ss:$72 sps:$4 sm:$0xff]   ;;  %v4941_v31 = vld [vmem:[%s6529_s0 + $0x258] ss:$72 sps:$4 sm:$0xff]  }
  0xe4   :  { %2908 = vmatpush1.bf16.msra.mxu0 %v4834_v29  ;;  %2577 = vmatprep.subr.bf16.mxu1 %v4840_v32  ;;  %v4934_v29 = vld [vmem:[%s6528_s1 + $0x870] ss:$8 sps:$4 sm:$0xff]  }
  0xe5   :  { %2909 = vmatprep.subr.bf16.mxu0 %v4843_v33  ;;  %2591 = vmatprep.mubr.bf16.mxu1 %v4900_v34  ;;  %v4969_v32 = vld [vmem:[%s6529_s0 + $0x278] ss:$72 sps:$4 sm:$0xff]   ;;  %v4978_v34 = vld [vmem:[%s6529_s0 + $0x44] ss:$72 sps:$4 sm:$0xff]  }
  0xe6   :  { %2923 = vmatprep.mubr.bf16.mxu0 %v4903_v35  ;;  %v4943_v33 = vld [vmem:[%s6528_s1 + $0x880] ss:$8 sps:$4 sm:$0xff]   ;;  %v4948_v35 = vld [vmem:[%s6528_s1 + $0x894] ss:$8 sps:$4 sm:$0xff]  }
  0xe7   :  { %2578 = vmatpush1.bf16.msra.mxu1 %v4838_v36  ;;  %v4946_v36 = vld [vmem:[%s6528_s1 + $0x890] ss:$8 sps:$4 sm:$0xff]  }
  0xe8   :  { %2910 = vmatpush1.bf16.msra.mxu0 %v4841_v37  ;;  %2579 = vmatprep.subr.bf16.mxu1 %v4849_v38  ;;  %v4954_v37 = vld [vmem:[%s6528_s1 + $0x8a4] ss:$8 sps:$4 sm:$0xff]   ;;  %v4952_v38 = vld [vmem:[%s6528_s1 + $0x8a0] ss:$8 sps:$4 sm:$0xff]  }
  0xe9   :  { %2911 = vmatprep.subr.bf16.mxu0 %v4854_v39  ;;  %v4957_v39 = vld [vmem:[%s6528_s1 + $0x8b4] ss:$8 sps:$4 sm:$0xff]  }
  0xeb   :  { %2580 = vmatpush1.bf16.msra.mxu1 %v4847_v40  ;;  %v4955_v40 = vld [vmem:[%s6528_s1 + $0x8b0] ss:$8 sps:$4 sm:$0xff]  }
  0xec   :  { %2912 = vmatpush1.bf16.msra.mxu0 %v4852_v41  ;;  %2581 = vmatprep.subr.bf16.mxu1 %v4858_v42  ;;  %v4963_v41 = vld [vmem:[%s6528_s1 + $0x8c4] ss:$8 sps:$4 sm:$0xff]   ;;  %v4961_v42 = vld [vmem:[%s6528_s1 + $0x8c0] ss:$8 sps:$4 sm:$0xff]  }
  0xed   :  { %2913 = vmatprep.subr.bf16.mxu0 %v4861_v43  ;;  %v4966_v43 = vld [vmem:[%s6528_s1 + $0x8d4] ss:$8 sps:$4 sm:$0xff]  }
  0xef   :  { %2582 = vmatpush1.bf16.msra.mxu1 %v4856_v44  ;;  %v4964_v44 = vld [vmem:[%s6528_s1 + $0x8d0] ss:$8 sps:$4 sm:$0xff]  }
  0xf0   :  { %2914 = vmatpush1.bf16.msra.mxu0 %v4859_v45  ;;  %2583 = vmatprep.subr.bf16.mxu1 %v4867_v46  ;;  %v4972_v45 = vld [vmem:[%s6528_s1 + $0x8e4] ss:$8 sps:$4 sm:$0xff]   ;;  %v4970_v46 = vld [vmem:[%s6528_s1 + $0x8e0] ss:$8 sps:$4 sm:$0xff]  }
  0xf1   :  { %2915 = vmatprep.subr.bf16.mxu0 %v4872_v47  ;;  %v4975_v47 = vld [vmem:[%s6528_s1 + $0x8f4] ss:$8 sps:$4 sm:$0xff]  }
  0xf3   :  { %2584 = vmatpush1.bf16.msra.mxu1 %v4865_v48  ;;  %v4973_v48 = vld [vmem:[%s6528_s1 + $0x8f0] ss:$8 sps:$4 sm:$0xff]  }
  0xf4   :  { %2916 = vmatpush1.bf16.msra.mxu0 %v4870_v49  ;;  %2585 = vmatprep.subr.bf16.mxu1 %v4876_v50  ;;  %v4976_v49 = vld [vmem:[%s6529_s0 + $0x40] ss:$72 sps:$4 sm:$0xff]   ;;  %v4979_v50 = vld [vmem:[%s6529_s0 + $0xd4] ss:$72 sps:$4 sm:$0xff]  }
  0xf5   :  { %2917 = vmatprep.subr.bf16.mxu0 %v4879_v51  ;;  %v4981_v51 = vld [vmem:[%s6529_s0 + $0xd0] ss:$72 sps:$4 sm:$0xff]  }
  0xf7   :  { %2586 = vmatpush1.bf16.msra.mxu1 %v4874_v52  ;;  %v4982_v52 = vld [vmem:[%s6529_s0 + $0x164] ss:$72 sps:$4 sm:$0xff]  }
  0xf8   :  { %2918 = vmatpush1.bf16.msra.mxu0 %v4877_v53  ;;  %2587 = vmatprep.subr.bf16.mxu1 %v4885_v54  ;;  %v4984_v53 = vld [vmem:[%s6529_s0 + $0x160] ss:$72 sps:$4 sm:$0xff]   ;;  %v4985_v54 = vld [vmem:[%s6529_s0 + $0x1f4] ss:$72 sps:$4 sm:$0xff]  }
  0xf9   :  { %2919 = vmatprep.subr.bf16.mxu0 %v4890_v55  ;;  %v4987_v55 = vld [vmem:[%s6529_s0 + $0x1f0] ss:$72 sps:$4 sm:$0xff]  }
  0xfb   :  { %2588 = vmatpush1.bf16.msra.mxu1 %v4883_v56  ;;  %v4988_v56 = vld [vmem:[%s6529_s0 + $0x284] ss:$72 sps:$4 sm:$0xff]  }
  0xfc   :  { %2920 = vmatpush1.bf16.msra.mxu0 %v4888_v57  ;;  %2589 = vmatprep.subr.bf16.mxu1 %v4894_v58  ;;  %v4990_v57 = vld [vmem:[%s6529_s0 + $0x280] ss:$72 sps:$4 sm:$0xff]   ;;  %v4993_v58 = vld [vmem:[%s6530_s3 + $0x4] ss:$8 sps:$4 sm:$0xff]  }
  0xfd   :  { %2921 = vmatprep.subr.bf16.mxu0 %v4897_v59  ;;  %v4991_v59 = vld [vmem:[%s6530_s3] ss:$8 sps:$4 sm:$0xff]  }
  0xff   :  { %2590 = vmatpush1.bf16.msra.mxu1 %v4892_v60  ;;  %v4994_v60 = vld [vmem:[%s6530_s3 + $0x10] ss:$8 sps:$4 sm:$0xff]  }
 0x100   :  { %2922 = vmatpush1.bf16.msra.mxu0 %v4895_v61  ;;  %3291 = vmatprep.subr.bf16.mxu1 %v4993_v58  ;;  %v4996_v61 = vld [vmem:[%s6530_s3 + $0x14] ss:$8 sps:$4 sm:$0xff]  }
 0x101   :  { %2974 = vmatprep.subr.bf16.mxu0 %v4906_v62  ;;  %v4999_v62 = vld [vmem:[%s6530_s3 + $0x24] ss:$8 sps:$4 sm:$0xff]  }
 0x102   :  { %2592 = vmatmul.mubr.bf16.vlgmr.msra.gmra.mrb[0].mxu1 %v4898_v63  ;;  %v4997_v63 = vld [vmem:[%s6530_s3 + $0x20] ss:$8 sps:$4 sm:$0xff]  }
 0x103   :  { %2924 = vmatmul.mubr.bf16.vlgmr.msra.gmra.mrb[0].mxu0 %v4901_v0  ;;  %2601 = vmatprep.mubr.bf16.mxu1 %v4910_v2  ;;  %v5000_v0 = vld [vmem:[%s6530_s3 + $0x30] ss:$8 sps:$4 sm:$0xff]   ;;  %v5005_v2 = vld [vmem:[%s6530_s3 + $0x44] ss:$8 sps:$4 sm:$0xff]  }
 0x104   :  { %2975 = vmatpush1.bf16.msra.mxu0 %v4904_v1  ;;  %2933 = vmatprep.mubr.bf16.mxu0 %v4939_v4  ;;  %v5002_v1 = vld [vmem:[%s6530_s3 + $0x34] ss:$8 sps:$4 sm:$0xff]   ;;  %v5006_v4 = vld [vmem:[%s6530_s3 + $0x50] ss:$8 sps:$4 sm:$0xff]  }
 0x105   :  { %2976 = vmatprep.subr.bf16.mxu0 %v4909_v3  ;;  %3292 = vmatpush1.bf16.msra.mxu1 %v4991_v59  ;;  %v5003_v3 = vld [vmem:[%s6530_s3 + $0x40] ss:$8 sps:$4 sm:$0xff]  }
 0x106   :  { %3293 = vmatprep.subr.bf16.mxu1 %v4996_v61 }
 0x108   :  { %2977 = vmatpush1.bf16.msra.mxu0 %v4907_v5  ;;  %v5008_v5 = vld [vmem:[%s6530_s3 + $0x54] ss:$8 sps:$4 sm:$0xff]  }
 0x109   :  { %2978 = vmatprep.subr.bf16.mxu0 %v4915_v6  ;;  %3294 = vmatpush1.bf16.msra.mxu1 %v4994_v60  ;;  %v5011_v6 = vld [vmem:[%s6530_s3 + $0x64] ss:$8 sps:$4 sm:$0xff]   ;;  %v408_v60 = vld [vmem:[%s6532_s2] sm:$0x3] }
 0x10a   :  { %2602 = vmatmul.mubr.bf16.gmra.mrb[4].mxu1 %v4912_v7  ;;  %3295 = vmatprep.subr.bf16.mxu1 %v4999_v62  ;;  %v5009_v7 = vld [vmem:[%s6530_s3 + $0x60] ss:$8 sps:$4 sm:$0xff]  }
 0x10b   :  { %2934 = vmatmul.mubr.bf16.gmra.mrb[4].mxu0 %v4942_v8  ;;  %2611 = vmatprep.mubr.bf16.mxu1 %v4919_v10  ;;  %v5012_v8 = vld [vmem:[%s6530_s3 + $0x70] ss:$8 sps:$4 sm:$0xff]   ;;  %v5017_v10 = vld [vmem:[%s6530_s3 + $0x84] ss:$8 sps:$4 sm:$0xff]  }
 0x10c   :  { %2979 = vmatpush1.bf16.msra.mxu0 %v4913_v9  ;;  %2943 = vmatprep.mubr.bf16.mxu0 %v4949_v12  ;;  %v5014_v9 = vld [vmem:[%s6530_s3 + $0x74] ss:$8 sps:$4 sm:$0xff]  }
 0x10d   :  { %2980 = vmatprep.subr.bf16.mxu0 %v4918_v11  ;;  %3296 = vmatpush1.bf16.msra.mxu1 %v4997_v63  ;;  %v5015_v11 = vld [vmem:[%s6530_s3 + $0x80] ss:$8 sps:$4 sm:$0xff]   ;;  %v5020_v12 = vld [vmem:[%s6530_s3 + $0x94] ss:$8 sps:$4 sm:$0xff]  }
 0x10e   :  { %3297 = vmatprep.subr.bf16.mxu1 %v5002_v1 }
 0x110   :  { %2981 = vmatpush1.bf16.msra.mxu0 %v4916_v13  ;;  %v5018_v13 = vld [vmem:[%s6530_s3 + $0x90] ss:$8 sps:$4 sm:$0xff]  }
 0x111   :  { %2982 = vmatprep.subr.bf16.mxu0 %v4924_v14  ;;  %3298 = vmatpush1.bf16.msra.mxu1 %v5000_v0  ;;  %v5023_v14 = vld [vmem:[%s6530_s3 + $0xa4] ss:$8 sps:$4 sm:$0xff]  }
 0x112   :  { %2612 = vmatmul.mubr.bf16.gmra.mrb[8].mxu1 %v4921_v15  ;;  %3299 = vmatprep.subr.bf16.mxu1 %v5005_v2  ;;  %v5021_v15 = vld [vmem:[%s6530_s3 + $0xa0] ss:$8 sps:$4 sm:$0xff]  }
 0x113   :  { %2944 = vmatmul.mubr.bf16.gmra.mrb[8].mxu0 %v4951_v16  ;;  %2621 = vmatprep.mubr.bf16.mxu1 %v4928_v18  ;;  %v5026_v16 = vld [vmem:[%s6530_s3 + $0xb4] ss:$8 sps:$4 sm:$0xff]   ;;  %v5029_v18 = vld [vmem:[%s6530_s3 + $0xc4] ss:$8 sps:$4 sm:$0xff]  }
 0x114   :  { %2983 = vmatpush1.bf16.msra.mxu0 %v4922_v17  ;;  %2953 = vmatprep.mubr.bf16.mxu0 %v4958_v20  ;;  %v5024_v17 = vld [vmem:[%s6530_s3 + $0xb0] ss:$8 sps:$4 sm:$0xff]   ;;  %v5032_v20 = vld [vmem:[%s6530_s3 + $0xd4] ss:$8 sps:$4 sm:$0xff]  }
 0x115   :  { %2984 = vmatprep.subr.bf16.mxu0 %v4927_v19  ;;  %3300 = vmatpush1.bf16.msra.mxu1 %v5003_v3  ;;  %v5027_v19 = vld [vmem:[%s6530_s3 + $0xc0] ss:$8 sps:$4 sm:$0xff]  }
 0x116   :  { %3301 = vmatprep.subr.bf16.mxu1 %v5008_v5 }
 0x118   :  { %2985 = vmatpush1.bf16.msra.mxu0 %v4925_v21  ;;  %v5030_v21 = vld [vmem:[%s6530_s3 + $0xd0] ss:$8 sps:$4 sm:$0xff]  }
 0x119   :  { %2986 = vmatprep.subr.bf16.mxu0 %v4933_v22  ;;  %3302 = vmatpush1.bf16.msra.mxu1 %v5006_v4  ;;  %v5035_v22 = vld [vmem:[%s6530_s3 + $0xe4] ss:$8 sps:$4 sm:$0xff]  }
 0x11a   :  { %2622 = vmatmul.mubr.bf16.gmra.mrb[12].mxu1 %v4930_v23  ;;  %3303 = vmatprep.subr.bf16.mxu1 %v5011_v6  ;;  %v5033_v23 = vld [vmem:[%s6530_s3 + $0xe0] ss:$8 sps:$4 sm:$0xff]  }
 0x11b   :  { %2954 = vmatmul.mubr.bf16.gmra.mrb[12].mxu0 %v4960_v24  ;;  %2631 = vmatprep.mubr.bf16.mxu1 %v4937_v26  ;;  %v5038_v24 = vld [vmem:[%s6530_s3 + $0xf4] ss:$8 sps:$4 sm:$0xff]   ;;  %v5039_v26 = vld [vmem:[%s6531_s5 + $0x40] sm:$0xff]  }
 0x11c   :  { %2987 = vmatpush1.bf16.msra.mxu0 %v4931_v25  ;;  %2963 = vmatprep.mubr.bf16.mxu0 %v4967_v28  ;;  %v5036_v25 = vld [vmem:[%s6530_s3 + $0xf0] ss:$8 sps:$4 sm:$0xff]   ;;  %v6344_v28 = vld [vmem:[%s6531_s5 + $0x48] sm:$0xff]  }
 0x11d   :  { %2988 = vmatprep.subr.bf16.mxu0 %v4936_v27  ;;  %3304 = vmatpush1.bf16.msra.mxu1 %v5009_v7  ;;  %v6339_v27 = vld [vmem:[%s6531_s5] sm:$0xff]  }
 0x11e   :  { %3305 = vmatprep.subr.bf16.mxu1 %v5014_v9 }
 0x120   :  { %2989 = vmatpush1.bf16.msra.mxu0 %v4934_v29  ;;  %v6350_v29 = vld [vmem:[%s6531_s5 + $0x8] sm:$0xff]  }
 0x121   :  { %2990 = vmatprep.subr.bf16.mxu0 %v4945_v30  ;;  %3306 = vmatpush1.bf16.msra.mxu1 %v5012_v8  ;;  %v6356_v30 = vld [vmem:[%s6531_s5 + $0x50] sm:$0xff]  }
 0x122   :  { %2632 = vmatmul.mubr.bf16.gmra.mrb[16].mxu1 %v4941_v31  ;;  %3307 = vmatprep.subr.bf16.mxu1 %v5017_v10  ;;  %v6362_v31 = vld [vmem:[%s6531_s5 + $0x10] sm:$0xff]  }
 0x123   :  { %2964 = vmatmul.mubr.bf16.gmra.mrb[16].mxu0 %v4969_v32  ;;  %v6368_v32 = vld [vmem:[%s6531_s5 + $0x58] sm:$0xff]  }
 0x124   :  { %2991 = vmatpush1.bf16.msra.mxu0 %v4943_v33  ;;  %3006 = vmatprep.mubr.bf16.mxu0 %v4978_v34  ;;  %v6373_v33 = vld [vmem:[%s6531_s5 + $0x18] sm:$0xff]   ;;  %v6379_v34 = vld [vmem:[%s6531_s5 + $0x60] sm:$0xff]  }
 0x125   :  { %2992 = vmatprep.subr.bf16.mxu0 %v4948_v35  ;;  %3308 = vmatpush1.bf16.msra.mxu1 %v5015_v11  ;;  %v6386_v35 = vld [vmem:[%s6531_s5 + $0x20] sm:$0xff]  }
 0x126   :  { %3309 = vmatprep.subr.bf16.mxu1 %v5020_v12 }
 0x128   :  { %2993 = vmatpush1.bf16.msra.mxu0 %v4946_v36  ;;  %v6392_v36 = vld [vmem:[%s6531_s5 + $0x68] sm:$0xff]  }
 0x129   :  { %2994 = vmatprep.subr.bf16.mxu0 %v4954_v37  ;;  %3310 = vmatpush1.bf16.msra.mxu1 %v5018_v13 }
 0x12a   :  { %3311 = vmatprep.subr.bf16.mxu1 %v5023_v14 }
 0x12c   :  { %2995 = vmatpush1.bf16.msra.mxu0 %v4952_v38 }
 0x12d   :  { %2996 = vmatprep.subr.bf16.mxu0 %v4957_v39  ;;  %3312 = vmatpush1.bf16.msra.mxu1 %v5021_v15 }
 0x12e   :  { %3313 = vmatprep.subr.bf16.mxu1 %v5026_v16 }
 0x130   :  { %2997 = vmatpush1.bf16.msra.mxu0 %v4955_v40 }
 0x131   :  { %2998 = vmatprep.subr.bf16.mxu0 %v4963_v41  ;;  %3314 = vmatpush1.bf16.msra.mxu1 %v5024_v17 }
 0x132   :  { %3315 = vmatprep.subr.bf16.mxu1 %v5029_v18 }
 0x134   :  { %2999 = vmatpush1.bf16.msra.mxu0 %v4961_v42 }
 0x135   :  { %3000 = vmatprep.subr.bf16.mxu0 %v4966_v43  ;;  %3316 = vmatpush1.bf16.msra.mxu1 %v5027_v19 }
 0x136   :  { %3317 = vmatprep.subr.bf16.mxu1 %v5032_v20 }
 0x138   :  { %3001 = vmatpush1.bf16.msra.mxu0 %v4964_v44 }
 0x139   :  { %3002 = vmatprep.subr.bf16.mxu0 %v4972_v45  ;;  %3318 = vmatpush1.bf16.msra.mxu1 %v5030_v21 }
 0x13a   :  { %3319 = vmatprep.subr.bf16.mxu1 %v5035_v22 }
 0x13c   :  { %3003 = vmatpush1.bf16.msra.mxu0 %v4970_v46 }
 0x13d   :  { %3004 = vmatprep.subr.bf16.mxu0 %v4975_v47  ;;  %3320 = vmatpush1.bf16.msra.mxu1 %v5033_v23 }
 0x13e   :  { %3321 = vmatprep.subr.bf16.mxu1 %v5038_v24 }
 0x140   :  { %3005 = vmatpush1.bf16.msra.mxu0 %v4973_v48 }
 0x141   :  { %3322 = vmatpush1.bf16.msra.mxu1 %v5036_v25  ;;  %4130 = vmatprep.subr.bf16.mxu0 %v5039_v26 }
 0x142   :  { %4225 = vmatprep.subr.bf16.mxu1 %v5039_v26 }
 0x143   :  { %3007 = vmatmul.mubr.bf16.vlgmr.msra.gmra.mrb[0].mxu0 %v4976_v49 }
 0x144   :  { %3016 = vmatprep.mubr.bf16.mxu0 %v4979_v50  ;;  %4131 = vmatpush3.bf16.msra.mxu0 %v6339_v27 }
 0x145   :  { %4132 = vmatprep.subr.bf16.mxu0 %v6344_v28 }
 0x148   :  { %4133 = vmatpush3.bf16.msra.mxu0 %v6350_v29 }
 0x149   :  { %4134 = vmatprep.subr.bf16.mxu0 %v6356_v30 }
 0x14b   :  { %3017 = vmatmul.mubr.bf16.gmra.mrb[4].mxu0 %v4981_v51 }
 0x14c   :  { %3026 = vmatprep.mubr.bf16.mxu0 %v4982_v52  ;;  %4135 = vmatpush3.bf16.msra.mxu0 %v6362_v31 }
 0x14d   :  { %4136 = vmatprep.subr.bf16.mxu0 %v6368_v32 }
 0x150   :  { %4137 = vmatpush3.bf16.msra.mxu0 %v6373_v33 }
 0x151   :  { %4138 = vmatprep.subr.bf16.mxu0 %v6379_v34 }
 0x153   :  { %3027 = vmatmul.mubr.bf16.gmra.mrb[8].mxu0 %v4984_v53 }
 0x154   :  { %3036 = vmatprep.mubr.bf16.mxu0 %v4985_v54  ;;  %4139 = vmatpush3.bf16.msra.mxu0 %v6386_v35 }
 0x155   :  { %4140 = vmatprep.subr.bf16.mxu0 %v6392_v36 }
 0x15b   :  { %3037 = vmatmul.mubr.bf16.gmra.mrb[12].mxu0 %v4987_v55 }
 0x15c   :  { %3046 = vmatprep.mubr.bf16.mxu0 %v4988_v56 }
 0x163   :  { %3047 = vmatmul.mubr.bf16.gmra.mrb[16].mxu0 %v4990_v57  ;;  %v410_v57 = vlaneseq }
 0x165   :  { %v6414_v58 = vshrl.u32 %v410_v57, 7 }
 0x167   :  { %v412_v59 = vsub.s32 0, %v6414_v58  ;;  %v416_v61 = vsub.s32 1, %v6414_v58 }
 0x169   :  { %v6423_v62 = vrot.slane %v408_v60, %v412_v59  ;;  %v6427_v63 = vrot.slane %v408_v60, %v416_v61 }
 0x1d5   :  { %v2593_v37 = vpop.f32.mrb[0].mxu1 }
 0x1d6   :  { %v2595_v38 = vpop.f32.mrb[1].mxu1  ;;  %v4241_v0 = vadd.f32 %v2593_v37, %v6423_v62 }
 0x1d7   :  { %v2597_v39 = vpop.f32.mrb[2].mxu1  ;;  %v4243_v1 = vadd.f32 %v2595_v38, %v6427_v63 }
 0x1d8   :  { %v2599_v40 = vpop.f32.mrb[3].mxu1  ;;  %v4245_v3 = vadd.f32 %v2597_v39, %v6423_v62 }
 0x1d9   :  { %v4247_v6 = vadd.f32 %v2599_v40, %v6427_v63 }
 0x1dd   :  { %v2603_v41 = vpop.f32.mrb[4].mxu1 }
 0x1de   :  { %v2605_v42 = vpop.f32.mrb[5].mxu1  ;;  %v4249_v16 = vadd.f32 %v2603_v41, %v6423_v62 }
 0x1df   :  { %v2607_v43 = vpop.f32.mrb[6].mxu1  ;;  %v4251_v18 = vadd.f32 %v2605_v42, %v6427_v63 }
 0x1e0   :  { %v2609_v44 = vpop.f32.mrb[7].mxu1  ;;  %v4253_v21 = vadd.f32 %v2607_v43, %v6423_v62 }
 0x1e1   :  { %v4255_v24 = vadd.f32 %v2609_v44, %v6427_v63 }
 0x1e5   :  { %v2613_v45 = vpop.f32.mrb[8].mxu1 }
 0x1e6   :  { %v2615_v46 = vpop.f32.mrb[9].mxu1  ;;  %v4257_v43 = vadd.f32 %v2613_v45, %v6423_v62 }
 0x1e7   :  { %v2617_v47 = vpop.f32.mrb[10].mxu1  ;;  %v4259_v44 = vadd.f32 %v2615_v46, %v6427_v63 }
 0x1e8   :  { %v6396_v48 = vpop.f32.mrb[11].mxu1 }
 0x1ed   :  { %v6398_v49 = vpop.f32.mrb[12].mxu1 }
 0x1ee   :  { %v6400_v50 = vpop.f32.mrb[13].mxu1 }
 0x1ef   :  { %v6402_v51 = vpop.f32.mrb[14].mxu1 }
 0x1f0   :  { %v6404_v52 = vpop.f32.mrb[15].mxu1 }
 0x1f5   :  { %v6406_v53 = vpop.f32.mrb[16].mxu1 }
 0x1f6   :  { %v6408_v54 = vpop.f32.mrb[17].mxu1 }
 0x1f7   :  { %v6410_v55 = vpop.f32.mrb[18].mxu1 }
 0x1f8   :  { %v6412_v56 = vpop.f32.mrb[19].mxu1 }
 0x216   :  { %v3008_v2 = vpop.f32.mrb[0].mxu0 }
 0x217   :  { %v4242_v4 = vadd.f32 %v4241_v0, %v3008_v2  ;;  %v3010_v5 = vpop.f32.mrb[1].mxu0  ;;  %v4261_v2 = vadd.f32 %v2617_v47, %v6423_v62 }
 0x218   :  { %v4244_v7 = vadd.f32 %v4243_v1, %v3010_v5  ;;  %v3012_v8 = vpop.f32.mrb[2].mxu0 }
 0x219   :  { %v4246_v9 = vadd.f32 %v4245_v3, %v3012_v8  ;;  %v3014_v10 = vpop.f32.mrb[3].mxu0  ;;  %v3057_v12 = vmax.f32 %v4242_v4, 0.0 }
 0x21a   :  { %v4248_v11 = vadd.f32 %v4247_v6, %v3014_v10  ;;  %v3058_v14 = vmax.f32 %v4244_v7, 0.0 }
 0x21b   :  { %v3059_v13 = vmax.f32 %v4246_v9, 0.0 }
 0x21c   :  { %v3060_v15 = vmax.f32 %v4248_v11, 0.0 }
 0x21d   :  { %v3077_v17 = vpack.c.bf16 %v3059_v13, %v3057_v12 }
 0x21e   :  { %v3078_v19 = vpack.c.bf16 %v3060_v15, %v3058_v14  ;;  %v3018_v20 = vpop.f32.mrb[4].mxu0 }
 0x21f   :  { %v4250_v22 = vadd.f32 %v4249_v16, %v3018_v20  ;;  %v3020_v23 = vpop.f32.mrb[5].mxu0 }
 0x220   :  { %v4252_v25 = vadd.f32 %v4251_v18, %v3020_v23  ;;  %v3022_v26 = vpop.f32.mrb[6].mxu0  ;;  %3323 = vmatprep.mubr.bf16.mxu1 %v3078_v19 }
 0x221   :  { %v4254_v37 = vadd.f32 %v4253_v21, %v3022_v26  ;;  %v3024_v38 = vpop.f32.mrb[7].mxu0  ;;  %3324 = vmatmul.mubr.bf16.vlgmr.msra.gmra.mrb[20].mxu1 %v3077_v17  ;;  %v3061_v40 = vmax.f32 %v4250_v22, 0.0  ;;  %v4277_v22 = vadd.f32 %v6410_v55, %v6423_v62  ;;  %v5050_v55 = vld [vmem:[%s6531_s5 + $0x28] sm:$0xff]  }
 0x222   :  { %v4256_v39 = vadd.f32 %v4255_v24, %v3024_v38  ;;  %4233 = vmatpush3.bf16.msra.mxu1 %v6339_v27  ;;  %v3062_v42 = vmax.f32 %v4252_v25, 0.0  ;;  %v4263_v27 = vadd.f32 %v6396_v48, %v6427_v63  ;;  %v4267_v48 = vadd.f32 %v6400_v50, %v6427_v63  ;;  %4141 = vmatpush3.bf16.msra.mxu0 %v5050_v55 }
 0x223   :  { %v3063_v41 = vmax.f32 %v4254_v37, 0.0  ;;  %4226 = vmatprep.subr.bf16.mxu1 %v6344_v28  ;;  %v4279_v24 = vadd.f32 %v6412_v56, %v6427_v63  ;;  %v5051_v56 = vld [vmem:[%s6531_s5 + $0x70] sm:$0xff]  }
 0x224   :  { %v3064_v57 = vmax.f32 %v4256_v39, 0.0  ;;  %4142 = vmatprep.subr.bf16.mxu0 %v5051_v56 }
 0x225   :  { %v3079_v60 = vpack.c.bf16 %v3063_v41, %v3061_v40 }
 0x226   :  { %v3080_v0 = vpack.c.bf16 %v3064_v57, %v3062_v42  ;;  %v3028_v1 = vpop.f32.mrb[8].mxu0  ;;  %4234 = vmatpush3.bf16.msra.mxu1 %v6350_v29  ;;  %v5054_v57 = vld [vmem:[%s6531_s5 + $0x38] sm:$0xff]  }
 0x227   :  { %v4258_v3 = vadd.f32 %v4257_v43, %v3028_v1  ;;  %v3030_v4 = vpop.f32.mrb[9].mxu0  ;;  %4227 = vmatprep.subr.bf16.mxu1 %v6356_v30  ;;  %v4265_v30 = vadd.f32 %v6398_v49, %v6423_v62  ;;  %v3119_v43 = vld [vmem:[%s6533_s4] sm:$0x3] }
 0x228   :  { %v4260_v28 = vadd.f32 %v4259_v44, %v3030_v4  ;;  %v3032_v5 = vpop.f32.mrb[10].mxu0  ;;  %3333 = vmatprep.mubr.bf16.mxu1 %v3080_v0  ;;  %v6492_v44 = vrot.slane %v3119_v43, %v416_v61 }
 0x229   :  { %v4262_v45 = vadd.f32 %v4261_v2, %v3032_v5  ;;  %v3034_v6 = vpop.f32.mrb[11].mxu0  ;;  %3334 = vmatmul.mubr.bf16.gmra.mrb[24].mxu1 %v3079_v60  ;;  %v3065_v7 = vmax.f32 %v4258_v3, 0.0  ;;  %v6488_v60 = vrot.slane %v3119_v43, %v412_v59 }
 0x22a   :  { %v4264_v46 = vadd.f32 %v4263_v27, %v3034_v6  ;;  %4235 = vmatpush3.bf16.msra.mxu1 %v6362_v31  ;;  %v3066_v47 = vmax.f32 %v4260_v28, 0.0  ;;  %v4269_v31 = vadd.f32 %v6402_v51, %v6423_v62 }
 0x22b   :  { %v3067_v29 = vmax.f32 %v4262_v45, 0.0  ;;  %4228 = vmatprep.subr.bf16.mxu1 %v6368_v32  ;;  %v4271_v32 = vadd.f32 %v6404_v52, %v6427_v63  ;;  %v4275_v52 = vadd.f32 %v6408_v54, %v6427_v63  ;;  %v5053_v63 = vld [vmem:[%s6531_s5 + $0x78] sm:$0xff]  }
 0x22c   :  { %v3068_v8 = vmax.f32 %v4264_v46, 0.0 }
 0x22d   :  { %v3081_v9 = vpack.c.bf16 %v3067_v29, %v3065_v7 }
 0x22e   :  { %v3082_v10 = vpack.c.bf16 %v3068_v8, %v3066_v47  ;;  %v3038_v11 = vpop.f32.mrb[12].mxu0  ;;  %4236 = vmatpush3.bf16.msra.mxu1 %v6373_v33 }
 0x22f   :  { %v4266_v12 = vadd.f32 %v4265_v30, %v3038_v11  ;;  %v3040_v13 = vpop.f32.mrb[13].mxu0  ;;  %4229 = vmatprep.subr.bf16.mxu1 %v6379_v34  ;;  %v4273_v34 = vadd.f32 %v6406_v53, %v6423_v62  ;;  %v5052_v62 = vld [vmem:[%s6531_s5 + $0x30] sm:$0xff]  }
 0x230   :  { %v4268_v14 = vadd.f32 %v4267_v48, %v3040_v13  ;;  %v3042_v49 = vpop.f32.mrb[14].mxu0  ;;  %3343 = vmatprep.mubr.bf16.mxu1 %v3082_v10  ;;  %4143 = vmatpush3.bf16.msra.mxu0 %v5052_v62 }
 0x231   :  { %v4270_v15 = vadd.f32 %v4269_v31, %v3042_v49  ;;  %v3044_v16 = vpop.f32.mrb[15].mxu0  ;;  %3344 = vmatmul.mubr.bf16.gmra.mrb[28].mxu1 %v3081_v9  ;;  %v3069_v33 = vmax.f32 %v4266_v12, 0.0  ;;  %4144 = vmatprep.subr.bf16.mxu0 %v5053_v63 }
 0x232   :  { %v4272_v50 = vadd.f32 %v4271_v32, %v3044_v16  ;;  %4237 = vmatpush3.bf16.msra.mxu1 %v6386_v35  ;;  %v3070_v51 = vmax.f32 %v4268_v14, 0.0 }
 0x233   :  { %v3071_v17 = vmax.f32 %v4270_v15, 0.0  ;;  %4230 = vmatprep.subr.bf16.mxu1 %v6392_v36 }
 0x234   :  { %v3072_v18 = vmax.f32 %v4272_v50, 0.0  ;;  %4145 = vmatpush3.bf16.msra.mxu0 %v5054_v57 }
 0x235   :  { %v3083_v19 = vpack.c.bf16 %v3071_v17, %v3069_v33 }
 0x236   :  { %v3084_v20 = vpack.c.bf16 %v3072_v18, %v3070_v51  ;;  %v3048_v21 = vpop.f32.mrb[16].mxu0  ;;  %4238 = vmatpush3.bf16.msra.mxu1 %v5050_v55 }
 0x237   :  { %v4274_v23 = vadd.f32 %v4273_v34, %v3048_v21  ;;  %v3050_v35 = vpop.f32.mrb[17].mxu0  ;;  %4231 = vmatprep.subr.bf16.mxu1 %v5051_v56 }
 0x238   :  { %v4276_v36 = vadd.f32 %v4275_v52, %v3050_v35  ;;  %v3052_v25 = vpop.f32.mrb[18].mxu0  ;;  %3353 = vmatprep.mubr.bf16.mxu1 %v3084_v20 }
 0x239   :  { %v4278_v26 = vadd.f32 %v4277_v22, %v3052_v25  ;;  %v3054_v37 = vpop.f32.mrb[19].mxu0  ;;  %3354 = vmatmul.mubr.bf16.gmra.mrb[32].mxu1 %v3083_v19  ;;  %v3073_v38 = vmax.f32 %v4274_v23, 0.0 }
 0x23a   :  { %v4280_v53 = vadd.f32 %v4279_v24, %v3054_v37  ;;  %v3074_v54 = vmax.f32 %v4276_v36, 0.0  ;;  %4239 = vmatpush3.bf16.msra.mxu1 %v5052_v62 }
 0x23b   :  { %v3075_v39 = vmax.f32 %v4278_v26, 0.0  ;;  %4232 = vmatprep.subr.bf16.mxu1 %v5053_v63 }
 0x23c   :  { %v3076_v40 = vmax.f32 %v4280_v53, 0.0 }
 0x23d   :  { %v3085_v41 = vpack.c.bf16 %v3075_v39, %v3073_v38 }
 0x23e   :  { %v3086_v42 = vpack.c.bf16 %v3076_v40, %v3074_v54  ;;  %4240 = vmatpush3.bf16.msra.mxu1 %v5054_v57 }
 0x240   :  { %3363 = vmatprep.mubr.bf16.mxu1 %v3086_v42 }
 0x241   :  { %3364 = vmatmul.mubr.bf16.gmra.mrb[36].mxu1 %v3085_v41 }
 0x2f4   :  { %v3325_v0 = vpop.f32.mrb[20].mxu1 }
 0x2f5   :  { %v3326_v1 = vadd.f32 %v3325_v0, %v6488_v60  ;;  %v3327_v2 = vpop.f32.mrb[21].mxu1 }
 0x2f6   :  { %v3328_v3 = vadd.f32 %v3327_v2, %v6492_v44  ;;  %v3329_v4 = vpop.f32.mrb[22].mxu1 }
 0x2f7   :  { %v3330_v27 = vadd.f32 %v3329_v4, %v6488_v60  ;;  %v3331_v28 = vpop.f32.mrb[23].mxu1  ;;  %v3374_v45 = vmax.f32 %v3326_v1, 0.0 }
 0x2f8   :  { %v3332_v5 = vadd.f32 %v3331_v28, %v6492_v44  ;;  %v3375_v59 = vmax.f32 %v3328_v3, 0.0 }
 0x2f9   :  { %v3376_v6 = vmax.f32 %v3330_v27, 0.0 }
 0x2fa   :  { %v3377_v46 = vmax.f32 %v3332_v5, 0.0 }
 0x2fb   :  { %v3394_v7 = vpack.c.bf16 %v3376_v6, %v3374_v45  ;;  %v5055_v45 = vmov 0.0|0.0   ;;  %v5057_v6 = vmov 0.0  }
 0x2fc   :  { %v3395_v58 = vpack.c.bf16 %v3377_v46, %v3375_v59  ;;  %v3335_v61 = vpop.f32.mrb[24].mxu1  ;;  %4210 = vmatprep.subr.bf16.mxu0 %v5055_v45 }
 0x2fd   :  { %v3336_v29 = vadd.f32 %v3335_v61, %v6488_v60  ;;  %v3337_v47 = vpop.f32.mrb[25].mxu1 }
 0x2fe   :  { %v3338_v8 = vadd.f32 %v3337_v47, %v6492_v44  ;;  %v3339_v30 = vpop.f32.mrb[26].mxu1  ;;  %3571 = vmatprep.mubr.bf16.mxu0 %v3395_v58 }
 0x2ff   :  { %v3340_v9 = vadd.f32 %v3339_v30, %v6488_v60  ;;  %v3341_v48 = vpop.f32.mrb[27].mxu1  ;;  %3572 = vmatmul.mubr.bf16.vlgmr.msra.gmra.mrb[20].mxu0 %v3394_v7  ;;  %v3378_v11 = vmax.f32 %v3336_v29, 0.0 }
 0x300   :  { %v3342_v10 = vadd.f32 %v3341_v48, %v6492_v44  ;;  %v3379_v12 = vmax.f32 %v3338_v8, 0.0 }
 0x301   :  { %v3380_v31 = vmax.f32 %v3340_v9, 0.0 }
 0x302   :  { %v3381_v13 = vmax.f32 %v3342_v10, 0.0 }
 0x303   :  { %v3396_v32 = vpack.c.bf16 %v3380_v31, %v3378_v11 }
 0x304   :  { %v3397_v14 = vpack.c.bf16 %v3381_v13, %v3379_v12  ;;  %v3345_v49 = vpop.f32.mrb[28].mxu1 }
 0x305   :  { %v3346_v15 = vadd.f32 %v3345_v49, %v6488_v60  ;;  %v3347_v16 = vpop.f32.mrb[29].mxu1 }
 0x306   :  { %v3348_v50 = vadd.f32 %v3347_v16, %v6492_v44  ;;  %v3349_v33 = vpop.f32.mrb[30].mxu1  ;;  %3579 = vmatprep.mubr.bf16.mxu0 %v3397_v14 }
 0x307   :  { %v3350_v17 = vadd.f32 %v3349_v33, %v6488_v60  ;;  %v3351_v51 = vpop.f32.mrb[31].mxu1  ;;  %3580 = vmatmul.mubr.bf16.gmra.mrb[24].mxu0 %v3396_v32  ;;  %v3382_v34 = vmax.f32 %v3346_v15, 0.0 }
 0x308   :  { %v3352_v18 = vadd.f32 %v3351_v51, %v6492_v44  ;;  %v3383_v52 = vmax.f32 %v3348_v50, 0.0  ;;  %4207 = vmatprep.mubr.msk.f32.mxu0 %vm5056_vm0, %v5057_v6 }
 0x309   :  { %v3384_v19 = vmax.f32 %v3350_v17, 0.0 }
 0x30a   :  { %v3385_v20 = vmax.f32 %v3352_v18, 0.0 }
 0x30b   :  { %v3398_v21 = vpack.c.bf16 %v3384_v19, %v3382_v34 }
 0x30c   :  { %v3399_v22 = vpack.c.bf16 %v3385_v20, %v3383_v52  ;;  %v3355_v23 = vpop.f32.mrb[32].mxu1 }
 0x30d   :  { %v3356_v35 = vadd.f32 %v3355_v23, %v6488_v60  ;;  %v3357_v24 = vpop.f32.mrb[33].mxu1 }
 0x30e   :  { %v3358_v36 = vadd.f32 %v3357_v24, %v6492_v44  ;;  %v3359_v25 = vpop.f32.mrb[34].mxu1  ;;  %3587 = vmatprep.mubr.bf16.mxu1 %v3399_v22 }
 0x30f   :  { %v3360_v26 = vadd.f32 %v3359_v25, %v6488_v60  ;;  %v3361_v37 = vpop.f32.mrb[35].mxu1  ;;  %3588 = vmatmul.mubr.bf16.vlgmr.msra.gmra.mrb[40].mxu1 %v3398_v21  ;;  %v3386_v38 = vmax.f32 %v3356_v35, 0.0 }
 0x310   :  { %v3362_v53 = vadd.f32 %v3361_v37, %v6492_v44  ;;  %v3387_v54 = vmax.f32 %v3358_v36, 0.0 }
 0x311   :  { %v3388_v39 = vmax.f32 %v3360_v26, 0.0 }
 0x312   :  { %v3389_v40 = vmax.f32 %v3362_v53, 0.0 }
 0x313   :  { %v3400_v41 = vpack.c.bf16 %v3388_v39, %v3386_v38 }
 0x314   :  { %v3401_v42 = vpack.c.bf16 %v3389_v40, %v3387_v54  ;;  %v3365_v55 = vpop.f32.mrb[36].mxu1 }
 0x315   :  { %v3366_v56 = vadd.f32 %v3365_v55, %v6488_v60  ;;  %v3367_v62 = vpop.f32.mrb[37].mxu1 }
 0x316   :  { %v3368_v63 = vadd.f32 %v3367_v62, %v6492_v44  ;;  %v3369_v57 = vpop.f32.mrb[38].mxu1  ;;  %3595 = vmatprep.mubr.bf16.mxu1 %v3401_v42 }
 0x317   :  { %v3370_v43 = vadd.f32 %v3369_v57, %v6488_v60  ;;  %v3371_v0 = vpop.f32.mrb[39].mxu1  ;;  %3596 = vmatmul.mubr.bf16.gmra.mrb[44].mxu1 %v3400_v41  ;;  %v3390_v2 = vmax.f32 %v3366_v56, 0.0  ;;  %v4112_v60 = vld [vmem:[%s6534_s6] ss:$0 sm:$0xff] }
 0x318   :  { %v3372_v1 = vadd.f32 %v3371_v0, %v6492_v44  ;;  %v3391_v4 = vmax.f32 %v3368_v63, 0.0 }
 0x319   :  { %v3392_v3 = vmax.f32 %v3370_v43, 0.0 }
 0x31a   :  { %v3393_v27 = vmax.f32 %v3372_v1, 0.0 }
 0x31b   :  { %v3402_v28 = vpack.c.bf16 %v3392_v3, %v3390_v2  ;;  %v3622_v2 = vld [vmem:[%s6535_s7] sm:$0xff] }
 0x31c   :  { %v3403_v5 = vpack.c.bf16 %v3393_v27, %v3391_v4 }
 0x31e   :  { %3603 = vmatprep.mubr.bf16.mxu1 %v3403_v5 }
 0x31f   :  { %3604 = vmatmul.mubr.bf16.gmra.mrb[48].mxu1 %v3402_v28 }
 0x3d2   :  { %v4146_v59 = vpop.f32.mrb[20].mxu0 }
 0x3d3   :  { %v4147_v44 = vpop.f32.mrb[21].mxu0 }
 0x3d4   :  { %v4148_v46 = vadd.f32 %v4147_v44, %v4146_v59  ;;  %v4149_v7 = vpop.f32.mrb[22].mxu0 }
 0x3d5   :  { %v4150_v58 = vpop.f32.mrb[23].mxu0 }
 0x3d6   :  { %v3574_v61 = vadd.f32 %v4148_v46, %v4112_v60  ;;  %v4151_v29 = vadd.f32 %v4150_v58, %v4149_v7 }
 0x3d8   :  { %v3577_v47 = vadd.f32 %v4151_v29, %v4112_v60  ;;  %v3612_v8 = vmax.f32 %v3574_v61, 0.0 }
 0x3da   :  { %v3613_v30 = vmax.f32 %v3577_v47, 0.0  ;;  %v4152_v9 = vpop.f32.mrb[24].mxu0 }
 0x3db   :  { %v4153_v48 = vpop.f32.mrb[25].mxu0 }
 0x3dc   :  { %v4211_v10 = vpack.c.bf16 %v3613_v30, %v3612_v8  ;;  %v4154_v11 = vadd.f32 %v4153_v48, %v4152_v9  ;;  %v4155_v31 = vpop.f32.mrb[26].mxu0 }
 0x3dd   :  { %v4156_v12 = vpop.f32.mrb[27].mxu0 }
 0x3de   :  { %v3582_v13 = vadd.f32 %v4154_v11, %v4112_v60  ;;  %v4157_v32 = vadd.f32 %v4156_v12, %v4155_v31  ;;  %4212 = vmatpush3.bf16.msra.mxu0 %v4211_v10 }
 0x3df   :  { %4213 = vmatprep.subr.bf16.mxu0 %v5055_v45 }
 0x3e0   :  { %v3585_v14 = vadd.f32 %v4157_v32, %v4112_v60  ;;  %v3614_v49 = vmax.f32 %v3582_v13, 0.0 }
 0x3e2   :  { %v3615_v15 = vmax.f32 %v3585_v14, 0.0  ;;  %v4158_v16 = vpop.f32.mrb[40].mxu1 }
 0x3e3   :  { %v4159_v50 = vpop.f32.mrb[41].mxu1 }
 0x3e4   :  { %v4214_v33 = vpack.c.bf16 %v3615_v15, %v3614_v49  ;;  %v4160_v17 = vadd.f32 %v4159_v50, %v4158_v16  ;;  %v4161_v51 = vpop.f32.mrb[42].mxu1 }
 0x3e5   :  { %v4162_v18 = vpop.f32.mrb[43].mxu1 }
 0x3e6   :  { %v3590_v34 = vadd.f32 %v4160_v17, %v4112_v60  ;;  %v4163_v19 = vadd.f32 %v4162_v18, %v4161_v51  ;;  %4215 = vmatpush3.bf16.msra.mxu0 %v4214_v33 }
 0x3e7   :  { %4216 = vmatprep.subr.bf16.mxu0 %v5055_v45 }
 0x3e8   :  { %v3593_v52 = vadd.f32 %v4163_v19, %v4112_v60  ;;  %v3616_v20 = vmax.f32 %v3590_v34, 0.0 }
 0x3ea   :  { %v3617_v21 = vmax.f32 %v3593_v52, 0.0  ;;  %v4164_v22 = vpop.f32.mrb[44].mxu1 }
 0x3eb   :  { %v4165_v23 = vpop.f32.mrb[45].mxu1 }
 0x3ec   :  { %v4217_v35 = vpack.c.bf16 %v3617_v21, %v3616_v20  ;;  %v4166_v24 = vadd.f32 %v4165_v23, %v4164_v22  ;;  %v4167_v36 = vpop.f32.mrb[46].mxu1 }
 0x3ed   :  { %v4168_v25 = vpop.f32.mrb[47].mxu1 }
 0x3ee   :  { %v3598_v26 = vadd.f32 %v4166_v24, %v4112_v60  ;;  %v4169_v37 = vadd.f32 %v4168_v25, %v4167_v36  ;;  %4218 = vmatpush3.bf16.msra.mxu0 %v4217_v35 }
 0x3ef   :  { %4219 = vmatprep.subr.bf16.mxu0 %v5055_v45 }
 0x3f0   :  { %v3601_v53 = vadd.f32 %v4169_v37, %v4112_v60  ;;  %v3618_v38 = vmax.f32 %v3598_v26, 0.0 }
 0x3f2   :  { %v3619_v39 = vmax.f32 %v3601_v53, 0.0  ;;  %v4170_v54 = vpop.f32.mrb[48].mxu1 }
 0x3f3   :  { %v4171_v40 = vpop.f32.mrb[49].mxu1 }
 0x3f4   :  { %v4220_v41 = vpack.c.bf16 %v3619_v39, %v3618_v38  ;;  %v4172_v42 = vadd.f32 %v4171_v40, %v4170_v54  ;;  %v4173_v55 = vpop.f32.mrb[50].mxu1 }
 0x3f5   :  { %v4174_v56 = vpop.f32.mrb[51].mxu1 }
 0x3f6   :  { %v3606_v62 = vadd.f32 %v4172_v42, %v4112_v60  ;;  %v4175_v63 = vadd.f32 %v4174_v56, %v4173_v55  ;;  %4221 = vmatpush3.bf16.msra.mxu0 %v4220_v41 }
 0x3f7   :  { %4222 = vmatprep.subr.bf16.mxu0 %v5055_v45 }
 0x3f8   :  { %v3609_v57 = vadd.f32 %v4175_v63, %v4112_v60  ;;  %v3620_v43 = vmax.f32 %v3606_v62, 0.0 }
 0x3fa   :  { %v3621_v0 = vmax.f32 %v3609_v57, 0.0 }
 0x3fc   :  { %v4223_v1 = vpack.c.bf16 %v3621_v0, %v3620_v43 }
 0x3fe   :  { %4224 = vmatpush3.bf16.msra.mxu0 %v4223_v1 }
 0x401   :  { %4208 = vmatmul.mubr.msk.f32.vlgmr.msra.gmra.mrb[28].mxu0 %vm3623_vm1, %v3622_v2 }
 0x4d4   :  { %v3693_v3 = vpop.f32.mrb[28].mxu0 }
 0x4d5   :  { %3697 = vst [vmem:[%s6536_s8] sm:$0xff] %v3693_v3  ;;  %v4209_v4 = vpop.f32.mrb[29].mxu0 }

</bundles_post_ra>
